<compile_context>
chip_gen: v7x
topology: tpu7x:2x2x1
jax: 0.10.0
libtpu: 0.0.40
codegen_flags: <defaults>
</compile_context>

<pallas_src>
import math
import functools

import jax
import jax.numpy as jnp
from jax.experimental import pallas as pl
from jax.experimental.pallas import tpu as pltpu


_MM_DTYPE = jnp.bfloat16           # MXU operand / streamed-activation dtype


def _tpu_vmem_capacity():
    try:
        info = pltpu.get_tpu_info()
        for attr in ("vmem_capacity_bytes", "vmem_bytes", "vmem_capacity"):
            v = getattr(info, attr, None)
            if v:
                return int(v)
    except Exception:
        pass
    return 64 * 1024 * 1024        # conservative (v7x-sized) default


_VMEM_CAP = _tpu_vmem_capacity()
# ~96 MiB scoped on v5e/v6e (128 MiB physical), <=48 MiB on v7x (64 MiB).
_VMEM_LIMIT = min((_VMEM_CAP * 3) // 4, 96 * 1024 * 1024)
_MM_TILE = 1024 if _VMEM_CAP >= 100 * 1024 * 1024 else 512


def _round_tile(size, target, align):
    """Largest tile <= target that is a multiple of `align` and divides `size`;
    falls back to the full dimension (always legal for a BlockSpec)."""
    if size <= target:
        return size
    t = (target // align) * align
    while t >= align:
        if size % t == 0:
            return t
        t -= align
    return size


def _row_tile(rows, target=512):
    return _round_tile(rows, target, 8)


def _tile_and_pad(size, target, align):
    """Pick a tile and (possibly padded) extent so that tile | extent.
    Avoids the full-dimension fallback for large, oddly sized dims."""
    if size <= target:
        return size, size
    t = (target // align) * align
    tt = t
    while tt >= align:
        if size % tt == 0:
            return tt, size
        tt -= align
    padded = ((size + t - 1) // t) * t
    return t, padded


# ---------------------------------------------------------------------------
# Fused tiled matmul:  y = act((x @ w) * scale + shift)
# (Linear, Conv1x1+BN+ReLU, FF+GELU, pre-scaled q all go through this kernel.)
# ---------------------------------------------------------------------------
def _linear_act_kernel(x_ref, w_ref, scale_ref, shift_ref, o_ref, acc_ref, *, act, nk):
    @pl.when(pl.program_id(2) == 0)
    def _init():
        acc_ref[...] = jnp.zeros_like(acc_ref)

    x = x_ref[...]
    if x.dtype != w_ref.dtype:
        x = x.astype(w_ref.dtype)          # no-op for bf16-streamed activations
    acc_ref[...] += jnp.dot(x, w_ref[...], preferred_element_type=jnp.float32)

    @pl.when(pl.program_id(2) == nk - 1)
    def _fin():
        y = acc_ref[...] * scale_ref[...] + shift_ref[...]
        if act == "relu":
            y = jnp.maximum(y, 0.0)
        elif act == "gelu":
            # tanh-approx GELU (EUP); TODO(synk): jax.lax.erf for exact GELU.
            y = 0.5 * y * (1.0 + jnp.tanh(0.7978845608028654 * (y + 0.044715 * y * y * y)))
        o_ref[...] = y.astype(o_ref.dtype)


def linear_act(x, w, scale, shift, act="none", out_dtype=jnp.float32):
    m, kdim = x.shape
    n = w.shape[1]
    tm, mp = _tile_and_pad(m, _MM_TILE, 8)
    tk, kp = _tile_and_pad(kdim, _MM_TILE, 256 if kdim % 256 == 0 else 128)
    tn, np_ = _tile_and_pad(n, _MM_TILE, 256 if n % 256 == 0 else 128)

    w = w.astype(_MM_DTYPE)
    scale = scale.astype(jnp.float32)
    shift = shift.astype(jnp.float32)
    if mp != m:
        x = jnp.pad(x, ((0, mp - m), (0, 0)))
    if kp != kdim:
        x = jnp.pad(x, ((0, 0), (0, kp - kdim)))
        w = jnp.pad(w, ((0, kp - kdim), (0, 0)))
    if np_ != n:
        w = jnp.pad(w, ((0, 0), (0, np_ - n)))
        scale = jnp.pad(scale, ((0, 0), (0, np_ - n)))
        shift = jnp.pad(shift, ((0, 0), (0, np_ - n)))

    gm, gn, gk = mp // tm, np_ // tn, kp // tk
    out = pl.pallas_call(
        functools.partial(_linear_act_kernel, act=act, nk=gk),
        out_shape=jax.ShapeDtypeStruct((mp, np_), out_dtype),
        grid_spec=pltpu.PrefetchScalarGridSpec(
            num_scalar_prefetch=0,
            grid=(gm, gn, gk),
            in_specs=[
                pl.BlockSpec((tm, tk), lambda i, j, k: (i, k)),
                pl.BlockSpec((tk, tn), lambda i, j, k: (k, j)),
                pl.BlockSpec((1, tn), lambda i, j, k: (0, j)),
                pl.BlockSpec((1, tn), lambda i, j, k: (0, j)),
            ],
            out_specs=pl.BlockSpec((tm, tn), lambda i, j, k: (i, j)),
            scratch_shapes=[pltpu.VMEM((tm, tn), jnp.float32)],
        ),
        compiler_params=pltpu.CompilerParams(
            dimension_semantics=("parallel", "parallel", "arbitrary"),
            vmem_limit_bytes=_VMEM_LIMIT),
    )(x, w, scale, shift)
    if mp != m or np_ != n:
        out = out[:m, :n]
    return out


def torch_linear(x2d, w, b=None, act="none", out_dtype=jnp.float32, scale=None):
    """torch nn.Linear layout: w (out, in), b (out,)."""
    n_out = w.shape[0]
    if scale is None:
        scale = jnp.ones((1, n_out), jnp.float32)
    shift = jnp.zeros((1, n_out), jnp.float32) if b is None else b.reshape(1, n_out)
    return linear_act(x2d, w.T, scale, shift, act=act, out_dtype=out_dtype)


def _bn_fold(conv_b, bn, eps=1e-5):
    s = bn["g"] / jnp.sqrt(bn["v"] + eps)
    shift = (conv_b - bn["m"]) * s + bn["b"]
    return s.reshape(1, -1), shift.reshape(1, -1)


# ---------------------------------------------------------------------------
# proj: o @ W_o + x_idwt @ W_idwt + b  (concat eliminated; bf16 operands)
# TODO(synk): add a K grid axis if inner_dim ever exceeds the tile target.
# ---------------------------------------------------------------------------
def _dual_linear_kernel(a_ref, wa_ref, c_ref, wc_ref, shift_ref, o_ref):
    a = a_ref[...]
    if a.dtype != wa_ref.dtype:
        a = a.astype(wa_ref.dtype)
    c = c_ref[...]
    if c.dtype != wc_ref.dtype:
        c = c.astype(wc_ref.dtype)
    y = jnp.dot(a, wa_ref[...], preferred_element_type=jnp.float32)
    y = y + jnp.dot(c, wc_ref[...], preferred_element_type=jnp.float32)
    o_ref[...] = (y + shift_ref[...]).astype(o_ref.dtype)


def dual_linear(a, wa, c, wc, shift):
    m, ka = a.shape
    kc = c.shape[1]
    n = wa.shape[1]
    tm = _round_tile(m, _MM_TILE, 8)
    tn = _round_tile(n, _MM_TILE, 128)
    return pl.pallas_call(
        _dual_linear_kernel,
        out_shape=jax.ShapeDtypeStruct((m, n), jnp.float32),
        grid=(m // tm, n // tn),
        in_specs=[
            pl.BlockSpec((tm, ka), lambda i, j: (i, 0)),
            pl.BlockSpec((ka, tn), lambda i, j: (0, j)),
            pl.BlockSpec((tm, kc), lambda i, j: (i, 0)),
            pl.BlockSpec((kc, tn), lambda i, j: (0, j)),
            pl.BlockSpec((1, tn), lambda i, j: (0, j)),
        ],
        out_specs=pl.BlockSpec((tm, tn), lambda i, j: (i, j)),
        compiler_params=pltpu.CompilerParams(
            dimension_semantics=("parallel", "parallel"),
            vmem_limit_bytes=_VMEM_LIMIT),
    )(a, wa.astype(_MM_DTYPE), c, wc.astype(_MM_DTYPE), shift.astype(jnp.float32))


# ---------------------------------------------------------------------------
# Fused residual-add + LayerNorm.  Residual stream stays f32; the normalized
# output (whose only consumers are matmuls) is emitted in bf16.
# ---------------------------------------------------------------------------
def _add_ln_kernel(x_ref, r_ref, g_ref, b_ref, s_ref, n_ref, *, eps):
    s = x_ref[...] + r_ref[...]
    s_ref[...] = s
    mu = jnp.mean(s, axis=-1, keepdims=True)
    xc = s - mu
    var = jnp.mean(xc * xc, axis=-1, keepdims=True)
    n_ref[...] = (xc * jax.lax.rsqrt(var + eps) * g_ref[...] + b_ref[...]).astype(n_ref.dtype)


def add_layernorm(x2d, res2d, gamma, beta, eps=1e-5):
    m, c = x2d.shape
    tm = _row_tile(m)
    spec_row = pl.BlockSpec((tm, c), lambda i: (i, 0))
    spec_vec = pl.BlockSpec((1, c), lambda i: (0, 0))
    return pl.pallas_call(
        functools.partial(_add_ln_kernel, eps=eps),
        out_shape=(jax.ShapeDtypeStruct((m, c), jnp.float32),
                   jax.ShapeDtypeStruct((m, c), _MM_DTYPE)),
        grid=(m // tm,),
        in_specs=[spec_row, spec_row, spec_vec, spec_vec],
        out_specs=(spec_row, spec_row),
        compiler_params=pltpu.CompilerParams(
            dimension_semantics=("parallel",), vmem_limit_bytes=_VMEM_LIMIT),
    )(x2d, res2d, gamma.reshape(1, c), beta.reshape(1, c))


# ---------------------------------------------------------------------------
# Fused LayerNorm + bias-free Linear (kv path); bf16 output for attention.
# ---------------------------------------------------------------------------
def _ln_linear_kernel(x_ref, g_ref, b_ref, w_ref, o_ref, *, eps):
    x = x_ref[...].astype(jnp.float32)
    mu = jnp.mean(x, axis=-1, keepdims=True)
    xc = x - mu
    var = jnp.mean(xc * xc, axis=-1, keepdims=True)
    xn = xc * jax.lax.rsqrt(var + eps) * g_ref[...] + b_ref[...]
    o_ref[...] = jnp.dot(xn.astype(w_ref.dtype), w_ref[...],
                         preferred_element_type=jnp.float32).astype(o_ref.dtype)


def ln_linear(x2d, gamma, beta, w, eps=1e-5):
    m, kdim = x2d.shape
    n = w.shape[1]
    tm = _row_tile(m)
    tn = _round_tile(n, _MM_TILE, 128)
    return pl.pallas_call(
        functools.partial(_ln_linear_kernel, eps=eps),
        out_shape=jax.ShapeDtypeStruct((m, n), _MM_DTYPE),
        grid=(m // tm, n // tn),
        in_specs=[
            pl.BlockSpec((tm, kdim), lambda i, j: (i, 0)),
            pl.BlockSpec((1, kdim), lambda i, j: (0, 0)),
            pl.BlockSpec((1, kdim), lambda i, j: (0, 0)),
            pl.BlockSpec((kdim, tn), lambda i, j: (0, j)),
        ],
        out_specs=pl.BlockSpec((tm, tn), lambda i, j: (i, j)),
        compiler_params=pltpu.CompilerParams(
            dimension_semantics=("parallel", "parallel"),
            vmem_limit_bytes=_VMEM_LIMIT),
    )(x2d, gamma.reshape(1, kdim), beta.reshape(1, kdim), w.astype(_MM_DTYPE))


# ---------------------------------------------------------------------------
# Haar DWT / IDWT (orthonormal 2x2 stride-2 butterfly), bf16 in/out, f32 math.
# Wrapper only does free row-major reshapes.
# DWT input layout: (rows=B*H2, 2, W2, 2*Cr) where
#   [:, 0, :, :Cr]=pix(2y,2x)   [:, 0, :, Cr:]=pix(2y,2x+1)
#   [:, 1, :, :Cr]=pix(2y+1,2x) [:, 1, :, Cr:]=pix(2y+1,2x+1)
# ---------------------------------------------------------------------------
def _dwt_kernel(x_ref, o_ref, *, cr):
    x = x_ref[...].astype(jnp.float32)
    top = x[:, 0, :, :]
    bot = x[:, 1, :, :]
    a, b = top[..., :cr], top[..., cr:]
    c, d = bot[..., :cr], bot[..., cr:]
    o_ref[...] = (jnp.concatenate(
        [(a + b + c + d), (a + b - c - d), (a - b + c - d), (a - b - c + d)],
        axis=-1) * 0.5).astype(o_ref.dtype)        # [LL, LH, HL, HH]


def dwt_haar(x4, cr):
    rows, _, w2, _ = x4.shape
    tr = _row_tile(rows)
    return pl.pallas_call(
        functools.partial(_dwt_kernel, cr=cr),
        out_shape=jax.ShapeDtypeStruct((rows, w2, 4 * cr), _MM_DTYPE),
        grid=(rows // tr,),
        in_specs=[pl.BlockSpec((tr, 2, w2, 2 * cr), lambda i: (i, 0, 0, 0))],
        out_specs=pl.BlockSpec((tr, w2, 4 * cr), lambda i: (i, 0, 0)),
        compiler_params=pltpu.CompilerParams(
            dimension_semantics=("parallel",), vmem_limit_bytes=_VMEM_LIMIT),
    )(x4)


def _idwt_kernel(y_ref, o_ref, *, cr, wv):
    # input rows carry 2 junk (padded-width) columns from the conv; drop them.
    y = y_ref[...][:, :wv, :].astype(jnp.float32)
    ll, lh = y[..., :cr], y[..., cr:2 * cr]
    hl, hh = y[..., 2 * cr:3 * cr], y[..., 3 * cr:]
    o_ref[:, 0, :, :] = (jnp.concatenate(
        [(ll + lh + hl + hh), (ll + lh - hl - hh)], axis=-1) * 0.5).astype(o_ref.dtype)
    o_ref[:, 1, :, :] = (jnp.concatenate(
        [(ll - lh + hl - hh), (ll - lh - hl + hh)], axis=-1) * 0.5).astype(o_ref.dtype)


def idwt_haar(y3, cr, wv):
    rows, wp, c4 = y3.shape
    tr = _row_tile(rows)
    return pl.pallas_call(
        functools.partial(_idwt_kernel, cr=cr, wv=wv),
        out_shape=jax.ShapeDtypeStruct((rows, 2, wv, 2 * cr), _MM_DTYPE),
        grid=(rows // tr,),
        in_specs=[pl.BlockSpec((tr, wp, c4), lambda i: (i, 0, 0))],
        out_specs=pl.BlockSpec((tr, 2, wv, 2 * cr), lambda i: (i, 0, 0, 0)),
        compiler_params=pltpu.CompilerParams(
            dimension_semantics=("parallel",), vmem_limit_bytes=_VMEM_LIMIT),
    )(y3)


# ---------------------------------------------------------------------------
# 3x3 conv + BN + ReLU, one batch element per grid step.
# The padded activation is fetched once as flat rows ((H+3)*(W+2), Cin); the
# three horizontal taps are fused into one K=3*Cin matmul per vertical tap
# (3 dots / step, M = H*(W+2)).  Output is stored flat (junk columns at
# w in [W, W+2) per row are discarded by the consumers).
# ---------------------------------------------------------------------------
def _conv3x3_kernel(xf_ref, w_ref, scale_ref, shift_ref, o_ref, *, h, w, cin):
    wp = w + 2
    m = h * wp
    cout = o_ref.shape[-1]
    acc = jnp.zeros((m, cout), jnp.float32)
    for ki in range(3):
        base = ki * wp
        slab = jnp.concatenate(
            [xf_ref[base + kj:base + kj + m, :] for kj in range(3)], axis=-1)
        acc = acc + jnp.dot(slab, w_ref[ki], preferred_element_type=jnp.float32)
    o_ref[...] = jnp.maximum(acc * scale_ref[...] + shift_ref[...], 0.0)


def conv3x3_bn_relu(x_cl, w, scale, shift):
    """x_cl: (B, H, W, Cin) channels-last bf16, stride 1, padding 1 (zeros).
    Returns (B, H*(W+2), Cout) f32 (flat rows; 2 junk columns per row)."""
    B, H, W, Cin = x_cl.shape
    Cout = w.shape[0]
    # rows padded (1, 2): the extra bottom row keeps the flat-row windows of
    # the last vertical tap in bounds; it never contributes to valid outputs.
    xp = jnp.pad(x_cl.astype(_MM_DTYPE), ((0, 0), (1, 2), (1, 1), (0, 0)))
    R = (H + 3) * (W + 2)
    xf = xp.reshape(B, R, Cin)
    w_cat = jnp.transpose(w, (2, 3, 1, 0)).reshape(3, 3 * Cin, Cout).astype(_MM_DTYPE)
    return pl.pallas_call(
        functools.partial(_conv3x3_kernel, h=H, w=W, cin=Cin),
        out_shape=jax.ShapeDtypeStruct((B, H * (W + 2), Cout), jnp.float32),
        grid=(B,),
        in_specs=[pl.BlockSpec((None, R, Cin), lambda b: (b, 0, 0)),
                  pl.BlockSpec((3, 3 * Cin, Cout), lambda b: (0, 0, 0)),
                  pl.BlockSpec((1, Cout), lambda b: (0, 0)),
                  pl.BlockSpec((1, Cout), lambda b: (0, 0))],
        out_specs=pl.BlockSpec((None, H * (W + 2), Cout), lambda b: (b, 0, 0)),
        compiler_params=pltpu.CompilerParams(
            dimension_semantics=("parallel",), vmem_limit_bytes=_VMEM_LIMIT),
    )(xf, w_cat, scale.astype(jnp.float32), shift.astype(jnp.float32))


# ---------------------------------------------------------------------------
# Attention: (B, N, C) layout end to end, heads split in-kernel from the lane
# axis, query axis tiled as a grid dimension, lane-dense (C-wide) output.
# q arrives pre-scaled by dim_head**-0.5 (folded into its projection).
# ---------------------------------------------------------------------------
def _attn_kernel(q_ref, kv_ref, o_ref, *, heads, dh):
    k_all = kv_ref[:, 0, :]                      # (M, C) bf16
    v_all = kv_ref[:, 1, :]
    outs = []
    for h in range(heads):
        lo = h * dh
        qh = q_ref[:, lo:lo + dh]                # (tq, dh) bf16 (pre-scaled)
        kh = k_all[:, lo:lo + dh]                # (M, dh)
        vh = v_all[:, lo:lo + dh]
        s = jax.lax.dot_general(qh, kh, (((1,), (1,)), ((), ())),
                                preferred_element_type=jnp.float32)      # (tq, M)
        s_max = jnp.max(s, axis=-1, keepdims=True)
        e = jnp.exp(s - s_max)
        denom = jnp.sum(e, axis=-1, keepdims=True)
        p = (e * pl.reciprocal(denom, approx=True)).astype(vh.dtype)
        outs.append(jnp.dot(p, vh, preferred_element_type=jnp.float32))  # (tq, dh)
    o_ref[...] = jnp.concatenate(outs, axis=-1).astype(o_ref.dtype)


def attention(q, kv, heads, dh):
    """q: (B, N, C) bf16 (pre-scaled); kv: (B, M, 2, C) bf16 (k at index 0)."""
    B, N, C = q.shape
    M = kv.shape[1]
    tq = _round_tile(N, _MM_TILE, 8)
    return pl.pallas_call(
        functools.partial(_attn_kernel, heads=heads, dh=dh),
        out_shape=jax.ShapeDtypeStruct((B, N, C), _MM_DTYPE),
        grid=(B, N // tq),
        in_specs=[pl.BlockSpec((None, tq, C), lambda b, i: (b, i, 0)),
                  pl.BlockSpec((None, M, 2, C), lambda b, i: (b, 0, 0, 0))],
        out_specs=pl.BlockSpec((None, tq, C), lambda b, i: (b, i, 0)),
        compiler_params=pltpu.CompilerParams(
            dimension_semantics=("parallel", "parallel"),
            vmem_limit_bytes=_VMEM_LIMIT),
    )(q, kv)


# ---------------------------------------------------------------------------
# WaveAttention / waveBlock forward
# ---------------------------------------------------------------------------
def wave_attention(lp, xn2d, B, N, H, W, heads, dim_head):
    dh = dim_head
    C = heads * dh
    Cr = C // 4
    H2, W2 = H // 2, W // 2
    dim = lp["proj_b"].shape[0]

    # q = Linear(dim, inner_dim, bias=False); softmax scale folded in; bf16 out
    q = torch_linear(xn2d, lp["q_w"], out_dtype=_MM_DTYPE,
                     scale=jnp.full((1, C), dh ** -0.5, jnp.float32))
    q = q.reshape(B, N, C)

    # reduce: Conv2d(C, C/4, 1) + BN(eval) + ReLU fused into the matmul epilogue
    red_scale, red_shift = _bn_fold(lp["red_b"], lp["red_bn"])
    r = linear_act(xn2d, lp["red_w"][:, :, 0, 0].T, red_scale, red_shift,
                   act="relu", out_dtype=_MM_DTYPE)                   # (B*N, Cr) bf16

    # Haar DWT (free reshape -> in-kernel butterfly, subband-major [LL,LH,HL,HH])
    x_dwt = dwt_haar(r.reshape(B * H2, 2, W2, 2 * Cr), Cr)            # (B*H2, W2, C) bf16

    # filter: Conv2d(C, C, 3, padding=1) + BN + ReLU (flat-row fused-tap conv)
    fil_scale, fil_shift = _bn_fold(lp["fil_b"], lp["fil_bn"])
    y2 = conv3x3_bn_relu(x_dwt.reshape(B, H2, W2, C), lp["fil_w"],
                         fil_scale, fil_shift)                        # (B, H2*(W2+2), C) f32
    y4 = y2.reshape(B, H2, W2 + 2, C)                                 # free reshape

    # IDWT back to full resolution (junk columns dropped in-kernel); bf16 out
    x_idwt = idwt_haar(y2.reshape(B * H2, W2 + 2, C), Cr, W2).reshape(B * N, Cr)

    # kv path (sr_ratio=1 -> kv_embed = Identity).  The module's reshape quirk
    #   kv.reshape(B, -1, H//2, heads, dh).permute(2,0,3,1,4); k, v = kv[0], kv[1]
    # only ever consumes the tokens with w2 in {0, 1}; LN/Linear are per-row,
    # so projecting just those rows is element-identical.
    kv_rows = y4[:, :, 0:2, :].reshape(B * H2 * 2, dim)
    kv = ln_linear(kv_rows, lp["kv_ln_g"], lp["kv_ln_b"], lp["kv_w"].T)
    kv = kv.reshape(B, H2, 2, C)                                      # (b, seq=h2, k/v, c)

    o = attention(q, kv, heads, dh).reshape(B * N, C)                 # bf16

    # proj: Linear(inner + inner//4, dim) without materializing the concat.
    wo = lp["proj_w"][:, :C].T                                        # (C, dim)
    wi = lp["proj_w"][:, C:].T                                        # (Cr, dim)
    return dual_linear(o, wo, x_idwt, wi, lp["proj_b"].reshape(1, dim))


def wave_block_forward(params, x, *, patch_size, heads, dim_head):
    orig_ndim = x.ndim
    if orig_ndim == 5:
        b5, c1, c2, h5, w5 = x.shape
        x = x.reshape(b5, c1 * c2, h5, w5)

    B, C_in, Himg, Wimg = x.shape
    p = patch_size
    hh, ww = Himg // p, Wimg // p
    N = hh * ww
    H = W = int(math.sqrt(N))     # same square-grid assumption as the torch code
    dim = params["pos"].shape[-1]

    # 'b c (h p1) (w p2) -> b (h w) (p1 p2 c)'  (cast fuses into the transpose)
    e = (x.reshape(B, C_in, hh, p, ww, p).transpose(0, 2, 4, 3, 5, 1)
           .reshape(B * N, p * p * C_in)).astype(_MM_DTYPE)
    tok = torch_linear(e, params["emb_w"], params["emb_b"])           # (B*N, dim) f32
    pos2d = jnp.broadcast_to(params["pos"][:, :N], (B, N, dim)).reshape(B * N, dim)

    layers = params["layers"]
    if layers:
        # fuse pos-add (dropout p=0) with the first PreNorm LayerNorm
        tok, xn = add_layernorm(tok, pos2d, layers[0]["ln1_g"], layers[0]["ln1_b"])
    else:
        tok = tok + pos2d
        xn = None

    for li, L in enumerate(layers):
        # Residual(PreNorm(WaveAttention))
        attn_out = wave_attention(L, xn, B, N, H, W, heads, dim_head)
        tok, xn = add_layernorm(tok, attn_out, L["ln2_g"], L["ln2_b"])
        # Residual(PreNorm(FeedForward)): GELU fused, bf16 hidden activation
        h = torch_linear(xn, L["ff_w1"], L["ff_b1"], act="gelu", out_dtype=_MM_DTYPE)
        h = torch_linear(h, L["ff_w2"], L["ff_b2"])
        if li + 1 < len(layers):
            nl = layers[li + 1]
            tok, xn = add_layernorm(tok, h, nl["ln1_g"], nl["ln1_b"])
        else:
            tok = tok + h

    out = torch_linear(tok, params["out_w"], params["out_b"])
    # 'b (h w) (p1 p2 c) -> b c (h p1) (w p2)'
    out = out.reshape(B, hh, ww, p, p, C_in).transpose(0, 5, 1, 3, 2, 4).reshape(B, C_in, Himg, Wimg)
    if orig_ndim == 5:
        out = out.reshape(b5, c1, c2, Himg, Wimg)
    return out


# ---------------------------------------------------------------------------
# Deterministic parameter construction (torch layouts)
# ---------------------------------------------------------------------------
def init_params(key, *, image_size, patch_size, dim, depth, heads, dim_head, mlp_dim, channels):
    num_patches = (image_size // patch_size) ** 2
    patch_dim = channels * patch_size ** 2
    inner = heads * dim_head
    assert inner == dim, "WaveAttention (as written) requires heads*dim_head == dim"

    ks = iter(jax.random.split(key, 256))
    nrm = lambda shape, s=0.05: s * jax.random.normal(next(ks), shape, jnp.float32)

    def bn(c):  # eval-mode BatchNorm params + running stats
        return {"g": 1.0 + nrm((c,)), "b": nrm((c,)),
                "m": nrm((c,)),
                "v": 1.0 + 0.1 * jnp.abs(jax.random.normal(next(ks), (c,), jnp.float32))}

    params = {
        "pos": 0.02 * jax.random.normal(next(ks), (1, num_patches, dim), jnp.float32),
        "emb_w": nrm((dim, patch_dim)), "emb_b": nrm((dim,)),
        "out_w": nrm((patch_dim, dim)), "out_b": nrm((patch_dim,)),
        "layers": [],
    }
    for _ in range(depth):
        params["layers"].append({
            "ln1_g": 1.0 + nrm((dim,)), "ln1_b": nrm((dim,)),
            "ln2_g": 1.0 + nrm((dim,)), "ln2_b": nrm((dim,)),
            "q_w": nrm((inner, dim)),
            "kv_ln_g": 1.0 + nrm((dim,)), "kv_ln_b": nrm((dim,)),
            "kv_w": nrm((inner, dim)),
            "proj_w": nrm((dim, inner + inner // 4)), "proj_b": nrm((dim,)),
            "red_w": nrm((inner // 4, inner, 1, 1)), "red_b": nrm((inner // 4,)),
            "red_bn": bn(inner // 4),
            "fil_w": nrm((inner, inner, 3, 3)), "fil_b": nrm((inner,)),
            "fil_bn": bn(inner),
            "ff_w1": nrm((mlp_dim, dim)), "ff_b1": nrm((mlp_dim,)),
            "ff_w2": nrm((dim, mlp_dim)), "ff_b2": nrm((dim,)),
        })
    return params


if __name__ == "__main__":
    cfg = dict(image_size=16, patch_size=2, dim=32, depth=1, heads=4,
               dim_head=8, mlp_dim=64, channels=4)
    key = jax.random.PRNGKey(0)
    pkey, xkey = jax.random.split(key)
    params = init_params(pkey, **cfg)
    x = jax.random.normal(
        xkey, (2, cfg["channels"], cfg["image_size"], cfg["image_size"]), jnp.float32)

    fwd = jax.jit(functools.partial(wave_block_forward,
                                    patch_size=cfg["patch_size"],
                                    heads=cfg["heads"],
                                    dim_head=cfg["dim_head"]))
    y = fwd(params, x)
    jax.block_until_ready(y)
    assert y.shape == x.shape
    assert bool(jnp.all(jnp.isfinite(y)))
    print("KERNEL_OK")
</pallas_src>

<mosaic_0001>
module attributes {stable_mosaic.version = 11 : i64} {
  func.func @_linear_act_kernel(%arg0: i32, %arg1: i32, %arg2: i32, %arg3: memref<128x16xbf16, #tpu.memory_space<vmem>>, %arg4: memref<16x32xbf16, #tpu.memory_space<vmem>>, %arg5: memref<1x32xf32, #tpu.memory_space<vmem>>, %arg6: memref<1x32xf32, #tpu.memory_space<vmem>>, %arg7: memref<128x32xf32, #tpu.memory_space<vmem>>, %arg8: memref<128x32xf32, #tpu.memory_space<vmem>>) attributes {dimension_semantics = [#tpu.dimension_semantics<parallel>, #tpu.dimension_semantics<parallel>, #tpu.dimension_semantics<arbitrary>], iteration_bounds = array<i64: 1, 1, 1>, scalar_prefetch = 0 : i64, scratch_operands = 1 : i64, tpu.core_type = #tpu.core_type<tc>, window_params = [{transform_indices = @transform_0, window_bounds = array<i64: 128, 16>}, {transform_indices = @transform_1, window_bounds = array<i64: 16, 32>}, {transform_indices = @transform_2, window_bounds = array<i64: 1, 32>}, {transform_indices = @transform_3, window_bounds = array<i64: 1, 32>}, {transform_indices = @transform_4, window_bounds = array<i64: 128, 32>}]} {
    %c0_i32 = arith.constant 0 : i32
    %0 = arith.cmpi eq, %arg2, %c0_i32 : i32
    %1 = arith.extui %0 : i1 to i32
    %c0_i32_0 = arith.constant 0 : i32
    %2 = arith.cmpi ne, %1, %c0_i32_0 : i32
    scf.if %2 {
      %cst_10 = arith.constant 0.000000e+00 : f32
      %12 = vector.broadcast %cst_10 : f32 to vector<128x32xf32>
      %c0_11 = arith.constant 0 : index
      %c0_12 = arith.constant 0 : index
      %13 = vector.load %arg8[%c0_11, %c0_12] : memref<128x32xf32, #tpu.memory_space<vmem>>, vector<128x32xf32>
      tpu.vector_store %arg8[%c0_11, %c0_12], %12 {strides = array<i32>} : memref<128x32xf32, #tpu.memory_space<vmem>>, vector<128x32xf32>,
    } else {
    }
    %c0 = arith.constant 0 : index
    %c0_1 = arith.constant 0 : index
    %3 = vector.load %arg3[%c0, %c0_1] : memref<128x16xbf16, #tpu.memory_space<vmem>>, vector<128x16xbf16>
    %c0_2 = arith.constant 0 : index
    %c0_3 = arith.constant 0 : index
    %4 = vector.load %arg8[%c0_2, %c0_3] : memref<128x32xf32, #tpu.memory_space<vmem>>, vector<128x32xf32>
    %c0_4 = arith.constant 0 : index
    %c0_5 = arith.constant 0 : index
    %5 = vector.load %arg4[%c0_4, %c0_5] : memref<16x32xbf16, #tpu.memory_space<vmem>>, vector<16x32xbf16>
    %cst = arith.constant dense<0.000000e+00> : vector<128x32xf32>
    %6 = tpu.matmul %3, %5, %cst {dimension_numbers = #tpu.dot_dimension_numbers<[1], [0], [0], [1], [0, 0, 1, 1], [], []>} : vector<128x16xbf16>, vector<16x32xbf16>, vector<128x32xf32> -> vector<128x32xf32>
    %7 = arith.addf %4, %6 : vector<128x32xf32>
    %c0_6 = arith.constant 0 : index
    %c0_7 = arith.constant 0 : index
    %8 = vector.load %arg8[%c0_6, %c0_7] : memref<128x32xf32, #tpu.memory_space<vmem>>, vector<128x32xf32>
    tpu.vector_store %arg8[%c0_6, %c0_7], %7 {strides = array<i32>} : memref<128x32xf32, #tpu.memory_space<vmem>>, vector<128x32xf32>,
    %c0_i32_8 = arith.constant 0 : i32
    %9 = arith.cmpi eq, %arg2, %c0_i32_8 : i32
    %10 = arith.extui %9 : i1 to i32
    %c0_i32_9 = arith.constant 0 : i32
    %11 = arith.cmpi ne, %10, %c0_i32_9 : i32
    scf.if %11 {
      %c0_10 = arith.constant 0 : index
      %c0_11 = arith.constant 0 : index
      %12 = vector.load %arg8[%c0_10, %c0_11] : memref<128x32xf32, #tpu.memory_space<vmem>>, vector<128x32xf32>
      %c0_12 = arith.constant 0 : index
      %c0_13 = arith.constant 0 : index
      %13 = vector.load %arg5[%c0_12, %c0_13] : memref<1x32xf32, #tpu.memory_space<vmem>>, vector<1x32xf32>
      %14 = vector.broadcast %13 : vector<1x32xf32> to vector<128x32xf32>
      %15 = arith.mulf %12, %14 : vector<128x32xf32>
      %c0_14 = arith.constant 0 : index
      %c0_15 = arith.constant 0 : index
      %16 = vector.load %arg6[%c0_14, %c0_15] : memref<1x32xf32, #tpu.memory_space<vmem>>, vector<1x32xf32>
      %17 = vector.broadcast %16 : vector<1x32xf32> to vector<128x32xf32>
      %18 = arith.addf %15, %17 : vector<128x32xf32>
      %c0_16 = arith.constant 0 : index
      %c0_17 = arith.constant 0 : index
      %19 = vector.load %arg7[%c0_16, %c0_17] : memref<128x32xf32, #tpu.memory_space<vmem>>, vector<128x32xf32>
      tpu.vector_store %arg7[%c0_16, %c0_17], %18 {strides = array<i32>} : memref<128x32xf32, #tpu.memory_space<vmem>>, vector<128x32xf32>,
    } else {
    }
    return
  }
  func.func @transform_0(%arg0: i32, %arg1: i32, %arg2: i32) -> (i32, i32) {
    %c0_i32 = arith.constant 0 : i32
    return %arg0, %arg2 : i32, i32
  }
  func.func @transform_1(%arg0: i32, %arg1: i32, %arg2: i32) -> (i32, i32) {
    %c0_i32 = arith.constant 0 : i32
    return %arg2, %arg1 : i32, i32
  }
  func.func @transform_2(%arg0: i32, %arg1: i32, %arg2: i32) -> (i32, i32) {
    %c0_i32 = arith.constant 0 : i32
    %c0_i32_0 = arith.constant 0 : i32
    return %c0_i32, %arg1 : i32, i32
  }
  func.func @transform_3(%arg0: i32, %arg1: i32, %arg2: i32) -> (i32, i32) {
    %c0_i32 = arith.constant 0 : i32
    %c0_i32_0 = arith.constant 0 : i32
    return %c0_i32, %arg1 : i32, i32
  }
  func.func @transform_4(%arg0: i32, %arg1: i32, %arg2: i32) -> (i32, i32) {
    %c0_i32 = arith.constant 0 : i32
    return %arg0, %arg1 : i32, i32
  }
}

module attributes {stable_mosaic.version = 11 : i64} {
  func.func @_add_ln_kernel(%arg0: i32, %arg1: memref<128x32xf32, #tpu.memory_space<vmem>>, %arg2: memref<128x32xf32, #tpu.memory_space<vmem>>, %arg3: memref<1x32xf32, #tpu.memory_space<vmem>>, %arg4: memref<1x32xf32, #tpu.memory_space<vmem>>, %arg5: memref<128x32xf32, #tpu.memory_space<vmem>>, %arg6: memref<128x32xbf16, #tpu.memory_space<vmem>>) attributes {dimension_semantics = [#tpu.dimension_semantics<parallel>], iteration_bounds = array<i64: 1>, scalar_prefetch = 0 : i64, scratch_operands = 0 : i64, tpu.core_type = #tpu.core_type<tc>, window_params = [{transform_indices = @transform_0, window_bounds = array<i64: 128, 32>}, {transform_indices = @transform_1, window_bounds = array<i64: 128, 32>}, {pipeline_mode = #tpu.pipeline_mode<synchronous>, transform_indices = @transform_2, window_bounds = array<i64: 1, 32>}, {pipeline_mode = #tpu.pipeline_mode<synchronous>, transform_indices = @transform_3, window_bounds = array<i64: 1, 32>}, {transform_indices = @transform_4, window_bounds = array<i64: 128, 32>}, {transform_indices = @transform_5, window_bounds = array<i64: 128, 32>}]} {
    %c0 = arith.constant 0 : index
    %c0_0 = arith.constant 0 : index
    %0 = vector.load %arg1[%c0, %c0_0] : memref<128x32xf32, #tpu.memory_space<vmem>>, vector<128x32xf32>
    %c0_1 = arith.constant 0 : index
    %c0_2 = arith.constant 0 : index
    %1 = vector.load %arg2[%c0_1, %c0_2] : memref<128x32xf32, #tpu.memory_space<vmem>>, vector<128x32xf32>
    %2 = arith.addf %0, %1 : vector<128x32xf32>
    %c0_3 = arith.constant 0 : index
    %c0_4 = arith.constant 0 : index
    %3 = vector.load %arg5[%c0_3, %c0_4] : memref<128x32xf32, #tpu.memory_space<vmem>>, vector<128x32xf32>
    tpu.vector_store %arg5[%c0_3, %c0_4], %2 {strides = array<i32>} : memref<128x32xf32, #tpu.memory_space<vmem>>, vector<128x32xf32>,
    %cst = arith.constant dense<0.000000e+00> : vector<128xf32>
    %4 = vector.multi_reduction <add>, %2, %cst [1] : vector<128x32xf32> to vector<128xf32>
    %5 = vector.shape_cast %4 : vector<128xf32> to vector<128x1xf32>
    %cst_5 = arith.constant 3.200000e+01 : f32
    %6 = vector.broadcast %cst_5 : f32 to vector<128x1xf32>
    %7 = arith.divf %5, %6 : vector<128x1xf32>
    %8 = vector.broadcast %7 : vector<128x1xf32> to vector<128x32xf32>
    %9 = arith.subf %2, %8 : vector<128x32xf32>
    %10 = arith.mulf %9, %9 : vector<128x32xf32>
    %cst_6 = arith.constant dense<0.000000e+00> : vector<128xf32>
    %11 = vector.multi_reduction <add>, %10, %cst_6 [1] : vector<128x32xf32> to vector<128xf32>
    %12 = vector.shape_cast %11 : vector<128xf32> to vector<128x1xf32>
    %cst_7 = arith.constant 3.200000e+01 : f32
    %13 = vector.broadcast %cst_7 : f32 to vector<128x1xf32>
    %14 = arith.divf %12, %13 : vector<128x1xf32>
    %cst_8 = arith.constant 9.99999974E-6 : f32
    %15 = vector.broadcast %cst_8 : f32 to vector<128x1xf32>
    %16 = arith.addf %14, %15 : vector<128x1xf32>
    %17 = math.rsqrt %16 : vector<128x1xf32>
    %18 = vector.broadcast %17 : vector<128x1xf32> to vector<128x32xf32>
    %19 = arith.mulf %9, %18 : vector<128x32xf32>
    %c0_9 = arith.constant 0 : index
    %c0_10 = arith.constant 0 : index
    %20 = vector.load %arg3[%c0_9, %c0_10] : memref<1x32xf32, #tpu.memory_space<vmem>>, vector<1x32xf32>
    %21 = vector.broadcast %20 : vector<1x32xf32> to vector<128x32xf32>
    %22 = arith.mulf %19, %21 : vector<128x32xf32>
    %c0_11 = arith.constant 0 : index
    %c0_12 = arith.constant 0 : index
    %23 = vector.load %arg4[%c0_11, %c0_12] : memref<1x32xf32, #tpu.memory_space<vmem>>, vector<1x32xf32>
    %24 = vector.broadcast %23 : vector<1x32xf32> to vector<128x32xf32>
    %25 = arith.addf %22, %24 : vector<128x32xf32>
    %26 = arith.truncf %25 : vector<128x32xf32> to vector<128x32xbf16>
    %c0_13 = arith.constant 0 : index
    %c0_14 = arith.constant 0 : index
    %27 = vector.load %arg6[%c0_13, %c0_14] : memref<128x32xbf16, #tpu.memory_space<vmem>>, vector<128x32xbf16>
    tpu.vector_store %arg6[%c0_13, %c0_14], %26 {strides = array<i32>} : memref<128x32xbf16, #tpu.memory_space<vmem>>, vector<128x32xbf16>,
    return
  }
  func.func @transform_0(%arg0: i32) -> (i32, i32) {
    %c0_i32 = arith.constant 0 : i32
    %c0_i32_0 = arith.constant 0 : i32
    return %arg0, %c0_i32 : i32, i32
  }
  func.func @transform_1(%arg0: i32) -> (i32, i32) {
    %c0_i32 = arith.constant 0 : i32
    %c0_i32_0 = arith.constant 0 : i32
    return %arg0, %c0_i32 : i32, i32
  }
  func.func @transform_2(%arg0: i32) -> (i32, i32) {
    %c0_i32 = arith.constant 0 : i32
    %c0_i32_0 = arith.constant 0 : i32
    %c0_i32_1 = arith.constant 0 : i32
    return %c0_i32, %c0_i32_0 : i32, i32
  }
  func.func @transform_3(%arg0: i32) -> (i32, i32) {
    %c0_i32 = arith.constant 0 : i32
    %c0_i32_0 = arith.constant 0 : i32
    %c0_i32_1 = arith.constant 0 : i32
    return %c0_i32, %c0_i32_0 : i32, i32
  }
  func.func @transform_4(%arg0: i32) -> (i32, i32) {
    %c0_i32 = arith.constant 0 : i32
    %c0_i32_0 = arith.constant 0 : i32
    return %arg0, %c0_i32 : i32, i32
  }
  func.func @transform_5(%arg0: i32) -> (i32, i32) {
    %c0_i32 = arith.constant 0 : i32
    %c0_i32_0 = arith.constant 0 : i32
    return %arg0, %c0_i32 : i32, i32
  }
}

module attributes {stable_mosaic.version = 11 : i64} {
  func.func @_linear_act_kernel(%arg0: i32, %arg1: i32, %arg2: i32, %arg3: memref<128x32xbf16, #tpu.memory_space<vmem>>, %arg4: memref<32x8xbf16, #tpu.memory_space<vmem>>, %arg5: memref<1x8xf32, #tpu.memory_space<vmem>>, %arg6: memref<1x8xf32, #tpu.memory_space<vmem>>, %arg7: memref<128x8xbf16, #tpu.memory_space<vmem>>, %arg8: memref<128x8xf32, #tpu.memory_space<vmem>>) attributes {dimension_semantics = [#tpu.dimension_semantics<parallel>, #tpu.dimension_semantics<parallel>, #tpu.dimension_semantics<arbitrary>], iteration_bounds = array<i64: 1, 1, 1>, scalar_prefetch = 0 : i64, scratch_operands = 1 : i64, tpu.core_type = #tpu.core_type<tc>, window_params = [{transform_indices = @transform_0, window_bounds = array<i64: 128, 32>}, {transform_indices = @transform_1, window_bounds = array<i64: 32, 8>}, {transform_indices = @transform_2, window_bounds = array<i64: 1, 8>}, {transform_indices = @transform_3, window_bounds = array<i64: 1, 8>}, {transform_indices = @transform_4, window_bounds = array<i64: 128, 8>}]} {
    %c0_i32 = arith.constant 0 : i32
    %0 = arith.cmpi eq, %arg2, %c0_i32 : i32
    %1 = arith.extui %0 : i1 to i32
    %c0_i32_0 = arith.constant 0 : i32
    %2 = arith.cmpi ne, %1, %c0_i32_0 : i32
    scf.if %2 {
      %cst_10 = arith.constant 0.000000e+00 : f32
      %12 = vector.broadcast %cst_10 : f32 to vector<128x8xf32>
      %c0_11 = arith.constant 0 : index
      %c0_12 = arith.constant 0 : index
      %13 = vector.load %arg8[%c0_11, %c0_12] : memref<128x8xf32, #tpu.memory_space<vmem>>, vector<128x8xf32>
      tpu.vector_store %arg8[%c0_11, %c0_12], %12 {strides = array<i32>} : memref<128x8xf32, #tpu.memory_space<vmem>>, vector<128x8xf32>,
    } else {
    }
    %c0 = arith.constant 0 : index
    %c0_1 = arith.constant 0 : index
    %3 = vector.load %arg3[%c0, %c0_1] : memref<128x32xbf16, #tpu.memory_space<vmem>>, vector<128x32xbf16>
    %c0_2 = arith.constant 0 : index
    %c0_3 = arith.constant 0 : index
    %4 = vector.load %arg8[%c0_2, %c0_3] : memref<128x8xf32, #tpu.memory_space<vmem>>, vector<128x8xf32>
    %c0_4 = arith.constant 0 : index
    %c0_5 = arith.constant 0 : index
    %5 = vector.load %arg4[%c0_4, %c0_5] : memref<32x8xbf16, #tpu.memory_space<vmem>>, vector<32x8xbf16>
    %cst = arith.constant dense<0.000000e+00> : vector<128x8xf32>
    %6 = tpu.matmul %3, %5, %cst {dimension_numbers = #tpu.dot_dimension_numbers<[1], [0], [0], [1], [0, 0, 1, 1], [], []>} : vector<128x32xbf16>, vector<32x8xbf16>, vector<128x8xf32> -> vector<128x8xf32>
    %7 = arith.addf %4, %6 : vector<128x8xf32>
    %c0_6 = arith.constant 0 : index
    %c0_7 = arith.constant 0 : index
    %8 = vector.load %arg8[%c0_6, %c0_7] : memref<128x8xf32, #tpu.memory_space<vmem>>, vector<128x8xf32>
    tpu.vector_store %arg8[%c0_6, %c0_7], %7 {strides = array<i32>} : memref<128x8xf32, #tpu.memory_space<vmem>>, vector<128x8xf32>,
    %c0_i32_8 = arith.constant 0 : i32
    %9 = arith.cmpi eq, %arg2, %c0_i32_8 : i32
    %10 = arith.extui %9 : i1 to i32
    %c0_i32_9 = arith.constant 0 : i32
    %11 = arith.cmpi ne, %10, %c0_i32_9 : i32
    scf.if %11 {
      %c0_10 = arith.constant 0 : index
      %c0_11 = arith.constant 0 : index
      %12 = vector.load %arg8[%c0_10, %c0_11] : memref<128x8xf32, #tpu.memory_space<vmem>>, vector<128x8xf32>
      %c0_12 = arith.constant 0 : index
      %c0_13 = arith.constant 0 : index
      %13 = vector.load %arg5[%c0_12, %c0_13] : memref<1x8xf32, #tpu.memory_space<vmem>>, vector<1x8xf32>
      %14 = vector.broadcast %13 : vector<1x8xf32> to vector<128x8xf32>
      %15 = arith.mulf %12, %14 : vector<128x8xf32>
      %c0_14 = arith.constant 0 : index
      %c0_15 = arith.constant 0 : index
      %16 = vector.load %arg6[%c0_14, %c0_15] : memref<1x8xf32, #tpu.memory_space<vmem>>, vector<1x8xf32>
      %17 = vector.broadcast %16 : vector<1x8xf32> to vector<128x8xf32>
      %18 = arith.addf %15, %17 : vector<128x8xf32>
      %cst_16 = arith.constant 0.000000e+00 : f32
      %19 = vector.broadcast %cst_16 : f32 to vector<128x8xf32>
      %20 = arith.maximumf %18, %19 : vector<128x8xf32>
      %21 = arith.truncf %20 : vector<128x8xf32> to vector<128x8xbf16>
      %c0_17 = arith.constant 0 : index
      %c0_18 = arith.constant 0 : index
      %22 = vector.load %arg7[%c0_17, %c0_18] : memref<128x8xbf16, #tpu.memory_space<vmem>>, vector<128x8xbf16>
      tpu.vector_store %arg7[%c0_17, %c0_18], %21 {strides = array<i32>} : memref<128x8xbf16, #tpu.memory_space<vmem>>, vector<128x8xbf16>,
    } else {
    }
    return
  }
  func.func @transform_0(%arg0: i32, %arg1: i32, %arg2: i32) -> (i32, i32) {
    %c0_i32 = arith.constant 0 : i32
    return %arg0, %arg2 : i32, i32
  }
  func.func @transform_1(%arg0: i32, %arg1: i32, %arg2: i32) -> (i32, i32) {
    %c0_i32 = arith.constant 0 : i32
    return %arg2, %arg1 : i32, i32
  }
  func.func @transform_2(%arg0: i32, %arg1: i32, %arg2: i32) -> (i32, i32) {
    %c0_i32 = arith.constant 0 : i32
    %c0_i32_0 = arith.constant 0 : i32
    return %c0_i32, %arg1 : i32, i32
  }
  func.func @transform_3(%arg0: i32, %arg1: i32, %arg2: i32) -> (i32, i32) {
    %c0_i32 = arith.constant 0 : i32
    %c0_i32_0 = arith.constant 0 : i32
    return %c0_i32, %arg1 : i32, i32
  }
  func.func @transform_4(%arg0: i32, %arg1: i32, %arg2: i32) -> (i32, i32) {
    %c0_i32 = arith.constant 0 : i32
    return %arg0, %arg1 : i32, i32
  }
}

module attributes {stable_mosaic.version = 11 : i64} {
  func.func @_dwt_kernel(%arg0: i32, %arg1: memref<8x2x4x16xbf16, #tpu.memory_space<vmem>>, %arg2: memref<8x4x32xbf16, #tpu.memory_space<vmem>>) attributes {dimension_semantics = [#tpu.dimension_semantics<parallel>], iteration_bounds = array<i64: 1>, scalar_prefetch = 0 : i64, scratch_operands = 0 : i64, tpu.core_type = #tpu.core_type<tc>, window_params = [{transform_indices = @transform_0, window_bounds = array<i64: 8, 2, 4, 16>}, {transform_indices = @transform_1, window_bounds = array<i64: 8, 4, 32>}]} {
    %c0 = arith.constant 0 : index
    %c0_0 = arith.constant 0 : index
    %c0_1 = arith.constant 0 : index
    %c0_2 = arith.constant 0 : index
    %0 = vector.load %arg1[%c0, %c0_0, %c0_1, %c0_2] : memref<8x2x4x16xbf16, #tpu.memory_space<vmem>>, vector<8x2x4x16xbf16>
    %1 = arith.extf %0 : vector<8x2x4x16xbf16> to vector<8x2x4x16xf32>
    %2 = vector.extract_strided_slice %1 {offsets = [0, 0, 0, 0], sizes = [8, 1, 4, 16], strides = [1, 1, 1, 1]} : vector<8x2x4x16xf32> to vector<8x1x4x16xf32>
    %3 = vector.shape_cast %2 : vector<8x1x4x16xf32> to vector<8x4x16xf32>
    %4 = vector.extract_strided_slice %1 {offsets = [0, 1, 0, 0], sizes = [8, 1, 4, 16], strides = [1, 1, 1, 1]} : vector<8x2x4x16xf32> to vector<8x1x4x16xf32>
    %5 = vector.shape_cast %4 : vector<8x1x4x16xf32> to vector<8x4x16xf32>
    %6 = vector.extract_strided_slice %3 {offsets = [0, 0, 0], sizes = [8, 4, 8], strides = [1, 1, 1]} : vector<8x4x16xf32> to vector<8x4x8xf32>
    %7 = vector.extract_strided_slice %3 {offsets = [0, 0, 8], sizes = [8, 4, 8], strides = [1, 1, 1]} : vector<8x4x16xf32> to vector<8x4x8xf32>
    %8 = vector.extract_strided_slice %5 {offsets = [0, 0, 0], sizes = [8, 4, 8], strides = [1, 1, 1]} : vector<8x4x16xf32> to vector<8x4x8xf32>
    %9 = vector.extract_strided_slice %5 {offsets = [0, 0, 8], sizes = [8, 4, 8], strides = [1, 1, 1]} : vector<8x4x16xf32> to vector<8x4x8xf32>
    %10 = arith.addf %6, %7 : vector<8x4x8xf32>
    %11 = arith.addf %10, %8 : vector<8x4x8xf32>
    %12 = arith.addf %11, %9 : vector<8x4x8xf32>
    %13 = arith.addf %6, %7 : vector<8x4x8xf32>
    %14 = arith.subf %13, %8 : vector<8x4x8xf32>
    %15 = arith.subf %14, %9 : vector<8x4x8xf32>
    %16 = arith.subf %6, %7 : vector<8x4x8xf32>
    %17 = arith.addf %16, %8 : vector<8x4x8xf32>
    %18 = arith.subf %17, %9 : vector<8x4x8xf32>
    %19 = arith.subf %6, %7 : vector<8x4x8xf32>
    %20 = arith.subf %19, %8 : vector<8x4x8xf32>
    %21 = arith.addf %20, %9 : vector<8x4x8xf32>
    %22 = tpu.concatenate %12, %15, %18, %21 in 2 : vector<8x4x8xf32>, vector<8x4x8xf32>, vector<8x4x8xf32>, vector<8x4x8xf32> -> vector<8x4x32xf32>
    %cst = arith.constant 5.000000e-01 : f32
    %23 = vector.broadcast %cst : f32 to vector<8x4x32xf32>
    %24 = arith.mulf %22, %23 : vector<8x4x32xf32>
    %25 = arith.truncf %24 : vector<8x4x32xf32> to vector<8x4x32xbf16>
    %c0_3 = arith.constant 0 : index
    %c0_4 = arith.constant 0 : index
    %c0_5 = arith.constant 0 : index
    %26 = vector.load %arg2[%c0_3, %c0_4, %c0_5] : memref<8x4x32xbf16, #tpu.memory_space<vmem>>, vector<8x4x32xbf16>
    tpu.vector_store %arg2[%c0_3, %c0_4, %c0_5], %25 {strides = array<i32>} : memref<8x4x32xbf16, #tpu.memory_space<vmem>>, vector<8x4x32xbf16>,
    return
  }
  func.func @transform_0(%arg0: i32) -> (i32, i32, i32, i32) {
    %c0_i32 = arith.constant 0 : i32
    %c0_i32_0 = arith.constant 0 : i32
    %c0_i32_1 = arith.constant 0 : i32
    %c0_i32_2 = arith.constant 0 : i32
    return %arg0, %c0_i32, %c0_i32_0, %c0_i32_1 : i32, i32, i32, i32
  }
  func.func @transform_1(%arg0: i32) -> (i32, i32, i32) {
    %c0_i32 = arith.constant 0 : i32
    %c0_i32_0 = arith.constant 0 : i32
    %c0_i32_1 = arith.constant 0 : i32
    return %arg0, %c0_i32, %c0_i32_0 : i32, i32, i32
  }
}

module attributes {stable_mosaic.version = 11 : i64} {
  func.func @_conv3x3_kernel(%arg0: i32, %arg1: memref<1x42x32xbf16, #tpu.memory_space<vmem>>, %arg2: memref<3x96x32xbf16, #tpu.memory_space<vmem>>, %arg3: memref<1x32xf32, #tpu.memory_space<vmem>>, %arg4: memref<1x32xf32, #tpu.memory_space<vmem>>, %arg5: memref<1x24x32xf32, #tpu.memory_space<vmem>>) attributes {dimension_semantics = [#tpu.dimension_semantics<parallel>], iteration_bounds = array<i64: 2>, scalar_prefetch = 0 : i64, scratch_operands = 0 : i64, tpu.core_type = #tpu.core_type<tc>, window_params = [{transform_indices = @transform_0, window_bounds = array<i64: 1, 42, 32>}, {pipeline_mode = #tpu.pipeline_mode<synchronous>, transform_indices = @transform_1, window_bounds = array<i64: 3, 96, 32>}, {pipeline_mode = #tpu.pipeline_mode<synchronous>, transform_indices = @transform_2, window_bounds = array<i64: 1, 32>}, {pipeline_mode = #tpu.pipeline_mode<synchronous>, transform_indices = @transform_3, window_bounds = array<i64: 1, 32>}, {transform_indices = @transform_4, window_bounds = array<i64: 1, 24, 32>}]} {
    %cst = arith.constant 0.000000e+00 : f32
    %0 = vector.broadcast %cst : f32 to vector<24x32xf32>
    %c0 = arith.constant 0 : index
    %c0_0 = arith.constant 0 : index
    %c0_1 = arith.constant 0 : index
    %1 = vector.load %arg1[%c0, %c0_0, %c0_1] : memref<1x42x32xbf16, #tpu.memory_space<vmem>>, vector<1x24x32xbf16>
    %2 = vector.shape_cast %1 : vector<1x24x32xbf16> to vector<24x32xbf16>
    %c0_2 = arith.constant 0 : index
    %c1 = arith.constant 1 : index
    %c0_3 = arith.constant 0 : index
    %3 = vector.load %arg1[%c0_2, %c1, %c0_3] : memref<1x42x32xbf16, #tpu.memory_space<vmem>>, vector<1x24x32xbf16>
    %4 = vector.shape_cast %3 : vector<1x24x32xbf16> to vector<24x32xbf16>
    %c0_4 = arith.constant 0 : index
    %c2 = arith.constant 2 : index
    %c0_5 = arith.constant 0 : index
    %5 = vector.load %arg1[%c0_4, %c2, %c0_5] : memref<1x42x32xbf16, #tpu.memory_space<vmem>>, vector<1x24x32xbf16>
    %6 = vector.shape_cast %5 : vector<1x24x32xbf16> to vector<24x32xbf16>
    %7 = tpu.concatenate %2, %4, %6 in 1 : vector<24x32xbf16>, vector<24x32xbf16>, vector<24x32xbf16> -> vector<24x96xbf16>
    %c0_6 = arith.constant 0 : index
    %c0_7 = arith.constant 0 : index
    %c0_8 = arith.constant 0 : index
    %8 = vector.load %arg2[%c0_6, %c0_7, %c0_8] : memref<3x96x32xbf16, #tpu.memory_space<vmem>>, vector<1x96x32xbf16>
    %9 = vector.shape_cast %8 : vector<1x96x32xbf16> to vector<96x32xbf16>
    %cst_9 = arith.constant dense<0.000000e+00> : vector<24x32xf32>
    %10 = tpu.matmul %7, %9, %cst_9 {dimension_numbers = #tpu.dot_dimension_numbers<[1], [0], [0], [1], [0, 0, 1, 1], [], []>} : vector<24x96xbf16>, vector<96x32xbf16>, vector<24x32xf32> -> vector<24x32xf32>
    %11 = arith.addf %0, %10 : vector<24x32xf32>
    %c0_10 = arith.constant 0 : index
    %c6 = arith.constant 6 : index
    %c0_11 = arith.constant 0 : index
    %12 = vector.load %arg1[%c0_10, %c6, %c0_11] : memref<1x42x32xbf16, #tpu.memory_space<vmem>>, vector<1x24x32xbf16>
    %13 = vector.shape_cast %12 : vector<1x24x32xbf16> to vector<24x32xbf16>
    %c0_12 = arith.constant 0 : index
    %c7 = arith.constant 7 : index
    %c0_13 = arith.constant 0 : index
    %14 = vector.load %arg1[%c0_12, %c7, %c0_13] : memref<1x42x32xbf16, #tpu.memory_space<vmem>>, vector<1x24x32xbf16>
    %15 = vector.shape_cast %14 : vector<1x24x32xbf16> to vector<24x32xbf16>
    %c0_14 = arith.constant 0 : index
    %c8 = arith.constant 8 : index
    %c0_15 = arith.constant 0 : index
    %16 = vector.load %arg1[%c0_14, %c8, %c0_15] : memref<1x42x32xbf16, #tpu.memory_space<vmem>>, vector<1x24x32xbf16>
    %17 = vector.shape_cast %16 : vector<1x24x32xbf16> to vector<24x32xbf16>
    %18 = tpu.concatenate %13, %15, %17 in 1 : vector<24x32xbf16>, vector<24x32xbf16>, vector<24x32xbf16> -> vector<24x96xbf16>
    %c1_16 = arith.constant 1 : index
    %c0_17 = arith.constant 0 : index
    %c0_18 = arith.constant 0 : index
    %19 = vector.load %arg2[%c1_16, %c0_17, %c0_18] : memref<3x96x32xbf16, #tpu.memory_space<vmem>>, vector<1x96x32xbf16>
    %20 = vector.shape_cast %19 : vector<1x96x32xbf16> to vector<96x32xbf16>
    %cst_19 = arith.constant dense<0.000000e+00> : vector<24x32xf32>
    %21 = tpu.matmul %18, %20, %cst_19 {dimension_numbers = #tpu.dot_dimension_numbers<[1], [0], [0], [1], [0, 0, 1, 1], [], []>} : vector<24x96xbf16>, vector<96x32xbf16>, vector<24x32xf32> -> vector<24x32xf32>
    %22 = arith.addf %11, %21 : vector<24x32xf32>
    %c0_20 = arith.constant 0 : index
    %c12 = arith.constant 12 : index
    %c0_21 = arith.constant 0 : index
    %23 = vector.load %arg1[%c0_20, %c12, %c0_21] : memref<1x42x32xbf16, #tpu.memory_space<vmem>>, vector<1x24x32xbf16>
    %24 = vector.shape_cast %23 : vector<1x24x32xbf16> to vector<24x32xbf16>
    %c0_22 = arith.constant 0 : index
    %c13 = arith.constant 13 : index
    %c0_23 = arith.constant 0 : index
    %25 = vector.load %arg1[%c0_22, %c13, %c0_23] : memref<1x42x32xbf16, #tpu.memory_space<vmem>>, vector<1x24x32xbf16>
    %26 = vector.shape_cast %25 : vector<1x24x32xbf16> to vector<24x32xbf16>
    %c0_24 = arith.constant 0 : index
    %c14 = arith.constant 14 : index
    %c0_25 = arith.constant 0 : index
    %27 = vector.load %arg1[%c0_24, %c14, %c0_25] : memref<1x42x32xbf16, #tpu.memory_space<vmem>>, vector<1x24x32xbf16>
    %28 = vector.shape_cast %27 : vector<1x24x32xbf16> to vector<24x32xbf16>
    %29 = tpu.concatenate %24, %26, %28 in 1 : vector<24x32xbf16>, vector<24x32xbf16>, vector<24x32xbf16> -> vector<24x96xbf16>
    %c2_26 = arith.constant 2 : index
    %c0_27 = arith.constant 0 : index
    %c0_28 = arith.constant 0 : index
    %30 = vector.load %arg2[%c2_26, %c0_27, %c0_28] : memref<3x96x32xbf16, #tpu.memory_space<vmem>>, vector<1x96x32xbf16>
    %31 = vector.shape_cast %30 : vector<1x96x32xbf16> to vector<96x32xbf16>
    %cst_29 = arith.constant dense<0.000000e+00> : vector<24x32xf32>
    %32 = tpu.matmul %29, %31, %cst_29 {dimension_numbers = #tpu.dot_dimension_numbers<[1], [0], [0], [1], [0, 0, 1, 1], [], []>} : vector<24x96xbf16>, vector<96x32xbf16>, vector<24x32xf32> -> vector<24x32xf32>
    %33 = arith.addf %22, %32 : vector<24x32xf32>
    %c0_30 = arith.constant 0 : index
    %c0_31 = arith.constant 0 : index
    %34 = vector.load %arg3[%c0_30, %c0_31] : memref<1x32xf32, #tpu.memory_space<vmem>>, vector<1x32xf32>
    %35 = vector.broadcast %34 : vector<1x32xf32> to vector<24x32xf32>
    %36 = arith.mulf %33, %35 : vector<24x32xf32>
    %c0_32 = arith.constant 0 : index
    %c0_33 = arith.constant 0 : index
    %37 = vector.load %arg4[%c0_32, %c0_33] : memref<1x32xf32, #tpu.memory_space<vmem>>, vector<1x32xf32>
    %38 = vector.broadcast %37 : vector<1x32xf32> to vector<24x32xf32>
    %39 = arith.addf %36, %38 : vector<24x32xf32>
    %cst_34 = arith.constant 0.000000e+00 : f32
    %40 = vector.broadcast %cst_34 : f32 to vector<24x32xf32>
    %41 = arith.maximumf %39, %40 : vector<24x32xf32>
    %c0_35 = arith.constant 0 : index
    %c0_36 = arith.constant 0 : index
    %c0_37 = arith.constant 0 : index
    %42 = vector.load %arg5[%c0_35, %c0_36, %c0_37] : memref<1x24x32xf32, #tpu.memory_space<vmem>>, vector<1x24x32xf32>
    %43 = vector.shape_cast %42 : vector<1x24x32xf32> to vector<24x32xf32>
    %44 = vector.shape_cast %41 : vector<24x32xf32> to vector<1x24x32xf32>
    tpu.vector_store %arg5[%c0_35, %c0_36, %c0_37], %44 {strides = array<i32>} : memref<1x24x32xf32, #tpu.memory_space<vmem>>, vector<1x24x32xf32>,
    return
  }
  func.func @transform_0(%arg0: i32) -> (i32, i32, i32) {
    %c0_i32 = arith.constant 0 : i32
    %c0_i32_0 = arith.constant 0 : i32
    %c0_i32_1 = arith.constant 0 : i32
    return %arg0, %c0_i32, %c0_i32_0 : i32, i32, i32
  }
  func.func @transform_1(%arg0: i32) -> (i32, i32, i32) {
    %c0_i32 = arith.constant 0 : i32
    %c0_i32_0 = arith.constant 0 : i32
    %c0_i32_1 = arith.constant 0 : i32
    %c0_i32_2 = arith.constant 0 : i32
    return %c0_i32, %c0_i32_0, %c0_i32_1 : i32, i32, i32
  }
  func.func @transform_2(%arg0: i32) -> (i32, i32) {
    %c0_i32 = arith.constant 0 : i32
    %c0_i32_0 = arith.constant 0 : i32
    %c0_i32_1 = arith.constant 0 : i32
    return %c0_i32, %c0_i32_0 : i32, i32
  }
  func.func @transform_3(%arg0: i32) -> (i32, i32) {
    %c0_i32 = arith.constant 0 : i32
    %c0_i32_0 = arith.constant 0 : i32
    %c0_i32_1 = arith.constant 0 : i32
    return %c0_i32, %c0_i32_0 : i32, i32
  }
  func.func @transform_4(%arg0: i32) -> (i32, i32, i32) {
    %c0_i32 = arith.constant 0 : i32
    %c0_i32_0 = arith.constant 0 : i32
    %c0_i32_1 = arith.constant 0 : i32
    return %arg0, %c0_i32, %c0_i32_0 : i32, i32, i32
  }
}

module attributes {stable_mosaic.version = 11 : i64} {
  func.func @_ln_linear_kernel(%arg0: i32, %arg1: i32, %arg2: memref<16x32xf32, #tpu.memory_space<vmem>>, %arg3: memref<1x32xf32, #tpu.memory_space<vmem>>, %arg4: memref<1x32xf32, #tpu.memory_space<vmem>>, %arg5: memref<32x32xbf16, #tpu.memory_space<vmem>>, %arg6: memref<16x32xbf16, #tpu.memory_space<vmem>>) attributes {dimension_semantics = [#tpu.dimension_semantics<parallel>, #tpu.dimension_semantics<parallel>], iteration_bounds = array<i64: 1, 1>, scalar_prefetch = 0 : i64, scratch_operands = 0 : i64, tpu.core_type = #tpu.core_type<tc>, window_params = [{transform_indices = @transform_0, window_bounds = array<i64: 16, 32>}, {pipeline_mode = #tpu.pipeline_mode<synchronous>, transform_indices = @transform_1, window_bounds = array<i64: 1, 32>}, {pipeline_mode = #tpu.pipeline_mode<synchronous>, transform_indices = @transform_2, window_bounds = array<i64: 1, 32>}, {transform_indices = @transform_3, window_bounds = array<i64: 32, 32>}, {transform_indices = @transform_4, window_bounds = array<i64: 16, 32>}]} {
    %c0 = arith.constant 0 : index
    %c0_0 = arith.constant 0 : index
    %0 = vector.load %arg2[%c0, %c0_0] : memref<16x32xf32, #tpu.memory_space<vmem>>, vector<16x32xf32>
    %cst = arith.constant dense<0.000000e+00> : vector<16xf32>
    %1 = vector.multi_reduction <add>, %0, %cst [1] : vector<16x32xf32> to vector<16xf32>
    %2 = vector.shape_cast %1 : vector<16xf32> to vector<16x1xf32>
    %cst_1 = arith.constant 3.200000e+01 : f32
    %3 = vector.broadcast %cst_1 : f32 to vector<16x1xf32>
    %4 = arith.divf %2, %3 : vector<16x1xf32>
    %5 = vector.broadcast %4 : vector<16x1xf32> to vector<16x32xf32>
    %6 = arith.subf %0, %5 : vector<16x32xf32>
    %7 = arith.mulf %6, %6 : vector<16x32xf32>
    %cst_2 = arith.constant dense<0.000000e+00> : vector<16xf32>
    %8 = vector.multi_reduction <add>, %7, %cst_2 [1] : vector<16x32xf32> to vector<16xf32>
    %9 = vector.shape_cast %8 : vector<16xf32> to vector<16x1xf32>
    %cst_3 = arith.constant 3.200000e+01 : f32
    %10 = vector.broadcast %cst_3 : f32 to vector<16x1xf32>
    %11 = arith.divf %9, %10 : vector<16x1xf32>
    %cst_4 = arith.constant 9.99999974E-6 : f32
    %12 = vector.broadcast %cst_4 : f32 to vector<16x1xf32>
    %13 = arith.addf %11, %12 : vector<16x1xf32>
    %14 = math.rsqrt %13 : vector<16x1xf32>
    %15 = vector.broadcast %14 : vector<16x1xf32> to vector<16x32xf32>
    %16 = arith.mulf %6, %15 : vector<16x32xf32>
    %c0_5 = arith.constant 0 : index
    %c0_6 = arith.constant 0 : index
    %17 = vector.load %arg3[%c0_5, %c0_6] : memref<1x32xf32, #tpu.memory_space<vmem>>, vector<1x32xf32>
    %18 = vector.broadcast %17 : vector<1x32xf32> to vector<16x32xf32>
    %19 = arith.mulf %16, %18 : vector<16x32xf32>
    %c0_7 = arith.constant 0 : index
    %c0_8 = arith.constant 0 : index
    %20 = vector.load %arg4[%c0_7, %c0_8] : memref<1x32xf32, #tpu.memory_space<vmem>>, vector<1x32xf32>
    %21 = vector.broadcast %20 : vector<1x32xf32> to vector<16x32xf32>
    %22 = arith.addf %19, %21 : vector<16x32xf32>
    %23 = arith.truncf %22 : vector<16x32xf32> to vector<16x32xbf16>
    %c0_9 = arith.constant 0 : index
    %c0_10 = arith.constant 0 : index
    %24 = vector.load %arg5[%c0_9, %c0_10] : memref<32x32xbf16, #tpu.memory_space<vmem>>, vector<32x32xbf16>
    %cst_11 = arith.constant dense<0.000000e+00> : vector<16x32xf32>
    %25 = tpu.matmul %23, %24, %cst_11 {dimension_numbers = #tpu.dot_dimension_numbers<[1], [0], [0], [1], [0, 0, 1, 1], [], []>} : vector<16x32xbf16>, vector<32x32xbf16>, vector<16x32xf32> -> vector<16x32xf32>
    %26 = arith.truncf %25 : vector<16x32xf32> to vector<16x32xbf16>
    %c0_12 = arith.constant 0 : index
    %c0_13 = arith.constant 0 : index
    %27 = vector.load %arg6[%c0_12, %c0_13] : memref<16x32xbf16, #tpu.memory_space<vmem>>, vector<16x32xbf16>
    tpu.vector_store %arg6[%c0_12, %c0_13], %26 {strides = array<i32>} : memref<16x32xbf16, #tpu.memory_space<vmem>>, vector<16x32xbf16>,
    return
  }
  func.func @transform_0(%arg0: i32, %arg1: i32) -> (i32, i32) {
    %c0_i32 = arith.constant 0 : i32
    %c0_i32_0 = arith.constant 0 : i32
    return %arg0, %c0_i32 : i32, i32
  }
  func.func @transform_1(%arg0: i32, %arg1: i32) -> (i32, i32) {
    %c0_i32 = arith.constant 0 : i32
    %c0_i32_0 = arith.constant 0 : i32
    %c0_i32_1 = arith.constant 0 : i32
    return %c0_i32, %c0_i32_0 : i32, i32
  }
  func.func @transform_2(%arg0: i32, %arg1: i32) -> (i32, i32) {
    %c0_i32 = arith.constant 0 : i32
    %c0_i32_0 = arith.constant 0 : i32
    %c0_i32_1 = arith.constant 0 : i32
    return %c0_i32, %c0_i32_0 : i32, i32
  }
  func.func @transform_3(%arg0: i32, %arg1: i32) -> (i32, i32) {
    %c0_i32 = arith.constant 0 : i32
    %c0_i32_0 = arith.constant 0 : i32
    return %c0_i32, %arg1 : i32, i32
  }
  func.func @transform_4(%arg0: i32, %arg1: i32) -> (i32, i32) {
    %c0_i32 = arith.constant 0 : i32
    return %arg0, %arg1 : i32, i32
  }
}

module attributes {stable_mosaic.version = 11 : i64} {
  func.func @_attn_kernel(%arg0: i32, %arg1: i32, %arg2: memref<1x64x32xbf16, #tpu.memory_space<vmem>>, %arg3: memref<1x4x2x32xbf16, #tpu.memory_space<vmem>>, %arg4: memref<1x64x32xbf16, #tpu.memory_space<vmem>>) attributes {dimension_semantics = [#tpu.dimension_semantics<parallel>, #tpu.dimension_semantics<parallel>], iteration_bounds = array<i64: 2, 1>, scalar_prefetch = 0 : i64, scratch_operands = 0 : i64, tpu.core_type = #tpu.core_type<tc>, window_params = [{transform_indices = @transform_0, window_bounds = array<i64: 1, 64, 32>}, {transform_indices = @transform_1, window_bounds = array<i64: 1, 4, 2, 32>}, {transform_indices = @transform_2, window_bounds = array<i64: 1, 64, 32>}]} {
    %c0 = arith.constant 0 : index
    %c0_0 = arith.constant 0 : index
    %c0_1 = arith.constant 0 : index
    %c0_2 = arith.constant 0 : index
    %0 = vector.load %arg3[%c0, %c0_0, %c0_1, %c0_2] : memref<1x4x2x32xbf16, #tpu.memory_space<vmem>>, vector<1x4x1x32xbf16>
    %1 = vector.shape_cast %0 : vector<1x4x1x32xbf16> to vector<4x32xbf16>
    %c0_3 = arith.constant 0 : index
    %c0_4 = arith.constant 0 : index
    %c1 = arith.constant 1 : index
    %c0_5 = arith.constant 0 : index
    %2 = vector.load %arg3[%c0_3, %c0_4, %c1, %c0_5] : memref<1x4x2x32xbf16, #tpu.memory_space<vmem>>, vector<1x4x1x32xbf16>
    %3 = vector.shape_cast %2 : vector<1x4x1x32xbf16> to vector<4x32xbf16>
    %c0_6 = arith.constant 0 : index
    %c0_7 = arith.constant 0 : index
    %c0_8 = arith.constant 0 : index
    %4 = vector.load %arg2[%c0_6, %c0_7, %c0_8] : memref<1x64x32xbf16, #tpu.memory_space<vmem>>, vector<1x64x8xbf16>
    %5 = vector.shape_cast %4 : vector<1x64x8xbf16> to vector<64x8xbf16>
    %6 = vector.extract_strided_slice %1 {offsets = [0, 0], sizes = [4, 8], strides = [1, 1]} : vector<4x32xbf16> to vector<4x8xbf16>
    %7 = vector.extract_strided_slice %3 {offsets = [0, 0], sizes = [4, 8], strides = [1, 1]} : vector<4x32xbf16> to vector<4x8xbf16>
    %cst = arith.constant dense<0.000000e+00> : vector<64x4xf32>
    %8 = tpu.matmul %5, %6, %cst {dimension_numbers = #tpu.dot_dimension_numbers<[1], [1], [0], [0], [0, 0, 1, 0], [], []>} : vector<64x8xbf16>, vector<4x8xbf16>, vector<64x4xf32> -> vector<64x4xf32>
    %cst_9 = arith.constant dense<0xFF800000> : vector<64xf32>
    %9 = vector.multi_reduction <maximumf>, %8, %cst_9 [1] : vector<64x4xf32> to vector<64xf32>
    %10 = vector.shape_cast %9 : vector<64xf32> to vector<64x1xf32>
    %11 = vector.broadcast %10 : vector<64x1xf32> to vector<64x4xf32>
    %12 = arith.subf %8, %11 : vector<64x4xf32>
    %13 = math.exp %12 : vector<64x4xf32>
    %cst_10 = arith.constant dense<0.000000e+00> : vector<64xf32>
    %14 = vector.multi_reduction <add>, %13, %cst_10 [1] : vector<64x4xf32> to vector<64xf32>
    %15 = vector.shape_cast %14 : vector<64xf32> to vector<64x1xf32>
    %16 = tpu.reciprocal %15 {approx = true} : vector<64x1xf32> -> vector<64x1xf32>
    %17 = vector.broadcast %16 : vector<64x1xf32> to vector<64x4xf32>
    %18 = arith.mulf %13, %17 : vector<64x4xf32>
    %19 = arith.truncf %18 : vector<64x4xf32> to vector<64x4xbf16>
    %cst_11 = arith.constant dense<0.000000e+00> : vector<64x8xf32>
    %20 = tpu.matmul %19, %7, %cst_11 {dimension_numbers = #tpu.dot_dimension_numbers<[1], [0], [0], [1], [0, 0, 1, 1], [], []>} : vector<64x4xbf16>, vector<4x8xbf16>, vector<64x8xf32> -> vector<64x8xf32>
    %c0_12 = arith.constant 0 : index
    %c0_13 = arith.constant 0 : index
    %c8 = arith.constant 8 : index
    %21 = vector.load %arg2[%c0_12, %c0_13, %c8] : memref<1x64x32xbf16, #tpu.memory_space<vmem>>, vector<1x64x8xbf16>
    %22 = vector.shape_cast %21 : vector<1x64x8xbf16> to vector<64x8xbf16>
    %23 = vector.extract_strided_slice %1 {offsets = [0, 8], sizes = [4, 8], strides = [1, 1]} : vector<4x32xbf16> to vector<4x8xbf16>
    %24 = vector.extract_strided_slice %3 {offsets = [0, 8], sizes = [4, 8], strides = [1, 1]} : vector<4x32xbf16> to vector<4x8xbf16>
    %cst_14 = arith.constant dense<0.000000e+00> : vector<64x4xf32>
    %25 = tpu.matmul %22, %23, %cst_14 {dimension_numbers = #tpu.dot_dimension_numbers<[1], [1], [0], [0], [0, 0, 1, 0], [], []>} : vector<64x8xbf16>, vector<4x8xbf16>, vector<64x4xf32> -> vector<64x4xf32>
    %cst_15 = arith.constant dense<0xFF800000> : vector<64xf32>
    %26 = vector.multi_reduction <maximumf>, %25, %cst_15 [1] : vector<64x4xf32> to vector<64xf32>
    %27 = vector.shape_cast %26 : vector<64xf32> to vector<64x1xf32>
    %28 = vector.broadcast %27 : vector<64x1xf32> to vector<64x4xf32>
    %29 = arith.subf %25, %28 : vector<64x4xf32>
    %30 = math.exp %29 : vector<64x4xf32>
    %cst_16 = arith.constant dense<0.000000e+00> : vector<64xf32>
    %31 = vector.multi_reduction <add>, %30, %cst_16 [1] : vector<64x4xf32> to vector<64xf32>
    %32 = vector.shape_cast %31 : vector<64xf32> to vector<64x1xf32>
    %33 = tpu.reciprocal %32 {approx = true} : vector<64x1xf32> -> vector<64x1xf32>
    %34 = vector.broadcast %33 : vector<64x1xf32> to vector<64x4xf32>
    %35 = arith.mulf %30, %34 : vector<64x4xf32>
    %36 = arith.truncf %35 : vector<64x4xf32> to vector<64x4xbf16>
    %cst_17 = arith.constant dense<0.000000e+00> : vector<64x8xf32>
    %37 = tpu.matmul %36, %24, %cst_17 {dimension_numbers = #tpu.dot_dimension_numbers<[1], [0], [0], [1], [0, 0, 1, 1], [], []>} : vector<64x4xbf16>, vector<4x8xbf16>, vector<64x8xf32> -> vector<64x8xf32>
    %c0_18 = arith.constant 0 : index
    %c0_19 = arith.constant 0 : index
    %c16 = arith.constant 16 : index
    %38 = vector.load %arg2[%c0_18, %c0_19, %c16] : memref<1x64x32xbf16, #tpu.memory_space<vmem>>, vector<1x64x8xbf16>
    %39 = vector.shape_cast %38 : vector<1x64x8xbf16> to vector<64x8xbf16>
    %40 = vector.extract_strided_slice %1 {offsets = [0, 16], sizes = [4, 8], strides = [1, 1]} : vector<4x32xbf16> to vector<4x8xbf16>
    %41 = vector.extract_strided_slice %3 {offsets = [0, 16], sizes = [4, 8], strides = [1, 1]} : vector<4x32xbf16> to vector<4x8xbf16>
    %cst_20 = arith.constant dense<0.000000e+00> : vector<64x4xf32>
    %42 = tpu.matmul %39, %40, %cst_20 {dimension_numbers = #tpu.dot_dimension_numbers<[1], [1], [0], [0], [0, 0, 1, 0], [], []>} : vector<64x8xbf16>, vector<4x8xbf16>, vector<64x4xf32> -> vector<64x4xf32>
    %cst_21 = arith.constant dense<0xFF800000> : vector<64xf32>
    %43 = vector.multi_reduction <maximumf>, %42, %cst_21 [1] : vector<64x4xf32> to vector<64xf32>
    %44 = vector.shape_cast %43 : vector<64xf32> to vector<64x1xf32>
    %45 = vector.broadcast %44 : vector<64x1xf32> to vector<64x4xf32>
    %46 = arith.subf %42, %45 : vector<64x4xf32>
    %47 = math.exp %46 : vector<64x4xf32>
    %cst_22 = arith.constant dense<0.000000e+00> : vector<64xf32>
    %48 = vector.multi_reduction <add>, %47, %cst_22 [1] : vector<64x4xf32> to vector<64xf32>
    %49 = vector.shape_cast %48 : vector<64xf32> to vector<64x1xf32>
    %50 = tpu.reciprocal %49 {approx = true} : vector<64x1xf32> -> vector<64x1xf32>
    %51 = vector.broadcast %50 : vector<64x1xf32> to vector<64x4xf32>
    %52 = arith.mulf %47, %51 : vector<64x4xf32>
    %53 = arith.truncf %52 : vector<64x4xf32> to vector<64x4xbf16>
    %cst_23 = arith.constant dense<0.000000e+00> : vector<64x8xf32>
    %54 = tpu.matmul %53, %41, %cst_23 {dimension_numbers = #tpu.dot_dimension_numbers<[1], [0], [0], [1], [0, 0, 1, 1], [], []>} : vector<64x4xbf16>, vector<4x8xbf16>, vector<64x8xf32> -> vector<64x8xf32>
    %c0_24 = arith.constant 0 : index
    %c0_25 = arith.constant 0 : index
    %c24 = arith.constant 24 : index
    %55 = vector.load %arg2[%c0_24, %c0_25, %c24] : memref<1x64x32xbf16, #tpu.memory_space<vmem>>, vector<1x64x8xbf16>
    %56 = vector.shape_cast %55 : vector<1x64x8xbf16> to vector<64x8xbf16>
    %57 = vector.extract_strided_slice %1 {offsets = [0, 24], sizes = [4, 8], strides = [1, 1]} : vector<4x32xbf16> to vector<4x8xbf16>
    %58 = vector.extract_strided_slice %3 {offsets = [0, 24], sizes = [4, 8], strides = [1, 1]} : vector<4x32xbf16> to vector<4x8xbf16>
    %cst_26 = arith.constant dense<0.000000e+00> : vector<64x4xf32>
    %59 = tpu.matmul %56, %57, %cst_26 {dimension_numbers = #tpu.dot_dimension_numbers<[1], [1], [0], [0], [0, 0, 1, 0], [], []>} : vector<64x8xbf16>, vector<4x8xbf16>, vector<64x4xf32> -> vector<64x4xf32>
    %cst_27 = arith.constant dense<0xFF800000> : vector<64xf32>
    %60 = vector.multi_reduction <maximumf>, %59, %cst_27 [1] : vector<64x4xf32> to vector<64xf32>
    %61 = vector.shape_cast %60 : vector<64xf32> to vector<64x1xf32>
    %62 = vector.broadcast %61 : vector<64x1xf32> to vector<64x4xf32>
    %63 = arith.subf %59, %62 : vector<64x4xf32>
    %64 = math.exp %63 : vector<64x4xf32>
    %cst_28 = arith.constant dense<0.000000e+00> : vector<64xf32>
    %65 = vector.multi_reduction <add>, %64, %cst_28 [1] : vector<64x4xf32> to vector<64xf32>
    %66 = vector.shape_cast %65 : vector<64xf32> to vector<64x1xf32>
    %67 = tpu.reciprocal %66 {approx = true} : vector<64x1xf32> -> vector<64x1xf32>
    %68 = vector.broadcast %67 : vector<64x1xf32> to vector<64x4xf32>
    %69 = arith.mulf %64, %68 : vector<64x4xf32>
    %70 = arith.truncf %69 : vector<64x4xf32> to vector<64x4xbf16>
    %cst_29 = arith.constant dense<0.000000e+00> : vector<64x8xf32>
    %71 = tpu.matmul %70, %58, %cst_29 {dimension_numbers = #tpu.dot_dimension_numbers<[1], [0], [0], [1], [0, 0, 1, 1], [], []>} : vector<64x4xbf16>, vector<4x8xbf16>, vector<64x8xf32> -> vector<64x8xf32>
    %72 = tpu.concatenate %20, %37, %54, %71 in 1 : vector<64x8xf32>, vector<64x8xf32>, vector<64x8xf32>, vector<64x8xf32> -> vector<64x32xf32>
    %73 = arith.truncf %72 : vector<64x32xf32> to vector<64x32xbf16>
    %c0_30 = arith.constant 0 : index
    %c0_31 = arith.constant 0 : index
    %c0_32 = arith.constant 0 : index
    %74 = vector.load %arg4[%c0_30, %c0_31, %c0_32] : memref<1x64x32xbf16, #tpu.memory_space<vmem>>, vector<1x64x32xbf16>
    %75 = vector.shape_cast %74 : vector<1x64x32xbf16> to vector<64x32xbf16>
    %76 = vector.shape_cast %73 : vector<64x32xbf16> to vector<1x64x32xbf16>
    tpu.vector_store %arg4[%c0_30, %c0_31, %c0_32], %76 {strides = array<i32>} : memref<1x64x32xbf16, #tpu.memory_space<vmem>>, vector<1x64x32xbf16>,
    return
  }
  func.func @transform_0(%arg0: i32, %arg1: i32) -> (i32, i32, i32) {
    %c0_i32 = arith.constant 0 : i32
    %c0_i32_0 = arith.constant 0 : i32
    return %arg0, %arg1, %c0_i32 : i32, i32, i32
  }
  func.func @transform_1(%arg0: i32, %arg1: i32) -> (i32, i32, i32, i32) {
    %c0_i32 = arith.constant 0 : i32
    %c0_i32_0 = arith.constant 0 : i32
    %c0_i32_1 = arith.constant 0 : i32
    %c0_i32_2 = arith.constant 0 : i32
    return %arg0, %c0_i32, %c0_i32_0, %c0_i32_1 : i32, i32, i32, i32
  }
  func.func @transform_2(%arg0: i32, %arg1: i32) -> (i32, i32, i32) {
    %c0_i32 = arith.constant 0 : i32
    %c0_i32_0 = arith.constant 0 : i32
    return %arg0, %arg1, %c0_i32 : i32, i32, i32
  }
}

module attributes {stable_mosaic.version = 11 : i64} {
  func.func @_linear_act_kernel(%arg0: i32, %arg1: i32, %arg2: i32, %arg3: memref<128x32xbf16, #tpu.memory_space<vmem>>, %arg4: memref<32x32xbf16, #tpu.memory_space<vmem>>, %arg5: memref<1x32xf32, #tpu.memory_space<vmem>>, %arg6: memref<1x32xf32, #tpu.memory_space<vmem>>, %arg7: memref<128x32xbf16, #tpu.memory_space<vmem>>, %arg8: memref<128x32xf32, #tpu.memory_space<vmem>>) attributes {dimension_semantics = [#tpu.dimension_semantics<parallel>, #tpu.dimension_semantics<parallel>, #tpu.dimension_semantics<arbitrary>], iteration_bounds = array<i64: 1, 1, 1>, scalar_prefetch = 0 : i64, scratch_operands = 1 : i64, tpu.core_type = #tpu.core_type<tc>, window_params = [{transform_indices = @transform_0, window_bounds = array<i64: 128, 32>}, {transform_indices = @transform_1, window_bounds = array<i64: 32, 32>}, {transform_indices = @transform_2, window_bounds = array<i64: 1, 32>}, {transform_indices = @transform_3, window_bounds = array<i64: 1, 32>}, {transform_indices = @transform_4, window_bounds = array<i64: 128, 32>}]} {
    %c0_i32 = arith.constant 0 : i32
    %0 = arith.cmpi eq, %arg2, %c0_i32 : i32
    %1 = arith.extui %0 : i1 to i32
    %c0_i32_0 = arith.constant 0 : i32
    %2 = arith.cmpi ne, %1, %c0_i32_0 : i32
    scf.if %2 {
      %cst_10 = arith.constant 0.000000e+00 : f32
      %12 = vector.broadcast %cst_10 : f32 to vector<128x32xf32>
      %c0_11 = arith.constant 0 : index
      %c0_12 = arith.constant 0 : index
      %13 = vector.load %arg8[%c0_11, %c0_12] : memref<128x32xf32, #tpu.memory_space<vmem>>, vector<128x32xf32>
      tpu.vector_store %arg8[%c0_11, %c0_12], %12 {strides = array<i32>} : memref<128x32xf32, #tpu.memory_space<vmem>>, vector<128x32xf32>,
    } else {
    }
    %c0 = arith.constant 0 : index
    %c0_1 = arith.constant 0 : index
    %3 = vector.load %arg3[%c0, %c0_1] : memref<128x32xbf16, #tpu.memory_space<vmem>>, vector<128x32xbf16>
    %c0_2 = arith.constant 0 : index
    %c0_3 = arith.constant 0 : index
    %4 = vector.load %arg8[%c0_2, %c0_3] : memref<128x32xf32, #tpu.memory_space<vmem>>, vector<128x32xf32>
    %c0_4 = arith.constant 0 : index
    %c0_5 = arith.constant 0 : index
    %5 = vector.load %arg4[%c0_4, %c0_5] : memref<32x32xbf16, #tpu.memory_space<vmem>>, vector<32x32xbf16>
    %cst = arith.constant dense<0.000000e+00> : vector<128x32xf32>
    %6 = tpu.matmul %3, %5, %cst {dimension_numbers = #tpu.dot_dimension_numbers<[1], [0], [0], [1], [0, 0, 1, 1], [], []>} : vector<128x32xbf16>, vector<32x32xbf16>, vector<128x32xf32> -> vector<128x32xf32>
    %7 = arith.addf %4, %6 : vector<128x32xf32>
    %c0_6 = arith.constant 0 : index
    %c0_7 = arith.constant 0 : index
    %8 = vector.load %arg8[%c0_6, %c0_7] : memref<128x32xf32, #tpu.memory_space<vmem>>, vector<128x32xf32>
    tpu.vector_store %arg8[%c0_6, %c0_7], %7 {strides = array<i32>} : memref<128x32xf32, #tpu.memory_space<vmem>>, vector<128x32xf32>,
    %c0_i32_8 = arith.constant 0 : i32
    %9 = arith.cmpi eq, %arg2, %c0_i32_8 : i32
    %10 = arith.extui %9 : i1 to i32
    %c0_i32_9 = arith.constant 0 : i32
    %11 = arith.cmpi ne, %10, %c0_i32_9 : i32
    scf.if %11 {
      %c0_10 = arith.constant 0 : index
      %c0_11 = arith.constant 0 : index
      %12 = vector.load %arg8[%c0_10, %c0_11] : memref<128x32xf32, #tpu.memory_space<vmem>>, vector<128x32xf32>
      %c0_12 = arith.constant 0 : index
      %c0_13 = arith.constant 0 : index
      %13 = vector.load %arg5[%c0_12, %c0_13] : memref<1x32xf32, #tpu.memory_space<vmem>>, vector<1x32xf32>
      %14 = vector.broadcast %13 : vector<1x32xf32> to vector<128x32xf32>
      %15 = arith.mulf %12, %14 : vector<128x32xf32>
      %c0_14 = arith.constant 0 : index
      %c0_15 = arith.constant 0 : index
      %16 = vector.load %arg6[%c0_14, %c0_15] : memref<1x32xf32, #tpu.memory_space<vmem>>, vector<1x32xf32>
      %17 = vector.broadcast %16 : vector<1x32xf32> to vector<128x32xf32>
      %18 = arith.addf %15, %17 : vector<128x32xf32>
      %19 = arith.truncf %18 : vector<128x32xf32> to vector<128x32xbf16>
      %c0_16 = arith.constant 0 : index
      %c0_17 = arith.constant 0 : index
      %20 = vector.load %arg7[%c0_16, %c0_17] : memref<128x32xbf16, #tpu.memory_space<vmem>>, vector<128x32xbf16>
      tpu.vector_store %arg7[%c0_16, %c0_17], %19 {strides = array<i32>} : memref<128x32xbf16, #tpu.memory_space<vmem>>, vector<128x32xbf16>,
    } else {
    }
    return
  }
  func.func @transform_0(%arg0: i32, %arg1: i32, %arg2: i32) -> (i32, i32) {
    %c0_i32 = arith.constant 0 : i32
    return %arg0, %arg2 : i32, i32
  }
  func.func @transform_1(%arg0: i32, %arg1: i32, %arg2: i32) -> (i32, i32) {
    %c0_i32 = arith.constant 0 : i32
    return %arg2, %arg1 : i32, i32
  }
  func.func @transform_2(%arg0: i32, %arg1: i32, %arg2: i32) -> (i32, i32) {
    %c0_i32 = arith.constant 0 : i32
    %c0_i32_0 = arith.constant 0 : i32
    return %c0_i32, %arg1 : i32, i32
  }
  func.func @transform_3(%arg0: i32, %arg1: i32, %arg2: i32) -> (i32, i32) {
    %c0_i32 = arith.constant 0 : i32
    %c0_i32_0 = arith.constant 0 : i32
    return %c0_i32, %arg1 : i32, i32
  }
  func.func @transform_4(%arg0: i32, %arg1: i32, %arg2: i32) -> (i32, i32) {
    %c0_i32 = arith.constant 0 : i32
    return %arg0, %arg1 : i32, i32
  }
}

module attributes {stable_mosaic.version = 11 : i64} {
  func.func @_idwt_kernel(%arg0: i32, %arg1: memref<8x6x32xf32, #tpu.memory_space<vmem>>, %arg2: memref<8x2x4x16xbf16, #tpu.memory_space<vmem>>) attributes {dimension_semantics = [#tpu.dimension_semantics<parallel>], iteration_bounds = array<i64: 1>, scalar_prefetch = 0 : i64, scratch_operands = 0 : i64, tpu.core_type = #tpu.core_type<tc>, window_params = [{transform_indices = @transform_0, window_bounds = array<i64: 8, 6, 32>}, {transform_indices = @transform_1, window_bounds = array<i64: 8, 2, 4, 16>}]} {
    %c0 = arith.constant 0 : index
    %c0_0 = arith.constant 0 : index
    %c0_1 = arith.constant 0 : index
    %0 = vector.load %arg1[%c0, %c0_0, %c0_1] : memref<8x6x32xf32, #tpu.memory_space<vmem>>, vector<8x6x32xf32>
    %1 = vector.extract_strided_slice %0 {offsets = [0, 0, 0], sizes = [8, 4, 32], strides = [1, 1, 1]} : vector<8x6x32xf32> to vector<8x4x32xf32>
    %2 = vector.extract_strided_slice %1 {offsets = [0, 0, 0], sizes = [8, 4, 8], strides = [1, 1, 1]} : vector<8x4x32xf32> to vector<8x4x8xf32>
    %3 = vector.extract_strided_slice %1 {offsets = [0, 0, 8], sizes = [8, 4, 8], strides = [1, 1, 1]} : vector<8x4x32xf32> to vector<8x4x8xf32>
    %4 = vector.extract_strided_slice %1 {offsets = [0, 0, 16], sizes = [8, 4, 8], strides = [1, 1, 1]} : vector<8x4x32xf32> to vector<8x4x8xf32>
    %5 = vector.extract_strided_slice %1 {offsets = [0, 0, 24], sizes = [8, 4, 8], strides = [1, 1, 1]} : vector<8x4x32xf32> to vector<8x4x8xf32>
    %6 = arith.addf %2, %3 : vector<8x4x8xf32>
    %7 = arith.addf %6, %4 : vector<8x4x8xf32>
    %8 = arith.addf %7, %5 : vector<8x4x8xf32>
    %9 = arith.addf %2, %3 : vector<8x4x8xf32>
    %10 = arith.subf %9, %4 : vector<8x4x8xf32>
    %11 = arith.subf %10, %5 : vector<8x4x8xf32>
    %12 = tpu.concatenate %8, %11 in 2 : vector<8x4x8xf32>, vector<8x4x8xf32> -> vector<8x4x16xf32>
    %cst = arith.constant 5.000000e-01 : f32
    %13 = vector.broadcast %cst : f32 to vector<8x4x16xf32>
    %14 = arith.mulf %12, %13 : vector<8x4x16xf32>
    %15 = arith.truncf %14 : vector<8x4x16xf32> to vector<8x4x16xbf16>
    %c0_2 = arith.constant 0 : index
    %c0_3 = arith.constant 0 : index
    %c0_4 = arith.constant 0 : index
    %c0_5 = arith.constant 0 : index
    %16 = vector.load %arg2[%c0_2, %c0_3, %c0_4, %c0_5] : memref<8x2x4x16xbf16, #tpu.memory_space<vmem>>, vector<8x1x4x16xbf16>
    %17 = vector.shape_cast %16 : vector<8x1x4x16xbf16> to vector<8x4x16xbf16>
    %18 = vector.shape_cast %15 : vector<8x4x16xbf16> to vector<8x1x4x16xbf16>
    tpu.vector_store %arg2[%c0_2, %c0_3, %c0_4, %c0_5], %18 {strides = array<i32>} : memref<8x2x4x16xbf16, #tpu.memory_space<vmem>>, vector<8x1x4x16xbf16>,
    %19 = arith.subf %2, %3 : vector<8x4x8xf32>
    %20 = arith.addf %19, %4 : vector<8x4x8xf32>
    %21 = arith.subf %20, %5 : vector<8x4x8xf32>
    %22 = arith.subf %2, %3 : vector<8x4x8xf32>
    %23 = arith.subf %22, %4 : vector<8x4x8xf32>
    %24 = arith.addf %23, %5 : vector<8x4x8xf32>
    %25 = tpu.concatenate %21, %24 in 2 : vector<8x4x8xf32>, vector<8x4x8xf32> -> vector<8x4x16xf32>
    %cst_6 = arith.constant 5.000000e-01 : f32
    %26 = vector.broadcast %cst_6 : f32 to vector<8x4x16xf32>
    %27 = arith.mulf %25, %26 : vector<8x4x16xf32>
    %28 = arith.truncf %27 : vector<8x4x16xf32> to vector<8x4x16xbf16>
    %c0_7 = arith.constant 0 : index
    %c1 = arith.constant 1 : index
    %c0_8 = arith.constant 0 : index
    %c0_9 = arith.constant 0 : index
    %29 = vector.load %arg2[%c0_7, %c1, %c0_8, %c0_9] : memref<8x2x4x16xbf16, #tpu.memory_space<vmem>>, vector<8x1x4x16xbf16>
    %30 = vector.shape_cast %29 : vector<8x1x4x16xbf16> to vector<8x4x16xbf16>
    %31 = vector.shape_cast %28 : vector<8x4x16xbf16> to vector<8x1x4x16xbf16>
    tpu.vector_store %arg2[%c0_7, %c1, %c0_8, %c0_9], %31 {strides = array<i32>} : memref<8x2x4x16xbf16, #tpu.memory_space<vmem>>, vector<8x1x4x16xbf16>,
    return
  }
  func.func @transform_0(%arg0: i32) -> (i32, i32, i32) {
    %c0_i32 = arith.constant 0 : i32
    %c0_i32_0 = arith.constant 0 : i32
    %c0_i32_1 = arith.constant 0 : i32
    return %arg0, %c0_i32, %c0_i32_0 : i32, i32, i32
  }
  func.func @transform_1(%arg0: i32) -> (i32, i32, i32, i32) {
    %c0_i32 = arith.constant 0 : i32
    %c0_i32_0 = arith.constant 0 : i32
    %c0_i32_1 = arith.constant 0 : i32
    %c0_i32_2 = arith.constant 0 : i32
    return %arg0, %c0_i32, %c0_i32_0, %c0_i32_1 : i32, i32, i32, i32
  }
}

module attributes {stable_mosaic.version = 11 : i64} {
  func.func @_dual_linear_kernel(%arg0: i32, %arg1: i32, %arg2: memref<128x32xbf16, #tpu.memory_space<vmem>>, %arg3: memref<32x32xbf16, #tpu.memory_space<vmem>>, %arg4: memref<128x8xbf16, #tpu.memory_space<vmem>>, %arg5: memref<8x32xbf16, #tpu.memory_space<vmem>>, %arg6: memref<1x32xf32, #tpu.memory_space<vmem>>, %arg7: memref<128x32xf32, #tpu.memory_space<vmem>>) attributes {dimension_semantics = [#tpu.dimension_semantics<parallel>, #tpu.dimension_semantics<parallel>], iteration_bounds = array<i64: 1, 1>, scalar_prefetch = 0 : i64, scratch_operands = 0 : i64, tpu.core_type = #tpu.core_type<tc>, window_params = [{transform_indices = @transform_0, window_bounds = array<i64: 128, 32>}, {transform_indices = @transform_1, window_bounds = array<i64: 32, 32>}, {transform_indices = @transform_2, window_bounds = array<i64: 128, 8>}, {transform_indices = @transform_3, window_bounds = array<i64: 8, 32>}, {transform_indices = @transform_4, window_bounds = array<i64: 1, 32>}, {transform_indices = @transform_5, window_bounds = array<i64: 128, 32>}]} {
    %c0 = arith.constant 0 : index
    %c0_0 = arith.constant 0 : index
    %0 = vector.load %arg2[%c0, %c0_0] : memref<128x32xbf16, #tpu.memory_space<vmem>>, vector<128x32xbf16>
    %c0_1 = arith.constant 0 : index
    %c0_2 = arith.constant 0 : index
    %1 = vector.load %arg4[%c0_1, %c0_2] : memref<128x8xbf16, #tpu.memory_space<vmem>>, vector<128x8xbf16>
    %c0_3 = arith.constant 0 : index
    %c0_4 = arith.constant 0 : index
    %2 = vector.load %arg3[%c0_3, %c0_4] : memref<32x32xbf16, #tpu.memory_space<vmem>>, vector<32x32xbf16>
    %cst = arith.constant dense<0.000000e+00> : vector<128x32xf32>
    %3 = tpu.matmul %0, %2, %cst {dimension_numbers = #tpu.dot_dimension_numbers<[1], [0], [0], [1], [0, 0, 1, 1], [], []>} : vector<128x32xbf16>, vector<32x32xbf16>, vector<128x32xf32> -> vector<128x32xf32>
    %c0_5 = arith.constant 0 : index
    %c0_6 = arith.constant 0 : index
    %4 = vector.load %arg5[%c0_5, %c0_6] : memref<8x32xbf16, #tpu.memory_space<vmem>>, vector<8x32xbf16>
    %cst_7 = arith.constant dense<0.000000e+00> : vector<128x32xf32>
    %5 = tpu.matmul %1, %4, %cst_7 {dimension_numbers = #tpu.dot_dimension_numbers<[1], [0], [0], [1], [0, 0, 1, 1], [], []>} : vector<128x8xbf16>, vector<8x32xbf16>, vector<128x32xf32> -> vector<128x32xf32>
    %6 = arith.addf %3, %5 : vector<128x32xf32>
    %c0_8 = arith.constant 0 : index
    %c0_9 = arith.constant 0 : index
    %7 = vector.load %arg6[%c0_8, %c0_9] : memref<1x32xf32, #tpu.memory_space<vmem>>, vector<1x32xf32>
    %8 = vector.broadcast %7 : vector<1x32xf32> to vector<128x32xf32>
    %9 = arith.addf %6, %8 : vector<128x32xf32>
    %c0_10 = arith.constant 0 : index
    %c0_11 = arith.constant 0 : index
    %10 = vector.load %arg7[%c0_10, %c0_11] : memref<128x32xf32, #tpu.memory_space<vmem>>, vector<128x32xf32>
    tpu.vector_store %arg7[%c0_10, %c0_11], %9 {strides = array<i32>} : memref<128x32xf32, #tpu.memory_space<vmem>>, vector<128x32xf32>,
    return
  }
  func.func @transform_0(%arg0: i32, %arg1: i32) -> (i32, i32) {
    %c0_i32 = arith.constant 0 : i32
    %c0_i32_0 = arith.constant 0 : i32
    return %arg0, %c0_i32 : i32, i32
  }
  func.func @transform_1(%arg0: i32, %arg1: i32) -> (i32, i32) {
    %c0_i32 = arith.constant 0 : i32
    %c0_i32_0 = arith.constant 0 : i32
    return %c0_i32, %arg1 : i32, i32
  }
  func.func @transform_2(%arg0: i32, %arg1: i32) -> (i32, i32) {
    %c0_i32 = arith.constant 0 : i32
    %c0_i32_0 = arith.constant 0 : i32
    return %arg0, %c0_i32 : i32, i32
  }
  func.func @transform_3(%arg0: i32, %arg1: i32) -> (i32, i32) {
    %c0_i32 = arith.constant 0 : i32
    %c0_i32_0 = arith.constant 0 : i32
    return %c0_i32, %arg1 : i32, i32
  }
  func.func @transform_4(%arg0: i32, %arg1: i32) -> (i32, i32) {
    %c0_i32 = arith.constant 0 : i32
    %c0_i32_0 = arith.constant 0 : i32
    return %c0_i32, %arg1 : i32, i32
  }
  func.func @transform_5(%arg0: i32, %arg1: i32) -> (i32, i32) {
    %c0_i32 = arith.constant 0 : i32
    return %arg0, %arg1 : i32, i32
  }
}

module attributes {stable_mosaic.version = 11 : i64} {
  func.func @_linear_act_kernel(%arg0: i32, %arg1: i32, %arg2: i32, %arg3: memref<128x32xbf16, #tpu.memory_space<vmem>>, %arg4: memref<32x64xbf16, #tpu.memory_space<vmem>>, %arg5: memref<1x64xf32, #tpu.memory_space<vmem>>, %arg6: memref<1x64xf32, #tpu.memory_space<vmem>>, %arg7: memref<128x64xbf16, #tpu.memory_space<vmem>>, %arg8: memref<128x64xf32, #tpu.memory_space<vmem>>) attributes {dimension_semantics = [#tpu.dimension_semantics<parallel>, #tpu.dimension_semantics<parallel>, #tpu.dimension_semantics<arbitrary>], iteration_bounds = array<i64: 1, 1, 1>, scalar_prefetch = 0 : i64, scratch_operands = 1 : i64, tpu.core_type = #tpu.core_type<tc>, window_params = [{transform_indices = @transform_0, window_bounds = array<i64: 128, 32>}, {transform_indices = @transform_1, window_bounds = array<i64: 32, 64>}, {transform_indices = @transform_2, window_bounds = array<i64: 1, 64>}, {transform_indices = @transform_3, window_bounds = array<i64: 1, 64>}, {transform_indices = @transform_4, window_bounds = array<i64: 128, 64>}]} {
    %c0_i32 = arith.constant 0 : i32
    %0 = arith.cmpi eq, %arg2, %c0_i32 : i32
    %1 = arith.extui %0 : i1 to i32
    %c0_i32_0 = arith.constant 0 : i32
    %2 = arith.cmpi ne, %1, %c0_i32_0 : i32
    scf.if %2 {
      %cst_10 = arith.constant 0.000000e+00 : f32
      %12 = vector.broadcast %cst_10 : f32 to vector<128x64xf32>
      %c0_11 = arith.constant 0 : index
      %c0_12 = arith.constant 0 : index
      %13 = vector.load %arg8[%c0_11, %c0_12] : memref<128x64xf32, #tpu.memory_space<vmem>>, vector<128x64xf32>
      tpu.vector_store %arg8[%c0_11, %c0_12], %12 {strides = array<i32>} : memref<128x64xf32, #tpu.memory_space<vmem>>, vector<128x64xf32>,
    } else {
    }
    %c0 = arith.constant 0 : index
    %c0_1 = arith.constant 0 : index
    %3 = vector.load %arg3[%c0, %c0_1] : memref<128x32xbf16, #tpu.memory_space<vmem>>, vector<128x32xbf16>
    %c0_2 = arith.constant 0 : index
    %c0_3 = arith.constant 0 : index
    %4 = vector.load %arg8[%c0_2, %c0_3] : memref<128x64xf32, #tpu.memory_space<vmem>>, vector<128x64xf32>
    %c0_4 = arith.constant 0 : index
    %c0_5 = arith.constant 0 : index
    %5 = vector.load %arg4[%c0_4, %c0_5] : memref<32x64xbf16, #tpu.memory_space<vmem>>, vector<32x64xbf16>
    %cst = arith.constant dense<0.000000e+00> : vector<128x64xf32>
    %6 = tpu.matmul %3, %5, %cst {dimension_numbers = #tpu.dot_dimension_numbers<[1], [0], [0], [1], [0, 0, 1, 1], [], []>} : vector<128x32xbf16>, vector<32x64xbf16>, vector<128x64xf32> -> vector<128x64xf32>
    %7 = arith.addf %4, %6 : vector<128x64xf32>
    %c0_6 = arith.constant 0 : index
    %c0_7 = arith.constant 0 : index
    %8 = vector.load %arg8[%c0_6, %c0_7] : memref<128x64xf32, #tpu.memory_space<vmem>>, vector<128x64xf32>
    tpu.vector_store %arg8[%c0_6, %c0_7], %7 {strides = array<i32>} : memref<128x64xf32, #tpu.memory_space<vmem>>, vector<128x64xf32>,
    %c0_i32_8 = arith.constant 0 : i32
    %9 = arith.cmpi eq, %arg2, %c0_i32_8 : i32
    %10 = arith.extui %9 : i1 to i32
    %c0_i32_9 = arith.constant 0 : i32
    %11 = arith.cmpi ne, %10, %c0_i32_9 : i32
    scf.if %11 {
      %c0_10 = arith.constant 0 : index
      %c0_11 = arith.constant 0 : index
      %12 = vector.load %arg8[%c0_10, %c0_11] : memref<128x64xf32, #tpu.memory_space<vmem>>, vector<128x64xf32>
      %c0_12 = arith.constant 0 : index
      %c0_13 = arith.constant 0 : index
      %13 = vector.load %arg5[%c0_12, %c0_13] : memref<1x64xf32, #tpu.memory_space<vmem>>, vector<1x64xf32>
      %14 = vector.broadcast %13 : vector<1x64xf32> to vector<128x64xf32>
      %15 = arith.mulf %12, %14 : vector<128x64xf32>
      %c0_14 = arith.constant 0 : index
      %c0_15 = arith.constant 0 : index
      %16 = vector.load %arg6[%c0_14, %c0_15] : memref<1x64xf32, #tpu.memory_space<vmem>>, vector<1x64xf32>
      %17 = vector.broadcast %16 : vector<1x64xf32> to vector<128x64xf32>
      %18 = arith.addf %15, %17 : vector<128x64xf32>
      %cst_16 = arith.constant 5.000000e-01 : f32
      %19 = vector.broadcast %cst_16 : f32 to vector<128x64xf32>
      %20 = arith.mulf %19, %18 : vector<128x64xf32>
      %cst_17 = arith.constant 4.471500e-02 : f32
      %21 = vector.broadcast %cst_17 : f32 to vector<128x64xf32>
      %22 = arith.mulf %21, %18 : vector<128x64xf32>
      %23 = arith.mulf %22, %18 : vector<128x64xf32>
      %24 = arith.mulf %23, %18 : vector<128x64xf32>
      %25 = arith.addf %18, %24 : vector<128x64xf32>
      %cst_18 = arith.constant 0.797884583 : f32
      %26 = vector.broadcast %cst_18 : f32 to vector<128x64xf32>
      %27 = arith.mulf %26, %25 : vector<128x64xf32>
      %28 = math.tanh %27 : vector<128x64xf32>
      %cst_19 = arith.constant 1.000000e+00 : f32
      %29 = vector.broadcast %cst_19 : f32 to vector<128x64xf32>
      %30 = arith.addf %29, %28 : vector<128x64xf32>
      %31 = arith.mulf %20, %30 : vector<128x64xf32>
      %32 = arith.truncf %31 : vector<128x64xf32> to vector<128x64xbf16>
      %c0_20 = arith.constant 0 : index
      %c0_21 = arith.constant 0 : index
      %33 = vector.load %arg7[%c0_20, %c0_21] : memref<128x64xbf16, #tpu.memory_space<vmem>>, vector<128x64xbf16>
      tpu.vector_store %arg7[%c0_20, %c0_21], %32 {strides = array<i32>} : memref<128x64xbf16, #tpu.memory_space<vmem>>, vector<128x64xbf16>,
    } else {
    }
    return
  }
  func.func @transform_0(%arg0: i32, %arg1: i32, %arg2: i32) -> (i32, i32) {
    %c0_i32 = arith.constant 0 : i32
    return %arg0, %arg2 : i32, i32
  }
  func.func @transform_1(%arg0: i32, %arg1: i32, %arg2: i32) -> (i32, i32) {
    %c0_i32 = arith.constant 0 : i32
    return %arg2, %arg1 : i32, i32
  }
  func.func @transform_2(%arg0: i32, %arg1: i32, %arg2: i32) -> (i32, i32) {
    %c0_i32 = arith.constant 0 : i32
    %c0_i32_0 = arith.constant 0 : i32
    return %c0_i32, %arg1 : i32, i32
  }
  func.func @transform_3(%arg0: i32, %arg1: i32, %arg2: i32) -> (i32, i32) {
    %c0_i32 = arith.constant 0 : i32
    %c0_i32_0 = arith.constant 0 : i32
    return %c0_i32, %arg1 : i32, i32
  }
  func.func @transform_4(%arg0: i32, %arg1: i32, %arg2: i32) -> (i32, i32) {
    %c0_i32 = arith.constant 0 : i32
    return %arg0, %arg1 : i32, i32
  }
}

module attributes {stable_mosaic.version = 11 : i64} {
  func.func @_linear_act_kernel(%arg0: i32, %arg1: i32, %arg2: i32, %arg3: memref<128x64xbf16, #tpu.memory_space<vmem>>, %arg4: memref<64x32xbf16, #tpu.memory_space<vmem>>, %arg5: memref<1x32xf32, #tpu.memory_space<vmem>>, %arg6: memref<1x32xf32, #tpu.memory_space<vmem>>, %arg7: memref<128x32xf32, #tpu.memory_space<vmem>>, %arg8: memref<128x32xf32, #tpu.memory_space<vmem>>) attributes {dimension_semantics = [#tpu.dimension_semantics<parallel>, #tpu.dimension_semantics<parallel>, #tpu.dimension_semantics<arbitrary>], iteration_bounds = array<i64: 1, 1, 1>, scalar_prefetch = 0 : i64, scratch_operands = 1 : i64, tpu.core_type = #tpu.core_type<tc>, window_params = [{transform_indices = @transform_0, window_bounds = array<i64: 128, 64>}, {transform_indices = @transform_1, window_bounds = array<i64: 64, 32>}, {transform_indices = @transform_2, window_bounds = array<i64: 1, 32>}, {transform_indices = @transform_3, window_bounds = array<i64: 1, 32>}, {transform_indices = @transform_4, window_bounds = array<i64: 128, 32>}]} {
    %c0_i32 = arith.constant 0 : i32
    %0 = arith.cmpi eq, %arg2, %c0_i32 : i32
    %1 = arith.extui %0 : i1 to i32
    %c0_i32_0 = arith.constant 0 : i32
    %2 = arith.cmpi ne, %1, %c0_i32_0 : i32
    scf.if %2 {
      %cst_10 = arith.constant 0.000000e+00 : f32
      %12 = vector.broadcast %cst_10 : f32 to vector<128x32xf32>
      %c0_11 = arith.constant 0 : index
      %c0_12 = arith.constant 0 : index
      %13 = vector.load %arg8[%c0_11, %c0_12] : memref<128x32xf32, #tpu.memory_space<vmem>>, vector<128x32xf32>
      tpu.vector_store %arg8[%c0_11, %c0_12], %12 {strides = array<i32>} : memref<128x32xf32, #tpu.memory_space<vmem>>, vector<128x32xf32>,
    } else {
    }
    %c0 = arith.constant 0 : index
    %c0_1 = arith.constant 0 : index
    %3 = vector.load %arg3[%c0, %c0_1] : memref<128x64xbf16, #tpu.memory_space<vmem>>, vector<128x64xbf16>
    %c0_2 = arith.constant 0 : index
    %c0_3 = arith.constant 0 : index
    %4 = vector.load %arg8[%c0_2, %c0_3] : memref<128x32xf32, #tpu.memory_space<vmem>>, vector<128x32xf32>
    %c0_4 = arith.constant 0 : index
    %c0_5 = arith.constant 0 : index
    %5 = vector.load %arg4[%c0_4, %c0_5] : memref<64x32xbf16, #tpu.memory_space<vmem>>, vector<64x32xbf16>
    %cst = arith.constant dense<0.000000e+00> : vector<128x32xf32>
    %6 = tpu.matmul %3, %5, %cst {dimension_numbers = #tpu.dot_dimension_numbers<[1], [0], [0], [1], [0, 0, 1, 1], [], []>} : vector<128x64xbf16>, vector<64x32xbf16>, vector<128x32xf32> -> vector<128x32xf32>
    %7 = arith.addf %4, %6 : vector<128x32xf32>
    %c0_6 = arith.constant 0 : index
    %c0_7 = arith.constant 0 : index
    %8 = vector.load %arg8[%c0_6, %c0_7] : memref<128x32xf32, #tpu.memory_space<vmem>>, vector<128x32xf32>
    tpu.vector_store %arg8[%c0_6, %c0_7], %7 {strides = array<i32>} : memref<128x32xf32, #tpu.memory_space<vmem>>, vector<128x32xf32>,
    %c0_i32_8 = arith.constant 0 : i32
    %9 = arith.cmpi eq, %arg2, %c0_i32_8 : i32
    %10 = arith.extui %9 : i1 to i32
    %c0_i32_9 = arith.constant 0 : i32
    %11 = arith.cmpi ne, %10, %c0_i32_9 : i32
    scf.if %11 {
      %c0_10 = arith.constant 0 : index
      %c0_11 = arith.constant 0 : index
      %12 = vector.load %arg8[%c0_10, %c0_11] : memref<128x32xf32, #tpu.memory_space<vmem>>, vector<128x32xf32>
      %c0_12 = arith.constant 0 : index
      %c0_13 = arith.constant 0 : index
      %13 = vector.load %arg5[%c0_12, %c0_13] : memref<1x32xf32, #tpu.memory_space<vmem>>, vector<1x32xf32>
      %14 = vector.broadcast %13 : vector<1x32xf32> to vector<128x32xf32>
      %15 = arith.mulf %12, %14 : vector<128x32xf32>
      %c0_14 = arith.constant 0 : index
      %c0_15 = arith.constant 0 : index
      %16 = vector.load %arg6[%c0_14, %c0_15] : memref<1x32xf32, #tpu.memory_space<vmem>>, vector<1x32xf32>
      %17 = vector.broadcast %16 : vector<1x32xf32> to vector<128x32xf32>
      %18 = arith.addf %15, %17 : vector<128x32xf32>
      %c0_16 = arith.constant 0 : index
      %c0_17 = arith.constant 0 : index
      %19 = vector.load %arg7[%c0_16, %c0_17] : memref<128x32xf32, #tpu.memory_space<vmem>>, vector<128x32xf32>
      tpu.vector_store %arg7[%c0_16, %c0_17], %18 {strides = array<i32>} : memref<128x32xf32, #tpu.memory_space<vmem>>, vector<128x32xf32>,
    } else {
    }
    return
  }
  func.func @transform_0(%arg0: i32, %arg1: i32, %arg2: i32) -> (i32, i32) {
    %c0_i32 = arith.constant 0 : i32
    return %arg0, %arg2 : i32, i32
  }
  func.func @transform_1(%arg0: i32, %arg1: i32, %arg2: i32) -> (i32, i32) {
    %c0_i32 = arith.constant 0 : i32
    return %arg2, %arg1 : i32, i32
  }
  func.func @transform_2(%arg0: i32, %arg1: i32, %arg2: i32) -> (i32, i32) {
    %c0_i32 = arith.constant 0 : i32
    %c0_i32_0 = arith.constant 0 : i32
    return %c0_i32, %arg1 : i32, i32
  }
  func.func @transform_3(%arg0: i32, %arg1: i32, %arg2: i32) -> (i32, i32) {
    %c0_i32 = arith.constant 0 : i32
    %c0_i32_0 = arith.constant 0 : i32
    return %c0_i32, %arg1 : i32, i32
  }
  func.func @transform_4(%arg0: i32, %arg1: i32, %arg2: i32) -> (i32, i32) {
    %c0_i32 = arith.constant 0 : i32
    return %arg0, %arg1 : i32, i32
  }
}

module attributes {stable_mosaic.version = 11 : i64} {
  func.func @_linear_act_kernel(%arg0: i32, %arg1: i32, %arg2: i32, %arg3: memref<128x32xf32, #tpu.memory_space<vmem>>, %arg4: memref<32x16xbf16, #tpu.memory_space<vmem>>, %arg5: memref<1x16xf32, #tpu.memory_space<vmem>>, %arg6: memref<1x16xf32, #tpu.memory_space<vmem>>, %arg7: memref<128x16xf32, #tpu.memory_space<vmem>>, %arg8: memref<128x16xf32, #tpu.memory_space<vmem>>) attributes {dimension_semantics = [#tpu.dimension_semantics<parallel>, #tpu.dimension_semantics<parallel>, #tpu.dimension_semantics<arbitrary>], iteration_bounds = array<i64: 1, 1, 1>, scalar_prefetch = 0 : i64, scratch_operands = 1 : i64, tpu.core_type = #tpu.core_type<tc>, window_params = [{transform_indices = @transform_0, window_bounds = array<i64: 128, 32>}, {transform_indices = @transform_1, window_bounds = array<i64: 32, 16>}, {transform_indices = @transform_2, window_bounds = array<i64: 1, 16>}, {transform_indices = @transform_3, window_bounds = array<i64: 1, 16>}, {transform_indices = @transform_4, window_bounds = array<i64: 128, 16>}]} {
    %c0_i32 = arith.constant 0 : i32
    %0 = arith.cmpi eq, %arg2, %c0_i32 : i32
    %1 = arith.extui %0 : i1 to i32
    %c0_i32_0 = arith.constant 0 : i32
    %2 = arith.cmpi ne, %1, %c0_i32_0 : i32
    scf.if %2 {
      %cst_10 = arith.constant 0.000000e+00 : f32
      %13 = vector.broadcast %cst_10 : f32 to vector<128x16xf32>
      %c0_11 = arith.constant 0 : index
      %c0_12 = arith.constant 0 : index
      %14 = vector.load %arg8[%c0_11, %c0_12] : memref<128x16xf32, #tpu.memory_space<vmem>>, vector<128x16xf32>
      tpu.vector_store %arg8[%c0_11, %c0_12], %13 {strides = array<i32>} : memref<128x16xf32, #tpu.memory_space<vmem>>, vector<128x16xf32>,
    } else {
    }
    %c0 = arith.constant 0 : index
    %c0_1 = arith.constant 0 : index
    %3 = vector.load %arg3[%c0, %c0_1] : memref<128x32xf32, #tpu.memory_space<vmem>>, vector<128x32xf32>
    %4 = arith.truncf %3 : vector<128x32xf32> to vector<128x32xbf16>
    %c0_2 = arith.constant 0 : index
    %c0_3 = arith.constant 0 : index
    %5 = vector.load %arg8[%c0_2, %c0_3] : memref<128x16xf32, #tpu.memory_space<vmem>>, vector<128x16xf32>
    %c0_4 = arith.constant 0 : index
    %c0_5 = arith.constant 0 : index
    %6 = vector.load %arg4[%c0_4, %c0_5] : memref<32x16xbf16, #tpu.memory_space<vmem>>, vector<32x16xbf16>
    %cst = arith.constant dense<0.000000e+00> : vector<128x16xf32>
    %7 = tpu.matmul %4, %6, %cst {dimension_numbers = #tpu.dot_dimension_numbers<[1], [0], [0], [1], [0, 0, 1, 1], [], []>} : vector<128x32xbf16>, vector<32x16xbf16>, vector<128x16xf32> -> vector<128x16xf32>
    %8 = arith.addf %5, %7 : vector<128x16xf32>
    %c0_6 = arith.constant 0 : index
    %c0_7 = arith.constant 0 : index
    %9 = vector.load %arg8[%c0_6, %c0_7] : memref<128x16xf32, #tpu.memory_space<vmem>>, vector<128x16xf32>
    tpu.vector_store %arg8[%c0_6, %c0_7], %8 {strides = array<i32>} : memref<128x16xf32, #tpu.memory_space<vmem>>, vector<128x16xf32>,
    %c0_i32_8 = arith.constant 0 : i32
    %10 = arith.cmpi eq, %arg2, %c0_i32_8 : i32
    %11 = arith.extui %10 : i1 to i32
    %c0_i32_9 = arith.constant 0 : i32
    %12 = arith.cmpi ne, %11, %c0_i32_9 : i32
    scf.if %12 {
      %c0_10 = arith.constant 0 : index
      %c0_11 = arith.constant 0 : index
      %13 = vector.load %arg8[%c0_10, %c0_11] : memref<128x16xf32, #tpu.memory_space<vmem>>, vector<128x16xf32>
      %c0_12 = arith.constant 0 : index
      %c0_13 = arith.constant 0 : index
      %14 = vector.load %arg5[%c0_12, %c0_13] : memref<1x16xf32, #tpu.memory_space<vmem>>, vector<1x16xf32>
      %15 = vector.broadcast %14 : vector<1x16xf32> to vector<128x16xf32>
      %16 = arith.mulf %13, %15 : vector<128x16xf32>
      %c0_14 = arith.constant 0 : index
      %c0_15 = arith.constant 0 : index
      %17 = vector.load %arg6[%c0_14, %c0_15] : memref<1x16xf32, #tpu.memory_space<vmem>>, vector<1x16xf32>
      %18 = vector.broadcast %17 : vector<1x16xf32> to vector<128x16xf32>
      %19 = arith.addf %16, %18 : vector<128x16xf32>
      %c0_16 = arith.constant 0 : index
      %c0_17 = arith.constant 0 : index
      %20 = vector.load %arg7[%c0_16, %c0_17] : memref<128x16xf32, #tpu.memory_space<vmem>>, vector<128x16xf32>
      tpu.vector_store %arg7[%c0_16, %c0_17], %19 {strides = array<i32>} : memref<128x16xf32, #tpu.memory_space<vmem>>, vector<128x16xf32>,
    } else {
    }
    return
  }
  func.func @transform_0(%arg0: i32, %arg1: i32, %arg2: i32) -> (i32, i32) {
    %c0_i32 = arith.constant 0 : i32
    return %arg0, %arg2 : i32, i32
  }
  func.func @transform_1(%arg0: i32, %arg1: i32, %arg2: i32) -> (i32, i32) {
    %c0_i32 = arith.constant 0 : i32
    return %arg2, %arg1 : i32, i32
  }
  func.func @transform_2(%arg0: i32, %arg1: i32, %arg2: i32) -> (i32, i32) {
    %c0_i32 = arith.constant 0 : i32
    %c0_i32_0 = arith.constant 0 : i32
    return %c0_i32, %arg1 : i32, i32
  }
  func.func @transform_3(%arg0: i32, %arg1: i32, %arg2: i32) -> (i32, i32) {
    %c0_i32 = arith.constant 0 : i32
    %c0_i32_0 = arith.constant 0 : i32
    return %c0_i32, %arg1 : i32, i32
  }
  func.func @transform_4(%arg0: i32, %arg1: i32, %arg2: i32) -> (i32, i32) {
    %c0_i32 = arith.constant 0 : i32
    return %arg0, %arg1 : i32, i32
  }
}

</mosaic_0001>

<bundles_post_ra>
// kernel: wave_block_forward.15
= control target key start
LH: loop header
LB: loop body
LE: loop exit
PB: predicated region body
PF: predicated region fallthrough
CT: control target
= control target key end

     0   :  { %vm67_vm0 = vcmask 261120   ;;  %vm403_vm1 = vcmask 257024   ;;  %s982_s0 = inlined_call_operand.vmem [shape: f32[128,32], index: 0, kind: input, shape index: {}]   ;;  %s983_s1 = inlined_call_operand.vmem [shape: f32[128,32], index: 1, kind: input, shape index: {}]   ;;  %s984_s4 = inlined_call_operand.vmem [shape: f32[128,32], index: 4, kind: output, shape index: {0}]   ;;  %s985_s2 = inlined_call_operand.vmem [shape: f32[1,32], index: 2, kind: input, shape index: {}]   ;;  %s986_s3 = inlined_call_operand.vmem [shape: f32[1,32], index: 3, kind: input, shape index: {}]   ;;  %s987_s5 = inlined_call_operand.vmem [shape: bf16[128,32], index: 5, kind: output, shape index: {1}]  }
   0x1   :  { %v19_v0 = vld [vmem:[%s982_s0] sm:$0xff]  ;;  %v21_v2 = vld [vmem:[%s982_s0 + $0x10] sm:$0xff]  ;;  %v20_v5 = vld [vmem:[%s982_s0 + $0x8] sm:$0xff] }
   0x2   :  { %v35_v1 = vld [vmem:[%s983_s1] sm:$0xff]  ;;  %v37_v4 = vld [vmem:[%s983_s1 + $0x10] sm:$0xff]  ;;  %v36_v6 = vld [vmem:[%s983_s1 + $0x8] sm:$0xff] }
   0x3   :  { %v533_v3 = vadd.f32 %v35_v1, %v19_v0  ;;  %v544_v7 = vadd.f32 %v37_v4, %v21_v2  ;;  %v546_v8 = vadd.f32 %v36_v6, %v20_v5  ;;  %v22_v9 = vld [vmem:[%s982_s0 + $0x18] sm:$0xff]  ;;  %v23_v11 = vld [vmem:[%s982_s0 + $0x20] sm:$0xff]  ;;  %v24_v15 = vld [vmem:[%s982_s0 + $0x28] sm:$0xff] }
   0x4   :  { %v38_v10 = vld [vmem:[%s983_s1 + $0x18] sm:$0xff]  ;;  %v39_v14 = vld [vmem:[%s983_s1 + $0x20] sm:$0xff]  ;;  %v40_v16 = vld [vmem:[%s983_s1 + $0x28] sm:$0xff] }
   0x5   :  { %v84_v12 = vsel %vm67_vm0, %v533_v3, 0.0  ;;  %68 = vst.msk [vmem:[%s984_s4] sm:$0xff] %vm67_vm0, %v533_v3  ;;  %v564_v13 = vadd.f32 %v38_v10, %v22_v9  ;;  %v90_v17 = vsel %vm67_vm0, %v544_v7, 0.0  ;;  %70 = vst.msk [vmem:[%s984_s4 + $0x10] sm:$0xff] %vm67_vm0, %v544_v7  ;;  %v587_v18 = vadd.f32 %v39_v14, %v23_v11  ;;  %v25_v20 = vld [vmem:[%s982_s0 + $0x30] sm:$0xff]  ;;  %v26_v22 = vld [vmem:[%s982_s0 + $0x38] sm:$0xff] }
   0x6   :  { %85 = vadd.xlane.f32.xlu0 %v84_v12  ;;  %69 = vst.msk [vmem:[%s984_s4 + $0x8] sm:$0xff] %vm67_vm0, %v546_v8  ;;  %v589_v19 = vadd.f32 %v40_v16, %v24_v15  ;;  %v41_v21 = vld [vmem:[%s983_s1 + $0x30] sm:$0xff]  ;;  %91 = vadd.xlane.f32.xlu1 %v90_v17  ;;  %v87_v23 = vsel %vm67_vm0, %v546_v8, 0.0  ;;  %v42_v25 = vld [vmem:[%s983_s1 + $0x38] sm:$0xff]  ;;  %v27_v26 = vld [vmem:[%s982_s0 + $0x40] sm:$0xff] }
   0x7   :  { %71 = vst.msk [vmem:[%s984_s4 + $0x18] sm:$0xff] %vm67_vm0, %v564_v13  ;;  %v607_v24 = vadd.f32 %v41_v21, %v25_v20  ;;  %v43_v27 = vld [vmem:[%s983_s1 + $0x40] sm:$0xff]  ;;  %v93_v28 = vsel %vm67_vm0, %v564_v13, 0.0  ;;  %72 = vst.msk [vmem:[%s984_s4 + $0x20] sm:$0xff] %vm67_vm0, %v587_v18  ;;  %v630_v29 = vadd.f32 %v42_v25, %v26_v22  ;;  %v28_v31 = vld [vmem:[%s982_s0 + $0x48] sm:$0xff]  ;;  %v96_v43 = vsel %vm67_vm0, %v587_v18, 0.0 }
   0x8   :  { %73 = vst.msk [vmem:[%s984_s4 + $0x28] sm:$0xff] %vm67_vm0, %v589_v19  ;;  %v632_v30 = vadd.f32 %v43_v27, %v27_v26  ;;  %v44_v32 = vld [vmem:[%s983_s1 + $0x48] sm:$0xff]  ;;  %v29_v33 = vld [vmem:[%s982_s0 + $0x50] sm:$0xff]  ;;  %v30_v36 = vld [vmem:[%s982_s0 + $0x58] sm:$0xff]  ;;  %v99_v48 = vsel %vm67_vm0, %v589_v19, 0.0 }
   0x9   :  { %74 = vst.msk [vmem:[%s984_s4 + $0x30] sm:$0xff] %vm67_vm0, %v607_v24  ;;  %v648_v34 = vadd.f32 %v44_v32, %v28_v31  ;;  %v45_v35 = vld [vmem:[%s983_s1 + $0x50] sm:$0xff]  ;;  %v46_v37 = vld [vmem:[%s983_s1 + $0x58] sm:$0xff]  ;;  %75 = vst.msk [vmem:[%s984_s4 + $0x38] sm:$0xff] %vm67_vm0, %v630_v29  ;;  %v102_v54 = vsel %vm67_vm0, %v607_v24, 0.0  ;;  %v105_v55 = vsel %vm67_vm0, %v630_v29, 0.0 }
   0xa   :  { %88 = vadd.xlane.f32.xlu0 %v87_v23  ;;  %76 = vst.msk [vmem:[%s984_s4 + $0x40] sm:$0xff] %vm67_vm0, %v632_v30  ;;  %v669_v38 = vadd.f32 %v45_v35, %v29_v33  ;;  %v671_v39 = vadd.f32 %v46_v37, %v30_v36  ;;  %v31_v40 = vld [vmem:[%s982_s0 + $0x60] sm:$0xff]  ;;  %v32_v42 = vld [vmem:[%s982_s0 + $0x68] sm:$0xff]  ;;  %94 = vadd.xlane.f32.xlu1 %v93_v28  ;;  %v33_v46 = vld [vmem:[%s982_s0 + $0x70] sm:$0xff]  ;;  %v108_v56 = vsel %vm67_vm0, %v632_v30, 0.0 }
   0xb   :  { %v47_v41 = vld [vmem:[%s983_s1 + $0x60] sm:$0xff]  ;;  %77 = vst.msk [vmem:[%s984_s4 + $0x48] sm:$0xff] %vm67_vm0, %v648_v34  ;;  %v48_v45 = vld [vmem:[%s983_s1 + $0x68] sm:$0xff]  ;;  %v49_v47 = vld [vmem:[%s983_s1 + $0x70] sm:$0xff]  ;;  %v111_v57 = vsel %vm67_vm0, %v648_v34, 0.0 }
   0xc   :  { %v689_v44 = vadd.f32 %v47_v41, %v31_v40  ;;  %78 = vst.msk [vmem:[%s984_s4 + $0x50] sm:$0xff] %vm67_vm0, %v669_v38  ;;  %79 = vst.msk [vmem:[%s984_s4 + $0x58] sm:$0xff] %vm67_vm0, %v671_v39  ;;  %v712_v49 = vadd.f32 %v48_v45, %v32_v42  ;;  %v714_v50 = vadd.f32 %v49_v47, %v33_v46  ;;  %v34_v51 = vld [vmem:[%s982_s0 + $0x78] sm:$0xff]  ;;  %v114_v58 = vsel %vm67_vm0, %v669_v38, 0.0 }
   0xd   :  { %v50_v52 = vld [vmem:[%s983_s1 + $0x78] sm:$0xff]  ;;  %v117_v59 = vsel %vm67_vm0, %v671_v39, 0.0 }
   0xe   :  { %80 = vst.msk [vmem:[%s984_s4 + $0x60] sm:$0xff] %vm67_vm0, %v689_v44  ;;  %v727_v53 = vadd.f32 %v50_v52, %v34_v51  ;;  %97 = vadd.xlane.f32.xlu0 %v96_v43  ;;  %81 = vst.msk [vmem:[%s984_s4 + $0x68] sm:$0xff] %vm67_vm0, %v712_v49  ;;  %100 = vadd.xlane.f32.xlu1 %v99_v48  ;;  %v120_v60 = vsel %vm67_vm0, %v689_v44, 0.0  ;;  %v123_v61 = vsel %vm67_vm0, %v712_v49, 0.0  ;;  %v126_v62 = vsel %vm67_vm0, %v714_v50, 0.0 }
   0xf   :  { %82 = vst.msk [vmem:[%s984_s4 + $0x70] sm:$0xff] %vm67_vm0, %v714_v50 }
  0x10   :  { %83 = vst.msk [vmem:[%s984_s4 + $0x78] sm:$0xff] %vm67_vm0, %v727_v53  ;;  %v129_v63 = vsel %vm67_vm0, %v727_v53, 0.0 }
  0x12   :  { %103 = vadd.xlane.f32.xlu0 %v102_v54  ;;  %106 = vadd.xlane.f32.xlu1 %v105_v55 }
  0x16   :  { %109 = vadd.xlane.f32.xlu0 %v108_v56  ;;  %112 = vadd.xlane.f32.xlu1 %v111_v57 }
  0x1a   :  { %115 = vadd.xlane.f32.xlu0 %v114_v58  ;;  %118 = vadd.xlane.f32.xlu1 %v117_v59 }
  0x1e   :  { %121 = vadd.xlane.f32.xlu0 %v120_v60  ;;  %124 = vadd.xlane.f32.xlu1 %v123_v61 }
  0x22   :  { %127 = vadd.xlane.f32.xlu0 %v126_v62  ;;  %130 = vadd.xlane.f32.xlu1 %v129_v63 }
  0x93   :  { %v86_v0 = vpop.xlane.xlu0 %85  ;;  %v92_v2 = vpop.xlane.xlu1 %91 }
  0x94   :  { %v133_v1 = vmul.f32 0.03125, %v86_v0  ;;  %v135_v4 = vmul.f32 0.03125, %v92_v2 }
  0x96   :  { %v765_v5 = vsub.f32 %v533_v3, %v133_v1  ;;  %v768_v6 = vsub.f32 %v544_v7, %v135_v4 }
  0x97   :  { %v89_v9 = vpop.xlane.xlu0 %88  ;;  %v95_v11 = vpop.xlane.xlu1 %94 }
  0x98   :  { %v134_v10 = vmul.f32 0.03125, %v89_v9  ;;  %v165_v12 = vmul.f32 %v765_v5, %v765_v5  ;;  %v136_v14 = vmul.f32 0.03125, %v95_v11  ;;  %v167_v15 = vmul.f32 %v768_v6, %v768_v6 }
  0x9a   :  { %v775_v16 = vsub.f32 %v546_v8, %v134_v10  ;;  %v181_v17 = vsel %vm67_vm0, %v165_v12, 0.0  ;;  %v779_v3 = vsub.f32 %v564_v13, %v136_v14  ;;  %v187_v22 = vsel %vm67_vm0, %v167_v15, 0.0 }
  0x9b   :  { %182 = vadd.xlane.f32.xlu0 %v181_v17  ;;  %v98_v7 = vpop.xlane.xlu0 %97  ;;  %v101_v21 = vpop.xlane.xlu1 %100 }
  0x9c   :  { %v137_v20 = vmul.f32 0.03125, %v98_v7  ;;  %v166_v23 = vmul.f32 %v775_v16, %v775_v16  ;;  %v138_v25 = vmul.f32 0.03125, %v101_v21  ;;  %v168_v26 = vmul.f32 %v779_v3, %v779_v3 }
  0x9e   :  { %v787_v8 = vsub.f32 %v587_v18, %v137_v20  ;;  %v184_v27 = vsel %vm67_vm0, %v166_v23, 0.0  ;;  %v791_v13 = vsub.f32 %v589_v19, %v138_v25  ;;  %v190_v33 = vsel %vm67_vm0, %v168_v26, 0.0 }
  0x9f   :  { %188 = vadd.xlane.f32.xlu0 %v187_v22  ;;  %185 = vadd.xlane.f32.xlu1 %v184_v27  ;;  %v104_v28 = vpop.xlane.xlu0 %103  ;;  %v107_v32 = vpop.xlane.xlu1 %106 }
  0xa0   :  { %v139_v31 = vmul.f32 0.03125, %v104_v28  ;;  %v169_v35 = vmul.f32 %v787_v8, %v787_v8  ;;  %v140_v36 = vmul.f32 0.03125, %v107_v32  ;;  %v170_v18 = vmul.f32 %v791_v13, %v791_v13 }
  0xa2   :  { %v799_v37 = vsub.f32 %v607_v24, %v139_v31  ;;  %v193_v19 = vsel %vm67_vm0, %v169_v35, 0.0  ;;  %v803_v40 = vsub.f32 %v630_v29, %v140_v36  ;;  %v196_v45 = vsel %vm67_vm0, %v170_v18, 0.0 }
  0xa3   :  { %191 = vadd.xlane.f32.xlu1 %v190_v33  ;;  %194 = vadd.xlane.f32.xlu0 %v193_v19  ;;  %v110_v41 = vpop.xlane.xlu0 %109  ;;  %v113_v43 = vpop.xlane.xlu1 %112 }
  0xa4   :  { %v141_v42 = vmul.f32 0.03125, %v110_v41  ;;  %v171_v46 = vmul.f32 %v799_v37, %v799_v37  ;;  %v142_v47 = vmul.f32 0.03125, %v113_v43  ;;  %v172_v24 = vmul.f32 %v803_v40, %v803_v40 }
  0xa6   :  { %v811_v48 = vsub.f32 %v632_v30, %v141_v42  ;;  %v199_v29 = vsel %vm67_vm0, %v171_v46, 0.0  ;;  %v815_v51 = vsub.f32 %v648_v34, %v142_v47  ;;  %v202_v56 = vsel %vm67_vm0, %v172_v24, 0.0 }
  0xa7   :  { %197 = vadd.xlane.f32.xlu1 %v196_v45  ;;  %200 = vadd.xlane.f32.xlu0 %v199_v29  ;;  %v116_v52 = vpop.xlane.xlu0 %115  ;;  %v119_v55 = vpop.xlane.xlu1 %118 }
  0xa8   :  { %v143_v54 = vmul.f32 0.03125, %v116_v52  ;;  %v173_v57 = vmul.f32 %v811_v48, %v811_v48  ;;  %v144_v58 = vmul.f32 0.03125, %v119_v55  ;;  %v174_v30 = vmul.f32 %v815_v51, %v815_v51 }
  0xaa   :  { %v823_v59 = vsub.f32 %v669_v38, %v143_v54  ;;  %v205_v34 = vsel %vm67_vm0, %v173_v57, 0.0  ;;  %v827_v60 = vsub.f32 %v671_v39, %v144_v58  ;;  %v208_v0 = vsel %vm67_vm0, %v174_v30, 0.0  ;;  %v863_v54 = vld [vmem:[%s985_s2] ss:$0 sm:$0xff] }
  0xab   :  { %203 = vadd.xlane.f32.xlu1 %v202_v56  ;;  %206 = vadd.xlane.f32.xlu0 %v205_v34  ;;  %v122_v61 = vpop.xlane.xlu0 %121  ;;  %v125_v63 = vpop.xlane.xlu1 %124  ;;  %v869_v34 = vld [vmem:[%s986_s3] ss:$0 sm:$0xff] }
  0xac   :  { %v145_v62 = vmul.f32 0.03125, %v122_v61  ;;  %v175_v1 = vmul.f32 %v823_v59, %v823_v59  ;;  %v146_v2 = vmul.f32 0.03125, %v125_v63  ;;  %v176_v38 = vmul.f32 %v827_v60, %v827_v60 }
  0xae   :  { %v835_v4 = vsub.f32 %v689_v44, %v145_v62  ;;  %v211_v39 = vsel %vm67_vm0, %v175_v1, 0.0  ;;  %v839_v9 = vsub.f32 %v712_v49, %v146_v2  ;;  %v214_v14 = vsel %vm67_vm0, %v176_v38, 0.0 }
  0xaf   :  { %209 = vadd.xlane.f32.xlu1 %v208_v0  ;;  %212 = vadd.xlane.f32.xlu0 %v211_v39  ;;  %v128_v10 = vpop.xlane.xlu0 %127  ;;  %v131_v12 = vpop.xlane.xlu1 %130 }
  0xb0   :  { %v147_v11 = vmul.f32 0.03125, %v128_v10  ;;  %v177_v15 = vmul.f32 %v835_v4, %v835_v4  ;;  %v148_v17 = vmul.f32 0.03125, %v131_v12  ;;  %v178_v44 = vmul.f32 %v839_v9, %v839_v9 }
  0xb2   :  { %v847_v7 = vsub.f32 %v714_v50, %v147_v11  ;;  %v217_v49 = vsel %vm67_vm0, %v177_v15, 0.0  ;;  %v851_v20 = vsub.f32 %v727_v53, %v148_v17  ;;  %v220_v21 = vsel %vm67_vm0, %v178_v44, 0.0 }
  0xb3   :  { %215 = vadd.xlane.f32.xlu1 %v214_v14  ;;  %218 = vadd.xlane.f32.xlu0 %v217_v49 }
  0xb4   :  { %v179_v22 = vmul.f32 %v847_v7, %v847_v7  ;;  %v180_v23 = vmul.f32 %v851_v20, %v851_v20 }
  0xb6   :  { %v223_v25 = vsel %vm67_vm0, %v179_v22, 0.0  ;;  %v226_v50 = vsel %vm67_vm0, %v180_v23, 0.0 }
  0xb7   :  { %221 = vadd.xlane.f32.xlu1 %v220_v21  ;;  %224 = vadd.xlane.f32.xlu0 %v223_v25 }
  0xbb   :  { %227 = vadd.xlane.f32.xlu1 %v226_v50 }
 0x128   :  { %v183_v26 = vpop.xlane.xlu0 %182 }
 0x129   :  { %v229_v53 = vmul.f32 0.03125, %v183_v26 }
 0x12b   :  { %v245_v27 = vadd.f32 1e-05, %v229_v53 }
 0x12c   :  { %v186_v28 = vpop.xlane.xlu1 %185  ;;  %v189_v31 = vpop.xlane.xlu0 %188 }
 0x12d   :  { %462 = vrsqrt.f32 %v245_v27  ;;  %v230_v32 = vmul.f32 0.03125, %v186_v28  ;;  %v231_v33 = vmul.f32 0.03125, %v189_v31 }
 0x12f   :  { %v246_v35 = vadd.f32 1e-05, %v230_v32  ;;  %v247_v36 = vadd.f32 1e-05, %v231_v33 }
 0x130   :  { %v192_v18 = vpop.xlane.xlu1 %191  ;;  %v195_v19 = vpop.xlane.xlu0 %194 }
 0x131   :  { %464 = vrsqrt.f32 %v246_v35  ;;  %v232_v41 = vmul.f32 0.03125, %v192_v18  ;;  %v233_v42 = vmul.f32 0.03125, %v195_v19 }
 0x132   :  { %466 = vrsqrt.f32 %v247_v36 }
 0x133   :  { %v248_v43 = vadd.f32 1e-05, %v232_v41  ;;  %v249_v45 = vadd.f32 1e-05, %v233_v42 }
 0x134   :  { %v198_v46 = vpop.xlane.xlu1 %197  ;;  %v201_v47 = vpop.xlane.xlu0 %200 }
 0x135   :  { %468 = vrsqrt.f32 %v248_v43  ;;  %v234_v24 = vmul.f32 0.03125, %v198_v46  ;;  %v235_v29 = vmul.f32 0.03125, %v201_v47 }
 0x136   :  { %470 = vrsqrt.f32 %v249_v45 }
 0x137   :  { %v463_v52 = vpop.eup %462  ;;  %v250_v55 = vadd.f32 1e-05, %v234_v24  ;;  %v251_v56 = vadd.f32 1e-05, %v235_v29 }
 0x138   :  { %v277_v57 = vmul.f32 %v463_v52, %v765_v5  ;;  %v204_v58 = vpop.xlane.xlu1 %203  ;;  %v207_v30 = vpop.xlane.xlu0 %206 }
 0x139   :  { %472 = vrsqrt.f32 %v250_v55  ;;  %v236_v61 = vmul.f32 0.03125, %v204_v58  ;;  %v237_v62 = vmul.f32 0.03125, %v207_v30 }
 0x13a   :  { %v300_v63 = vmul.f32 %v863_v54, %v277_v57  ;;  %474 = vrsqrt.f32 %v251_v56 }
 0x13b   :  { %v465_v0 = vpop.eup %464  ;;  %v252_v1 = vadd.f32 1e-05, %v236_v61  ;;  %v253_v2 = vadd.f32 1e-05, %v237_v62 }
 0x13c   :  { %v467_v38 = vpop.eup %466  ;;  %v323_v5 = vadd.f32 %v869_v34, %v300_v63  ;;  %v278_v39 = vmul.f32 %v465_v0, %v775_v16  ;;  %v210_v10 = vpop.xlane.xlu1 %209 }
 0x13d   :  { %v213_v11 = vpop.xlane.xlu0 %212  ;;  %v279_v12 = vmul.f32 %v467_v38, %v768_v6  ;;  %476 = vrsqrt.f32 %v252_v1  ;;  %v238_v14 = vmul.f32 0.03125, %v210_v10 }
 0x13e   :  { %v239_v15 = vmul.f32 0.03125, %v213_v11  ;;  %v446_v17 = vpack.c.bf16 %v323_v5, %v323_v5  ;;  %v301_v44 = vmul.f32 %v863_v54, %v278_v39  ;;  %478 = vrsqrt.f32 %v253_v2 }
 0x13f   :  { %v469_v49 = vpop.eup %468  ;;  %v302_v21 = vmul.f32 %v863_v54, %v279_v12  ;;  %v254_v22 = vadd.f32 1e-05, %v238_v14 }
 0x140   :  { %v255_v23 = vadd.f32 1e-05, %v239_v15  ;;  %v471_v25 = vpop.eup %470  ;;  %404 = vst.msk [vmem:[%s987_s5] sm:$0xf] %vm403_vm1, %v446_v17  ;;  %v324_v6 = vadd.f32 %v869_v34, %v301_v44  ;;  %v280_v16 = vmul.f32 %v469_v49, %v779_v3  ;;  %v216_v50 = vpop.xlane.xlu1 %215 }
 0x141   :  { %v219_v26 = vpop.xlane.xlu0 %218  ;;  %v325_v53 = vadd.f32 %v869_v34, %v302_v21  ;;  %v281_v27 = vmul.f32 %v471_v25, %v787_v8  ;;  %480 = vrsqrt.f32 %v254_v22  ;;  %v240_v28 = vmul.f32 0.03125, %v216_v50 }
 0x142   :  { %v447_v31 = vpack.c.bf16 %v324_v6, %v324_v6  ;;  %v303_v32 = vmul.f32 %v863_v54, %v280_v16  ;;  %482 = vrsqrt.f32 %v255_v23  ;;  %v241_v33 = vmul.f32 0.03125, %v219_v26 }
 0x143   :  { %v473_v35 = vpop.eup %472  ;;  %v448_v36 = vpack.c.bf16 %v325_v53, %v325_v53  ;;  %v304_v18 = vmul.f32 %v863_v54, %v281_v27  ;;  %v256_v19 = vadd.f32 1e-05, %v240_v28 }
 0x144   :  { %v475_v41 = vpop.eup %474  ;;  %405 = vst.msk [vmem:[%s987_s5 + $0x4] sm:$0xf] %vm403_vm1, %v447_v31  ;;  %v326_v3 = vadd.f32 %v869_v34, %v303_v32  ;;  %v282_v8 = vmul.f32 %v473_v35, %v791_v13  ;;  %v257_v42 = vadd.f32 1e-05, %v241_v33  ;;  %v222_v43 = vpop.xlane.xlu1 %221 }
 0x145   :  { %v225_v45 = vpop.xlane.xlu0 %224  ;;  %406 = vst.msk [vmem:[%s987_s5 + $0x8] sm:$0xf] %vm403_vm1, %v448_v36  ;;  %v327_v46 = vadd.f32 %v869_v34, %v304_v18  ;;  %v283_v47 = vmul.f32 %v475_v41, %v799_v37  ;;  %484 = vrsqrt.f32 %v256_v19  ;;  %v242_v24 = vmul.f32 0.03125, %v222_v43 }
 0x146   :  { %v449_v29 = vpack.c.bf16 %v326_v3, %v326_v3  ;;  %v305_v52 = vmul.f32 %v863_v54, %v282_v8  ;;  %486 = vrsqrt.f32 %v257_v42  ;;  %v243_v55 = vmul.f32 0.03125, %v225_v45 }
 0x147   :  { %v477_v13 = vpop.eup %476  ;;  %v450_v56 = vpack.c.bf16 %v327_v46, %v327_v46  ;;  %v306_v57 = vmul.f32 %v863_v54, %v283_v47  ;;  %v258_v58 = vadd.f32 1e-05, %v242_v24 }
 0x148   :  { %v479_v30 = vpop.eup %478  ;;  %407 = vst.msk [vmem:[%s987_s5 + $0xc] sm:$0xf] %vm403_vm1, %v449_v29  ;;  %v328_v37 = vadd.f32 %v869_v34, %v305_v52  ;;  %v284_v61 = vmul.f32 %v477_v13, %v803_v40  ;;  %v259_v62 = vadd.f32 1e-05, %v243_v55  ;;  %v228_v63 = vpop.xlane.xlu1 %227 }
 0x149   :  { %408 = vst.msk [vmem:[%s987_s5 + $0x10] sm:$0xf] %vm403_vm1, %v450_v56  ;;  %v329_v0 = vadd.f32 %v869_v34, %v306_v57  ;;  %v285_v1 = vmul.f32 %v479_v30, %v811_v48  ;;  %488 = vrsqrt.f32 %v258_v58  ;;  %v244_v2 = vmul.f32 0.03125, %v228_v63 }
 0x14a   :  { %v451_v38 = vpack.c.bf16 %v328_v37, %v328_v37  ;;  %v307_v5 = vmul.f32 %v863_v54, %v284_v61  ;;  %490 = vrsqrt.f32 %v259_v62 }
 0x14b   :  { %v481_v39 = vpop.eup %480  ;;  %v452_v10 = vpack.c.bf16 %v329_v0, %v329_v0  ;;  %v308_v40 = vmul.f32 %v863_v54, %v285_v1  ;;  %v260_v11 = vadd.f32 1e-05, %v244_v2 }
 0x14c   :  { %v483_v12 = vpop.eup %482  ;;  %409 = vst.msk [vmem:[%s987_s5 + $0x14] sm:$0xf] %vm403_vm1, %v451_v38  ;;  %v330_v14 = vadd.f32 %v869_v34, %v307_v5  ;;  %v286_v48 = vmul.f32 %v481_v39, %v815_v51 }
 0x14d   :  { %410 = vst.msk [vmem:[%s987_s5 + $0x18] sm:$0xf] %vm403_vm1, %v452_v10  ;;  %v331_v15 = vadd.f32 %v869_v34, %v308_v40  ;;  %v287_v17 = vmul.f32 %v483_v12, %v823_v59  ;;  %492 = vrsqrt.f32 %v260_v11 }
 0x14e   :  { %v453_v44 = vpack.c.bf16 %v330_v14, %v330_v14  ;;  %v309_v49 = vmul.f32 %v863_v54, %v286_v48 }
 0x14f   :  { %v485_v21 = vpop.eup %484  ;;  %v454_v22 = vpack.c.bf16 %v331_v15, %v331_v15  ;;  %v310_v23 = vmul.f32 %v863_v54, %v287_v17 }
 0x150   :  { %v487_v25 = vpop.eup %486  ;;  %411 = vst.msk [vmem:[%s987_s5 + $0x1c] sm:$0xf] %vm403_vm1, %v453_v44  ;;  %v332_v51 = vadd.f32 %v869_v34, %v309_v49  ;;  %v288_v6 = vmul.f32 %v485_v21, %v827_v60 }
 0x151   :  { %412 = vst.msk [vmem:[%s987_s5 + $0x20] sm:$0xf] %vm403_vm1, %v454_v22  ;;  %v333_v59 = vadd.f32 %v869_v34, %v310_v23  ;;  %v289_v16 = vmul.f32 %v487_v25, %v835_v4 }
 0x152   :  { %v455_v50 = vpack.c.bf16 %v332_v51, %v332_v51  ;;  %v311_v26 = vmul.f32 %v863_v54, %v288_v6 }
 0x153   :  { %v489_v53 = vpop.eup %488  ;;  %v456_v27 = vpack.c.bf16 %v333_v59, %v333_v59  ;;  %v312_v28 = vmul.f32 %v863_v54, %v289_v16 }
 0x154   :  { %v491_v31 = vpop.eup %490  ;;  %413 = vst.msk [vmem:[%s987_s5 + $0x24] sm:$0xf] %vm403_vm1, %v455_v50  ;;  %v334_v60 = vadd.f32 %v869_v34, %v311_v26  ;;  %v290_v32 = vmul.f32 %v489_v53, %v839_v9 }
 0x155   :  { %414 = vst.msk [vmem:[%s987_s5 + $0x28] sm:$0xf] %vm403_vm1, %v456_v27  ;;  %v335_v4 = vadd.f32 %v869_v34, %v312_v28  ;;  %v291_v33 = vmul.f32 %v491_v31, %v847_v7 }
 0x156   :  { %v457_v35 = vpack.c.bf16 %v334_v60, %v334_v60  ;;  %v313_v36 = vmul.f32 %v863_v54, %v290_v32 }
 0x157   :  { %v493_v18 = vpop.eup %492  ;;  %v458_v19 = vpack.c.bf16 %v335_v4, %v335_v4  ;;  %v314_v41 = vmul.f32 %v863_v54, %v291_v33 }
 0x158   :  { %415 = vst.msk [vmem:[%s987_s5 + $0x2c] sm:$0xf] %vm403_vm1, %v457_v35  ;;  %v336_v9 = vadd.f32 %v869_v34, %v313_v36  ;;  %v292_v3 = vmul.f32 %v493_v18, %v851_v20 }
 0x159   :  { %416 = vst.msk [vmem:[%s987_s5 + $0x30] sm:$0xf] %vm403_vm1, %v458_v19  ;;  %v337_v7 = vadd.f32 %v869_v34, %v314_v41 }
 0x15a   :  { %v459_v8 = vpack.c.bf16 %v336_v9, %v336_v9  ;;  %v315_v42 = vmul.f32 %v863_v54, %v292_v3 }
 0x15b   :  { %v460_v43 = vpack.c.bf16 %v337_v7, %v337_v7 }
 0x15c   :  { %417 = vst.msk [vmem:[%s987_s5 + $0x34] sm:$0xf] %vm403_vm1, %v459_v8  ;;  %v338_v45 = vadd.f32 %v869_v34, %v315_v42 }
 0x15d   :  { %418 = vst.msk [vmem:[%s987_s5 + $0x38] sm:$0xf] %vm403_vm1, %v460_v43 }
 0x15e   :  { %v461_v20 = vpack.c.bf16 %v338_v45, %v338_v45 }
 0x160   :  { %419 = vst.msk [vmem:[%s987_s5 + $0x3c] sm:$0xf] %vm403_vm1, %v461_v20 }

// kernel: wave_block_forward.14
= control target key start
LH: loop header
LB: loop body
LE: loop exit
PB: predicated region body
PF: predicated region fallthrough
CT: control target
= control target key end

     0   :  { %vm22_vm0 = vcmask 261120   ;;  %v417_v1 = vmov 0.0   ;;  %vm119_vm1 = vcmask 130048   ;;  %s616_s1 = inlined_call_operand.vmem [shape: bf16[16,32], index: 1, kind: input, shape index: {}]   ;;  %s617_s0 = inlined_call_operand.vmem [shape: bf16[128,16], index: 0, kind: input, shape index: {}]   ;;  %s618_s2 = inlined_call_operand.vmem [shape: f32[1,32], index: 2, kind: input, shape index: {}]   ;;  %s619_s3 = inlined_call_operand.vmem [shape: f32[1,32], index: 3, kind: input, shape index: {}]   ;;  %s620_s4 = inlined_call_operand.vmem [shape: f32[128,32], index: 4, kind: output, shape index: {}]  }
   0x1   :  { %v408_v0 = vld [vmem:[%s616_s1] sm:$0xff]   ;;  %25 = vst.msk [vmem:[#allocation2 + $0x10] sm:$0xff] %vm22_vm0, %v417_v1  ;;  %23 = vst.msk [vmem:[#allocation2] sm:$0xff] %vm22_vm0, %v417_v1  ;;  %v411_v4 = vld [vmem:[%s617_s0 + $0x8] sm:$0xff]  }
   0x2   :  { %24 = vst.msk [vmem:[#allocation2 + $0x8] sm:$0xff] %vm22_vm0, %v417_v1  ;;  %26 = vst.msk [vmem:[#allocation2 + $0x18] sm:$0xff] %vm22_vm0, %v417_v1  ;;  %v409_v2 = vld [vmem:[%s617_s0] sm:$0xff]   ;;  %387 = vmatprep.subr.bf16.mxu0 %v408_v0  ;;  %405 = vmatprep.subr.bf16.mxu1 %v408_v0  ;;  %v412_v5 = vld [vmem:[%s617_s0 + $0x28] sm:$0xff]  }
   0x3   :  { %27 = vst.msk [vmem:[#allocation2 + $0x20] sm:$0xff] %vm22_vm0, %v417_v1  ;;  %28 = vst.msk [vmem:[#allocation2 + $0x28] sm:$0xff] %vm22_vm0, %v417_v1  ;;  %v410_v3 = vld [vmem:[%s617_s0 + $0x20] sm:$0xff]   ;;  %388 = vmatpush3.bf16.msra.mxu0 %v408_v0  ;;  %406 = vmatpush3.bf16.msra.mxu1 %v408_v0  ;;  %v413_v6 = vld [vmem:[%s617_s0 + $0x10] sm:$0xff]  }
   0x4   :  { %29 = vst.msk [vmem:[#allocation2 + $0x30] sm:$0xff] %vm22_vm0, %v417_v1  ;;  %30 = vst.msk [vmem:[#allocation2 + $0x38] sm:$0xff] %vm22_vm0, %v417_v1  ;;  %389 = vmatprep.mubr.msk.bf16.mxu0 %vm119_vm1, %v409_v2  ;;  %397 = vmatprep.mubr.msk.bf16.mxu1 %vm119_vm1, %v410_v3  ;;  %v414_v7 = vld [vmem:[%s617_s0 + $0x30] sm:$0xff]   ;;  %v415_v8 = vld [vmem:[%s617_s0 + $0x18] sm:$0xff]  }
   0x5   :  { %31 = vst.msk [vmem:[#allocation2 + $0x40] sm:$0xff] %vm22_vm0, %v417_v1  ;;  %32 = vst.msk [vmem:[#allocation2 + $0x48] sm:$0xff] %vm22_vm0, %v417_v1  ;;  %v416_v9 = vld [vmem:[%s617_s0 + $0x38] sm:$0xff]   ;;  %v505_v38 = vld [vmem:[%s618_s2] ss:$0 sm:$0xff] }
   0x6   :  { %33 = vst.msk [vmem:[#allocation2 + $0x50] sm:$0xff] %vm22_vm0, %v417_v1  ;;  %34 = vst.msk [vmem:[#allocation2 + $0x58] sm:$0xff] %vm22_vm0, %v417_v1  ;;  %390 = vmatmul.mubr.msk.bf16.vlgmr.msra.gmra.mrb[0].mxu0 %vm119_vm1, %v411_v4  ;;  %398 = vmatmul.mubr.msk.bf16.vlgmr.msra.gmra.mrb[0].mxu1 %vm119_vm1, %v412_v5  ;;  %v510_v50 = vld [vmem:[%s619_s3] ss:$0 sm:$0xff] }
   0x7   :  { %35 = vst.msk [vmem:[#allocation2 + $0x60] sm:$0xff] %vm22_vm0, %v417_v1  ;;  %36 = vst.msk [vmem:[#allocation2 + $0x68] sm:$0xff] %vm22_vm0, %v417_v1  ;;  %393 = vmatprep.mubr.msk.bf16.mxu0 %vm119_vm1, %v413_v6  ;;  %401 = vmatprep.mubr.msk.bf16.mxu1 %vm119_vm1, %v414_v7 }
   0x8   :  { %37 = vst.msk [vmem:[#allocation2 + $0x70] sm:$0xff] %vm22_vm0, %v417_v1  ;;  %38 = vst.msk [vmem:[#allocation2 + $0x78] sm:$0xff] %vm22_vm0, %v417_v1  ;;  %v57_v10 = vld [vmem:[#allocation2 + $0x10] sm:$0xff]  ;;  %v55_v12 = vld [vmem:[#allocation2] sm:$0xff] }
   0x9   :  { %v58_v16 = vld [vmem:[#allocation2 + $0x18] sm:$0xff]  ;;  %v56_v22 = vld [vmem:[#allocation2 + $0x8] sm:$0xff] }
   0xa   :  { %v59_v36 = vld [vmem:[#allocation2 + $0x20] sm:$0xff]  ;;  %v60_v47 = vld [vmem:[#allocation2 + $0x28] sm:$0xff] }
   0xb   :  { %v61_v34 = vld [vmem:[#allocation2 + $0x30] sm:$0xff]  ;;  %v62_v41 = vld [vmem:[#allocation2 + $0x38] sm:$0xff] }
   0xc   :  { %v63_v13 = vld [vmem:[#allocation2 + $0x40] sm:$0xff]  ;;  %v64_v23 = vld [vmem:[#allocation2 + $0x48] sm:$0xff] }
   0xd   :  { %v65_v11 = vld [vmem:[#allocation2 + $0x50] sm:$0xff]  ;;  %v66_v17 = vld [vmem:[#allocation2 + $0x58] sm:$0xff] }
   0xe   :  { %394 = vmatmul.mubr.msk.bf16.gmra.mrb[4].mxu0 %vm119_vm1, %v415_v8  ;;  %402 = vmatmul.mubr.msk.bf16.gmra.mrb[4].mxu1 %vm119_vm1, %v416_v9  ;;  %v67_v37 = vld [vmem:[#allocation2 + $0x60] sm:$0xff]  ;;  %v68_v48 = vld [vmem:[#allocation2 + $0x68] sm:$0xff] }
   0xf   :  { %v69_v35 = vld [vmem:[#allocation2 + $0x70] sm:$0xff]  ;;  %v70_v42 = vld [vmem:[#allocation2 + $0x78] sm:$0xff] }
  0xd9   :  { %v391_v14 = vpop.f32.mrb[0].mxu0  ;;  %v399_v15 = vpop.f32.mrb[0].mxu1 }
  0xda   :  { %v243_v18 = vadd.f32 %v391_v14, %v57_v10  ;;  %v251_v19 = vadd.f32 %v399_v15, %v65_v11  ;;  %v178_v20 = vpop.f32.mrb[1].mxu0  ;;  %v210_v21 = vpop.f32.mrb[1].mxu1 }
  0xdb   :  { %v241_v24 = vadd.f32 %v178_v20, %v55_v12  ;;  %v249_v25 = vadd.f32 %v210_v21, %v63_v13  ;;  %v392_v26 = vpop.f32.mrb[2].mxu0  ;;  %v400_v27 = vpop.f32.mrb[2].mxu1 }
  0xdc   :  { %260 = vst.msk [vmem:[#allocation2 + $0x10] sm:$0xff] %vm22_vm0, %v243_v18  ;;  %268 = vst.msk [vmem:[#allocation2 + $0x50] sm:$0xff] %vm22_vm0, %v251_v19  ;;  %v244_v28 = vadd.f32 %v392_v26, %v58_v16  ;;  %v252_v29 = vadd.f32 %v400_v27, %v66_v17  ;;  %v181_v30 = vpop.f32.mrb[3].mxu0  ;;  %v213_v31 = vpop.f32.mrb[3].mxu1 }
  0xdd   :  { %258 = vst.msk [vmem:[#allocation2] sm:$0xff] %vm22_vm0, %v241_v24  ;;  %266 = vst.msk [vmem:[#allocation2 + $0x40] sm:$0xff] %vm22_vm0, %v249_v25  ;;  %v242_v32 = vadd.f32 %v181_v30, %v56_v22  ;;  %v250_v33 = vadd.f32 %v213_v31, %v64_v23 }
  0xde   :  { %261 = vst.msk [vmem:[#allocation2 + $0x18] sm:$0xff] %vm22_vm0, %v244_v28  ;;  %269 = vst.msk [vmem:[#allocation2 + $0x58] sm:$0xff] %vm22_vm0, %v252_v29 }
  0xdf   :  { %259 = vst.msk [vmem:[#allocation2 + $0x8] sm:$0xff] %vm22_vm0, %v242_v32  ;;  %267 = vst.msk [vmem:[#allocation2 + $0x48] sm:$0xff] %vm22_vm0, %v250_v33 }
  0xe1   :  { %v395_v39 = vpop.f32.mrb[4].mxu0  ;;  %v403_v40 = vpop.f32.mrb[4].mxu1 }
  0xe2   :  { %v247_v43 = vadd.f32 %v395_v39, %v61_v34  ;;  %v255_v44 = vadd.f32 %v403_v40, %v69_v35  ;;  %v194_v45 = vpop.f32.mrb[5].mxu0  ;;  %v226_v46 = vpop.f32.mrb[5].mxu1 }
  0xe3   :  { %v279_v49 = vld [vmem:[#allocation2 + $0x10] sm:$0xff]  ;;  %v245_v52 = vadd.f32 %v194_v45, %v59_v36  ;;  %v253_v53 = vadd.f32 %v226_v46, %v67_v37  ;;  %v396_v54 = vpop.f32.mrb[6].mxu0  ;;  %v404_v55 = vpop.f32.mrb[6].mxu1 }
  0xe4   :  { %v287_v51 = vld [vmem:[#allocation2 + $0x50] sm:$0xff]  ;;  %v302_v56 = vmul.f32 %v505_v38, %v279_v49  ;;  %v277_v58 = vld [vmem:[#allocation2] sm:$0xff]  ;;  %264 = vst.msk [vmem:[#allocation2 + $0x30] sm:$0xff] %vm22_vm0, %v247_v43  ;;  %272 = vst.msk [vmem:[#allocation2 + $0x70] sm:$0xff] %vm22_vm0, %v255_v44  ;;  %v248_v60 = vadd.f32 %v396_v54, %v62_v41  ;;  %v256_v61 = vadd.f32 %v404_v55, %v70_v42  ;;  %v197_v62 = vpop.f32.mrb[7].mxu0  ;;  %v229_v63 = vpop.f32.mrb[7].mxu1 }
  0xe5   :  { %v310_v57 = vmul.f32 %v505_v38, %v287_v51  ;;  %v285_v59 = vld [vmem:[#allocation2 + $0x40] sm:$0xff]  ;;  %v300_v0 = vmul.f32 %v505_v38, %v277_v58  ;;  %v280_v2 = vld [vmem:[#allocation2 + $0x18] sm:$0xff]  ;;  %262 = vst.msk [vmem:[#allocation2 + $0x20] sm:$0xff] %vm22_vm0, %v245_v52  ;;  %270 = vst.msk [vmem:[#allocation2 + $0x60] sm:$0xff] %vm22_vm0, %v253_v53  ;;  %v246_v4 = vadd.f32 %v197_v62, %v60_v47 }
  0xe6   :  { %v308_v1 = vmul.f32 %v505_v38, %v285_v59  ;;  %v288_v3 = vld [vmem:[#allocation2 + $0x58] sm:$0xff]  ;;  %v254_v5 = vadd.f32 %v229_v63, %v68_v48  ;;  %v325_v6 = vadd.f32 %v510_v50, %v302_v56  ;;  %v303_v8 = vmul.f32 %v505_v38, %v280_v2  ;;  %v278_v10 = vld [vmem:[#allocation2 + $0x8] sm:$0xff]  ;;  %265 = vst.msk [vmem:[#allocation2 + $0x38] sm:$0xff] %vm22_vm0, %v248_v60 }
  0xe7   :  { %v333_v7 = vadd.f32 %v510_v50, %v310_v57  ;;  %v311_v9 = vmul.f32 %v505_v38, %v288_v3  ;;  %v286_v11 = vld [vmem:[#allocation2 + $0x48] sm:$0xff]  ;;  %273 = vst.msk [vmem:[#allocation2 + $0x78] sm:$0xff] %vm22_vm0, %v256_v61  ;;  %v323_v12 = vadd.f32 %v510_v50, %v300_v0  ;;  %v301_v14 = vmul.f32 %v505_v38, %v278_v10 }
  0xe8   :  { %v331_v13 = vadd.f32 %v510_v50, %v308_v1  ;;  %v309_v15 = vmul.f32 %v505_v38, %v286_v11  ;;  %263 = vst.msk [vmem:[#allocation2 + $0x28] sm:$0xff] %vm22_vm0, %v246_v4  ;;  %271 = vst.msk [vmem:[#allocation2 + $0x68] sm:$0xff] %vm22_vm0, %v254_v5  ;;  %v326_v16 = vadd.f32 %v510_v50, %v303_v8 }
  0xe9   :  { %341 = vst.msk [vmem:[%s620_s4 + $0x10] sm:$0xff] %vm22_vm0, %v325_v6  ;;  %349 = vst.msk [vmem:[%s620_s4 + $0x50] sm:$0xff] %vm22_vm0, %v333_v7  ;;  %v334_v17 = vadd.f32 %v510_v50, %v311_v9  ;;  %v324_v18 = vadd.f32 %v510_v50, %v301_v14 }
  0xea   :  { %339 = vst.msk [vmem:[%s620_s4] sm:$0xff] %vm22_vm0, %v323_v12  ;;  %347 = vst.msk [vmem:[%s620_s4 + $0x40] sm:$0xff] %vm22_vm0, %v331_v13  ;;  %v332_v19 = vadd.f32 %v510_v50, %v309_v15 }
  0xeb   :  { %342 = vst.msk [vmem:[%s620_s4 + $0x18] sm:$0xff] %vm22_vm0, %v326_v16  ;;  %350 = vst.msk [vmem:[%s620_s4 + $0x58] sm:$0xff] %vm22_vm0, %v334_v17  ;;  %v283_v20 = vld [vmem:[#allocation2 + $0x30] sm:$0xff] }
  0xec   :  { %340 = vst.msk [vmem:[%s620_s4 + $0x8] sm:$0xff] %vm22_vm0, %v324_v18  ;;  %348 = vst.msk [vmem:[%s620_s4 + $0x48] sm:$0xff] %vm22_vm0, %v332_v19  ;;  %v291_v21 = vld [vmem:[#allocation2 + $0x70] sm:$0xff]  ;;  %v306_v22 = vmul.f32 %v505_v38, %v283_v20  ;;  %v281_v24 = vld [vmem:[#allocation2 + $0x20] sm:$0xff] }
  0xed   :  { %v314_v23 = vmul.f32 %v505_v38, %v291_v21  ;;  %v289_v25 = vld [vmem:[#allocation2 + $0x60] sm:$0xff]  ;;  %v304_v26 = vmul.f32 %v505_v38, %v281_v24  ;;  %v284_v28 = vld [vmem:[#allocation2 + $0x38] sm:$0xff] }
  0xee   :  { %v312_v27 = vmul.f32 %v505_v38, %v289_v25  ;;  %v292_v29 = vld [vmem:[#allocation2 + $0x78] sm:$0xff]  ;;  %v329_v30 = vadd.f32 %v510_v50, %v306_v22  ;;  %v307_v32 = vmul.f32 %v505_v38, %v284_v28 }
  0xef   :  { %v337_v31 = vadd.f32 %v510_v50, %v314_v23  ;;  %v315_v33 = vmul.f32 %v505_v38, %v292_v29  ;;  %v282_v34 = vld [vmem:[#allocation2 + $0x28] sm:$0xff]  ;;  %v327_v36 = vadd.f32 %v510_v50, %v304_v26 }
  0xf0   :  { %v290_v35 = vld [vmem:[#allocation2 + $0x68] sm:$0xff]  ;;  %v335_v37 = vadd.f32 %v510_v50, %v312_v27  ;;  %v305_v39 = vmul.f32 %v505_v38, %v282_v34  ;;  %345 = vst.msk [vmem:[%s620_s4 + $0x30] sm:$0xff] %vm22_vm0, %v329_v30  ;;  %v330_v41 = vadd.f32 %v510_v50, %v307_v32 }
  0xf1   :  { %v313_v40 = vmul.f32 %v505_v38, %v290_v35  ;;  %353 = vst.msk [vmem:[%s620_s4 + $0x70] sm:$0xff] %vm22_vm0, %v337_v31  ;;  %v338_v42 = vadd.f32 %v510_v50, %v315_v33  ;;  %343 = vst.msk [vmem:[%s620_s4 + $0x20] sm:$0xff] %vm22_vm0, %v327_v36 }
  0xf2   :  { %351 = vst.msk [vmem:[%s620_s4 + $0x60] sm:$0xff] %vm22_vm0, %v335_v37  ;;  %v328_v38 = vadd.f32 %v510_v50, %v305_v39  ;;  %346 = vst.msk [vmem:[%s620_s4 + $0x38] sm:$0xff] %vm22_vm0, %v330_v41 }
  0xf3   :  { %v336_v43 = vadd.f32 %v510_v50, %v313_v40  ;;  %354 = vst.msk [vmem:[%s620_s4 + $0x78] sm:$0xff] %vm22_vm0, %v338_v42 }
  0xf4   :  { %344 = vst.msk [vmem:[%s620_s4 + $0x28] sm:$0xff] %vm22_vm0, %v328_v38 }
  0xf5   :  { %352 = vst.msk [vmem:[%s620_s4 + $0x68] sm:$0xff] %vm22_vm0, %v336_v43 }

// kernel: wave_block_forward.17
= control target key start
LH: loop header
LB: loop body
LE: loop exit
PB: predicated region body
PF: predicated region fallthrough
CT: control target
= control target key end

     0   :  { %vm22_vm0 = vcmask 64512   ;;  %v545_v1 = vmov 0.0   ;;  %vm127_vm1 = vcmask 261120   ;;  %vm427_vm2 = vcmask 60416   ;;  %s747_s1 = inlined_call_operand.vmem [shape: bf16[32,8], index: 1, kind: input, shape index: {}]   ;;  %s748_s0 = inlined_call_operand.vmem [shape: bf16[128,32], index: 0, kind: input, shape index: {}]   ;;  %s749_s2 = inlined_call_operand.vmem [shape: f32[1,8], index: 2, kind: input, shape index: {}]   ;;  %s750_s3 = inlined_call_operand.vmem [shape: f32[1,8], index: 3, kind: input, shape index: {}]   ;;  %s751_s4 = inlined_call_operand.vmem [shape: bf16[128,8], index: 4, kind: output, shape index: {}]  }
   0x1   :  { %v535_v0 = vld [vmem:[%s747_s1] sm:$0xff]   ;;  %25 = vst.msk [vmem:[#allocation2 + $0x10] sm:$0xff] %vm22_vm0, %v545_v1  ;;  %23 = vst.msk [vmem:[#allocation2] sm:$0xff] %vm22_vm0, %v545_v1  ;;  %v536_v2 = vld [vmem:[%s747_s1 + $0x8] sm:$0xff]  }
   0x2   :  { %24 = vst.msk [vmem:[#allocation2 + $0x8] sm:$0xff] %vm22_vm0, %v545_v1  ;;  %26 = vst.msk [vmem:[#allocation2 + $0x18] sm:$0xff] %vm22_vm0, %v545_v1  ;;  %510 = vmatprep.subr.bf16.mxu0 %v535_v0  ;;  %530 = vmatprep.subr.bf16.mxu1 %v535_v0  ;;  %v537_v3 = vld [vmem:[%s748_s0] sm:$0xff]   ;;  %v539_v5 = vld [vmem:[%s748_s0 + $0x8] sm:$0xff]  }
   0x3   :  { %27 = vst.msk [vmem:[#allocation2 + $0x20] sm:$0xff] %vm22_vm0, %v545_v1  ;;  %28 = vst.msk [vmem:[#allocation2 + $0x28] sm:$0xff] %vm22_vm0, %v545_v1  ;;  %511 = vmatpush3.bf16.msra.mxu0 %v535_v0  ;;  %532 = vmatpush3.bf16.msra.mxu1 %v535_v0  ;;  %v538_v4 = vld [vmem:[%s748_s0 + $0x20] sm:$0xff]   ;;  %v540_v6 = vld [vmem:[%s748_s0 + $0x28] sm:$0xff]  }
   0x4   :  { %29 = vst.msk [vmem:[#allocation2 + $0x30] sm:$0xff] %vm22_vm0, %v545_v1  ;;  %30 = vst.msk [vmem:[#allocation2 + $0x38] sm:$0xff] %vm22_vm0, %v545_v1  ;;  %512 = vmatprep.subr.bf16.mxu0 %v536_v2  ;;  %531 = vmatprep.subr.bf16.mxu1 %v536_v2  ;;  %v541_v7 = vld [vmem:[%s748_s0 + $0x10] sm:$0xff]   ;;  %v543_v9 = vld [vmem:[%s748_s0 + $0x18] sm:$0xff]  }
   0x5   :  { %31 = vst.msk [vmem:[#allocation2 + $0x40] sm:$0xff] %vm22_vm0, %v545_v1  ;;  %32 = vst.msk [vmem:[#allocation2 + $0x48] sm:$0xff] %vm22_vm0, %v545_v1  ;;  %514 = vmatprep.mubr.msk.bf16.mxu0 %vm127_vm1, %v537_v3  ;;  %522 = vmatprep.mubr.msk.bf16.mxu1 %vm127_vm1, %v538_v4  ;;  %v542_v8 = vld [vmem:[%s748_s0 + $0x30] sm:$0xff]   ;;  %v544_v10 = vld [vmem:[%s748_s0 + $0x38] sm:$0xff]  }
   0x6   :  { %33 = vst.msk [vmem:[#allocation2 + $0x50] sm:$0xff] %vm22_vm0, %v545_v1  ;;  %34 = vst.msk [vmem:[#allocation2 + $0x58] sm:$0xff] %vm22_vm0, %v545_v1  ;;  %v636_v39 = vld [vmem:[%s749_s2] ss:$0 sm:$0xff] }
   0x7   :  { %35 = vst.msk [vmem:[#allocation2 + $0x60] sm:$0xff] %vm22_vm0, %v545_v1  ;;  %36 = vst.msk [vmem:[#allocation2 + $0x68] sm:$0xff] %vm22_vm0, %v545_v1  ;;  %513 = vmatpush3.bf16.msra.mxu0 %v536_v2  ;;  %533 = vmatpush3.bf16.msra.mxu1 %v536_v2  ;;  %v641_v44 = vld [vmem:[%s750_s3] ss:$0 sm:$0xff] }
   0x8   :  { %37 = vst.msk [vmem:[#allocation2 + $0x70] sm:$0xff] %vm22_vm0, %v545_v1  ;;  %38 = vst.msk [vmem:[#allocation2 + $0x78] sm:$0xff] %vm22_vm0, %v545_v1  ;;  %v57_v11 = vld [vmem:[#allocation2 + $0x10] sm:$0xff]  ;;  %v55_v13 = vld [vmem:[#allocation2] sm:$0xff] }
   0x9   :  { %v58_v17 = vld [vmem:[#allocation2 + $0x18] sm:$0xff]  ;;  %v56_v23 = vld [vmem:[#allocation2 + $0x8] sm:$0xff] }
   0xa   :  { %515 = vmatmul.mubr.msk.bf16.vlgmr.msra.gmra.mrb[0].mxu0 %vm127_vm1, %v539_v5  ;;  %523 = vmatmul.mubr.msk.bf16.vlgmr.msra.gmra.mrb[0].mxu1 %vm127_vm1, %v540_v6  ;;  %v59_v37 = vld [vmem:[#allocation2 + $0x20] sm:$0xff]  ;;  %v60_v49 = vld [vmem:[#allocation2 + $0x28] sm:$0xff] }
   0xb   :  { %518 = vmatprep.mubr.msk.bf16.mxu0 %vm127_vm1, %v541_v7  ;;  %526 = vmatprep.mubr.msk.bf16.mxu1 %vm127_vm1, %v542_v8  ;;  %v61_v35 = vld [vmem:[#allocation2 + $0x30] sm:$0xff]  ;;  %v62_v42 = vld [vmem:[#allocation2 + $0x38] sm:$0xff] }
   0xc   :  { %v63_v14 = vld [vmem:[#allocation2 + $0x40] sm:$0xff]  ;;  %v64_v24 = vld [vmem:[#allocation2 + $0x48] sm:$0xff] }
   0xd   :  { %v65_v12 = vld [vmem:[#allocation2 + $0x50] sm:$0xff]  ;;  %v66_v18 = vld [vmem:[#allocation2 + $0x58] sm:$0xff] }
   0xe   :  { %v67_v38 = vld [vmem:[#allocation2 + $0x60] sm:$0xff]  ;;  %v68_v50 = vld [vmem:[#allocation2 + $0x68] sm:$0xff] }
   0xf   :  { %v69_v36 = vld [vmem:[#allocation2 + $0x70] sm:$0xff]  ;;  %v70_v43 = vld [vmem:[#allocation2 + $0x78] sm:$0xff] }
  0x12   :  { %519 = vmatmul.mubr.msk.bf16.gmra.mrb[4].mxu0 %vm127_vm1, %v543_v9  ;;  %527 = vmatmul.mubr.msk.bf16.gmra.mrb[4].mxu1 %vm127_vm1, %v544_v10 }
  0xdd   :  { %v516_v15 = vpop.f32.mrb[0].mxu0  ;;  %v524_v16 = vpop.f32.mrb[0].mxu1 }
  0xde   :  { %v251_v19 = vadd.f32 %v516_v15, %v57_v11  ;;  %v259_v20 = vadd.f32 %v524_v16, %v65_v12  ;;  %v186_v21 = vpop.f32.mrb[1].mxu0  ;;  %v218_v22 = vpop.f32.mrb[1].mxu1 }
  0xdf   :  { %v249_v25 = vadd.f32 %v186_v21, %v55_v13  ;;  %v257_v26 = vadd.f32 %v218_v22, %v63_v14  ;;  %v517_v27 = vpop.f32.mrb[2].mxu0  ;;  %v525_v28 = vpop.f32.mrb[2].mxu1 }
  0xe0   :  { %268 = vst.msk [vmem:[#allocation2 + $0x10] sm:$0xff] %vm22_vm0, %v251_v19  ;;  %276 = vst.msk [vmem:[#allocation2 + $0x50] sm:$0xff] %vm22_vm0, %v259_v20  ;;  %v252_v29 = vadd.f32 %v517_v27, %v58_v17  ;;  %v260_v30 = vadd.f32 %v525_v28, %v66_v18  ;;  %v189_v31 = vpop.f32.mrb[3].mxu0  ;;  %v221_v32 = vpop.f32.mrb[3].mxu1 }
  0xe1   :  { %266 = vst.msk [vmem:[#allocation2] sm:$0xff] %vm22_vm0, %v249_v25  ;;  %274 = vst.msk [vmem:[#allocation2 + $0x40] sm:$0xff] %vm22_vm0, %v257_v26  ;;  %v250_v33 = vadd.f32 %v189_v31, %v56_v23  ;;  %v258_v34 = vadd.f32 %v221_v32, %v64_v24 }
  0xe2   :  { %269 = vst.msk [vmem:[#allocation2 + $0x18] sm:$0xff] %vm22_vm0, %v252_v29  ;;  %277 = vst.msk [vmem:[#allocation2 + $0x58] sm:$0xff] %vm22_vm0, %v260_v30 }
  0xe3   :  { %267 = vst.msk [vmem:[#allocation2 + $0x8] sm:$0xff] %vm22_vm0, %v250_v33  ;;  %275 = vst.msk [vmem:[#allocation2 + $0x48] sm:$0xff] %vm22_vm0, %v258_v34 }
  0xe5   :  { %v520_v40 = vpop.f32.mrb[4].mxu0  ;;  %v528_v41 = vpop.f32.mrb[4].mxu1 }
  0xe6   :  { %v255_v45 = vadd.f32 %v520_v40, %v61_v35  ;;  %v263_v46 = vadd.f32 %v528_v41, %v69_v36  ;;  %v202_v47 = vpop.f32.mrb[5].mxu0  ;;  %v234_v48 = vpop.f32.mrb[5].mxu1 }
  0xe7   :  { %v287_v51 = vld [vmem:[#allocation2 + $0x10] sm:$0xff]  ;;  %v253_v53 = vadd.f32 %v202_v47, %v59_v37  ;;  %v261_v54 = vadd.f32 %v234_v48, %v67_v38  ;;  %v521_v55 = vpop.f32.mrb[6].mxu0  ;;  %v529_v56 = vpop.f32.mrb[6].mxu1 }
  0xe8   :  { %v295_v52 = vld [vmem:[#allocation2 + $0x50] sm:$0xff]  ;;  %v310_v57 = vmul.f32 %v636_v39, %v287_v51  ;;  %v285_v59 = vld [vmem:[#allocation2] sm:$0xff]  ;;  %272 = vst.msk [vmem:[#allocation2 + $0x30] sm:$0xff] %vm22_vm0, %v255_v45  ;;  %280 = vst.msk [vmem:[#allocation2 + $0x70] sm:$0xff] %vm22_vm0, %v263_v46  ;;  %v256_v61 = vadd.f32 %v521_v55, %v62_v42  ;;  %v264_v62 = vadd.f32 %v529_v56, %v70_v43  ;;  %v205_v63 = vpop.f32.mrb[7].mxu0  ;;  %v237_v0 = vpop.f32.mrb[7].mxu1 }
  0xe9   :  { %v318_v58 = vmul.f32 %v636_v39, %v295_v52  ;;  %v293_v60 = vld [vmem:[#allocation2 + $0x40] sm:$0xff]  ;;  %v308_v1 = vmul.f32 %v636_v39, %v285_v59  ;;  %v288_v3 = vld [vmem:[#allocation2 + $0x18] sm:$0xff]  ;;  %270 = vst.msk [vmem:[#allocation2 + $0x20] sm:$0xff] %vm22_vm0, %v253_v53  ;;  %278 = vst.msk [vmem:[#allocation2 + $0x60] sm:$0xff] %vm22_vm0, %v261_v54  ;;  %v254_v5 = vadd.f32 %v205_v63, %v60_v49 }
  0xea   :  { %v316_v2 = vmul.f32 %v636_v39, %v293_v60  ;;  %v296_v4 = vld [vmem:[#allocation2 + $0x58] sm:$0xff]  ;;  %v262_v6 = vadd.f32 %v237_v0, %v68_v50  ;;  %v333_v7 = vadd.f32 %v641_v44, %v310_v57  ;;  %v311_v9 = vmul.f32 %v636_v39, %v288_v3  ;;  %v286_v11 = vld [vmem:[#allocation2 + $0x8] sm:$0xff]  ;;  %273 = vst.msk [vmem:[#allocation2 + $0x38] sm:$0xff] %vm22_vm0, %v256_v61 }
  0xeb   :  { %v341_v8 = vadd.f32 %v641_v44, %v318_v58  ;;  %v319_v10 = vmul.f32 %v636_v39, %v296_v4  ;;  %v294_v12 = vld [vmem:[#allocation2 + $0x48] sm:$0xff]  ;;  %281 = vst.msk [vmem:[#allocation2 + $0x78] sm:$0xff] %vm22_vm0, %v264_v62  ;;  %v331_v13 = vadd.f32 %v641_v44, %v308_v1  ;;  %v309_v15 = vmul.f32 %v636_v39, %v286_v11 }
  0xec   :  { %v339_v14 = vadd.f32 %v641_v44, %v316_v2  ;;  %v317_v16 = vmul.f32 %v636_v39, %v294_v12  ;;  %271 = vst.msk [vmem:[#allocation2 + $0x28] sm:$0xff] %vm22_vm0, %v254_v5  ;;  %279 = vst.msk [vmem:[#allocation2 + $0x68] sm:$0xff] %vm22_vm0, %v262_v6  ;;  %v349_v17 = vmax.f32 %v333_v7, 0.0  ;;  %v334_v19 = vadd.f32 %v641_v44, %v311_v9 }
  0xed   :  { %v357_v18 = vmax.f32 %v341_v8, 0.0  ;;  %v342_v20 = vadd.f32 %v641_v44, %v319_v10  ;;  %v347_v21 = vmax.f32 %v331_v13, 0.0  ;;  %v332_v23 = vadd.f32 %v641_v44, %v309_v15 }
  0xee   :  { %v355_v22 = vmax.f32 %v339_v14, 0.0  ;;  %v340_v24 = vadd.f32 %v641_v44, %v317_v16  ;;  %v486_v25 = vpack.c.bf16 %v349_v17, %v349_v17  ;;  %v350_v27 = vmax.f32 %v334_v19, 0.0 }
  0xef   :  { %v494_v26 = vpack.c.bf16 %v357_v18, %v357_v18  ;;  %v358_v28 = vmax.f32 %v342_v20, 0.0  ;;  %v484_v29 = vpack.c.bf16 %v347_v21, %v347_v21  ;;  %v348_v31 = vmax.f32 %v332_v23, 0.0  ;;  %v291_v33 = vld [vmem:[#allocation2 + $0x30] sm:$0xff] }
  0xf0   :  { %v492_v30 = vpack.c.bf16 %v355_v22, %v355_v22  ;;  %v356_v32 = vmax.f32 %v340_v24, 0.0  ;;  %v299_v34 = vld [vmem:[#allocation2 + $0x70] sm:$0xff]  ;;  %430 = vst.msk [vmem:[%s751_s4 + $0x8] sm:$0xf] %vm427_vm2, %v486_v25  ;;  %v487_v35 = vpack.c.bf16 %v350_v27, %v350_v27  ;;  %v314_v37 = vmul.f32 %v636_v39, %v291_v33  ;;  %v289_v40 = vld [vmem:[#allocation2 + $0x20] sm:$0xff] }
  0xf1   :  { %438 = vst.msk [vmem:[%s751_s4 + $0x28] sm:$0xf] %vm427_vm2, %v494_v26  ;;  %v495_v36 = vpack.c.bf16 %v358_v28, %v358_v28  ;;  %v322_v38 = vmul.f32 %v636_v39, %v299_v34  ;;  %v297_v41 = vld [vmem:[#allocation2 + $0x60] sm:$0xff]  ;;  %428 = vst.msk [vmem:[%s751_s4] sm:$0xf] %vm427_vm2, %v484_v29  ;;  %v485_v42 = vpack.c.bf16 %v348_v31, %v348_v31  ;;  %v292_v47 = vld [vmem:[#allocation2 + $0x38] sm:$0xff] }
  0xf2   :  { %436 = vst.msk [vmem:[%s751_s4 + $0x20] sm:$0xf] %vm427_vm2, %v492_v30  ;;  %v493_v43 = vpack.c.bf16 %v356_v32, %v356_v32  ;;  %v312_v45 = vmul.f32 %v636_v39, %v289_v40  ;;  %v320_v46 = vmul.f32 %v636_v39, %v297_v41  ;;  %v300_v48 = vld [vmem:[#allocation2 + $0x78] sm:$0xff]  ;;  %431 = vst.msk [vmem:[%s751_s4 + $0xc] sm:$0xf] %vm427_vm2, %v487_v35 }
  0xf3   :  { %439 = vst.msk [vmem:[%s751_s4 + $0x2c] sm:$0xf] %vm427_vm2, %v495_v36  ;;  %v337_v49 = vadd.f32 %v641_v44, %v314_v37  ;;  %v345_v50 = vadd.f32 %v641_v44, %v322_v38  ;;  %v315_v51 = vmul.f32 %v636_v39, %v292_v47  ;;  %v323_v52 = vmul.f32 %v636_v39, %v300_v48  ;;  %v290_v53 = vld [vmem:[#allocation2 + $0x28] sm:$0xff] }
  0xf4   :  { %v298_v54 = vld [vmem:[#allocation2 + $0x68] sm:$0xff]  ;;  %429 = vst.msk [vmem:[%s751_s4 + $0x4] sm:$0xf] %vm427_vm2, %v485_v42  ;;  %437 = vst.msk [vmem:[%s751_s4 + $0x24] sm:$0xf] %vm427_vm2, %v493_v43  ;;  %v335_v55 = vadd.f32 %v641_v44, %v312_v45  ;;  %v343_v56 = vadd.f32 %v641_v44, %v320_v46  ;;  %v313_v57 = vmul.f32 %v636_v39, %v290_v53 }
  0xf5   :  { %v321_v58 = vmul.f32 %v636_v39, %v298_v54  ;;  %v353_v59 = vmax.f32 %v337_v49, 0.0  ;;  %v361_v60 = vmax.f32 %v345_v50, 0.0  ;;  %v338_v61 = vadd.f32 %v641_v44, %v315_v51 }
  0xf6   :  { %v346_v62 = vadd.f32 %v641_v44, %v323_v52  ;;  %v351_v63 = vmax.f32 %v335_v55, 0.0  ;;  %v359_v0 = vmax.f32 %v343_v56, 0.0  ;;  %v336_v1 = vadd.f32 %v641_v44, %v313_v57 }
  0xf7   :  { %v344_v2 = vadd.f32 %v641_v44, %v321_v58  ;;  %v490_v3 = vpack.c.bf16 %v353_v59, %v353_v59  ;;  %v498_v4 = vpack.c.bf16 %v361_v60, %v361_v60  ;;  %v354_v5 = vmax.f32 %v338_v61, 0.0 }
  0xf8   :  { %v362_v6 = vmax.f32 %v346_v62, 0.0  ;;  %v488_v7 = vpack.c.bf16 %v351_v63, %v351_v63  ;;  %v496_v8 = vpack.c.bf16 %v359_v0, %v359_v0  ;;  %v352_v9 = vmax.f32 %v336_v1, 0.0 }
  0xf9   :  { %v360_v39 = vmax.f32 %v344_v2, 0.0  ;;  %434 = vst.msk [vmem:[%s751_s4 + $0x18] sm:$0xf] %vm427_vm2, %v490_v3  ;;  %442 = vst.msk [vmem:[%s751_s4 + $0x38] sm:$0xf] %vm427_vm2, %v498_v4  ;;  %v491_v10 = vpack.c.bf16 %v354_v5, %v354_v5 }
  0xfa   :  { %v499_v44 = vpack.c.bf16 %v362_v6, %v362_v6  ;;  %432 = vst.msk [vmem:[%s751_s4 + $0x10] sm:$0xf] %vm427_vm2, %v488_v7  ;;  %440 = vst.msk [vmem:[%s751_s4 + $0x30] sm:$0xf] %vm427_vm2, %v496_v8  ;;  %v489_v11 = vpack.c.bf16 %v352_v9, %v352_v9 }
  0xfb   :  { %v497_v12 = vpack.c.bf16 %v360_v39, %v360_v39  ;;  %435 = vst.msk [vmem:[%s751_s4 + $0x1c] sm:$0xf] %vm427_vm2, %v491_v10 }
  0xfc   :  { %443 = vst.msk [vmem:[%s751_s4 + $0x3c] sm:$0xf] %vm427_vm2, %v499_v44  ;;  %433 = vst.msk [vmem:[%s751_s4 + $0x14] sm:$0xf] %vm427_vm2, %v489_v11 }
  0xfd   :  { %441 = vst.msk [vmem:[%s751_s4 + $0x34] sm:$0xf] %vm427_vm2, %v497_v12 }

// kernel: wave_block_forward.18
= control target key start
LH: loop header
LB: loop body
LE: loop exit
PB: predicated region body
PF: predicated region fallthrough
CT: control target
= control target key end

     0   :  { %s380_s30 = smov 120   ;;  %s382_s10 = smov 16   ;;  %vm280_vm0 = vcmask 64512   ;;  %vm289_vm1 = vcmask 130048   ;;  %vm298_vm2 = vcmask 195584   ;;  %vm323_vm3 = vcmask 254976   ;;  %s722_s0 = inlined_call_operand.vmem [shape: bf16[8,2,4,16], index: 0, kind: input, shape index: {}]   ;;  %s723_s1 = inlined_call_operand.vmem [shape: bf16[8,4,32], index: 1, kind: output, shape index: {}]  }
   0x1   :  { %v16_v0 = vld [vmem:[%s722_s0 + $0x10] sm:$0x3]  ;;  %v18_v1 = vld [vmem:[%s722_s0 + $0x14] sm:$0x3]  ;;  %v8_v2 = vld [vmem:[%s722_s0] sm:$0x3] }
   0x2   :  { %v403_v3 = vunpack.c.l.bf16 %v16_v0  ;;  %v405_v4 = vunpack.c.l.bf16 %v18_v1  ;;  %v10_v5 = vld [vmem:[%s722_s0 + $0x4] sm:$0x3]  ;;  %v410_v6 = vunpack.c.l.bf16 %v8_v2  ;;  %v20_v7 = vld [vmem:[%s722_s0 + $0x18] sm:$0x3]  ;;  %v22_v8 = vld [vmem:[%s722_s0 + $0x1c] sm:$0x3] }
   0x3   :  { %v418_v9 = vunpack.c.l.bf16 %v10_v5  ;;  %v420_v10 = vunpack.c.l.bf16 %v20_v7  ;;  %v422_v11 = vunpack.c.l.bf16 %v22_v8  ;;  %v12_v12 = vld [vmem:[%s722_s0 + $0x8] sm:$0x3]  ;;  %v14_v13 = vld [vmem:[%s722_s0 + $0xc] sm:$0x3]  ;;  %v13_v14 = vld [vmem:[%s722_s0 + $0xa] sm:$0x3] }
   0x4   :  { %v350_v15 = vpack.i.bf16 %v405_v4, %v403_v3  ;;  %v435_v16 = vunpack.c.l.bf16 %v12_v12  ;;  %v437_v17 = vunpack.c.l.bf16 %v14_v13  ;;  %v15_v18 = vld [vmem:[%s722_s0 + $0xe] sm:$0x3]  ;;  %v9_v19 = vld [vmem:[%s722_s0 + $0x2] sm:$0x3]  ;;  %v11_v20 = vld [vmem:[%s722_s0 + $0x6] sm:$0x3]  ;;  %v452_v23 = vunpack.c.l.bf16 %v13_v14 }
   0x5   :  { %v340_v21 = vpack.i.bf16 %v418_v9, %v410_v6  ;;  %v355_v22 = vpack.i.bf16 %v422_v11, %v420_v10  ;;  %v454_v24 = vunpack.c.l.bf16 %v15_v18  ;;  %v458_v26 = vunpack.c.l.bf16 %v9_v19  ;;  %v21_v28 = vld [vmem:[%s722_s0 + $0x1a] sm:$0x3]  ;;  %v23_v29 = vld [vmem:[%s722_s0 + $0x1e] sm:$0x3]  ;;  %v17_v30 = vld [vmem:[%s722_s0 + $0x12] sm:$0x3] }
   0x6   :  { %351 = vrot.lane.b32.xlu1 %v350_v15, %s380_s30  ;;  %v345_v25 = vpack.i.bf16 %v437_v17, %v435_v16  ;;  %v460_v27 = vunpack.c.l.bf16 %v11_v20  ;;  %v19_v31 = vld [vmem:[%s722_s0 + $0x16] sm:$0x3]  ;;  %v476_v33 = vunpack.c.l.bf16 %v21_v28  ;;  %v478_v34 = vunpack.c.l.bf16 %v23_v29  ;;  %s381_s0 = smov 8   ;;  %s383_s11 = smov 24  }
   0x7   :  { %341 = vrot.lane.b32.xlu0 %v340_v21, %s380_s30  ;;  %v365_v32 = vpack.i.bf16 %v454_v24, %v452_v23  ;;  %v482_v36 = vunpack.c.l.bf16 %v17_v30  ;;  %v484_v37 = vunpack.c.l.bf16 %v19_v31 }
   0x8   :  { %v360_v35 = vpack.i.bf16 %v460_v27, %v458_v26  ;;  %v375_v38 = vpack.i.bf16 %v478_v34, %v476_v33 }
   0x9   :  { %v370_v39 = vpack.i.bf16 %v484_v37, %v482_v36 }
   0xa   :  { %356 = vrot.lane.b32.xlu1 %v355_v22, %s380_s30 }
   0xb   :  { %346 = vrot.lane.b32.xlu0 %v345_v25, %s380_s30 }
   0xe   :  { %366 = vrot.lane.b32.xlu1 %v365_v32, %s380_s30 }
   0xf   :  { %361 = vrot.lane.b32.xlu0 %v360_v35, %s380_s30 }
  0x12   :  { %376 = vrot.lane.b32.xlu1 %v375_v38, %s380_s30 }
  0x13   :  { %371 = vrot.lane.b32.xlu0 %v370_v39, %s380_s30 }
  0x78   :  { %v490_v40 = vpop.permute.xlu1 %351 }
  0x79   :  { %v492_v41 = vpop.permute.xlu0 %341  ;;  %v354_v48 = vunpack.i.h.bf16 %v490_v40  ;;  %v353_v60 = vunpack.i.l.bf16 %v490_v40 }
  0x7a   :  { %v344_v44 = vunpack.i.h.bf16 %v492_v41  ;;  %v343_v45 = vunpack.i.l.bf16 %v492_v41 }
  0x7b   :  { %v77_v59 = vadd.f32 %v354_v48, %v405_v4  ;;  %v76_v15 = vadd.f32 %v353_v60, %v403_v3 }
  0x7c   :  { %v496_v43 = vpop.permute.xlu1 %356  ;;  %v73_v50 = vadd.f32 %v344_v44, %v418_v9  ;;  %v72_v51 = vadd.f32 %v343_v45, %v410_v6 }
  0x7d   :  { %v494_v42 = vpop.permute.xlu0 %346  ;;  %v359_v52 = vunpack.i.h.bf16 %v496_v43  ;;  %v358_v53 = vunpack.i.l.bf16 %v496_v43  ;;  %v85_v14 = vadd.f32 %v77_v59, %v484_v37  ;;  %v133_v39 = vsub.f32 %v77_v59, %v484_v37 }
  0x7e   :  { %v349_v46 = vunpack.i.h.bf16 %v494_v42  ;;  %v348_v47 = vunpack.i.l.bf16 %v494_v42  ;;  %v129_v61 = vsub.f32 %v73_v50, %v460_v27  ;;  %v128_v62 = vsub.f32 %v72_v51, %v458_v26 }
  0x7f   :  { %v79_v63 = vadd.f32 %v359_v52, %v422_v11  ;;  %v78_v0 = vadd.f32 %v358_v53, %v420_v10  ;;  %v81_v18 = vadd.f32 %v73_v50, %v460_v27  ;;  %v80_v20 = vadd.f32 %v72_v51, %v458_v26 }
  0x80   :  { %v367_v54 = vpop.permute.xlu1 %366  ;;  %v75_v55 = vadd.f32 %v349_v46, %v437_v17  ;;  %v74_v56 = vadd.f32 %v348_v47, %v435_v16  ;;  %v132_v50 = vsub.f32 %v76_v15, %v482_v36 }
  0x81   :  { %v362_v49 = vpop.permute.xlu0 %361  ;;  %v533_v1 = vunpack.i.h.bf16 %v367_v54  ;;  %v535_v2 = vunpack.i.l.bf16 %v367_v54  ;;  %v87_v21 = vadd.f32 %v79_v63, %v478_v34  ;;  %v86_v22 = vadd.f32 %v78_v0, %v476_v33 }
  0x82   :  { %v517_v57 = vunpack.i.h.bf16 %v362_v49  ;;  %v519_v58 = vunpack.i.l.bf16 %v362_v49  ;;  %v131_v5 = vsub.f32 %v75_v55, %v454_v24  ;;  %v130_v7 = vsub.f32 %v74_v56, %v452_v23 }
  0x83   :  { %v83_v25 = vadd.f32 %v75_v55, %v454_v24  ;;  %v82_v28 = vadd.f32 %v74_v56, %v452_v23  ;;  %v84_v49 = vadd.f32 %v76_v15, %v482_v36  ;;  %v135_v51 = vsub.f32 %v79_v63, %v478_v34 }
  0x84   :  { %v137_v12 = vsub.f32 %v129_v61, %v517_v57  ;;  %v136_v13 = vsub.f32 %v128_v62, %v519_v58  ;;  %v377_v19 = vpop.permute.xlu1 %376  ;;  %v139_v35 = vsub.f32 %v131_v5, %v533_v1  ;;  %v138_v38 = vsub.f32 %v130_v7, %v535_v2 }
  0x85   :  { %v372_v8 = vpop.permute.xlu0 %371  ;;  %v557_v31 = vunpack.i.h.bf16 %v377_v19  ;;  %v559_v32 = vunpack.i.l.bf16 %v377_v19  ;;  %v134_v54 = vsub.f32 %v78_v0, %v476_v33  ;;  %v571_v55 = vadd.f32 %v517_v57, %v81_v18 }
  0x86   :  { %194 = vrot.lane.b32.xlu1 %v137_v12, %s381_s0  ;;  %192 = vrot.lane.b32.xlu0 %v136_v13, %s381_s0  ;;  %v553_v29 = vunpack.i.h.bf16 %v372_v8  ;;  %v555_v30 = vunpack.i.l.bf16 %v372_v8  ;;  %v574_v56 = vadd.f32 %v519_v58, %v80_v20  ;;  %v577_v59 = vadd.f32 %v533_v1, %v83_v25 }
  0x87   :  { %v580_v61 = vadd.f32 %v535_v2, %v82_v28  ;;  %v591_v7 = vadd.f32 %v557_v31, %v87_v21  ;;  %v594_v8 = vadd.f32 %v559_v32, %v86_v22  ;;  %v145_v12 = vsub.f32 %v418_v9, %v344_v44 }
  0x88   :  { %v583_v62 = vadd.f32 %v553_v29, %v85_v14  ;;  %v586_v63 = vadd.f32 %v555_v30, %v84_v49  ;;  %v141_v0 = vsub.f32 %v133_v39, %v553_v29  ;;  %v140_v5 = vsub.f32 %v132_v50, %v555_v30 }
  0x89   :  { %v144_v13 = vsub.f32 %v410_v6, %v343_v45  ;;  %v147_v14 = vsub.f32 %v437_v17, %v349_v46  ;;  %v146_v15 = vsub.f32 %v435_v16, %v348_v47  ;;  %v143_v18 = vsub.f32 %v135_v51, %v557_v31 }
  0x8a   :  { %198 = vrot.lane.b32.xlu1 %v139_v35, %s381_s0  ;;  %196 = vrot.lane.b32.xlu0 %v138_v38, %s381_s0  ;;  %v142_v9 = vsub.f32 %v134_v54, %v559_v32  ;;  %v153_v41 = vadd.f32 %v145_v12, %v460_v27  ;;  %v149_v45 = vsub.f32 %v405_v4, %v354_v48 }
  0x8b   :  { %v152_v6 = vadd.f32 %v144_v13, %v458_v26  ;;  %v155_v44 = vadd.f32 %v147_v14, %v454_v24  ;;  %v154_v17 = vadd.f32 %v146_v15, %v452_v23  ;;  %v148_v46 = vsub.f32 %v403_v3, %v353_v60 }
  0x8c   :  { %v161_v42 = vsub.f32 %v153_v41, %v517_v57  ;;  %v151_v47 = vsub.f32 %v422_v11, %v359_v52  ;;  %v150_v19 = vsub.f32 %v420_v10, %v358_v53  ;;  %v157_v4 = vadd.f32 %v149_v45, %v484_v37 }
  0x8d   :  { %v160_v16 = vsub.f32 %v152_v6, %v519_v58  ;;  %v163_v20 = vsub.f32 %v155_v44, %v533_v1  ;;  %v162_v21 = vsub.f32 %v154_v17, %v535_v2  ;;  %v156_v40 = vadd.f32 %v148_v46, %v482_v36 }
  0x8e   :  { %202 = vrot.lane.b32.xlu1 %v141_v0, %s381_s0  ;;  %200 = vrot.lane.b32.xlu0 %v140_v5, %s381_s0  ;;  %v159_v3 = vadd.f32 %v151_v47, %v478_v34  ;;  %v158_v48 = vadd.f32 %v150_v19, %v476_v33  ;;  %v165_v11 = vsub.f32 %v157_v4, %v553_v29 }
  0x8f   :  { %v164_v43 = vsub.f32 %v156_v40, %v555_v30  ;;  %v169_v53 = vsub.f32 %v145_v12, %v460_v27  ;;  %v168_v60 = vsub.f32 %v144_v13, %v458_v26  ;;  %v171_v22 = vsub.f32 %v147_v14, %v454_v24 }
  0x90   :  { %v167_v10 = vsub.f32 %v159_v3, %v557_v31  ;;  %v166_v52 = vsub.f32 %v158_v48, %v559_v32  ;;  %v170_v25 = vsub.f32 %v146_v15, %v452_v23  ;;  %v173_v27 = vsub.f32 %v149_v45, %v484_v37 }
  0x91   :  { %v177_v28 = vadd.f32 %v517_v57, %v169_v53  ;;  %v176_v35 = vadd.f32 %v519_v58, %v168_v60  ;;  %v179_v38 = vadd.f32 %v533_v1, %v171_v22  ;;  %v172_v26 = vsub.f32 %v148_v46, %v482_v36 }
  0x92   :  { %206 = vrot.lane.b32.xlu1 %v143_v18, %s381_s0  ;;  %204 = vrot.lane.b32.xlu0 %v142_v9, %s381_s0  ;;  %v178_v39 = vadd.f32 %v535_v2, %v170_v25  ;;  %v175_v24 = vsub.f32 %v151_v47, %v478_v34  ;;  %v174_v23 = vsub.f32 %v150_v19, %v476_v33 }
  0x93   :  { %v181_v57 = vadd.f32 %v553_v29, %v173_v27  ;;  %v180_v58 = vadd.f32 %v555_v30, %v172_v26 }
  0x94   :  { %v183_v1 = vadd.f32 %v557_v31, %v175_v24  ;;  %v182_v2 = vadd.f32 %v559_v32, %v174_v23 }
  0x96   :  { %226 = vrot.lane.b32.xlu1 %v161_v42, %s382_s10  ;;  %224 = vrot.lane.b32.xlu0 %v160_v16, %s382_s10 }
  0x9a   :  { %230 = vrot.lane.b32.xlu1 %v163_v20, %s382_s10  ;;  %228 = vrot.lane.b32.xlu0 %v162_v21, %s382_s10 }
  0x9e   :  { %234 = vrot.lane.b32.xlu1 %v165_v11, %s382_s10  ;;  %232 = vrot.lane.b32.xlu0 %v164_v43, %s382_s10 }
  0xa2   :  { %238 = vrot.lane.b32.xlu1 %v167_v10, %s382_s10  ;;  %236 = vrot.lane.b32.xlu0 %v166_v52, %s382_s10 }
  0xa6   :  { %258 = vrot.lane.b32.xlu1 %v177_v28, %s383_s11  ;;  %256 = vrot.lane.b32.xlu0 %v176_v35, %s383_s11 }
  0xaa   :  { %262 = vrot.lane.b32.xlu1 %v179_v38, %s383_s11  ;;  %260 = vrot.lane.b32.xlu0 %v178_v39, %s383_s11 }
  0xae   :  { %266 = vrot.lane.b32.xlu1 %v181_v57, %s383_s11  ;;  %264 = vrot.lane.b32.xlu0 %v180_v58, %s383_s11 }
  0xb2   :  { %270 = vrot.lane.b32.xlu1 %v183_v1, %s383_s11  ;;  %268 = vrot.lane.b32.xlu0 %v182_v2, %s383_s11 }
  0xf8   :  { %v195_v37 = vpop.permute.xlu1 %194  ;;  %v193_v36 = vpop.permute.xlu0 %192 }
  0xf9   :  { %v282_v32 = vsel %vm280_vm0, %v571_v55, %v195_v37  ;;  %v281_v15 = vsel %vm280_vm0, %v574_v56, %v193_v36 }
  0xfc   :  { %v199_v49 = vpop.permute.xlu1 %198  ;;  %v197_v50 = vpop.permute.xlu0 %196 }
  0xfd   :  { %v284_v45 = vsel %vm280_vm0, %v577_v59, %v199_v49  ;;  %v283_v55 = vsel %vm280_vm0, %v580_v61, %v197_v50 }
 0x100   :  { %v203_v51 = vpop.permute.xlu1 %202  ;;  %v201_v34 = vpop.permute.xlu0 %200 }
 0x101   :  { %v286_v3 = vsel %vm280_vm0, %v583_v62, %v203_v51  ;;  %v285_v48 = vsel %vm280_vm0, %v586_v63, %v201_v34 }
 0x104   :  { %v207_v54 = vpop.permute.xlu1 %206  ;;  %v205_v33 = vpop.permute.xlu0 %204 }
 0x105   :  { %v288_v28 = vsel %vm280_vm0, %v591_v7, %v207_v54  ;;  %v287_v35 = vsel %vm280_vm0, %v594_v8, %v205_v33 }
 0x108   :  { %v227_v0 = vpop.permute.xlu1 %226  ;;  %v225_v29 = vpop.permute.xlu0 %224 }
 0x109   :  { %v291_v18 = vsel %vm289_vm1, %v282_v32, %v227_v0  ;;  %v290_v9 = vsel %vm289_vm1, %v281_v15, %v225_v29 }
 0x10c   :  { %v231_v5 = vpop.permute.xlu1 %230  ;;  %v229_v30 = vpop.permute.xlu0 %228 }
 0x10d   :  { %v293_v56 = vsel %vm289_vm1, %v284_v45, %v231_v5  ;;  %v292_v46 = vsel %vm289_vm1, %v283_v55, %v229_v30 }
 0x110   :  { %v235_v12 = vpop.permute.xlu1 %234  ;;  %v233_v13 = vpop.permute.xlu0 %232 }
 0x111   :  { %v295_v11 = vsel %vm289_vm1, %v286_v3, %v235_v12  ;;  %v294_v43 = vsel %vm289_vm1, %v285_v48, %v233_v13 }
 0x114   :  { %v239_v31 = vpop.permute.xlu1 %238  ;;  %v237_v14 = vpop.permute.xlu0 %236 }
 0x115   :  { %v297_v38 = vsel %vm289_vm1, %v288_v28, %v239_v31  ;;  %v296_v39 = vsel %vm289_vm1, %v287_v35, %v237_v14 }
 0x118   :  { %v259_v41 = vpop.permute.xlu1 %258  ;;  %v257_v6 = vpop.permute.xlu0 %256 }
 0x119   :  { %v300_v44 = vsel %vm298_vm2, %v291_v18, %v259_v41  ;;  %v299_v17 = vsel %vm298_vm2, %v290_v9, %v257_v6 }
 0x11a   :  { %v308_v42 = vmul.f32 0.5, %v300_v44  ;;  %v307_v16 = vmul.f32 0.5, %v299_v17 }
 0x11c   :  { %v316_v47 = vpack.c.bf16 %v308_v42, %v308_v42  ;;  %v315_v19 = vpack.c.bf16 %v307_v16, %v307_v16  ;;  %v263_v20 = vpop.permute.xlu1 %262  ;;  %v261_v21 = vpop.permute.xlu0 %260 }
 0x11d   :  { %v302_v4 = vsel %vm298_vm2, %v293_v56, %v263_v20  ;;  %v301_v40 = vsel %vm298_vm2, %v292_v46, %v261_v21 }
 0x11e   :  { %325 = vst.msk [vmem:[%s723_s1 + $0x2] sm:$0x3] %vm323_vm3, %v316_v47  ;;  %324 = vst.msk [vmem:[%s723_s1] sm:$0x3] %vm323_vm3, %v315_v19  ;;  %v310_v59 = vmul.f32 0.5, %v302_v4  ;;  %v309_v61 = vmul.f32 0.5, %v301_v40 }
 0x120   :  { %v318_v10 = vpack.c.bf16 %v310_v59, %v310_v59  ;;  %v317_v52 = vpack.c.bf16 %v309_v61, %v309_v61  ;;  %v267_v53 = vpop.permute.xlu1 %266  ;;  %v265_v60 = vpop.permute.xlu0 %264 }
 0x121   :  { %v304_v22 = vsel %vm298_vm2, %v295_v11, %v267_v53  ;;  %v303_v25 = vsel %vm298_vm2, %v294_v43, %v265_v60 }
 0x122   :  { %327 = vst.msk [vmem:[%s723_s1 + $0x6] sm:$0x3] %vm323_vm3, %v318_v10  ;;  %326 = vst.msk [vmem:[%s723_s1 + $0x4] sm:$0x3] %vm323_vm3, %v317_v52  ;;  %v312_v62 = vmul.f32 0.5, %v304_v22  ;;  %v311_v63 = vmul.f32 0.5, %v303_v25 }
 0x124   :  { %v320_v27 = vpack.c.bf16 %v312_v62, %v312_v62  ;;  %v319_v26 = vpack.c.bf16 %v311_v63, %v311_v63  ;;  %v271_v24 = vpop.permute.xlu1 %270  ;;  %v269_v23 = vpop.permute.xlu0 %268 }
 0x125   :  { %v306_v57 = vsel %vm298_vm2, %v297_v38, %v271_v24  ;;  %v305_v58 = vsel %vm298_vm2, %v296_v39, %v269_v23 }
 0x126   :  { %329 = vst.msk [vmem:[%s723_s1 + $0xa] sm:$0x3] %vm323_vm3, %v320_v27  ;;  %328 = vst.msk [vmem:[%s723_s1 + $0x8] sm:$0x3] %vm323_vm3, %v319_v26  ;;  %v314_v7 = vmul.f32 0.5, %v306_v57  ;;  %v313_v8 = vmul.f32 0.5, %v305_v58 }
 0x128   :  { %v322_v1 = vpack.c.bf16 %v314_v7, %v314_v7  ;;  %v321_v2 = vpack.c.bf16 %v313_v8, %v313_v8 }
 0x12a   :  { %331 = vst.msk [vmem:[%s723_s1 + $0xe] sm:$0x3] %vm323_vm3, %v322_v1  ;;  %330 = vst.msk [vmem:[%s723_s1 + $0xc] sm:$0x3] %vm323_vm3, %v321_v2 }

// kernel: wave_block_forward.21
= control target key start
LH: loop header
LB: loop body
LE: loop exit
PB: predicated region body
PF: predicated region fallthrough
CT: control target
= control target key end

     0   :  { %vm20_vm0 = vcmask 261120   ;;  %v170_v15 = vmov 0.0   ;;  %vm171_vm1 = vmmov 0   ;;  %vm135_vm2 = vcmask 257024   ;;  %s226_s0 = inlined_call_operand.vmem [shape: f32[16,32], index: 0, kind: input, shape index: {}]   ;;  %s227_s3 = inlined_call_operand.vmem [shape: bf16[32,32], index: 3, kind: input, shape index: {}]   ;;  %s228_s1 = inlined_call_operand.vmem [shape: f32[1,32], index: 1, kind: input, shape index: {}]   ;;  %s229_s2 = inlined_call_operand.vmem [shape: f32[1,32], index: 2, kind: input, shape index: {}]   ;;  %s230_s4 = inlined_call_operand.vmem [shape: bf16[16,32], index: 4, kind: output, shape index: {}]  }
   0x1   :  { %v18_v0 = vld [vmem:[%s226_s0] sm:$0xff]  ;;  %v19_v1 = vld [vmem:[%s226_s0 + $0x8] sm:$0xff]  ;;  %154 = vmatprep.subr.bf16.mxu0 %v170_v15  ;;  %158 = vmatprep.mubr.msk.bf16.mxu0 %vm171_vm1, %v170_v15 }
   0x2   :  { %v21_v2 = vsel %vm20_vm0, %v18_v0, 0.0  ;;  %v24_v3 = vsel %vm20_vm0, %v19_v1, 0.0  ;;  %v164_v14 = vld [vmem:[%s227_s3] sm:$0xff]   ;;  %v165_v16 = vld [vmem:[%s227_s3 + $0x8] sm:$0xff]  }
   0x3   :  { %22 = vadd.xlane.f32.xlu0 %v21_v2  ;;  %155 = vmatpush3.bf16.msra.mxu0 %v164_v14  ;;  %v142_v25 = vld [vmem:[%s228_s1] ss:$0 sm:$0xff] }
   0x4   :  { %156 = vmatprep.subr.bf16.mxu0 %v170_v15  ;;  %v143_v29 = vld [vmem:[%s229_s2] ss:$0 sm:$0xff] }
   0x7   :  { %25 = vadd.xlane.f32.xlu0 %v24_v3  ;;  %157 = vmatpush3.bf16.msra.mxu0 %v165_v16 }
  0x90   :  { %v23_v4 = vpop.xlane.xlu0 %22 }
  0x91   :  { %v28_v5 = vmul.f32 0.03125, %v23_v4 }
  0x93   :  { %v30_v6 = vsub.f32 %v18_v0, %v28_v5 }
  0x94   :  { %v26_v7 = vpop.xlane.xlu0 %25 }
  0x95   :  { %v29_v8 = vmul.f32 0.03125, %v26_v7  ;;  %v32_v9 = vmul.f32 %v30_v6, %v30_v6 }
  0x97   :  { %v31_v10 = vsub.f32 %v19_v1, %v29_v8  ;;  %v34_v11 = vsel %vm20_vm0, %v32_v9, 0.0 }
  0x98   :  { %35 = vadd.xlane.f32.xlu1 %v34_v11 }
  0x99   :  { %v33_v12 = vmul.f32 %v31_v10, %v31_v10 }
  0x9b   :  { %v37_v13 = vsel %vm20_vm0, %v33_v12, 0.0 }
  0x9c   :  { %38 = vadd.xlane.f32.xlu1 %v37_v13 }
 0x125   :  { %v36_v17 = vpop.xlane.xlu1 %35 }
 0x126   :  { %v40_v18 = vmul.f32 0.03125, %v36_v17 }
 0x128   :  { %v42_v19 = vadd.f32 1e-05, %v40_v18 }
 0x129   :  { %v39_v20 = vpop.xlane.xlu1 %38 }
 0x12a   :  { %166 = vrsqrt.f32 %v42_v19  ;;  %v41_v21 = vmul.f32 0.03125, %v39_v20 }
 0x12c   :  { %v43_v22 = vadd.f32 1e-05, %v41_v21 }
 0x12e   :  { %168 = vrsqrt.f32 %v43_v22 }
 0x134   :  { %v167_v23 = vpop.eup %166 }
 0x135   :  { %v46_v24 = vmul.f32 %v167_v23, %v30_v6 }
 0x137   :  { %v55_v28 = vmul.f32 %v142_v25, %v46_v24 }
 0x138   :  { %v169_v26 = vpop.eup %168 }
 0x139   :  { %v47_v27 = vmul.f32 %v169_v26, %v31_v10  ;;  %v64_v31 = vadd.f32 %v143_v29, %v55_v28 }
 0x13b   :  { %v56_v30 = vmul.f32 %v142_v25, %v47_v27 }
 0x13d   :  { %v65_v32 = vadd.f32 %v143_v29, %v56_v30 }
 0x13f   :  { %v66_v33 = vpack.c.bf16 %v65_v32, %v64_v31 }
 0x141   :  { %159 = vmatmul.mubr.msk.bf16.vlgmr.msra.gmra.mrb[0].mxu0 %vm20_vm0, %v66_v33 }
 0x214   :  { %v120_v34 = vpop.f32.mrb[0].mxu0 }
 0x215   :  { %v149_v35 = vpack.c.bf16 %v120_v34, %v120_v34  ;;  %v160_v36 = vpop.f32.mrb[1].mxu0 }
 0x216   :  { %v123_v37 = vpop.f32.mrb[2].mxu0 }
 0x217   :  { %136 = vst.msk [vmem:[%s230_s4] sm:$0xf] %vm135_vm2, %v149_v35  ;;  %v150_v38 = vpack.c.bf16 %v123_v37, %v123_v37  ;;  %v161_v39 = vpop.f32.mrb[3].mxu0 }
 0x219   :  { %137 = vst.msk [vmem:[%s230_s4 + $0x4] sm:$0xf] %vm135_vm2, %v150_v38 }

// kernel: wave_block_forward.19
= control target key start
LH: loop header
LB: loop body
LE: loop exit
PB: predicated region body
PF: predicated region fallthrough
CT: control target
= control target key end

     0   :  { %s995_s15 = smov 0   ;;  %s1192_s0 = inlined_call_operand.vmem [shape: bf16[2,42,32], index: 0, kind: input, shape index: {}]   ;;  %s1193_s1 = inlined_call_operand.vmem [shape: bf16[3,96,32], index: 1, kind: input, shape index: {}]   ;;  %s1194_s2 = inlined_call_operand.vmem [shape: f32[1,32], index: 2, kind: input, shape index: {}]   ;;  %s1195_s3 = inlined_call_operand.vmem [shape: f32[1,32], index: 3, kind: input, shape index: {}]   ;;  %s1196_s4 = inlined_call_operand.vmem [shape: f32[2,24,32], index: 4, kind: output, shape index: {}]  }
   0x1 LB: > { %s767_s16 = sadd.s32 4294967295, %s966_s15   ;;  %p771_p0 = scmp.ge.s32.totalorder %s966_s15, 1  ;;  %s966_s15 = sphi %s995_s15, %s14_s15  }
   0x2   : > { %p162_p1 = scmp.lt.s32.totalorder %s966_s15, 3 }
   0x4   : > { %p163_p2 = pnand %p771_p0, %p162_p1 }
   0x5   : > { %p188_p3 = scmp.lt.s32.totalorder (!%p163_p2), %s767_s16, 1  ;;  %v939_v0 = vld [vmem:[%s1193_s1] sm:$0xff] (!%p163_p2)   ;;  %v940_v1 = vld [vmem:[%s1193_s1 + $0x8] sm:$0xff] (!%p163_p2)   ;;  %v941_v2 = vld [vmem:[%s1193_s1 + $0x10] sm:$0xff] (!%p163_p2)   ;;  %vm238_vm0 = vcmask (!%p163_p2), 1046528   ;;  %s968_s9 = smov (!%p163_p2), 64  }
   0x6   : > { %166 = sbr.rel (%p163_p2) target bundleno = 398 (0x18e), region = 36  ;;  %879 = vmatprep.subr.bf16.mxu0 (!%p163_p2), %v939_v0  ;;  %v943_v3 = vld [vmem:[%s1193_s1 + $0x30] sm:$0xff] (!%p163_p2)   ;;  %v942_v7 = vld [vmem:[%s1193_s1 + $0x18] sm:$0xff] (!%p163_p2)   ;;  %vm215_vm1 = vsmask.f32 (!%p163_p2), 7424  ;;  %v944_v24 = vld [vmem:[%s1193_s1 + $0x20] sm:$0xff] (!%p163_p2)  }
   0x7   : > { %880 = vmatpush3.bf16.msra.mxu0 (!%p163_p2), %v939_v0  ;;  %863 = vmatprep.subr.bf16.mxu1 (!%p163_p2), %v943_v3  ;;  %v945_v33 = vld [vmem:[%s1193_s1 + $0x38] sm:$0xff] (!%p163_p2)   ;;  %v947_v39 = vld [vmem:[%s1193_s1 + $0x40] sm:$0xff] (!%p163_p2)   ;;  %v946_v48 = vld [vmem:[%s1193_s1 + $0x28] sm:$0xff] (!%p163_p2)   ;;  %s969_s14 = smov (!%p163_p2), 32   ;;  %vm302_vm2 = vcmask (!%p163_p2), 1042432   ;;  %vm246_vm3 = vcmask (!%p163_p2), 261120  }
   0x8   : > { %881 = vmatprep.subr.bf16.mxu0 (!%p163_p2), %v940_v1  ;;  %864 = vmatpush3.bf16.msra.mxu1 (!%p163_p2), %v943_v3  ;;  %v951_v54 = vld [vmem:[%s1193_s1 + $0x48] sm:$0xff] (!%p163_p2)   ;;  %v950_v56 = vld [vmem:[%s1193_s1 + $0x60] sm:$0xff] (!%p163_p2)   ;;  %v954_v58 = vld [vmem:[%s1193_s1 + $0x50] sm:$0xff] (!%p163_p2)   ;;  %vm252_vm4 = vcmask (!%p163_p2), 523264   ;;  %vm374_vm5 = vcmask (!%p163_p2), 785408   ;;  %vm334_vm6 = vcmask (!%p163_p2), 1044480  }
   0x9   : > { %865 = vmatprep.subr.bf16.mxu1 (!%p163_p2), %v945_v33  ;;  %vm589_vm7 = vcmask (!%p163_p2), 1045504  }
   0xb   : > { %882 = vmatpush3.bf16.msra.mxu0 (!%p163_p2), %v940_v1 }
   0xc   : > { %883 = vmatprep.subr.bf16.mxu0 (!%p163_p2), %v941_v2  ;;  %866 = vmatpush3.bf16.msra.mxu1 (!%p163_p2), %v945_v33  ;;  %v957_v33 = vld [vmem:[%s1193_s1 + $0x78] sm:$0xff] (!%p163_p2)  }
   0xd   : > { %s1198_s16 = smov (!%p188_p3, %s767_s16), 1  ;;  %867 = vmatprep.subr.bf16.mxu1 %v947_v39 }
   0xe   : > { %s918_s21 = smul.u32 24, %s1198_s16 }
   0xf   : > { %884 = vmatpush3.bf16.msra.mxu0 %v941_v2  ;;  %v956_v2 = vld [vmem:[%s1193_s1 + $0x58] sm:$0xff]  }
  0x10   : > { %s1023_s28 = scalar_lea.vmem %s1192_s0, %s918_s21  ;;  %885 = vmatprep.subr.bf16.mxu0 %v942_v7  ;;  %868 = vmatpush3.bf16.msra.mxu1 %v947_v39  ;;  %v958_v39 = vld [vmem:[%s1193_s1 + $0x80] sm:$0xff]   ;;  %s197_s18 = scalar_lea.vmem %s1196_s4, %s918_s21 }
  0x11   : > { %v1026_v4 = vld [vmem:[%s1023_s28 + $0x4] sm:$0xf]  ;;  %v1029_v5 = vld [vmem:[%s1023_s28 + $0x8] sm:$0xf]  ;;  %v202_v6 = vld [vmem:[%s1023_s28 + $0xc] sm:$0x1]  ;;  %869 = vmatprep.subr.bf16.mxu1 %v951_v54 }
  0x12   : > { %v203_v8 = vld [vmem:[%s1023_s28] sm:$0xe]  ;;  %v776_v9 = vcombine.low %v1029_v5, %v202_v6  ;;  %v1039_v11 = vld [vmem:[%s1023_s28 + $0xc] sm:$0xf]  ;;  %v521_v16 = vld [vmem:[%s1023_s28 + $0x10] sm:$0x7]  ;;  %v781_v40 = vcombine.low %v1026_v4, %v1029_v5 }
  0x13   : > { %v199_v10 = vld [vmem:[%s1023_s28] sm:$0xf]  ;;  %v777_v12 = vcombine.low %v203_v8, %v1026_v4  ;;  %v780_v14 = vcombine.low %v1029_v5, %v1039_v11  ;;  %v1048_v15 = vld [vmem:[%s1023_s28 + $0xc] sm:$0xf]  ;;  %v517_v27 = vld [vmem:[%s1023_s28 + $0x4] sm:$0xc]  ;;  %v782_v42 = vcombine.low %v1039_v11, %v1039_v11  ;;  %886 = vmatpush3.bf16.msra.mxu0 %v942_v7 }
  0x14   : > { %v1043_v13 = vcombine.low %v199_v10, %v1026_v4  ;;  %v269_v17 = vld [vmem:[%s1023_s28] sm:$0x8]  ;;  %v240_v18 = vrot.slane %v776_v9, 1  ;;  %v224_v19 = vshll.u32 %v776_v9, 16  ;;  %v1058_v25 = vcombine.low %v1048_v15, %v521_v16  ;;  %v1065_v28 = vld [vmem:[%s1023_s28 + $0x8] sm:$0xf]  ;;  %887 = vmatprep.subr.bf16.mxu0 %v944_v24  ;;  %870 = vmatpush3.bf16.msra.mxu1 %v951_v54 }
  0x15   : > { %v239_v20 = vrot.slane %v777_v12, 1  ;;  %v289_v23 = vshll.u32 %v780_v14, 16  ;;  %v1061_v26 = vcombine.low %v269_v17, %v1026_v4  ;;  %v228_v32 = vshrl.u32 %v776_v9, 16  ;;  %v1086_v44 = vld [vmem:[%s1023_s28 + $0xc] sm:$0x7]  ;;  %871 = vmatprep.subr.bf16.mxu1 %v954_v58 }
  0x16   : > { %v217_v21 = vshrl.u32 %v1043_v13, 16  ;;  %v219_v22 = vshll.u32 %v1043_v13, 16  ;;  %v226_v31 = vrot.slane %v224_v19, 1  ;;  %v293_v35 = vshrl.u32 %v780_v14, 16  ;;  %v1102_v55 = vld [vmem:[%s1023_s28 + $0x10] sm:$0x3] }
  0x17   : > { %v241_v29 = vsel %vm238_vm0, %v239_v20, %v240_v18  ;;  %v291_v34 = vrot.slane %v289_v23, 1  ;;  %v544_v36 = vshll.u32 %v1058_v25, 16  ;;  %v284_v38 = vshll.u32 %v1061_v26, 16  ;;  %888 = vmatpush3.bf16.msra.mxu0 %v944_v24  ;;  %v522_v1 = vld [vmem:[%s1023_s28 + $0x4] sm:$0x8]  ;;  %v953_v23 = vld [vmem:[%s1193_s1 + $0x68] sm:$0xff]  }
  0x18   : > { %v221_v30 = vrot.slane %v219_v22, 1  ;;  %242 = vrot.lane.b32.xlu1 %v241_v29, %s968_s9  ;;  %v548_v41 = vshrl.u32 %v1058_v25, 16  ;;  %v1083_v43 = vcombine.low %v517_v27, %v1065_v28  ;;  %v230_v46 = vor.u32 %v228_v32, %v226_v31  ;;  %889 = vmatprep.subr.bf16.mxu0 %v946_v48  ;;  %v955_v27 = vld [vmem:[%s1193_s1 + $0x70] sm:$0xff]  }
  0x19   : > { %v282_v47 = vshrl.u32 %v1061_v26, 16  ;;  %v779_v49 = vcombine.low %v1029_v5, %v1086_v44  ;;  %v295_v50 = vor.u32 %v293_v35, %v291_v34  ;;  %v546_v51 = vrot.slane %v544_v36, 1  ;;  %872 = vmatpush3.bf16.msra.mxu1 %v954_v58  ;;  %v959_v44 = vld [vmem:[%s1193_s1 + $0x88] sm:$0xff]  }
  0x1a   : > { %v222_v37 = vor.u32 %v221_v30, %v217_v21  ;;  %v286_v52 = vrot.slane %v284_v38, 1  ;;  %v539_v53 = vshll.u32 %v1083_v43, 16  ;;  %v812_v57 = vcombine.low %v1048_v15, %v1102_v55  ;;  %873 = vmatprep.subr.bf16.mxu1 %v956_v2  ;;  %v836_v55 = vld [vmem:[%s1195_s3] ss:$0 sm:$0xff] }
  0x1b   : > { %v303_v59 = vrot.slane %v781_v40, 5  ;;  %v550_v60 = vor.u32 %v548_v41, %v546_v51  ;;  %v304_v61 = vrot.slane %v782_v42, 5  ;;  %v537_v63 = vshrl.u32 %v1083_v43, 16  ;;  %890 = vmatpush3.bf16.msra.mxu0 %v946_v48 }
  0x1c   : > { %v227_v45 = vsel %vm215_vm1, %v222_v37, %v226_v31  ;;  %244 = vrot.lane.b32.xlu1 %v240_v18, %s968_s9  ;;  %v287_v62 = vor.u32 %v286_v52, %v282_v47  ;;  %v541_v0 = vrot.slane %v539_v53, 1  ;;  %895 = vmatprep.subr.bf16.mxu0 %v950_v56  ;;  %v814_v7 = vcombine.low %v522_v1, %v1065_v28  ;;  %v835_v52 = vld [vmem:[%s1194_s2] ss:$0 sm:$0xff] }
  0x1d   : > { %231 = vrot.lane.b32.xlu0 %v227_v45, %s969_s14  ;;  %v305_v4 = vsel %vm302_vm2, %v303_v59, %v304_v61  ;;  %v559_v8 = vrot.slane %v1058_v25, 1  ;;  %874 = vmatpush3.bf16.msra.mxu1 %v956_v2  ;;  %v775_v18 = vcombine.low %v1029_v5, %v1029_v5 }
  0x1e   : > { %v292_v3 = vsel %vm215_vm1, %v287_v62, %v291_v34  ;;  %v542_v6 = vor.u32 %v541_v0, %v537_v63  ;;  %v558_v10 = vrot.slane %v814_v7, 1 }
  0x20   : > { %298 = vrot.lane.b32.xlu1 %v295_v50, %s969_s14  ;;  %v547_v9 = vsel %vm215_vm1, %v542_v6, %v546_v51  ;;  %v560_v11 = vsel %vm238_vm0, %v558_v10, %v559_v8 }
  0x21   : > { %233 = vrot.lane.b32.xlu0 %v230_v46, %s969_s14 }
  0x24   : > { %553 = vrot.lane.b32.xlu1 %v550_v60, %s969_s14 }
  0x25   : > { %306 = vrot.lane.b32.xlu0 %v303_v59, %s968_s9 }
  0x28   : > { %308 = vrot.lane.b32.xlu1 %v305_v4, %s968_s9 }
  0x29   : > { %296 = vrot.lane.b32.xlu0 %v292_v3, %s969_s14 }
  0x2c   : > { %563 = vrot.lane.b32.xlu1 %v559_v8, %s968_s9 }
  0x2d   : > { %551 = vrot.lane.b32.xlu0 %v547_v9, %s969_s14 }
  0x31   : > { %561 = vrot.lane.b32.xlu0 %v560_v11, %s968_s9 }
  0x8a   : > { %v243_v12 = vpop.permute.xlu1 %242 }
  0x8e   : > { %v245_v16 = vpop.permute.xlu1 %244 }
  0x8f   : > { %v232_v14 = vpop.permute.xlu0 %231 }
  0x90   : > { %v248_v17 = vsel %vm246_vm3, %v1043_v13, %v232_v14 }
  0x91   : > { %v254_v19 = vsel %vm252_vm4, %v248_v17, %v243_v12 }
  0x92   : > { %891 = vmatprep.mubr.msk.bf16.mxu0 %vm374_vm5, %v254_v19  ;;  %v299_v21 = vpop.permute.xlu1 %298 }
  0x93   : > { %v234_v20 = vpop.permute.xlu0 %233  ;;  %v314_v28 = vsel %vm246_vm3, %v779_v49, %v299_v21 }
  0x94   : > { %v251_v22 = vsel %vm246_vm3, %v775_v18, %v234_v20 }
  0x95   : > { %v256_v24 = vsel %vm252_vm4, %v251_v22, %v245_v16 }
  0x96   : > { %892 = vmatmul.mubr.msk.bf16.vlgmr.msra.gmra.mrb[0].mxu0 %vm374_vm5, %v256_v24  ;;  %v554_v25 = vpop.permute.xlu1 %553 }
  0x97   : > { %896 = vmatpush3.bf16.msra.mxu0 %v950_v56  ;;  %v307_v13 = vpop.permute.xlu0 %306  ;;  %v569_v36 = vsel %vm246_vm3, %v812_v57, %v554_v25 }
  0x98   : > { %897 = vmatprep.subr.bf16.mxu0 %v953_v23 }
  0x9a   : > { %v309_v30 = vpop.permute.xlu1 %308 }
  0x9b   : > { %898 = vmatpush3.bf16.msra.mxu0 %v953_v23  ;;  %v297_v29 = vpop.permute.xlu0 %296  ;;  %v318_v32 = vsel %vm252_vm4, %v314_v28, %v309_v30 }
  0x9c   : > { %v311_v31 = vsel %vm246_vm3, %v1061_v26, %v297_v29  ;;  %899 = vmatprep.subr.bf16.mxu0 %v955_v27  ;;  %v336_v35 = vrot.slane %v318_v32, 3 }
  0x9d   : > { %v316_v34 = vsel %vm252_vm4, %v311_v31, %v307_v13 }
  0x9e   : > { %v335_v5 = vrot.slane %v316_v34, 3  ;;  %v564_v26 = vpop.permute.xlu1 %563 }
  0x9f   : > { %900 = vmatpush3.bf16.msra.mxu0 %v955_v27  ;;  %v552_v37 = vpop.permute.xlu0 %551  ;;  %v573_v41 = vsel %vm252_vm4, %v569_v36, %v564_v26 }
  0xa0   : > { %v337_v38 = vsel %vm334_vm6, %v335_v5, %v336_v35  ;;  %901 = vmatprep.subr.bf16.mxu0 %v957_v33  ;;  %v566_v40 = vsel %vm246_vm3, %v1083_v43, %v552_v37  ;;  %v591_v45 = vrot.slane %v573_v41, 2 }
  0xa1   : > { %875 = vmatprep.mubr.msk.bf16.mxu1 %vm374_vm5, %v337_v38 }
  0xa2   : > { %876 = vmatmul.mubr.msk.bf16.vlgmr.msra.gmra.mrb[0].mxu1 %vm374_vm5, %v336_v35 }
  0xa3   : > { %902 = vmatpush3.bf16.msra.mxu0 %v957_v33  ;;  %v562_v15 = vpop.permute.xlu0 %561 }
  0xa4   : > { %v571_v42 = vsel %vm252_vm4, %v566_v40, %v562_v15  ;;  %903 = vmatprep.subr.bf16.mxu0 %v958_v39 }
  0xa5   : > { %v590_v46 = vrot.slane %v571_v42, 2 }
  0xa7   : > { %904 = vmatpush3.bf16.msra.mxu0 %v958_v39  ;;  %v592_v43 = vsel %vm589_vm7, %v590_v46, %v591_v45 }
  0xa8   : > { %907 = vmatprep.mubr.msk.bf16.mxu0 %vm374_vm5, %v592_v43  ;;  %905 = vmatprep.subr.bf16.mxu0 %v959_v44 }
  0xab   : > { %906 = vmatpush3.bf16.msra.mxu0 %v959_v44 }
  0xae   : > { %908 = vmatmul.mubr.msk.bf16.vlgmr.msra.gmra.mrb[0].mxu0 %vm374_vm5, %v591_v45 }
 0x175   : > { %v877_v47 = vpop.f32.mrb[0].mxu1 }
 0x176   : > { %v415_v48 = vpop.f32.mrb[1].mxu1 }
 0x177   : > { %v878_v49 = vpop.f32.mrb[2].mxu1 }
 0x178   : > { %v418_v50 = vpop.f32.mrb[3].mxu1 }
 0x181   : > { %v909_v51 = vpop.f32.mrb[0].mxu0 }
 0x182   : > { %v911_v53 = vadd.f32 %v909_v51, %v877_v47  ;;  %v669_v54 = vpop.f32.mrb[1].mxu0 }
 0x183   : > { %v912_v56 = vadd.f32 %v669_v54, %v415_v48  ;;  %v910_v57 = vpop.f32.mrb[2].mxu0 }
 0x184   : > { %v695_v58 = vmul.f32 %v911_v53, %v835_v52  ;;  %v672_v59 = vpop.f32.mrb[3].mxu0 }
 0x185   : > { %v693_v60 = vmul.f32 %v912_v56, %v835_v52  ;;  %v913_v61 = vadd.f32 %v672_v59, %v418_v50 }
 0x186   : > { %v705_v62 = vadd.f32 %v836_v55, %v695_v58 }
 0x187   : > { %v703_v63 = vadd.f32 %v836_v55, %v693_v60  ;;  %v694_v0 = vmul.f32 %v913_v61, %v835_v52 }
 0x188   : > { %v708_v1 = vmax.f32 %v705_v62, 0.0 }
 0x189   : > { %v706_v2 = vmax.f32 %v703_v63, 0.0  ;;  %v704_v3 = vadd.f32 %v836_v55, %v694_v0 }
 0x18a   : > { %711 = vst.msk [vmem:[%s197_s18 + $0x10] sm:$0xff] %vm246_vm3, %v708_v1 }
 0x18b   : > { %709 = vst.msk [vmem:[%s197_s18] sm:$0xff] %vm246_vm3, %v706_v2  ;;  %v707_v4 = vmax.f32 %v704_v3, 0.0 }
 0x18d   : > { %710 = vst.msk [vmem:[%s197_s18 + $0x8] sm:$0xff] %vm246_vm3, %v707_v4 }
 0x18e PF: > { %s14_s15 = sadd.s32 1, %s966_s15  }
 0x18f   : > { %p11_p4 = scmp.ge.s32.totalorder %s14_s15, 4  }
 0x191   :  { %13 = sbr.rel (!%p11_p4) target bundleno = 1 (0x1), region = 68 }

// kernel: wave_block_forward.16
= control target key start
LH: loop header
LB: loop body
LE: loop exit
PB: predicated region body
PF: predicated region fallthrough
CT: control target
= control target key end

     0   :  { %vm22_vm0 = vcmask 261120   ;;  %v528_v1 = vmov 0.0   ;;  %vm410_vm1 = vcmask 257024   ;;  %s730_s1 = inlined_call_operand.vmem [shape: bf16[32,32], index: 1, kind: input, shape index: {}]   ;;  %s731_s0 = inlined_call_operand.vmem [shape: bf16[128,32], index: 0, kind: input, shape index: {}]   ;;  %s732_s2 = inlined_call_operand.vmem [shape: f32[1,32], index: 2, kind: input, shape index: {}]   ;;  %s733_s3 = inlined_call_operand.vmem [shape: f32[1,32], index: 3, kind: input, shape index: {}]   ;;  %s734_s4 = inlined_call_operand.vmem [shape: bf16[128,32], index: 4, kind: output, shape index: {}]  }
   0x1   :  { %v518_v0 = vld [vmem:[%s730_s1] sm:$0xff]   ;;  %25 = vst.msk [vmem:[#allocation2 + $0x10] sm:$0xff] %vm22_vm0, %v528_v1  ;;  %23 = vst.msk [vmem:[#allocation2] sm:$0xff] %vm22_vm0, %v528_v1  ;;  %v519_v2 = vld [vmem:[%s730_s1 + $0x8] sm:$0xff]  }
   0x2   :  { %24 = vst.msk [vmem:[#allocation2 + $0x8] sm:$0xff] %vm22_vm0, %v528_v1  ;;  %26 = vst.msk [vmem:[#allocation2 + $0x18] sm:$0xff] %vm22_vm0, %v528_v1  ;;  %493 = vmatprep.subr.bf16.mxu0 %v518_v0  ;;  %513 = vmatprep.subr.bf16.mxu1 %v518_v0  ;;  %v520_v3 = vld [vmem:[%s731_s0] sm:$0xff]   ;;  %v522_v5 = vld [vmem:[%s731_s0 + $0x8] sm:$0xff]  }
   0x3   :  { %27 = vst.msk [vmem:[#allocation2 + $0x20] sm:$0xff] %vm22_vm0, %v528_v1  ;;  %28 = vst.msk [vmem:[#allocation2 + $0x28] sm:$0xff] %vm22_vm0, %v528_v1  ;;  %494 = vmatpush3.bf16.msra.mxu0 %v518_v0  ;;  %515 = vmatpush3.bf16.msra.mxu1 %v518_v0  ;;  %v521_v4 = vld [vmem:[%s731_s0 + $0x20] sm:$0xff]   ;;  %v523_v6 = vld [vmem:[%s731_s0 + $0x28] sm:$0xff]  }
   0x4   :  { %29 = vst.msk [vmem:[#allocation2 + $0x30] sm:$0xff] %vm22_vm0, %v528_v1  ;;  %30 = vst.msk [vmem:[#allocation2 + $0x38] sm:$0xff] %vm22_vm0, %v528_v1  ;;  %495 = vmatprep.subr.bf16.mxu0 %v519_v2  ;;  %514 = vmatprep.subr.bf16.mxu1 %v519_v2  ;;  %v524_v7 = vld [vmem:[%s731_s0 + $0x10] sm:$0xff]   ;;  %v526_v9 = vld [vmem:[%s731_s0 + $0x18] sm:$0xff]  }
   0x5   :  { %31 = vst.msk [vmem:[#allocation2 + $0x40] sm:$0xff] %vm22_vm0, %v528_v1  ;;  %32 = vst.msk [vmem:[#allocation2 + $0x48] sm:$0xff] %vm22_vm0, %v528_v1  ;;  %497 = vmatprep.mubr.msk.bf16.mxu0 %vm22_vm0, %v520_v3  ;;  %505 = vmatprep.mubr.msk.bf16.mxu1 %vm22_vm0, %v521_v4  ;;  %v525_v8 = vld [vmem:[%s731_s0 + $0x30] sm:$0xff]   ;;  %v527_v10 = vld [vmem:[%s731_s0 + $0x38] sm:$0xff]  }
   0x6   :  { %33 = vst.msk [vmem:[#allocation2 + $0x50] sm:$0xff] %vm22_vm0, %v528_v1  ;;  %34 = vst.msk [vmem:[#allocation2 + $0x58] sm:$0xff] %vm22_vm0, %v528_v1  ;;  %v619_v39 = vld [vmem:[%s732_s2] ss:$0 sm:$0xff] }
   0x7   :  { %35 = vst.msk [vmem:[#allocation2 + $0x60] sm:$0xff] %vm22_vm0, %v528_v1  ;;  %36 = vst.msk [vmem:[#allocation2 + $0x68] sm:$0xff] %vm22_vm0, %v528_v1  ;;  %496 = vmatpush3.bf16.msra.mxu0 %v519_v2  ;;  %516 = vmatpush3.bf16.msra.mxu1 %v519_v2  ;;  %v624_v44 = vld [vmem:[%s733_s3] ss:$0 sm:$0xff] }
   0x8   :  { %37 = vst.msk [vmem:[#allocation2 + $0x70] sm:$0xff] %vm22_vm0, %v528_v1  ;;  %38 = vst.msk [vmem:[#allocation2 + $0x78] sm:$0xff] %vm22_vm0, %v528_v1  ;;  %v57_v11 = vld [vmem:[#allocation2 + $0x10] sm:$0xff]  ;;  %v55_v13 = vld [vmem:[#allocation2] sm:$0xff] }
   0x9   :  { %v58_v17 = vld [vmem:[#allocation2 + $0x18] sm:$0xff]  ;;  %v56_v23 = vld [vmem:[#allocation2 + $0x8] sm:$0xff] }
   0xa   :  { %498 = vmatmul.mubr.msk.bf16.vlgmr.msra.gmra.mrb[0].mxu0 %vm22_vm0, %v522_v5  ;;  %506 = vmatmul.mubr.msk.bf16.vlgmr.msra.gmra.mrb[0].mxu1 %vm22_vm0, %v523_v6  ;;  %v59_v37 = vld [vmem:[#allocation2 + $0x20] sm:$0xff]  ;;  %v60_v49 = vld [vmem:[#allocation2 + $0x28] sm:$0xff] }
   0xb   :  { %501 = vmatprep.mubr.msk.bf16.mxu0 %vm22_vm0, %v524_v7  ;;  %509 = vmatprep.mubr.msk.bf16.mxu1 %vm22_vm0, %v525_v8  ;;  %v61_v35 = vld [vmem:[#allocation2 + $0x30] sm:$0xff]  ;;  %v62_v42 = vld [vmem:[#allocation2 + $0x38] sm:$0xff] }
   0xc   :  { %v63_v14 = vld [vmem:[#allocation2 + $0x40] sm:$0xff]  ;;  %v64_v24 = vld [vmem:[#allocation2 + $0x48] sm:$0xff] }
   0xd   :  { %v65_v12 = vld [vmem:[#allocation2 + $0x50] sm:$0xff]  ;;  %v66_v18 = vld [vmem:[#allocation2 + $0x58] sm:$0xff] }
   0xe   :  { %v67_v38 = vld [vmem:[#allocation2 + $0x60] sm:$0xff]  ;;  %v68_v50 = vld [vmem:[#allocation2 + $0x68] sm:$0xff] }
   0xf   :  { %v69_v36 = vld [vmem:[#allocation2 + $0x70] sm:$0xff]  ;;  %v70_v43 = vld [vmem:[#allocation2 + $0x78] sm:$0xff] }
  0x12   :  { %502 = vmatmul.mubr.msk.bf16.gmra.mrb[4].mxu0 %vm22_vm0, %v526_v9  ;;  %510 = vmatmul.mubr.msk.bf16.gmra.mrb[4].mxu1 %vm22_vm0, %v527_v10 }
  0xdd   :  { %v499_v15 = vpop.f32.mrb[0].mxu0  ;;  %v507_v16 = vpop.f32.mrb[0].mxu1 }
  0xde   :  { %v251_v19 = vadd.f32 %v499_v15, %v57_v11  ;;  %v259_v20 = vadd.f32 %v507_v16, %v65_v12  ;;  %v186_v21 = vpop.f32.mrb[1].mxu0  ;;  %v218_v22 = vpop.f32.mrb[1].mxu1 }
  0xdf   :  { %v249_v25 = vadd.f32 %v186_v21, %v55_v13  ;;  %v257_v26 = vadd.f32 %v218_v22, %v63_v14  ;;  %v500_v27 = vpop.f32.mrb[2].mxu0  ;;  %v508_v28 = vpop.f32.mrb[2].mxu1 }
  0xe0   :  { %267 = vst.msk [vmem:[#allocation2 + $0x10] sm:$0xff] %vm22_vm0, %v251_v19  ;;  %275 = vst.msk [vmem:[#allocation2 + $0x50] sm:$0xff] %vm22_vm0, %v259_v20  ;;  %v252_v29 = vadd.f32 %v500_v27, %v58_v17  ;;  %v260_v30 = vadd.f32 %v508_v28, %v66_v18  ;;  %v189_v31 = vpop.f32.mrb[3].mxu0  ;;  %v221_v32 = vpop.f32.mrb[3].mxu1 }
  0xe1   :  { %265 = vst.msk [vmem:[#allocation2] sm:$0xff] %vm22_vm0, %v249_v25  ;;  %273 = vst.msk [vmem:[#allocation2 + $0x40] sm:$0xff] %vm22_vm0, %v257_v26  ;;  %v250_v33 = vadd.f32 %v189_v31, %v56_v23  ;;  %v258_v34 = vadd.f32 %v221_v32, %v64_v24 }
  0xe2   :  { %268 = vst.msk [vmem:[#allocation2 + $0x18] sm:$0xff] %vm22_vm0, %v252_v29  ;;  %276 = vst.msk [vmem:[#allocation2 + $0x58] sm:$0xff] %vm22_vm0, %v260_v30 }
  0xe3   :  { %266 = vst.msk [vmem:[#allocation2 + $0x8] sm:$0xff] %vm22_vm0, %v250_v33  ;;  %274 = vst.msk [vmem:[#allocation2 + $0x48] sm:$0xff] %vm22_vm0, %v258_v34 }
  0xe5   :  { %v503_v40 = vpop.f32.mrb[4].mxu0  ;;  %v511_v41 = vpop.f32.mrb[4].mxu1 }
  0xe6   :  { %v255_v45 = vadd.f32 %v503_v40, %v61_v35  ;;  %v263_v46 = vadd.f32 %v511_v41, %v69_v36  ;;  %v202_v47 = vpop.f32.mrb[5].mxu0  ;;  %v234_v48 = vpop.f32.mrb[5].mxu1 }
  0xe7   :  { %v286_v51 = vld [vmem:[#allocation2 + $0x10] sm:$0xff]  ;;  %v253_v53 = vadd.f32 %v202_v47, %v59_v37  ;;  %v261_v54 = vadd.f32 %v234_v48, %v67_v38  ;;  %v504_v55 = vpop.f32.mrb[6].mxu0  ;;  %v512_v56 = vpop.f32.mrb[6].mxu1 }
  0xe8   :  { %v294_v52 = vld [vmem:[#allocation2 + $0x50] sm:$0xff]  ;;  %v309_v57 = vmul.f32 %v619_v39, %v286_v51  ;;  %v284_v59 = vld [vmem:[#allocation2] sm:$0xff]  ;;  %271 = vst.msk [vmem:[#allocation2 + $0x30] sm:$0xff] %vm22_vm0, %v255_v45  ;;  %279 = vst.msk [vmem:[#allocation2 + $0x70] sm:$0xff] %vm22_vm0, %v263_v46  ;;  %v256_v61 = vadd.f32 %v504_v55, %v62_v42  ;;  %v264_v62 = vadd.f32 %v512_v56, %v70_v43  ;;  %v205_v63 = vpop.f32.mrb[7].mxu0  ;;  %v237_v0 = vpop.f32.mrb[7].mxu1 }
  0xe9   :  { %v317_v58 = vmul.f32 %v619_v39, %v294_v52  ;;  %v292_v60 = vld [vmem:[#allocation2 + $0x40] sm:$0xff]  ;;  %v307_v1 = vmul.f32 %v619_v39, %v284_v59  ;;  %v287_v3 = vld [vmem:[#allocation2 + $0x18] sm:$0xff]  ;;  %269 = vst.msk [vmem:[#allocation2 + $0x20] sm:$0xff] %vm22_vm0, %v253_v53  ;;  %277 = vst.msk [vmem:[#allocation2 + $0x60] sm:$0xff] %vm22_vm0, %v261_v54  ;;  %v254_v5 = vadd.f32 %v205_v63, %v60_v49 }
  0xea   :  { %v315_v2 = vmul.f32 %v619_v39, %v292_v60  ;;  %v295_v4 = vld [vmem:[#allocation2 + $0x58] sm:$0xff]  ;;  %v262_v6 = vadd.f32 %v237_v0, %v68_v50  ;;  %v332_v7 = vadd.f32 %v624_v44, %v309_v57  ;;  %v310_v9 = vmul.f32 %v619_v39, %v287_v3  ;;  %v285_v11 = vld [vmem:[#allocation2 + $0x8] sm:$0xff]  ;;  %272 = vst.msk [vmem:[#allocation2 + $0x38] sm:$0xff] %vm22_vm0, %v256_v61 }
  0xeb   :  { %v340_v8 = vadd.f32 %v624_v44, %v317_v58  ;;  %v318_v10 = vmul.f32 %v619_v39, %v295_v4  ;;  %v293_v12 = vld [vmem:[#allocation2 + $0x48] sm:$0xff]  ;;  %280 = vst.msk [vmem:[#allocation2 + $0x78] sm:$0xff] %vm22_vm0, %v264_v62  ;;  %v330_v13 = vadd.f32 %v624_v44, %v307_v1  ;;  %v308_v15 = vmul.f32 %v619_v39, %v285_v11 }
  0xec   :  { %v338_v14 = vadd.f32 %v624_v44, %v315_v2  ;;  %v316_v16 = vmul.f32 %v619_v39, %v293_v12  ;;  %270 = vst.msk [vmem:[#allocation2 + $0x28] sm:$0xff] %vm22_vm0, %v254_v5  ;;  %278 = vst.msk [vmem:[#allocation2 + $0x68] sm:$0xff] %vm22_vm0, %v262_v6  ;;  %v469_v17 = vpack.c.bf16 %v332_v7, %v332_v7 }
  0xed   :  { %v477_v18 = vpack.c.bf16 %v340_v8, %v340_v8  ;;  %v333_v19 = vadd.f32 %v624_v44, %v310_v9  ;;  %v341_v20 = vadd.f32 %v624_v44, %v318_v10  ;;  %v467_v21 = vpack.c.bf16 %v330_v13, %v330_v13 }
  0xee   :  { %v475_v22 = vpack.c.bf16 %v338_v14, %v338_v14  ;;  %v331_v23 = vadd.f32 %v624_v44, %v308_v15  ;;  %v339_v24 = vadd.f32 %v624_v44, %v316_v16  ;;  %413 = vst.msk [vmem:[%s734_s4 + $0x8] sm:$0xf] %vm410_vm1, %v469_v17 }
  0xef   :  { %421 = vst.msk [vmem:[%s734_s4 + $0x28] sm:$0xf] %vm410_vm1, %v477_v18  ;;  %v470_v25 = vpack.c.bf16 %v333_v19, %v333_v19  ;;  %v478_v26 = vpack.c.bf16 %v341_v20, %v341_v20  ;;  %411 = vst.msk [vmem:[%s734_s4] sm:$0xf] %vm410_vm1, %v467_v21  ;;  %v290_v29 = vld [vmem:[#allocation2 + $0x30] sm:$0xff] }
  0xf0   :  { %419 = vst.msk [vmem:[%s734_s4 + $0x20] sm:$0xf] %vm410_vm1, %v475_v22  ;;  %v468_v27 = vpack.c.bf16 %v331_v23, %v331_v23  ;;  %v476_v28 = vpack.c.bf16 %v339_v24, %v339_v24  ;;  %v298_v30 = vld [vmem:[#allocation2 + $0x70] sm:$0xff]  ;;  %v313_v31 = vmul.f32 %v619_v39, %v290_v29  ;;  %v288_v33 = vld [vmem:[#allocation2 + $0x20] sm:$0xff] }
  0xf1   :  { %414 = vst.msk [vmem:[%s734_s4 + $0xc] sm:$0xf] %vm410_vm1, %v470_v25  ;;  %422 = vst.msk [vmem:[%s734_s4 + $0x2c] sm:$0xf] %vm410_vm1, %v478_v26  ;;  %v321_v32 = vmul.f32 %v619_v39, %v298_v30  ;;  %v296_v34 = vld [vmem:[#allocation2 + $0x60] sm:$0xff]  ;;  %v311_v35 = vmul.f32 %v619_v39, %v288_v33  ;;  %v291_v37 = vld [vmem:[#allocation2 + $0x38] sm:$0xff] }
  0xf2   :  { %412 = vst.msk [vmem:[%s734_s4 + $0x4] sm:$0xf] %vm410_vm1, %v468_v27  ;;  %420 = vst.msk [vmem:[%s734_s4 + $0x24] sm:$0xf] %vm410_vm1, %v476_v28  ;;  %v319_v36 = vmul.f32 %v619_v39, %v296_v34  ;;  %v299_v38 = vld [vmem:[#allocation2 + $0x78] sm:$0xff]  ;;  %v336_v40 = vadd.f32 %v624_v44, %v313_v31  ;;  %v314_v42 = vmul.f32 %v619_v39, %v291_v37 }
  0xf3   :  { %v344_v41 = vadd.f32 %v624_v44, %v321_v32  ;;  %v322_v43 = vmul.f32 %v619_v39, %v299_v38  ;;  %v289_v45 = vld [vmem:[#allocation2 + $0x28] sm:$0xff]  ;;  %v334_v47 = vadd.f32 %v624_v44, %v311_v35 }
  0xf4   :  { %v297_v46 = vld [vmem:[#allocation2 + $0x68] sm:$0xff]  ;;  %v342_v48 = vadd.f32 %v624_v44, %v319_v36  ;;  %v312_v49 = vmul.f32 %v619_v39, %v289_v45  ;;  %v473_v51 = vpack.c.bf16 %v336_v40, %v336_v40  ;;  %v337_v53 = vadd.f32 %v624_v44, %v314_v42 }
  0xf5   :  { %v320_v50 = vmul.f32 %v619_v39, %v297_v46  ;;  %v481_v52 = vpack.c.bf16 %v344_v41, %v344_v41  ;;  %v345_v54 = vadd.f32 %v624_v44, %v322_v43  ;;  %v471_v55 = vpack.c.bf16 %v334_v47, %v334_v47 }
  0xf6   :  { %v479_v56 = vpack.c.bf16 %v342_v48, %v342_v48  ;;  %v335_v57 = vadd.f32 %v624_v44, %v312_v49  ;;  %417 = vst.msk [vmem:[%s734_s4 + $0x18] sm:$0xf] %vm410_vm1, %v473_v51  ;;  %v474_v39 = vpack.c.bf16 %v337_v53, %v337_v53 }
  0xf7   :  { %v343_v58 = vadd.f32 %v624_v44, %v320_v50  ;;  %425 = vst.msk [vmem:[%s734_s4 + $0x38] sm:$0xf] %vm410_vm1, %v481_v52  ;;  %v482_v59 = vpack.c.bf16 %v345_v54, %v345_v54  ;;  %415 = vst.msk [vmem:[%s734_s4 + $0x10] sm:$0xf] %vm410_vm1, %v471_v55 }
  0xf8   :  { %423 = vst.msk [vmem:[%s734_s4 + $0x30] sm:$0xf] %vm410_vm1, %v479_v56  ;;  %v472_v44 = vpack.c.bf16 %v335_v57, %v335_v57  ;;  %418 = vst.msk [vmem:[%s734_s4 + $0x1c] sm:$0xf] %vm410_vm1, %v474_v39 }
  0xf9   :  { %v480_v60 = vpack.c.bf16 %v343_v58, %v343_v58  ;;  %426 = vst.msk [vmem:[%s734_s4 + $0x3c] sm:$0xf] %vm410_vm1, %v482_v59 }
  0xfa   :  { %416 = vst.msk [vmem:[%s734_s4 + $0x14] sm:$0xf] %vm410_vm1, %v472_v44 }
  0xfb   :  { %424 = vst.msk [vmem:[%s734_s4 + $0x34] sm:$0xf] %vm410_vm1, %v480_v60 }

// kernel: wave_block_forward.20
= control target key start
LH: loop header
LB: loop body
LE: loop exit
PB: predicated region body
PF: predicated region fallthrough
CT: control target
= control target key end

     0   :  { %s323_s10 = smov 120   ;;  %s324_s23 = smov 112   ;;  %vm168_vm0 = vcmask 64512   ;;  %vm193_vm1 = vcmask 123904   ;;  %s651_s0 = inlined_call_operand.vmem [shape: f32[8,6,32], index: 0, kind: input, shape index: {}]   ;;  %s652_s1 = inlined_call_operand.vmem [shape: bf16[8,2,4,16], index: 1, kind: output, shape index: {}]  }
   0x1   :  { %v10_v0 = vld [vmem:[%s651_s0 + $0x10] sm:$0x3f]  ;;  %v8_v1 = vld [vmem:[%s651_s0] sm:$0x3f]  ;;  %v11_v2 = vld [vmem:[%s651_s0 + $0x18] sm:$0x3f] }
   0x2   :  { %28 = vrot.lane.b32.xlu1 %v10_v0, %s323_s10  ;;  %24 = vrot.lane.b32.xlu0 %v8_v1, %s323_s10  ;;  %v9_v3 = vld [vmem:[%s651_s0 + $0x8] sm:$0x3f]  ;;  %v12_v5 = vld [vmem:[%s651_s0 + $0x20] sm:$0x3f]  ;;  %s325_s24 = smov 104  }
   0x3   :  { %v13_v4 = vld [vmem:[%s651_s0 + $0x28] sm:$0x3f]  ;;  %v15_v6 = vld [vmem:[%s651_s0 + $0x38] sm:$0x3f]  ;;  %v14_v7 = vld [vmem:[%s651_s0 + $0x30] sm:$0x3f] }
   0x4   :  { %s326_s0 = smov 8  }
   0x6   :  { %30 = vrot.lane.b32.xlu1 %v11_v2, %s323_s10  ;;  %26 = vrot.lane.b32.xlu0 %v9_v3, %s323_s10 }
   0xa   :  { %34 = vrot.lane.b32.xlu1 %v13_v4, %s323_s10  ;;  %32 = vrot.lane.b32.xlu0 %v12_v5, %s323_s10 }
   0xe   :  { %38 = vrot.lane.b32.xlu1 %v15_v6, %s323_s10  ;;  %36 = vrot.lane.b32.xlu0 %v14_v7, %s323_s10 }
  0x12   :  { %58 = vrot.lane.b32.xlu1 %v9_v3, %s324_s23  ;;  %56 = vrot.lane.b32.xlu0 %v8_v1, %s324_s23 }
  0x16   :  { %62 = vrot.lane.b32.xlu1 %v11_v2, %s324_s23  ;;  %60 = vrot.lane.b32.xlu0 %v10_v0, %s324_s23 }
  0x1a   :  { %66 = vrot.lane.b32.xlu1 %v13_v4, %s324_s23  ;;  %64 = vrot.lane.b32.xlu0 %v12_v5, %s324_s23 }
  0x1e   :  { %70 = vrot.lane.b32.xlu1 %v15_v6, %s324_s23  ;;  %68 = vrot.lane.b32.xlu0 %v14_v7, %s324_s23 }
  0x22   :  { %90 = vrot.lane.b32.xlu1 %v9_v3, %s325_s24  ;;  %88 = vrot.lane.b32.xlu0 %v8_v1, %s325_s24 }
  0x26   :  { %94 = vrot.lane.b32.xlu1 %v11_v2, %s325_s24  ;;  %92 = vrot.lane.b32.xlu0 %v10_v0, %s325_s24 }
  0x2a   :  { %98 = vrot.lane.b32.xlu1 %v13_v4, %s325_s24  ;;  %96 = vrot.lane.b32.xlu0 %v12_v5, %s325_s24 }
  0x2e   :  { %102 = vrot.lane.b32.xlu1 %v15_v6, %s325_s24  ;;  %100 = vrot.lane.b32.xlu0 %v14_v7, %s325_s24 }
  0x74   :  { %v29_v8 = vpop.permute.xlu1 %28  ;;  %v25_v9 = vpop.permute.xlu0 %24 }
  0x75   :  { %v48_v18 = vadd.f32 %v25_v9, %v8_v1  ;;  %v363_v19 = vsub.f32 %v8_v1, %v25_v9  ;;  %v50_v28 = vadd.f32 %v29_v8, %v10_v0  ;;  %v381_v29 = vsub.f32 %v10_v0, %v29_v8 }
  0x78   :  { %v31_v10 = vpop.permute.xlu1 %30  ;;  %v27_v11 = vpop.permute.xlu0 %26 }
  0x79   :  { %v49_v16 = vadd.f32 %v27_v11, %v9_v3  ;;  %v361_v17 = vsub.f32 %v9_v3, %v27_v11  ;;  %v51_v26 = vadd.f32 %v31_v10, %v11_v2  ;;  %v379_v27 = vsub.f32 %v11_v2, %v31_v10 }
  0x7c   :  { %v35_v12 = vpop.permute.xlu1 %34  ;;  %v33_v13 = vpop.permute.xlu0 %32 }
  0x7d   :  { %v53_v36 = vadd.f32 %v35_v12, %v13_v4  ;;  %v397_v37 = vsub.f32 %v13_v4, %v35_v12  ;;  %v52_v38 = vadd.f32 %v33_v13, %v12_v5  ;;  %v399_v39 = vsub.f32 %v12_v5, %v33_v13 }
  0x80   :  { %v39_v14 = vpop.permute.xlu1 %38  ;;  %v37_v15 = vpop.permute.xlu0 %36 }
  0x81   :  { %v55_v46 = vadd.f32 %v39_v14, %v15_v6  ;;  %v415_v47 = vsub.f32 %v15_v6, %v39_v14  ;;  %v54_v48 = vadd.f32 %v37_v15, %v14_v7  ;;  %v417_v49 = vsub.f32 %v14_v7, %v37_v15 }
  0x84   :  { %v365_v20 = vpop.permute.xlu1 %58  ;;  %v367_v21 = vpop.permute.xlu0 %56 }
  0x85   :  { %v81_v22 = vadd.f32 %v365_v20, %v49_v16  ;;  %v372_v23 = vadd.f32 %v361_v17, %v365_v20  ;;  %v80_v24 = vadd.f32 %v367_v21, %v48_v18  ;;  %v377_v25 = vadd.f32 %v363_v19, %v367_v21 }
  0x86   :  { %v121_v56 = vsub.f32 %v49_v16, %v365_v20  ;;  %v120_v57 = vsub.f32 %v48_v18, %v367_v21 }
  0x88   :  { %v383_v30 = vpop.permute.xlu1 %62  ;;  %v385_v31 = vpop.permute.xlu0 %60 }
  0x89   :  { %v83_v32 = vadd.f32 %v383_v30, %v51_v26  ;;  %v390_v33 = vadd.f32 %v379_v27, %v383_v30  ;;  %v82_v34 = vadd.f32 %v385_v31, %v50_v28  ;;  %v395_v35 = vadd.f32 %v381_v29, %v385_v31 }
  0x8a   :  { %v123_v2 = vsub.f32 %v51_v26, %v383_v30  ;;  %v122_v3 = vsub.f32 %v50_v28, %v385_v31 }
  0x8c   :  { %v401_v40 = vpop.permute.xlu1 %66  ;;  %v403_v41 = vpop.permute.xlu0 %64 }
  0x8d   :  { %v85_v42 = vadd.f32 %v401_v40, %v53_v36  ;;  %v408_v43 = vadd.f32 %v397_v37, %v401_v40  ;;  %v84_v44 = vadd.f32 %v403_v41, %v52_v38  ;;  %v413_v45 = vadd.f32 %v399_v39, %v403_v41 }
  0x8e   :  { %v125_v12 = vsub.f32 %v53_v36, %v401_v40  ;;  %v124_v13 = vsub.f32 %v52_v38, %v403_v41 }
  0x90   :  { %v419_v50 = vpop.permute.xlu1 %70  ;;  %v421_v51 = vpop.permute.xlu0 %68 }
  0x91   :  { %v424_v52 = vadd.f32 %v419_v50, %v55_v46  ;;  %v428_v53 = vadd.f32 %v415_v47, %v419_v50  ;;  %v431_v54 = vadd.f32 %v421_v51, %v54_v48  ;;  %v435_v55 = vadd.f32 %v417_v49, %v421_v51 }
  0x94   :  { %v439_v58 = vpop.permute.xlu1 %90  ;;  %v441_v59 = vpop.permute.xlu0 %88 }
  0x95   :  { %v444_v60 = vadd.f32 %v439_v58, %v81_v22  ;;  %v219_v61 = vsub.f32 %v372_v23, %v439_v58  ;;  %v449_v62 = vadd.f32 %v441_v59, %v80_v24  ;;  %v218_v63 = vsub.f32 %v377_v25, %v441_v59 }
  0x96   :  { %v129_v0 = vsub.f32 %v121_v56, %v439_v58  ;;  %v128_v1 = vsub.f32 %v120_v57, %v441_v59  ;;  %v227_v56 = vsub.f32 %v361_v17, %v365_v20  ;;  %v231_v20 = vsub.f32 %v397_v37, %v401_v40 }
  0x98   :  { %146 = vrot.lane.b32.xlu1 %v129_v0, %s326_s0  ;;  %144 = vrot.lane.b32.xlu0 %v128_v1, %s326_s0  ;;  %v459_v4 = vpop.permute.xlu1 %94  ;;  %v461_v5 = vpop.permute.xlu0 %92  ;;  %v229_v0 = vsub.f32 %v379_v27, %v383_v30  ;;  %v228_v1 = vsub.f32 %v381_v29, %v385_v31  ;;  %v233_v30 = vsub.f32 %v415_v47, %v419_v50 }
  0x99   :  { %v464_v6 = vadd.f32 %v459_v4, %v83_v32  ;;  %v221_v7 = vsub.f32 %v390_v33, %v459_v4  ;;  %v469_v8 = vadd.f32 %v461_v5, %v82_v34  ;;  %v220_v9 = vsub.f32 %v395_v35, %v461_v5 }
  0x9a   :  { %v131_v10 = vsub.f32 %v123_v2, %v459_v4  ;;  %v130_v11 = vsub.f32 %v122_v3, %v461_v5  ;;  %v127_v32 = vsub.f32 %v55_v46, %v419_v50  ;;  %v126_v34 = vsub.f32 %v54_v48, %v421_v51 }
  0x9b   :  { %v226_v46 = vsub.f32 %v363_v19, %v367_v21  ;;  %v235_v48 = vadd.f32 %v227_v56, %v439_v58  ;;  %v237_v17 = vadd.f32 %v229_v0, %v459_v4  ;;  %v236_v19 = vadd.f32 %v228_v1, %v461_v5 }
  0x9c   :  { %150 = vrot.lane.b32.xlu1 %v131_v10, %s326_s0  ;;  %148 = vrot.lane.b32.xlu0 %v130_v11, %s326_s0  ;;  %v479_v14 = vpop.permute.xlu1 %98  ;;  %v481_v15 = vpop.permute.xlu0 %96  ;;  %v230_v21 = vsub.f32 %v399_v39, %v403_v41  ;;  %v232_v31 = vsub.f32 %v417_v49, %v421_v51 }
  0x9d   :  { %v484_v16 = vadd.f32 %v479_v14, %v85_v42  ;;  %v223_v18 = vsub.f32 %v408_v43, %v479_v14  ;;  %v489_v22 = vadd.f32 %v481_v15, %v84_v44  ;;  %v222_v24 = vsub.f32 %v413_v45, %v481_v15 }
  0x9e   :  { %v133_v26 = vsub.f32 %v125_v12, %v479_v14  ;;  %v132_v28 = vsub.f32 %v124_v13, %v481_v15  ;;  %v234_v57 = vadd.f32 %v226_v46, %v441_v59  ;;  %v239_v27 = vadd.f32 %v231_v20, %v479_v14 }
  0x9f   :  { %v238_v29 = vadd.f32 %v230_v21, %v481_v15 }
  0xa0   :  { %154 = vrot.lane.b32.xlu1 %v133_v26, %s326_s0  ;;  %152 = vrot.lane.b32.xlu0 %v132_v28, %s326_s0  ;;  %v499_v36 = vpop.permute.xlu1 %102  ;;  %v501_v38 = vpop.permute.xlu0 %100 }
  0xa1   :  { %v135_v42 = vsub.f32 %v127_v32, %v499_v36  ;;  %v134_v44 = vsub.f32 %v126_v34, %v501_v38  ;;  %v241_v37 = vadd.f32 %v233_v30, %v499_v36  ;;  %v240_v39 = vadd.f32 %v232_v31, %v501_v38 }
  0xa2   :  { %v119_v56 = vadd.f32 %v499_v36, %v424_v52  ;;  %v225_v43 = vsub.f32 %v428_v53, %v499_v36  ;;  %v224_v45 = vsub.f32 %v435_v55, %v501_v38 }
  0xa4   :  { %158 = vrot.lane.b32.xlu1 %v135_v42, %s326_s0  ;;  %156 = vrot.lane.b32.xlu0 %v134_v44, %s326_s0 }
  0xa8   :  { %252 = vrot.lane.b32.xlu1 %v235_v48, %s326_s0  ;;  %250 = vrot.lane.b32.xlu0 %v234_v57, %s326_s0 }
  0xac   :  { %256 = vrot.lane.b32.xlu1 %v237_v17, %s326_s0  ;;  %254 = vrot.lane.b32.xlu0 %v236_v19, %s326_s0 }
  0xb0   :  { %260 = vrot.lane.b32.xlu1 %v239_v27, %s326_s0  ;;  %258 = vrot.lane.b32.xlu0 %v238_v29, %s326_s0 }
  0xb4   :  { %264 = vrot.lane.b32.xlu1 %v241_v37, %s326_s0  ;;  %262 = vrot.lane.b32.xlu0 %v240_v39, %s326_s0 }
 0x10a   :  { %v147_v40 = vpop.permute.xlu1 %146  ;;  %v145_v41 = vpop.permute.xlu0 %144 }
 0x10b   :  { %v170_v47 = vsel %vm168_vm0, %v444_v60, %v147_v40  ;;  %v169_v49 = vsel %vm168_vm0, %v449_v62, %v145_v41 }
 0x10c   :  { %v178_v50 = vmul.f32 0.5, %v170_v47  ;;  %v177_v51 = vmul.f32 0.5, %v169_v49 }
 0x10e   :  { %v186_v2 = vpack.c.bf16 %v178_v50, %v178_v50  ;;  %v185_v3 = vpack.c.bf16 %v177_v51, %v177_v51  ;;  %v151_v10 = vpop.permute.xlu1 %150  ;;  %v149_v11 = vpop.permute.xlu0 %148 }
 0x10f   :  { %v172_v12 = vsel %vm168_vm0, %v464_v6, %v151_v10  ;;  %v171_v13 = vsel %vm168_vm0, %v469_v8, %v149_v11 }
 0x110   :  { %195 = vst.msk [vmem:[%s652_s1 + $0x4] sm:$0x3] %vm193_vm1, %v186_v2  ;;  %194 = vst.msk [vmem:[%s652_s1] sm:$0x3] %vm193_vm1, %v185_v3  ;;  %v180_v60 = vmul.f32 0.5, %v172_v12  ;;  %v179_v62 = vmul.f32 0.5, %v171_v13 }
 0x112   :  { %v188_v26 = vpack.c.bf16 %v180_v60, %v180_v60  ;;  %v187_v28 = vpack.c.bf16 %v179_v62, %v179_v62  ;;  %v155_v32 = vpop.permute.xlu1 %154  ;;  %v153_v34 = vpop.permute.xlu0 %152 }
 0x113   :  { %v174_v6 = vsel %vm168_vm0, %v484_v16, %v155_v32  ;;  %v173_v8 = vsel %vm168_vm0, %v489_v22, %v153_v34  ;;  %v118_v16 = vadd.f32 %v501_v38, %v431_v54 }
 0x114   :  { %197 = vst.msk [vmem:[%s652_s1 + $0xc] sm:$0x3] %vm193_vm1, %v188_v26  ;;  %196 = vst.msk [vmem:[%s652_s1 + $0x8] sm:$0x3] %vm193_vm1, %v187_v28  ;;  %v182_v42 = vmul.f32 0.5, %v174_v6  ;;  %v181_v44 = vmul.f32 0.5, %v173_v8 }
 0x116   :  { %v190_v46 = vpack.c.bf16 %v182_v42, %v182_v42  ;;  %v189_v22 = vpack.c.bf16 %v181_v44, %v181_v44  ;;  %v159_v48 = vpop.permute.xlu1 %158  ;;  %v157_v57 = vpop.permute.xlu0 %156 }
 0x117   :  { %v176_v0 = vsel %vm168_vm0, %v119_v56, %v159_v48  ;;  %v175_v1 = vsel %vm168_vm0, %v118_v16, %v157_v57 }
 0x118   :  { %199 = vst.msk [vmem:[%s652_s1 + $0x14] sm:$0x3] %vm193_vm1, %v190_v46  ;;  %198 = vst.msk [vmem:[%s652_s1 + $0x10] sm:$0x3] %vm193_vm1, %v189_v22  ;;  %v184_v52 = vmul.f32 0.5, %v176_v0  ;;  %v183_v54 = vmul.f32 0.5, %v175_v1 }
 0x11a   :  { %v192_v17 = vpack.c.bf16 %v184_v52, %v184_v52  ;;  %v191_v19 = vpack.c.bf16 %v183_v54, %v183_v54  ;;  %v253_v20 = vpop.permute.xlu1 %252  ;;  %v251_v21 = vpop.permute.xlu0 %250 }
 0x11b   :  { %v275_v27 = vsel %vm168_vm0, %v219_v61, %v253_v20  ;;  %v274_v29 = vsel %vm168_vm0, %v218_v63, %v251_v21 }
 0x11c   :  { %201 = vst.msk [vmem:[%s652_s1 + $0x1c] sm:$0x3] %vm193_vm1, %v192_v17  ;;  %200 = vst.msk [vmem:[%s652_s1 + $0x18] sm:$0x3] %vm193_vm1, %v191_v19  ;;  %v283_v30 = vmul.f32 0.5, %v275_v27  ;;  %v282_v31 = vmul.f32 0.5, %v274_v29 }
 0x11e   :  { %v291_v23 = vpack.c.bf16 %v283_v30, %v283_v30  ;;  %v290_v58 = vpack.c.bf16 %v282_v31, %v282_v31  ;;  %v257_v61 = vpop.permute.xlu1 %256  ;;  %v255_v37 = vpop.permute.xlu0 %254 }
 0x11f   :  { %v277_v25 = vsel %vm168_vm0, %v221_v7, %v257_v61  ;;  %v276_v59 = vsel %vm168_vm0, %v220_v9, %v255_v37 }
 0x120   :  { %312 = vst.msk [vmem:[%s652_s1 + $0x6] sm:$0x3] %vm193_vm1, %v291_v23  ;;  %311 = vst.msk [vmem:[%s652_s1 + $0x2] sm:$0x3] %vm193_vm1, %v290_v58  ;;  %v285_v63 = vmul.f32 0.5, %v277_v25  ;;  %v284_v39 = vmul.f32 0.5, %v276_v59 }
 0x122   :  { %v293_v33 = vpack.c.bf16 %v285_v63, %v285_v63  ;;  %v292_v4 = vpack.c.bf16 %v284_v39, %v284_v39  ;;  %v261_v7 = vpop.permute.xlu1 %260  ;;  %v259_v40 = vpop.permute.xlu0 %258 }
 0x123   :  { %v279_v35 = vsel %vm168_vm0, %v223_v18, %v261_v7  ;;  %v278_v5 = vsel %vm168_vm0, %v222_v24, %v259_v40 }
 0x124   :  { %314 = vst.msk [vmem:[%s652_s1 + $0xe] sm:$0x3] %vm193_vm1, %v293_v33  ;;  %313 = vst.msk [vmem:[%s652_s1 + $0xa] sm:$0x3] %vm193_vm1, %v292_v4  ;;  %v287_v9 = vmul.f32 0.5, %v279_v35  ;;  %v286_v41 = vmul.f32 0.5, %v278_v5 }
 0x126   :  { %v295_v14 = vpack.c.bf16 %v287_v9, %v287_v9  ;;  %v294_v15 = vpack.c.bf16 %v286_v41, %v286_v41  ;;  %v265_v18 = vpop.permute.xlu1 %264  ;;  %v263_v24 = vpop.permute.xlu0 %262 }
 0x127   :  { %v281_v47 = vsel %vm168_vm0, %v225_v43, %v265_v18  ;;  %v280_v49 = vsel %vm168_vm0, %v224_v45, %v263_v24 }
 0x128   :  { %316 = vst.msk [vmem:[%s652_s1 + $0x16] sm:$0x3] %vm193_vm1, %v295_v14  ;;  %315 = vst.msk [vmem:[%s652_s1 + $0x12] sm:$0x3] %vm193_vm1, %v294_v15  ;;  %v289_v53 = vmul.f32 0.5, %v281_v47  ;;  %v288_v55 = vmul.f32 0.5, %v280_v49 }
 0x12a   :  { %v297_v36 = vpack.c.bf16 %v289_v53, %v289_v53  ;;  %v296_v38 = vpack.c.bf16 %v288_v55, %v288_v55 }
 0x12c   :  { %318 = vst.msk [vmem:[%s652_s1 + $0x1e] sm:$0x3] %vm193_vm1, %v297_v36  ;;  %317 = vst.msk [vmem:[%s652_s1 + $0x1a] sm:$0x3] %vm193_vm1, %v296_v38 }

// kernel: wave_block_forward.22
= control target key start
LH: loop header
LB: loop body
LE: loop exit
PB: predicated region body
PF: predicated region fallthrough
CT: control target
= control target key end

     0   :  { %s2198_s9 = smov 0   ;;  %s2200_s10 = smov 0   ;;  %s2716_s0 = inlined_call_operand.vmem [shape: bf16[2,64,32], index: 0, kind: input, shape index: {}]   ;;  %s2717_s1 = inlined_call_operand.vmem [shape: bf16[2,4,2,32], index: 1, kind: input, shape index: {}]   ;;  %s2718_s2 = inlined_call_operand.vmem [shape: bf16[2,64,32], index: 2, kind: output, shape index: {}]  }
   0x1   :  { %s2202_s11 = smov 0  }
   0x2 LB: > { %s24_s12 = sadd.s32 1, %s2170_s10  ;;  %p1711_p0 = scmp.ge.s32.totalorder %s2174_s11, 1  ;;  %s2174_s11 = sphi %s2202_s11, %s12_s11   ;;  %s2170_s10 = sphi %s2200_s10, %s2720_s10   ;;  %s2166_s9 = sphi %s2198_s9, %s2719_s9  }
   0x3   : > { %p26_p1 = scmp.ge.s32.totalorder %s24_s12, 2  ;;  %p142_p2 = scmp.lt.s32.totalorder %s2174_s11, 3 }
   0x5   : > { %s2722_s12 = smov (%p26_p1, %s24_s12), 0  ;;  %p143_p3 = pnand %p1711_p0, %p142_p2 }
   0x6   : > { %p177_p4 = scmp.lt.s32.totalorder (!%p143_p3), %s2166_s9, 1  ;;  %v247_v0 = vlaneseq (!%p143_p3)  ;;  %v2176_v1 = vmov (!%p143_p3), 1966171168   ;;  %vm307_vm0 = vcmask (!%p143_p3), 64512   ;;  %vm298_vm1 = vcmask (!%p143_p3), 1041409   ;;  %s2177_s21 = smov (!%p143_p3), 120  }
   0x7   : > { %146 = sbr.rel (%p143_p3) target bundleno = 1538 (0x602), region = 28  ;;  %v245_v2 = vunpack.c.l.s4 (!%p143_p3), %v2176_v1  ;;  %vm301_vm2 = vcmask (!%p143_p3), 1042434   ;;  %vm304_vm3 = vcmask (!%p143_p3), 1043459   ;;  %vm388_vm4 = vcmask (!%p143_p3), 31744   ;;  %s2178_s22 = smov (!%p143_p3), 112  }
   0x8   : > { %v248_v3 = vshrl.u32 (!%p143_p3), %v247_v0, 7  ;;  %vm500_vm5 = vcmask (!%p143_p3), 1041408   ;;  %s2179_s23 = smov (!%p143_p3), 104   ;;  %s2180_s24 = smov (!%p143_p3), 8   ;;  %vm1549_vm6 = vcmask (!%p143_p3), 130048   ;;  %vm1558_vm7 = vcmask (!%p143_p3), 195584  }
   0x9   : > { %v246_v4 = vunpack.c.0.s8 (!%p143_p3), %v245_v2  ;;  %s2181_s25 = smov (!%p143_p3), 16   ;;  %s2182_s26 = smov (!%p143_p3), 24   ;;  %vm1599_vm8 = vcmask (!%p143_p3), 257024  }
   0xb   : > { %v249_v5 = vsub.s32 (!%p143_p3), %v246_v4, %v248_v3 }
   0xe   : > { %s2724_s9 = smov (!%p177_p4, %s2166_s9), 1 }
   0xf   : > { %s1779_s13 = sshll.u32 %s2724_s9, 5  ;;  %s1714_s14 = sshll.u32 %s2724_s9, 2 }
  0x10   : > { %s2225_s17 = scalar_lea.vmem %s2716_s0, %s1779_s13  ;;  %s189_s20 = scalar_lea.vmem %s2717_s1, %s1714_s14 }
  0x11   : > { %v1721_v6 = vld.sshfl [vmem:[%s189_s20] sm:$0x1 pattern:$0x75316420]  ;;  %v2009_v27 = vld [vmem:[%s2225_s17 + $0x8] sm:$0xff]   ;;  %v2010_v28 = vld [vmem:[%s2225_s17 + $0x10] sm:$0xff]   ;;  %s2669_s29 = scalar_lea.vmem %s2718_s2, %s1779_s13 }
  0x12   : > { %v1722_v7 = vld.sshfl [vmem:[%s189_s20 + $0x1] sm:$0x1 pattern:$0x75316420]  ;;  %v250_v8 = vrot.slane %v1721_v6, %v249_v5  ;;  %v2011_v29 = vld [vmem:[%s2225_s17 + $0x18] sm:$0xff]  }
  0x13   : > { %v1723_v9 = vld.sshfl [vmem:[%s189_s20 + $0x2] sm:$0x1 pattern:$0x75316420]  ;;  %v264_v10 = vrot.slane %v1722_v7, %v249_v5 }
  0x14   : > { %v2008_v11 = vld [vmem:[%s2225_s17] sm:$0xff]   ;;  %v278_v13 = vrot.slane %v1723_v9, %v249_v5  ;;  %v2231_v15 = vunpack.c.l.b16 %v250_v8 }
  0x15   : > { %v1724_v12 = vld.sshfl [vmem:[%s189_s20 + $0x3] sm:$0x1 pattern:$0x75316420]  ;;  %v2233_v16 = vunpack.c.l.b16 %v264_v10  ;;  %1831 = vmatprep.mubr.msk.bf16.mxu0 %vm307_vm0, %v2008_v11 }
  0x16   : > { %v292_v14 = vrot.slane %v1724_v12, %v249_v5  ;;  %v2236_v17 = vunpack.c.l.b16 %v278_v13 }
  0x17   : > { %v297_v19 = vrot.slane %v2233_v16, 7 }
  0x18   : > { %v2238_v18 = vunpack.c.l.b16 %v292_v14  ;;  %v300_v20 = vrot.slane %v2236_v17, 6 }
  0x19   : > { %v299_v21 = vsel %vm298_vm1, %v297_v19, %v2231_v15 }
  0x1a   : > { %v303_v22 = vrot.slane %v2238_v18, 5  ;;  %v302_v23 = vsel %vm301_vm2, %v300_v20, %v299_v21 }
  0x1c   : > { %v305_v24 = vsel %vm304_vm3, %v303_v22, %v302_v23 }
  0x1d   : > { %v2247_v25 = vpack.c.b16 %v305_v24, %v305_v24 }
  0x1f   : > { %1909 = vmatprep.subr.msk.bf16.mxu0 %vm307_vm0, %v2247_v25  ;;  %v321_v26 = vsel %vm307_vm0, %v2247_v25, 0 }
  0x20   : > { %1830 = vmatpush3.bf16.xpose.msra.mxu0 %v321_v26 }
  0x27   : > { %1832 = vmatmul.mubr.msk.bf16.vlgmr.msra.gmra.mrb[0].mxu0 %vm307_vm0, %v2009_v27  ;;  %v481_v27 = vrot.slane %v2231_v15, 1 }
  0x28   : > { %1835 = vmatprep.mubr.msk.bf16.mxu0 %vm307_vm0, %v2010_v28  ;;  %v483_v28 = vrot.slane %v2236_v17, 7  ;;  %v2015_v17 = vld [vmem:[%s2225_s17 + $0x18] sm:$0xff]  }
  0x2f   : > { %1836 = vmatmul.mubr.msk.bf16.gmra.mrb[4].mxu0 %vm307_vm0, %v2011_v29  ;;  %v482_v29 = vsel %vm298_vm1, %v2233_v16, %v481_v27  ;;  %v2013_v16 = vld [vmem:[%s2225_s17 + $0x8] sm:$0xff]  }
  0xfa   : > { %v1833_v30 = vpop.f32.mrb[0].mxu0 }
  0xfb   : > { %v357_v31 = vpop.f32.mrb[1].mxu0  ;;  %v395_v32 = vsel %vm388_vm4, %v1833_v30, -inf }
  0xfc   : > { %396 = vmax.xlane.f32.xlu1 %v395_v32  ;;  %v1834_v33 = vpop.f32.mrb[2].mxu0  ;;  %v389_v34 = vsel %vm388_vm4, %v357_v31, -inf  ;;  %v2012_v32 = vld [vmem:[%s2225_s17] sm:$0xff]  }
  0xfd   : > { %390 = vmax.xlane.f32.xlu0 %v389_v34  ;;  %v360_v35 = vpop.f32.mrb[3].mxu0  ;;  %v398_v36 = vsel %vm388_vm4, %v1834_v33, -inf }
  0xfe   : > { %v392_v37 = vsel %vm388_vm4, %v360_v35, -inf }
 0x100   : > { %399 = vmax.xlane.f32.xlu1 %v398_v36  ;;  %v2018_v36 = vld [vmem:[%s2225_s17 + $0x10] sm:$0xff]  }
 0x101   : > { %393 = vmax.xlane.f32.xlu0 %v392_v37  ;;  %v2017_v37 = vld [vmem:[%s2225_s17 + $0x8] sm:$0xff]  }
 0x102   : > { %v1837_v38 = vpop.f32.mrb[4].mxu0 }
 0x103   : > { %v373_v39 = vpop.f32.mrb[5].mxu0  ;;  %v407_v44 = vsel %vm388_vm4, %v1837_v38, -inf }
 0x104   : > { %v1838_v40 = vpop.f32.mrb[6].mxu0  ;;  %v401_v41 = vsel %vm388_vm4, %v373_v39, -inf }
 0x105   : > { %402 = vmax.xlane.f32.xlu0 %v401_v41  ;;  %v376_v42 = vpop.f32.mrb[7].mxu0  ;;  %v410_v45 = vsel %vm388_vm4, %v1838_v40, -inf  ;;  %v2023_v41 = vld [vmem:[%s2225_s17 + $0x18] sm:$0xff]  }
 0x106   : > { %v404_v43 = vsel %vm388_vm4, %v376_v42, -inf }
 0x107   : > { %405 = vmax.xlane.f32.xlu1 %v404_v43 }
 0x109   : > { %408 = vmax.xlane.f32.xlu0 %v407_v44 }
 0x10b   : > { %411 = vmax.xlane.f32.xlu1 %v410_v45 }
 0x189   : > { %v397_v46 = vpop.xlane.xlu1 %396 }
 0x18a   : > { %v415_v47 = vsub.f32 %v1833_v30, %v397_v46  ;;  %v391_v48 = vpop.xlane.xlu0 %390  ;;  %v485_v30 = vrot.slane %v2238_v18, 6  ;;  %v2014_v18 = vld [vmem:[%s2225_s17 + $0x10] sm:$0xff]  }
 0x18b   : > { %v413_v49 = vsub.f32 %v357_v31, %v391_v48  ;;  %v484_v31 = vsel %vm301_vm2, %v483_v28, %v482_v29 }
 0x18c   : > { %v425_v50 = vmul.f32 1.442695, %v415_v47 }
 0x18d   : > { %v421_v51 = vmul.f32 1.442695, %v413_v49  ;;  %v400_v52 = vpop.xlane.xlu1 %399 }
 0x18e   : > { %2024 = vpow2.f32 %v425_v50  ;;  %v416_v53 = vsub.f32 %v1834_v33, %v400_v52  ;;  %v394_v54 = vpop.xlane.xlu0 %393  ;;  %v486_v33 = vsel %vm304_vm3, %v485_v30, %v484_v31 }
 0x18f   : > { %v414_v55 = vsub.f32 %v360_v35, %v394_v54  ;;  %2026 = vpow2.f32 %v421_v51  ;;  %v2307_v34 = vpack.c.b16 %v486_v33, %v486_v33  ;;  %v2016_v35 = vld [vmem:[%s2225_s17] sm:$0xff]  }
 0x190   : > { %v427_v56 = vmul.f32 1.442695, %v416_v53 }
 0x191   : > { %v423_v57 = vmul.f32 1.442695, %v414_v55  ;;  %1910 = vmatprep.subr.msk.bf16.mxu1 %vm500_vm5, %v2307_v34  ;;  %v502_v15 = vsel %vm500_vm5, %v2307_v34, 0 }
 0x192   : > { %2028 = vpow2.f32 %v427_v56  ;;  %v403_v58 = vpop.xlane.xlu0 %402  ;;  %1840 = vmatpush3.bf16.msra.mxu1 %v502_v15 }
 0x193   : > { %2030 = vpow2.f32 %v423_v57  ;;  %v417_v59 = vsub.f32 %v373_v39, %v403_v58  ;;  %v2021_v39 = vld [vmem:[%s2225_s17 + $0x8] sm:$0xff]  }
 0x194   : > { %v406_v60 = vpop.xlane.xlu1 %405 }
 0x195   : > { %v418_v62 = vsub.f32 %v376_v42, %v406_v60  ;;  %v429_v1 = vmul.f32 1.442695, %v417_v59  ;;  %v2022_v42 = vld [vmem:[%s2225_s17 + $0x10] sm:$0xff]  }
 0x196   : > { %v409_v61 = vpop.xlane.xlu0 %408 }
 0x197   : > { %v419_v63 = vsub.f32 %v1837_v38, %v409_v61  ;;  %v431_v7 = vmul.f32 1.442695, %v418_v62  ;;  %v2019_v38 = vld [vmem:[%s2225_s17 + $0x18] sm:$0xff]  }
 0x198   : > { %v2267_v0 = vpop.eup %2024  ;;  %v412_v2 = vpop.xlane.xlu1 %411 }
 0x199   : > { %v433_v3 = vmul.f32 1.442695, %v419_v63  ;;  %v420_v4 = vsub.f32 %v1838_v40, %v412_v2  ;;  %v443_v5 = vsel %vm388_vm4, %v2267_v0, 0.0  ;;  %v2271_v6 = vpop.eup %2026  ;;  %v2020_v40 = vld [vmem:[%s2225_s17] sm:$0xff]  }
 0x19a   : > { %444 = vadd.xlane.f32.xlu0 %v443_v5  ;;  %v437_v10 = vsel %vm388_vm4, %v2271_v6, 0.0 }
 0x19b   : > { %2032 = vpow2.f32 %v433_v3  ;;  %v435_v8 = vmul.f32 1.442695, %v420_v4 }
 0x19c   : > { %v2273_v9 = vpop.eup %2028  ;;  %2034 = vpow2.f32 %v429_v1 }
 0x19d   : > { %2036 = vpow2.f32 %v435_v8  ;;  %v446_v11 = vsel %vm388_vm4, %v2273_v9, 0.0  ;;  %v2279_v12 = vpop.eup %2030 }
 0x19e   : > { %438 = vadd.xlane.f32.xlu0 %v437_v10  ;;  %447 = vadd.xlane.f32.xlu1 %v446_v11  ;;  %2038 = vpow2.f32 %v431_v7  ;;  %v440_v13 = vsel %vm388_vm4, %v2279_v12, 0.0 }
 0x1a2   : > { %441 = vadd.xlane.f32.xlu1 %v440_v13 }
 0x1a5   : > { %v2283_v14 = vpop.eup %2032 }
 0x1a6   : > { %v2285_v19 = vpop.eup %2034  ;;  %v455_v20 = vsel %vm388_vm4, %v2283_v14, 0.0 }
 0x1a7   : > { %v2289_v21 = vpop.eup %2036  ;;  %456 = vadd.xlane.f32.xlu0 %v455_v20  ;;  %v449_v24 = vsel %vm388_vm4, %v2285_v19, 0.0 }
 0x1a8   : > { %v458_v22 = vsel %vm388_vm4, %v2289_v21, 0.0  ;;  %v2293_v23 = vpop.eup %2038 }
 0x1a9   : > { %459 = vadd.xlane.f32.xlu1 %v458_v22  ;;  %v452_v26 = vsel %vm388_vm4, %v2293_v23, 0.0 }
 0x1ab   : > { %450 = vadd.xlane.f32.xlu0 %v449_v24 }
 0x1ad   : > { %453 = vadd.xlane.f32.xlu1 %v452_v26 }
 0x1be   : > { %597 = vrot.lane.b32.xlu1 %v2012_v32, %s2177_s21 }
 0x1c1   : > { %605 = vrot.lane.b32.xlu0 %v2247_v25, %s2177_s21 }
 0x1c2   : > { %599 = vrot.lane.b32.xlu1 %v2013_v16, %s2177_s21 }
 0x1c5   : > { %603 = vrot.lane.b32.xlu0 %v2015_v17, %s2177_s21 }
 0x1c6   : > { %601 = vrot.lane.b32.xlu1 %v2014_v18, %s2177_s21 }
 0x1c9   : > { %889 = vrot.lane.b32.xlu0 %v2016_v35, %s2178_s22 }
 0x1ca   : > { %897 = vrot.lane.b32.xlu1 %v2247_v25, %s2178_s22 }
 0x1cd   : > { %893 = vrot.lane.b32.xlu0 %v2018_v36, %s2178_s22 }
 0x1ce   : > { %891 = vrot.lane.b32.xlu1 %v2017_v37, %s2178_s22 }
 0x1d1   : > { %1189 = vrot.lane.b32.xlu0 %v2247_v25, %s2179_s23 }
 0x1d2   : > { %895 = vrot.lane.b32.xlu1 %v2019_v38, %s2178_s22 }
 0x1d5   : > { %1183 = vrot.lane.b32.xlu0 %v2021_v39, %s2179_s23 }
 0x1d6   : > { %1181 = vrot.lane.b32.xlu1 %v2020_v40, %s2179_s23 }
 0x1d9   : > { %1187 = vrot.lane.b32.xlu0 %v2023_v41, %s2179_s23 }
 0x1da   : > { %1185 = vrot.lane.b32.xlu1 %v2022_v42, %s2179_s23 }
 0x227   : > { %v445_v43 = vpop.xlane.xlu0 %444 }
 0x22b   : > { %v439_v44 = vpop.xlane.xlu0 %438  ;;  %v448_v45 = vpop.xlane.xlu1 %447 }
 0x22c   : > { %2040 = vrcp.f32 %v448_v45 }
 0x22d   : > { %2042 = vrcp.f32 %v439_v44 }
 0x22e   : > { %2044 = vrcp.f32 %v445_v43 }
 0x22f   : > { %v442_v25 = vpop.xlane.xlu1 %441 }
 0x230   : > { %2046 = vrcp.f32 %v442_v25 }
 0x234   : > { %v457_v46 = vpop.xlane.xlu0 %456 }
 0x236   : > { %v460_v47 = vpop.xlane.xlu1 %459  ;;  %v2041_v48 = vpop.eup %2040 }
 0x237   : > { %v2043_v49 = vpop.eup %2042  ;;  %2048 = vrcp.f32 %v460_v47  ;;  %v472_v54 = vmul.f32 %v2041_v48, %v2273_v9 }
 0x238   : > { %v451_v50 = vpop.xlane.xlu0 %450  ;;  %v2045_v51 = vpop.eup %2044  ;;  %v469_v55 = vmul.f32 %v2043_v49, %v2271_v6 }
 0x239   : > { %2050 = vrcp.f32 %v451_v50  ;;  %v471_v57 = vmul.f32 %v2045_v51, %v2267_v0 }
 0x23a   : > { %v2047_v52 = vpop.eup %2046  ;;  %2052 = vrcp.f32 %v457_v46  ;;  %v454_v53 = vpop.xlane.xlu1 %453 }
 0x23b   : > { %2054 = vrcp.f32 %v454_v53  ;;  %v470_v56 = vmul.f32 %v2047_v52, %v2279_v12  ;;  %v478_v60 = vpack.c.bf16 %v472_v54, %v471_v57 }
 0x23c   : > { %v606_v58 = vpop.permute.xlu0 %605 }
 0x23d   : > { %v477_v59 = vpack.c.bf16 %v470_v56, %v469_v55  ;;  %1911 = vmatprep.subr.msk.bf16.mxu1 %vm307_vm0, %v606_v58  ;;  %v620_v61 = vsel %vm307_vm0, %v606_v58, 0 }
 0x23e   : > { %v598_v62 = vpop.permute.xlu1 %597 }
 0x23f   : > { %1841 = vmatprep.mubr.msk.bf16.mxu1 %vm388_vm4, %v477_v59 }
 0x240   : > { %1842 = vmatmul.mubr.msk.bf16.vlgmr.msra.gmra.mrb[0].mxu1 %vm388_vm4, %v478_v60  ;;  %v604_v2 = vpop.permute.xlu0 %603 }
 0x241   : > { %1850 = vmatpush3.bf16.xpose.msra.mxu1 %v620_v61  ;;  %v2049_v63 = vpop.eup %2048 }
 0x242   : > { %v600_v1 = vpop.permute.xlu1 %599  ;;  %v476_v0 = vmul.f32 %v2049_v63, %v2289_v21 }
 0x243   : > { %v2051_v3 = vpop.eup %2050 }
 0x244   : > { %v2053_v4 = vpop.eup %2052  ;;  %v473_v6 = vmul.f32 %v2051_v3, %v2285_v19  ;;  %v890_v9 = vpop.permute.xlu0 %889 }
 0x245   : > { %v2055_v5 = vpop.eup %2054  ;;  %v475_v10 = vmul.f32 %v2053_v4, %v2283_v14 }
 0x246   : > { %v474_v7 = vmul.f32 %v2055_v5, %v2293_v23  ;;  %v602_v8 = vpop.permute.xlu1 %601 }
 0x247   : > { %v480_v12 = vpack.c.bf16 %v476_v0, %v475_v10 }
 0x248   : > { %v479_v11 = vpack.c.bf16 %v474_v7, %v473_v6  ;;  %v894_v20 = vpop.permute.xlu0 %893 }
 0x24a   : > { %1845 = vmatprep.mubr.msk.bf16.mxu1 %vm388_vm4, %v479_v11  ;;  %v898_v13 = vpop.permute.xlu1 %897 }
 0x24b   : > { %1846 = vmatmul.mubr.msk.bf16.gmra.mrb[4].mxu1 %vm388_vm4, %v480_v12  ;;  %1913 = vmatprep.subr.msk.bf16.mxu1 %vm307_vm0, %v898_v13  ;;  %v912_v19 = vsel %vm307_vm0, %v898_v13, 0 }
 0x24c   : > { %1851 = vmatprep.mubr.msk.bf16.mxu1 %vm307_vm0, %v598_v62  ;;  %v1190_v21 = vpop.permute.xlu0 %1189 }
 0x24d   : > { %v1204_v22 = vsel %vm307_vm0, %v1190_v21, 0 }
 0x24e   : > { %v892_v14 = vpop.permute.xlu1 %891 }
 0x250   : > { %v1184_v26 = vpop.permute.xlu0 %1183 }
 0x252   : > { %v896_v23 = vpop.permute.xlu1 %895 }
 0x253   : > { %1852 = vmatmul.mubr.msk.bf16.vlgmr.msra.gmra.mrb[8].mxu1 %vm307_vm0, %v600_v1 }
 0x254   : > { %1855 = vmatprep.mubr.msk.bf16.mxu1 %vm307_vm0, %v602_v8  ;;  %1870 = vmatpush3.bf16.xpose.msra.mxu1 %v912_v19  ;;  %v1188_v28 = vpop.permute.xlu0 %1187 }
 0x255   : > { %1915 = vmatprep.subr.msk.bf16.mxu1 %vm307_vm0, %v1190_v21 }
 0x256   : > { %v1182_v24 = vpop.permute.xlu1 %1181 }
 0x25a   : > { %v1186_v27 = vpop.permute.xlu1 %1185 }
 0x25b   : > { %1856 = vmatmul.mubr.msk.bf16.gmra.mrb[12].mxu1 %vm307_vm0, %v604_v2 }
 0x25c   : > { %1871 = vmatprep.mubr.msk.bf16.mxu1 %vm307_vm0, %v890_v9 }
 0x263   : > { %1872 = vmatmul.mubr.msk.bf16.vlgmr.msra.gmra.mrb[16].mxu1 %vm307_vm0, %v892_v14 }
 0x264   : > { %1875 = vmatprep.mubr.msk.bf16.mxu1 %vm307_vm0, %v894_v20  ;;  %1890 = vmatpush3.bf16.xpose.msra.mxu1 %v1204_v22 }
 0x26b   : > { %1876 = vmatmul.mubr.msk.bf16.gmra.mrb[20].mxu1 %vm307_vm0, %v896_v23 }
 0x26c   : > { %1891 = vmatprep.mubr.msk.bf16.mxu1 %vm307_vm0, %v1182_v24 }
 0x273   : > { %1892 = vmatmul.mubr.msk.bf16.vlgmr.msra.gmra.mrb[24].mxu1 %vm307_vm0, %v1184_v26 }
 0x274   : > { %1895 = vmatprep.mubr.msk.bf16.mxu1 %vm307_vm0, %v1186_v27 }
 0x27b   : > { %1896 = vmatmul.mubr.msk.bf16.gmra.mrb[28].mxu1 %vm307_vm0, %v1188_v28 }
 0x313   : > { %v2372_v29 = vpop.f32.mrb[0].mxu1 }
 0x314   : > { %v2374_v30 = vpop.f32.mrb[1].mxu1 }
 0x315   : > { %v2376_v31 = vpop.f32.mrb[2].mxu1 }
 0x316   : > { %v2378_v32 = vpop.f32.mrb[3].mxu1 }
 0x31e   : > { %v2380_v33 = vpop.f32.mrb[4].mxu1 }
 0x31f   : > { %v2382_v15 = vpop.f32.mrb[5].mxu1 }
 0x320   : > { %v2384_v16 = vpop.f32.mrb[6].mxu1 }
 0x321   : > { %v2386_v17 = vpop.f32.mrb[7].mxu1 }
 0x326   : > { %v2388_v18 = vpop.f32.mrb[8].mxu1 }
 0x327   : > { %v2390_v35 = vpop.f32.mrb[9].mxu1  ;;  %v693_v36 = vsel %vm388_vm4, %v2388_v18, -inf }
 0x328   : > { %694 = vmax.xlane.f32.xlu0 %v693_v36  ;;  %v2394_v37 = vpop.f32.mrb[10].mxu1  ;;  %v687_v38 = vsel %vm388_vm4, %v2390_v35, -inf }
 0x329   : > { %688 = vmax.xlane.f32.xlu1 %v687_v38  ;;  %v2398_v39 = vpop.f32.mrb[11].mxu1  ;;  %v696_v40 = vsel %vm388_vm4, %v2394_v37, -inf }
 0x32a   : > { %v690_v43 = vsel %vm388_vm4, %v2398_v39, -inf }
 0x32c   : > { %697 = vmax.xlane.f32.xlu0 %v696_v40 }
 0x32e   : > { %v2402_v41 = vpop.f32.mrb[12].mxu1 }
 0x32f   : > { %v2404_v42 = vpop.f32.mrb[13].mxu1  ;;  %v705_v44 = vsel %vm388_vm4, %v2402_v41, -inf }
 0x330   : > { %691 = vmax.xlane.f32.xlu0 %v690_v43  ;;  %706 = vmax.xlane.f32.xlu1 %v705_v44  ;;  %v2410_v45 = vpop.f32.mrb[14].mxu1  ;;  %v699_v46 = vsel %vm388_vm4, %v2404_v42, -inf }
 0x331   : > { %v2412_v25 = vpop.f32.mrb[15].mxu1  ;;  %v708_v47 = vsel %vm388_vm4, %v2410_v45, -inf }
 0x332   : > { %v702_v50 = vsel %vm388_vm4, %v2412_v25, -inf }
 0x334   : > { %700 = vmax.xlane.f32.xlu1 %v699_v46  ;;  %709 = vmax.xlane.f32.xlu0 %v708_v47 }
 0x336   : > { %v2418_v48 = vpop.f32.mrb[16].mxu1 }
 0x337   : > { %v2420_v49 = vpop.f32.mrb[17].mxu1  ;;  %v985_v51 = vsel %vm388_vm4, %v2418_v48, -inf }
 0x338   : > { %703 = vmax.xlane.f32.xlu0 %v702_v50  ;;  %986 = vmax.xlane.f32.xlu1 %v985_v51  ;;  %v2426_v52 = vpop.f32.mrb[18].mxu1  ;;  %v979_v54 = vsel %vm388_vm4, %v2420_v49, -inf }
 0x339   : > { %v2428_v53 = vpop.f32.mrb[19].mxu1  ;;  %v988_v55 = vsel %vm388_vm4, %v2426_v52, -inf }
 0x33a   : > { %v982_v58 = vsel %vm388_vm4, %v2428_v53, -inf }
 0x33c   : > { %980 = vmax.xlane.f32.xlu1 %v979_v54  ;;  %989 = vmax.xlane.f32.xlu0 %v988_v55 }
 0x33e   : > { %v2434_v56 = vpop.f32.mrb[20].mxu1 }
 0x33f   : > { %v2436_v57 = vpop.f32.mrb[21].mxu1  ;;  %v997_v59 = vsel %vm388_vm4, %v2434_v56, -inf }
 0x340   : > { %983 = vmax.xlane.f32.xlu0 %v982_v58  ;;  %998 = vmax.xlane.f32.xlu1 %v997_v59  ;;  %v2442_v60 = vpop.f32.mrb[22].mxu1  ;;  %v991_v62 = vsel %vm388_vm4, %v2436_v57, -inf }
 0x341   : > { %v2444_v61 = vpop.f32.mrb[23].mxu1  ;;  %v1000_v63 = vsel %vm388_vm4, %v2442_v60, -inf }
 0x342   : > { %v994_v2 = vsel %vm388_vm4, %v2444_v61, -inf }
 0x344   : > { %992 = vmax.xlane.f32.xlu1 %v991_v62  ;;  %1001 = vmax.xlane.f32.xlu0 %v1000_v63 }
 0x346   : > { %v2450_v1 = vpop.f32.mrb[24].mxu1 }
 0x347   : > { %v1277_v3 = vsel %vm388_vm4, %v2450_v1, -inf  ;;  %v2456_v4 = vpop.f32.mrb[25].mxu1 }
 0x348   : > { %995 = vmax.xlane.f32.xlu0 %v994_v2  ;;  %1278 = vmax.xlane.f32.xlu1 %v1277_v3  ;;  %v2458_v5 = vpop.f32.mrb[26].mxu1  ;;  %v1271_v6 = vsel %vm388_vm4, %v2456_v4, -inf }
 0x349   : > { %v2460_v0 = vpop.f32.mrb[27].mxu1  ;;  %v1280_v7 = vsel %vm388_vm4, %v2458_v5, -inf }
 0x34a   : > { %v1274_v9 = vsel %vm388_vm4, %v2460_v0, -inf }
 0x34c   : > { %1272 = vmax.xlane.f32.xlu1 %v1271_v6  ;;  %1281 = vmax.xlane.f32.xlu0 %v1280_v7 }
 0x34e   : > { %v2466_v8 = vpop.f32.mrb[28].mxu1 }
 0x34f   : > { %v1289_v10 = vsel %vm388_vm4, %v2466_v8, -inf  ;;  %v2472_v11 = vpop.f32.mrb[29].mxu1 }
 0x350   : > { %1275 = vmax.xlane.f32.xlu0 %v1274_v9  ;;  %1290 = vmax.xlane.f32.xlu1 %v1289_v10  ;;  %v2474_v12 = vpop.f32.mrb[30].mxu1  ;;  %v1283_v13 = vsel %vm388_vm4, %v2472_v11, -inf }
 0x351   : > { %v1292_v20 = vsel %vm388_vm4, %v2474_v12, -inf  ;;  %v2480_v19 = vpop.f32.mrb[31].mxu1 }
 0x352   : > { %v1286_v21 = vsel %vm388_vm4, %v2480_v19, -inf }
 0x354   : > { %1284 = vmax.xlane.f32.xlu1 %v1283_v13  ;;  %1293 = vmax.xlane.f32.xlu0 %v1292_v20 }
 0x358   : > { %1287 = vmax.xlane.f32.xlu0 %v1286_v21 }
 0x365   : > { %779 = vrot.lane.b32.xlu1 %v2307_v34, %s2177_s21 }
 0x3b5   : > { %v695_v14 = vpop.xlane.xlu0 %694 }
 0x3b6   : > { %v713_v22 = vsub.f32 %v2388_v18, %v695_v14  ;;  %v689_v23 = vpop.xlane.xlu1 %688 }
 0x3b7   : > { %v711_v24 = vsub.f32 %v2390_v35, %v689_v23 }
 0x3b8   : > { %v723_v26 = vmul.f32 1.442695, %v713_v22 }
 0x3b9   : > { %v719_v27 = vmul.f32 1.442695, %v711_v24  ;;  %v698_v28 = vpop.xlane.xlu0 %697 }
 0x3ba   : > { %2056 = vpow2.f32 %v723_v26  ;;  %v714_v36 = vsub.f32 %v2394_v37, %v698_v28 }
 0x3bb   : > { %2058 = vpow2.f32 %v719_v27 }
 0x3bc   : > { %v725_v38 = vmul.f32 1.442695, %v714_v36 }
 0x3bd   : > { %v692_v40 = vpop.xlane.xlu0 %691  ;;  %v707_v43 = vpop.xlane.xlu1 %706 }
 0x3be   : > { %2060 = vpow2.f32 %v725_v38  ;;  %v712_v44 = vsub.f32 %v2398_v39, %v692_v40  ;;  %v717_v46 = vsub.f32 %v2402_v41, %v707_v43 }
 0x3c0   : > { %v721_v47 = vmul.f32 1.442695, %v712_v44  ;;  %v731_v18 = vmul.f32 1.442695, %v717_v46 }
 0x3c1   : > { %v710_v50 = vpop.xlane.xlu0 %709  ;;  %v701_v51 = vpop.xlane.xlu1 %700 }
 0x3c2   : > { %2062 = vpow2.f32 %v721_v47  ;;  %v718_v35 = vsub.f32 %v2410_v45, %v710_v50  ;;  %v715_v54 = vsub.f32 %v2404_v42, %v701_v51 }
 0x3c3   : > { %2064 = vpow2.f32 %v731_v18 }
 0x3c4   : > { %v2493_v37 = vpop.eup %2056  ;;  %v733_v55 = vmul.f32 1.442695, %v718_v35  ;;  %v727_v58 = vmul.f32 1.442695, %v715_v54 }
 0x3c5   : > { %v704_v59 = vpop.xlane.xlu0 %703  ;;  %v987_v62 = vpop.xlane.xlu1 %986  ;;  %v741_v39 = vsel %vm388_vm4, %v2493_v37, 0.0 }
 0x3c6   : > { %v2497_v41 = vpop.eup %2058  ;;  %2066 = vpow2.f32 %v733_v55  ;;  %v716_v63 = vsub.f32 %v2412_v25, %v704_v59  ;;  %v1005_v2 = vsub.f32 %v2418_v48, %v987_v62  ;;  %742 = vadd.xlane.f32.xlu1 %v741_v39 }
 0x3c7   : > { %2068 = vpow2.f32 %v727_v58  ;;  %v735_v10 = vsel %vm388_vm4, %v2497_v41, 0.0 }
 0x3c8   : > { %v2501_v42 = vpop.eup %2060  ;;  %v729_v45 = vmul.f32 1.442695, %v716_v63  ;;  %v1015_v3 = vmul.f32 1.442695, %v1005_v2 }
 0x3c9   : > { %v990_v6 = vpop.xlane.xlu0 %989  ;;  %v981_v7 = vpop.xlane.xlu1 %980  ;;  %v744_v9 = vsel %vm388_vm4, %v2501_v42, 0.0 }
 0x3ca   : > { %2070 = vpow2.f32 %v729_v45  ;;  %v1006_v13 = vsub.f32 %v2426_v52, %v990_v6  ;;  %v1003_v25 = vsub.f32 %v2420_v49, %v981_v7  ;;  %745 = vadd.xlane.f32.xlu0 %v744_v9  ;;  %736 = vadd.xlane.f32.xlu1 %v735_v10 }
 0x3cb   : > { %2072 = vpow2.f32 %v1015_v3 }
 0x3cc   : > { %v2509_v48 = vpop.eup %2062  ;;  %v1017_v20 = vmul.f32 1.442695, %v1006_v13  ;;  %v1011_v21 = vmul.f32 1.442695, %v1003_v25 }
 0x3cd   : > { %v2511_v14 = vpop.eup %2064  ;;  %v984_v22 = vpop.xlane.xlu0 %983  ;;  %v738_v24 = vsel %vm388_vm4, %v2509_v48, 0.0 }
 0x3ce   : > { %v999_v23 = vpop.xlane.xlu1 %998  ;;  %2074 = vpow2.f32 %v1017_v20  ;;  %v1004_v26 = vsub.f32 %v2428_v53, %v984_v22  ;;  %739 = vadd.xlane.f32.xlu0 %v738_v24  ;;  %v753_v49 = vsel %vm388_vm4, %v2511_v14, 0.0 }
 0x3cf   : > { %v1009_v52 = vsub.f32 %v2434_v56, %v999_v23  ;;  %2076 = vpow2.f32 %v1011_v21  ;;  %754 = vadd.xlane.f32.xlu1 %v753_v49 }
 0x3d0   : > { %v2519_v27 = vpop.eup %2066  ;;  %v1013_v28 = vmul.f32 1.442695, %v1004_v26 }
 0x3d1   : > { %v1023_v36 = vmul.f32 1.442695, %v1009_v52  ;;  %v2521_v38 = vpop.eup %2068  ;;  %v1002_v40 = vpop.xlane.xlu0 %1001  ;;  %v756_v44 = vsel %vm388_vm4, %v2519_v27, 0.0 }
 0x3d2   : > { %v993_v43 = vpop.xlane.xlu1 %992  ;;  %2078 = vpow2.f32 %v1013_v28  ;;  %v1010_v53 = vsub.f32 %v2442_v60, %v1002_v40  ;;  %757 = vadd.xlane.f32.xlu0 %v756_v44  ;;  %v747_v46 = vsel %vm388_vm4, %v2521_v38, 0.0 }
 0x3d3   : > { %v1007_v56 = vsub.f32 %v2436_v57, %v993_v43  ;;  %2080 = vpow2.f32 %v1023_v36  ;;  %748 = vadd.xlane.f32.xlu1 %v747_v46 }
 0x3d4   : > { %v2529_v47 = vpop.eup %2070  ;;  %v1025_v18 = vmul.f32 1.442695, %v1010_v53 }
 0x3d5   : > { %v1019_v50 = vmul.f32 1.442695, %v1007_v56  ;;  %v2531_v51 = vpop.eup %2072  ;;  %v996_v35 = vpop.xlane.xlu0 %995  ;;  %v750_v55 = vsel %vm388_vm4, %v2529_v47, 0.0 }
 0x3d6   : > { %v1279_v54 = vpop.xlane.xlu1 %1278  ;;  %2082 = vpow2.f32 %v1025_v18  ;;  %v1008_v57 = vsub.f32 %v2444_v61, %v996_v35  ;;  %751 = vadd.xlane.f32.xlu0 %v750_v55  ;;  %v1033_v58 = vsel %vm388_vm4, %v2531_v51, 0.0 }
 0x3d7   : > { %v1297_v60 = vsub.f32 %v2450_v1, %v1279_v54  ;;  %2084 = vpow2.f32 %v1019_v50  ;;  %1034 = vadd.xlane.f32.xlu1 %v1033_v58 }
 0x3d8   : > { %v2539_v59 = vpop.eup %2074  ;;  %v1021_v62 = vmul.f32 1.442695, %v1008_v57 }
 0x3d9   : > { %v1307_v39 = vmul.f32 1.442695, %v1297_v60  ;;  %v2541_v63 = vpop.eup %2076  ;;  %v1282_v2 = vpop.xlane.xlu0 %1281  ;;  %v1036_v3 = vsel %vm388_vm4, %v2539_v59, 0.0 }
 0x3da   : > { %v1273_v45 = vpop.xlane.xlu1 %1272  ;;  %2086 = vpow2.f32 %v1021_v62  ;;  %1037 = vadd.xlane.f32.xlu0 %v1036_v3  ;;  %v1027_v1 = vsel %vm388_vm4, %v2541_v63, 0.0  ;;  %v1298_v7 = vsub.f32 %v2458_v5, %v1282_v2 }
 0x3db   : > { %v1295_v61 = vsub.f32 %v2456_v4, %v1273_v45  ;;  %1028 = vadd.xlane.f32.xlu1 %v1027_v1  ;;  %2088 = vpow2.f32 %v1307_v39 }
 0x3dc   : > { %v2548_v6 = vpop.eup %2078  ;;  %v1309_v22 = vmul.f32 1.442695, %v1298_v7 }
 0x3dd   : > { %v1303_v9 = vmul.f32 1.442695, %v1295_v61  ;;  %v2551_v10 = vpop.eup %2080  ;;  %v1276_v13 = vpop.xlane.xlu0 %1275  ;;  %v1030_v20 = vsel %vm388_vm4, %v2548_v6, 0.0 }
 0x3de   : > { %v1291_v25 = vpop.xlane.xlu1 %1290  ;;  %1031 = vadd.xlane.f32.xlu0 %v1030_v20  ;;  %v1045_v4 = vsel %vm388_vm4, %v2551_v10, 0.0  ;;  %v1296_v23 = vsub.f32 %v2460_v0, %v1276_v13 }
 0x3df   : > { %1046 = vadd.xlane.f32.xlu1 %v1045_v4  ;;  %2090 = vpow2.f32 %v1303_v9  ;;  %v1301_v0 = vsub.f32 %v2466_v8, %v1291_v25 }
 0x3e0   : > { %v2557_v21 = vpop.eup %2082  ;;  %2092 = vpow2.f32 %v1309_v22  ;;  %v1305_v40 = vmul.f32 1.442695, %v1296_v23 }
 0x3e1   : > { %v2560_v5 = vpop.eup %2084  ;;  %v1048_v26 = vsel %vm388_vm4, %v2557_v21, 0.0  ;;  %v1294_v28 = vpop.xlane.xlu0 %1293  ;;  %v1315_v46 = vmul.f32 1.442695, %v1301_v0 }
 0x3e2   : > { %v1285_v24 = vpop.xlane.xlu1 %1284  ;;  %1049 = vadd.xlane.f32.xlu0 %v1048_v26  ;;  %v1039_v49 = vsel %vm388_vm4, %v2560_v5, 0.0  ;;  %v1302_v18 = vsub.f32 %v2474_v12, %v1294_v28 }
 0x3e3   : > { %v1299_v52 = vsub.f32 %v2472_v11, %v1285_v24  ;;  %1040 = vadd.xlane.f32.xlu1 %v1039_v49 }
 0x3e4   : > { %v2567_v36 = vpop.eup %2086  ;;  %v1317_v54 = vmul.f32 1.442695, %v1302_v18 }
 0x3e5   : > { %v1311_v43 = vmul.f32 1.442695, %v1299_v52  ;;  %v1042_v44 = vsel %vm388_vm4, %v2567_v36, 0.0  ;;  %v2572_v56 = vpop.eup %2088  ;;  %v1288_v50 = vpop.xlane.xlu0 %1287 }
 0x3e6   : > { %v780_v53 = vpop.permute.xlu1 %779  ;;  %1043 = vadd.xlane.f32.xlu0 %v1042_v44  ;;  %v1325_v8 = vsel %vm388_vm4, %v2572_v56, 0.0  ;;  %v1300_v55 = vsub.f32 %v2480_v19, %v1288_v50 }
 0x3e7   : > { %v794_v11 = vsel %vm500_vm5, %v780_v53, 0  ;;  %1912 = vmatprep.subr.msk.bf16.mxu0 %vm500_vm5, %v780_v53  ;;  %2094 = vpow2.f32 %v1311_v43 }
 0x3e8   : > { %1860 = vmatpush3.bf16.msra.mxu0 %v794_v11  ;;  %2096 = vpow2.f32 %v1305_v40  ;;  %v1313_v58 = vmul.f32 1.442695, %v1300_v55 }
 0x3e9   : > { %v2579_v35 = vpop.eup %2090  ;;  %2098 = vpow2.f32 %v1315_v46 }
 0x3ea   : > { %1326 = vadd.xlane.f32.xlu0 %v1325_v8  ;;  %v1319_v57 = vsel %vm388_vm4, %v2579_v35, 0.0  ;;  %v2584_v60 = vpop.eup %2092  ;;  %2100 = vpow2.f32 %v1317_v54 }
 0x3eb   : > { %v1328_v62 = vsel %vm388_vm4, %v2584_v60, 0.0  ;;  %2102 = vpow2.f32 %v1313_v58 }
 0x3ee   : > { %1320 = vadd.xlane.f32.xlu0 %v1319_v57 }
 0x3f1   : > { %v2586_v12 = vpop.eup %2094 }
 0x3f2   : > { %v2590_v39 = vpop.eup %2096  ;;  %1329 = vadd.xlane.f32.xlu0 %v1328_v62  ;;  %v1331_v2 = vsel %vm388_vm4, %v2586_v12, 0.0 }
 0x3f3   : > { %1332 = vadd.xlane.f32.xlu1 %v1331_v2  ;;  %v1322_v19 = vsel %vm388_vm4, %v2590_v39, 0.0  ;;  %v2596_v45 = vpop.eup %2098 }
 0x3f4   : > { %v1337_v3 = vsel %vm388_vm4, %v2596_v45, 0.0  ;;  %v2600_v61 = vpop.eup %2100 }
 0x3f5   : > { %v1340_v1 = vsel %vm388_vm4, %v2600_v61, 0.0  ;;  %v2604_v7 = vpop.eup %2102 }
 0x3f6   : > { %1323 = vadd.xlane.f32.xlu0 %v1322_v19  ;;  %v1334_v9 = vsel %vm388_vm4, %v2604_v7, 0.0 }
 0x3fa   : > { %1338 = vadd.xlane.f32.xlu0 %v1337_v3 }
 0x3fe   : > { %1341 = vadd.xlane.f32.xlu0 %v1340_v1 }
 0x402   : > { %1335 = vadd.xlane.f32.xlu0 %v1334_v9 }
 0x404   : > { %1363 = vrot.lane.b32.xlu1 %v2307_v34, %s2179_s23 }
 0x418   : > { %1071 = vrot.lane.b32.xlu0 %v2307_v34, %s2178_s22 }
 0x453   : > { %v743_v13 = vpop.xlane.xlu1 %742 }
 0x457   : > { %v746_v25 = vpop.xlane.xlu0 %745  ;;  %v737_v20 = vpop.xlane.xlu1 %736 }
 0x458   : > { %2104 = vrcp.f32 %v746_v25 }
 0x459   : > { %2106 = vrcp.f32 %v737_v20 }
 0x45a   : > { %2108 = vrcp.f32 %v743_v13 }
 0x45b   : > { %v740_v4 = vpop.xlane.xlu0 %739 }
 0x45c   : > { %2110 = vrcp.f32 %v740_v4  ;;  %v755_v22 = vpop.xlane.xlu1 %754 }
 0x45f   : > { %v758_v23 = vpop.xlane.xlu0 %757 }
 0x460   : > { %v749_v24 = vpop.xlane.xlu1 %748  ;;  %2112 = vrcp.f32 %v758_v23 }
 0x461   : > { %2114 = vrcp.f32 %v749_v24 }
 0x462   : > { %v2105_v26 = vpop.eup %2104  ;;  %2116 = vrcp.f32 %v755_v22 }
 0x463   : > { %v752_v52 = vpop.xlane.xlu0 %751  ;;  %v2107_v49 = vpop.eup %2106  ;;  %v770_v0 = vmul.f32 %v2105_v26, %v2501_v42 }
 0x464   : > { %2118 = vrcp.f32 %v752_v52  ;;  %v1035_v28 = vpop.xlane.xlu1 %1034  ;;  %v2109_v34 = vpop.eup %2108  ;;  %v767_v44 = vmul.f32 %v2107_v49, %v2497_v41 }
 0x465   : > { %v769_v11 = vmul.f32 %v2109_v34, %v2493_v37 }
 0x466   : > { %v2111_v40 = vpop.eup %2110 }
 0x467   : > { %v1038_v43 = vpop.xlane.xlu0 %1037  ;;  %v768_v53 = vmul.f32 %v2111_v40, %v2509_v48  ;;  %v776_v50 = vpack.c.bf16 %v770_v0, %v769_v11 }
 0x468   : > { %v1029_v46 = vpop.xlane.xlu1 %1028 }
 0x469   : > { %v775_v18 = vpack.c.bf16 %v768_v53, %v767_v44  ;;  %2120 = vrcp.f32 %v1029_v46 }
 0x46a   : > { %v2113_v8 = vpop.eup %2112 }
 0x46b   : > { %v1032_v54 = vpop.xlane.xlu0 %1031  ;;  %1861 = vmatprep.mubr.msk.bf16.mxu0 %vm388_vm4, %v775_v18  ;;  %v2115_v55 = vpop.eup %2114  ;;  %v774_v41 = vmul.f32 %v2113_v8, %v2519_v27 }
 0x46c   : > { %2122 = vrcp.f32 %v1032_v54  ;;  %1862 = vmatmul.mubr.msk.bf16.vlgmr.msra.gmra.mrb[8].mxu0 %vm388_vm4, %v776_v50  ;;  %v2117_v42 = vpop.eup %2116  ;;  %v771_v48 = vmul.f32 %v2115_v55, %v2521_v38 }
 0x46d   : > { %v773_v62 = vmul.f32 %v2117_v42, %v2511_v14  ;;  %2124 = vrcp.f32 %v1038_v43 }
 0x46e   : > { %v2119_v57 = vpop.eup %2118 }
 0x46f   : > { %v1050_v58 = vpop.xlane.xlu0 %1049  ;;  %v772_v37 = vmul.f32 %v2119_v57, %v2529_v47  ;;  %v778_v19 = vpack.c.bf16 %v774_v41, %v773_v62  ;;  %v1047_v47 = vpop.xlane.xlu1 %1046 }
 0x471   : > { %v777_v2 = vpack.c.bf16 %v772_v37, %v771_v48 }
 0x473   : > { %v1044_v3 = vpop.xlane.xlu0 %1043  ;;  %1865 = vmatprep.mubr.msk.bf16.mxu0 %vm388_vm4, %v777_v2  ;;  %v2121_v1 = vpop.eup %2120 }
 0x474   : > { %1866 = vmatmul.mubr.msk.bf16.gmra.mrb[12].mxu0 %vm388_vm4, %v778_v19  ;;  %v1059_v25 = vmul.f32 %v2121_v1, %v2541_v63  ;;  %v1041_v22 = vpop.xlane.xlu1 %1040  ;;  %2126 = vrcp.f32 %v1044_v3 }
 0x475   : > { %2128 = vrcp.f32 %v1035_v28 }
 0x476   : > { %v2123_v9 = vpop.eup %2122  ;;  %2130 = vrcp.f32 %v1041_v22 }
 0x477   : > { %v1327_v13 = vpop.xlane.xlu0 %1326  ;;  %v1060_v27 = vmul.f32 %v2123_v9, %v2548_v6  ;;  %2132 = vrcp.f32 %v1050_v58  ;;  %v2125_v26 = vpop.eup %2124 }
 0x478   : > { %v1062_v40 = vmul.f32 %v2125_v26, %v2539_v59 }
 0x479   : > { %v1067_v20 = vpack.c.bf16 %v1060_v27, %v1059_v25 }
 0x47b   : > { %v1321_v38 = vpop.xlane.xlu0 %1320  ;;  %1881 = vmatprep.mubr.msk.bf16.mxu0 %vm388_vm4, %v1067_v20 }
 0x47e   : > { %v2127_v52 = vpop.eup %2126 }
 0x47f   : > { %v1330_v14 = vpop.xlane.xlu0 %1329  ;;  %v2129_v49 = vpop.eup %2128  ;;  %v1064_v43 = vmul.f32 %v2127_v52, %v2567_v36 }
 0x480   : > { %v1333_v63 = vpop.xlane.xlu1 %1332  ;;  %v2131_v34 = vpop.eup %2130  ;;  %v1061_v28 = vmul.f32 %v2129_v49, %v2531_v51 }
 0x481   : > { %v1063_v11 = vmul.f32 %v2131_v34, %v2560_v5  ;;  %v2133_v59 = vpop.eup %2132 }
 0x482   : > { %v1068_v46 = vpack.c.bf16 %v1062_v40, %v1061_v28  ;;  %v1066_v5 = vmul.f32 %v2133_v59, %v2557_v21 }
 0x483   : > { %v1324_v4 = vpop.xlane.xlu0 %1323  ;;  %v1069_v36 = vpack.c.bf16 %v1064_v43, %v1063_v11 }
 0x484   : > { %2134 = vrcp.f32 %v1324_v4  ;;  %v1364_v44 = vpop.permute.xlu1 %1363 }
 0x485   : > { %2136 = vrcp.f32 %v1047_v47  ;;  %v1378_v18 = vsel %vm500_vm5, %v1364_v44, 0 }
 0x486   : > { %2138 = vrcp.f32 %v1321_v38 }
 0x487   : > { %v1339_v23 = vpop.xlane.xlu0 %1338  ;;  %2140 = vrcp.f32 %v1330_v14 }
 0x48b   : > { %v1342_v24 = vpop.xlane.xlu0 %1341 }
 0x48e   : > { %v2135_v50 = vpop.eup %2134 }
 0x48f   : > { %v1336_v6 = vpop.xlane.xlu0 %1335  ;;  %v2137_v51 = vpop.eup %2136  ;;  %v1352_v54 = vmul.f32 %v2135_v50, %v2590_v39 }
 0x490   : > { %2142 = vrcp.f32 %v1336_v6  ;;  %v2139_v8 = vpop.eup %2138  ;;  %v1065_v55 = vmul.f32 %v2137_v51, %v2551_v10 }
 0x491   : > { %2144 = vrcp.f32 %v1327_v13  ;;  %v1351_v42 = vmul.f32 %v2139_v8, %v2579_v35  ;;  %v2141_v41 = vpop.eup %2140 }
 0x492   : > { %2146 = vrcp.f32 %v1333_v63  ;;  %v1070_v57 = vpack.c.bf16 %v1066_v5, %v1065_v55  ;;  %v1354_v21 = vmul.f32 %v2141_v41, %v2584_v60 }
 0x493   : > { %v1072_v0 = vpop.permute.xlu0 %1071  ;;  %2148 = vrcp.f32 %v1342_v24  ;;  %v1359_v58 = vpack.c.bf16 %v1352_v54, %v1351_v42 }
 0x494   : > { %v1086_v53 = vsel %vm500_vm5, %v1072_v0, 0  ;;  %1914 = vmatprep.subr.msk.bf16.mxu0 %vm500_vm5, %v1072_v0  ;;  %2150 = vrcp.f32 %v1339_v23 }
 0x495   : > { %1880 = vmatpush3.bf16.msra.mxu0 %v1086_v53 }
 0x496   : > { %1916 = vmatprep.subr.msk.bf16.mxu0 %vm500_vm5, %v1364_v44 }
 0x498   : > { %1882 = vmatmul.mubr.msk.bf16.vlgmr.msra.gmra.mrb[16].mxu0 %vm388_vm4, %v1068_v46 }
 0x499   : > { %1885 = vmatprep.mubr.msk.bf16.mxu0 %vm388_vm4, %v1069_v36  ;;  %1900 = vmatpush3.bf16.msra.mxu0 %v1378_v18 }
 0x49a   : > { %v2143_v48 = vpop.eup %2142 }
 0x49b   : > { %v2145_v37 = vpop.eup %2144  ;;  %v1356_v39 = vmul.f32 %v2143_v48, %v2604_v7 }
 0x49c   : > { %v2147_v62 = vpop.eup %2146  ;;  %v1353_v10 = vmul.f32 %v2145_v37, %v2572_v56 }
 0x49d   : > { %v1355_v2 = vmul.f32 %v2147_v62, %v2586_v12  ;;  %v2149_v19 = vpop.eup %2148 }
 0x49e   : > { %v1360_v35 = vpack.c.bf16 %v1354_v21, %v1353_v10  ;;  %v2151_v1 = vpop.eup %2150  ;;  %v1358_v9 = vmul.f32 %v2149_v19, %v2600_v61 }
 0x49f   : > { %v1361_v3 = vpack.c.bf16 %v1356_v39, %v1355_v2  ;;  %v1357_v13 = vmul.f32 %v2151_v1, %v2596_v45 }
 0x4a0   : > { %1886 = vmatmul.mubr.msk.bf16.gmra.mrb[20].mxu0 %vm388_vm4, %v1070_v57 }
 0x4a1   : > { %1901 = vmatprep.mubr.msk.bf16.mxu0 %vm388_vm4, %v1359_v58  ;;  %v1362_v25 = vpack.c.bf16 %v1358_v9, %v1357_v13 }
 0x4a8   : > { %1902 = vmatmul.mubr.msk.bf16.vlgmr.msra.gmra.mrb[24].mxu0 %vm388_vm4, %v1360_v35 }
 0x4a9   : > { %1905 = vmatprep.mubr.msk.bf16.mxu0 %vm388_vm4, %v1361_v3 }
 0x4b0   : > { %1906 = vmatmul.mubr.msk.bf16.gmra.mrb[28].mxu0 %vm388_vm4, %v1362_v25 }
 0x53f   : > { %v1863_v60 = vpop.f32.mrb[8].mxu0 }
 0x540   : > { %v830_v7 = vpop.f32.mrb[9].mxu0 }
 0x541   : > { %v1864_v56 = vpop.f32.mrb[10].mxu0 }
 0x542   : > { %v1948_v27 = vpack.i.bf16 %v1864_v56, %v1863_v60  ;;  %v833_v12 = vpop.f32.mrb[11].mxu0 }
 0x543   : > { %v1953_v20 = vpack.i.bf16 %v833_v12, %v830_v7 }
 0x544   : > { %1949 = vrot.lane.b32.xlu0 %v1948_v27, %s2180_s24 }
 0x547   : > { %v1867_v38 = vpop.f32.mrb[12].mxu0 }
 0x548   : > { %1954 = vrot.lane.b32.xlu0 %v1953_v20, %s2180_s24  ;;  %v846_v47 = vpop.f32.mrb[13].mxu0 }
 0x549   : > { %v1868_v14 = vpop.f32.mrb[14].mxu0 }
 0x54a   : > { %v1958_v4 = vpack.i.bf16 %v1868_v14, %v1867_v38  ;;  %v849_v22 = vpop.f32.mrb[15].mxu0 }
 0x54b   : > { %v1963_v61 = vpack.i.bf16 %v849_v22, %v846_v47 }
 0x54c   : > { %1959 = vrot.lane.b32.xlu0 %v1958_v4, %s2180_s24 }
 0x550   : > { %1964 = vrot.lane.b32.xlu0 %v1963_v61, %s2180_s24 }
 0x56b   : > { %v1883_v45 = vpop.f32.mrb[16].mxu0 }
 0x56c   : > { %v1122_v23 = vpop.f32.mrb[17].mxu0 }
 0x56d   : > { %v1884_v24 = vpop.f32.mrb[18].mxu0 }
 0x56e   : > { %v1968_v26 = vpack.i.bf16 %v1884_v24, %v1883_v45  ;;  %v1125_v63 = vpop.f32.mrb[19].mxu0 }
 0x56f   : > { %v1973_v6 = vpack.i.bf16 %v1125_v63, %v1122_v23 }
 0x570   : > { %1969 = vrot.lane.b32.xlu1 %v1968_v26, %s2181_s25 }
 0x571   : > { %1974 = vrot.lane.b32.xlu0 %v1973_v6, %s2181_s25 }
 0x573   : > { %v1887_v52 = vpop.f32.mrb[20].mxu0 }
 0x574   : > { %v1138_v49 = vpop.f32.mrb[21].mxu0 }
 0x575   : > { %v1888_v34 = vpop.f32.mrb[22].mxu0 }
 0x576   : > { %v1978_v40 = vpack.i.bf16 %v1888_v34, %v1887_v52  ;;  %v1141_v0 = vpop.f32.mrb[23].mxu0 }
 0x577   : > { %v1983_v43 = vpack.i.bf16 %v1141_v0, %v1138_v49 }
 0x578   : > { %1979 = vrot.lane.b32.xlu1 %v1978_v40, %s2181_s25 }
 0x579   : > { %1984 = vrot.lane.b32.xlu0 %v1983_v43, %s2181_s25 }
 0x57b   : > { %v1903_v44 = vpop.f32.mrb[24].mxu0 }
 0x57c   : > { %v1414_v28 = vpop.f32.mrb[25].mxu0 }
 0x57d   : > { %v1904_v53 = vpop.f32.mrb[26].mxu0 }
 0x57e   : > { %v1988_v11 = vpack.i.bf16 %v1904_v53, %v1903_v44  ;;  %v1417_v46 = vpop.f32.mrb[27].mxu0 }
 0x57f   : > { %v1993_v18 = vpack.i.bf16 %v1417_v46, %v1414_v28 }
 0x580   : > { %1989 = vrot.lane.b32.xlu1 %v1988_v11, %s2182_s26 }
 0x581   : > { %1994 = vrot.lane.b32.xlu0 %v1993_v18, %s2182_s26 }
 0x583   : > { %v1907_v59 = vpop.f32.mrb[28].mxu0 }
 0x584   : > { %v1430_v36 = vpop.f32.mrb[29].mxu0 }
 0x585   : > { %v1908_v50 = vpop.f32.mrb[30].mxu0 }
 0x586   : > { %v2003_v51 = vpack.i.bf16 %v1908_v50, %v1907_v59  ;;  %v1433_v8 = vpop.f32.mrb[31].mxu0 }
 0x587   : > { %v1998_v5 = vpack.i.bf16 %v1433_v8, %v1430_v36 }
 0x588   : > { %2004 = vrot.lane.b32.xlu1 %v2003_v51, %s2182_s26 }
 0x589   : > { %1999 = vrot.lane.b32.xlu0 %v1998_v5, %s2182_s26 }
 0x5b6   : > { %v1950_v54 = vpop.permute.xlu0 %1949 }
 0x5b7   : > { %v1952_v48 = vunpack.i.h.bf16 %v1950_v54  ;;  %v1951_v37 = vunpack.i.l.bf16 %v1950_v54 }
 0x5b9   : > { %v1544_v1 = vsel %vm307_vm0, %v2376_v31, %v1952_v48  ;;  %v1543_v9 = vsel %vm307_vm0, %v2372_v29, %v1951_v37 }
 0x5ba   : > { %v1955_v55 = vpop.permute.xlu0 %1954 }
 0x5bb   : > { %v1957_v62 = vunpack.i.h.bf16 %v1955_v55  ;;  %v1956_v21 = vunpack.i.l.bf16 %v1955_v55 }
 0x5bd   : > { %v1542_v13 = vsel %vm307_vm0, %v2378_v32, %v1957_v62  ;;  %v1541_v25 = vsel %vm307_vm0, %v2374_v30, %v1956_v21 }
 0x5be   : > { %v1960_v42 = vpop.permute.xlu0 %1959 }
 0x5bf   : > { %v1962_v7 = vunpack.i.h.bf16 %v1960_v42  ;;  %v1961_v56 = vunpack.i.l.bf16 %v1960_v42 }
 0x5c1   : > { %v1548_v0 = vsel %vm307_vm0, %v2384_v16, %v1962_v7  ;;  %v1547_v43 = vsel %vm307_vm0, %v2380_v33, %v1961_v56 }
 0x5c2   : > { %v1965_v57 = vpop.permute.xlu0 %1964 }
 0x5c3   : > { %v1967_v24 = vunpack.i.h.bf16 %v1965_v57  ;;  %v1966_v26 = vunpack.i.l.bf16 %v1965_v57 }
 0x5c5   : > { %v1546_v28 = vsel %vm307_vm0, %v2386_v17, %v1967_v24  ;;  %v1545_v53 = vsel %vm307_vm0, %v2382_v15, %v1966_v26 }
 0x5e2   : > { %v1970_v41 = vpop.permute.xlu1 %1969 }
 0x5e3   : > { %v1975_v58 = vpop.permute.xlu0 %1974  ;;  %v1972_v2 = vunpack.i.h.bf16 %v1970_v41  ;;  %v1971_v35 = vunpack.i.l.bf16 %v1970_v41 }
 0x5e4   : > { %v1977_v19 = vunpack.i.h.bf16 %v1975_v58  ;;  %v1976_v3 = vunpack.i.l.bf16 %v1975_v58 }
 0x5e5   : > { %v1553_v38 = vsel %vm1549_vm6, %v1544_v1, %v1972_v2  ;;  %v1552_v31 = vsel %vm1549_vm6, %v1543_v9, %v1971_v35 }
 0x5e6   : > { %v1551_v29 = vsel %vm1549_vm6, %v1542_v13, %v1977_v19  ;;  %v1550_v4 = vsel %vm1549_vm6, %v1541_v25, %v1976_v3 }
 0x5ea   : > { %v1980_v39 = vpop.permute.xlu1 %1979 }
 0x5eb   : > { %v1985_v10 = vpop.permute.xlu0 %1984  ;;  %v1982_v52 = vunpack.i.h.bf16 %v1980_v39  ;;  %v1981_v49 = vunpack.i.l.bf16 %v1980_v39 }
 0x5ec   : > { %v1987_v34 = vunpack.i.h.bf16 %v1985_v10  ;;  %v1986_v40 = vunpack.i.l.bf16 %v1985_v10 }
 0x5ed   : > { %v1557_v59 = vsel %vm1549_vm6, %v1548_v0, %v1982_v52  ;;  %v1556_v16 = vsel %vm1549_vm6, %v1547_v43, %v1981_v49 }
 0x5ee   : > { %v1555_v50 = vsel %vm1549_vm6, %v1546_v28, %v1987_v34  ;;  %v1554_v17 = vsel %vm1549_vm6, %v1545_v53, %v1986_v40 }
 0x5f2   : > { %v1990_v60 = vpop.permute.xlu1 %1989 }
 0x5f3   : > { %v1992_v27 = vunpack.i.h.bf16 %v1990_v60  ;;  %v1991_v12 = vunpack.i.l.bf16 %v1990_v60  ;;  %v1995_v20 = vpop.permute.xlu0 %1994 }
 0x5f4   : > { %v1997_v47 = vunpack.i.h.bf16 %v1995_v20  ;;  %v1996_v14 = vunpack.i.l.bf16 %v1995_v20 }
 0x5f5   : > { %v1561_v30 = vsel %vm1558_vm7, %v1552_v31, %v1991_v12  ;;  %v1562_v32 = vsel %vm1558_vm7, %v1553_v38, %v1992_v27 }
 0x5f6   : > { %v1783_v22 = vpack.c.bf16 %v1561_v30, %v1561_v30  ;;  %v1784_v61 = vpack.c.bf16 %v1562_v32, %v1562_v32  ;;  %v1560_v45 = vsel %vm1558_vm7, %v1551_v29, %v1997_v47  ;;  %v1559_v23 = vsel %vm1558_vm7, %v1550_v4, %v1996_v14 }
 0x5f7   : > { %v1782_v63 = vpack.c.bf16 %v1560_v45, %v1560_v45  ;;  %v1781_v6 = vpack.c.bf16 %v1559_v23, %v1559_v23 }
 0x5f8   : > { %1602 = vst.msk [vmem:[%s2669_s29 + $0x8] sm:$0xf] %vm1599_vm8, %v1783_v22  ;;  %1603 = vst.msk [vmem:[%s2669_s29 + $0xc] sm:$0xf] %vm1599_vm8, %v1784_v61 }
 0x5f9   : > { %1601 = vst.msk [vmem:[%s2669_s29 + $0x4] sm:$0xf] %vm1599_vm8, %v1782_v63  ;;  %1600 = vst.msk [vmem:[%s2669_s29] sm:$0xf] %vm1599_vm8, %v1781_v6 }
 0x5fa   : > { %v2005_v44 = vpop.permute.xlu1 %2004 }
 0x5fb   : > { %v2007_v11 = vunpack.i.h.bf16 %v2005_v44  ;;  %v2006_v46 = vunpack.i.l.bf16 %v2005_v44  ;;  %v2000_v18 = vpop.permute.xlu0 %1999 }
 0x5fc   : > { %v2002_v36 = vunpack.i.h.bf16 %v2000_v18  ;;  %v2001_v33 = vunpack.i.l.bf16 %v2000_v18 }
 0x5fd   : > { %v1565_v51 = vsel %vm1558_vm7, %v1556_v16, %v2006_v46  ;;  %v1566_v15 = vsel %vm1558_vm7, %v1557_v59, %v2007_v11 }
 0x5fe   : > { %v1787_v8 = vpack.c.bf16 %v1565_v51, %v1565_v51  ;;  %v1788_v5 = vpack.c.bf16 %v1566_v15, %v1566_v15  ;;  %v1564_v54 = vsel %vm1558_vm7, %v1555_v50, %v2002_v36  ;;  %v1563_v55 = vsel %vm1558_vm7, %v1554_v17, %v2001_v33 }
 0x5ff   : > { %v1786_v42 = vpack.c.bf16 %v1564_v54, %v1564_v54  ;;  %v1785_v57 = vpack.c.bf16 %v1563_v55, %v1563_v55 }
 0x600   : > { %1606 = vst.msk [vmem:[%s2669_s29 + $0x18] sm:$0xf] %vm1599_vm8, %v1787_v8  ;;  %1607 = vst.msk [vmem:[%s2669_s29 + $0x1c] sm:$0xf] %vm1599_vm8, %v1788_v5 }
 0x601   : > { %1605 = vst.msk [vmem:[%s2669_s29 + $0x14] sm:$0xf] %vm1599_vm8, %v1786_v42  ;;  %1604 = vst.msk [vmem:[%s2669_s29 + $0x10] sm:$0xf] %vm1599_vm8, %v1785_v57 }
 0x602 PF: > { %s12_s11 = sadd.s32 1, %s2174_s11   ;;  %s2719_s9 = smov %s2170_s10 }
 0x603   : > { %p9_p5 = scmp.ge.s32.totalorder %s12_s11, 4   ;;  %s2720_s10 = smov %s2722_s12 }
 0x605   :  { %11 = sbr.rel (!%p9_p5) target bundleno = 2 (0x2), region = 61 }

// kernel: wave_block_forward.23
= control target key start
LH: loop header
LB: loop body
LE: loop exit
PB: predicated region body
PF: predicated region fallthrough
CT: control target
= control target key end

     0   :  { %vm123_vm0 = vcmask 1043456   ;;  %vm98_vm1 = vcmask 64512   ;;  %vm276_vm2 = vcmask 261120   ;;  %s756_s1 = inlined_call_operand.vmem [shape: bf16[32,32], index: 1, kind: input, shape index: {}]   ;;  %s757_s3 = inlined_call_operand.vmem [shape: bf16[8,32], index: 3, kind: input, shape index: {}]   ;;  %s758_s2 = inlined_call_operand.vmem [shape: bf16[128,8], index: 2, kind: input, shape index: {}]   ;;  %s759_s0 = inlined_call_operand.vmem [shape: bf16[128,32], index: 0, kind: input, shape index: {}]   ;;  %s760_s4 = inlined_call_operand.vmem [shape: f32[1,32], index: 4, kind: input, shape index: {}]   ;;  %s761_s5 = inlined_call_operand.vmem [shape: f32[128,32], index: 5, kind: output, shape index: {}]  }
   0x1   :  { %v550_v0 = vld [vmem:[%s756_s1] sm:$0xff]   ;;  %v552_v4 = vld [vmem:[%s756_s1 + $0x8] sm:$0xff]   ;;  %v556_v8 = vld [vmem:[%s758_s2 + $0x10] sm:$0xff]  }
   0x2   :  { %v57_v1 = vld [vmem:[%s757_s3] sm:$0xf]  ;;  %513 = vmatprep.subr.bf16.mxu0 %v550_v0  ;;  %v553_v5 = vld [vmem:[%s758_s2 + $0x8] sm:$0xff]   ;;  %v558_v9 = vld [vmem:[%s759_s0 + $0x10] sm:$0xff]  }
   0x3   :  { %549 = vmatprep.subr.msk.bf16.mxu1 %vm123_vm0, %v57_v1  ;;  %v125_v2 = vsel %vm123_vm0, %v57_v1, 0  ;;  %v551_v3 = vld [vmem:[%s758_s2] sm:$0xff]   ;;  %514 = vmatpush3.bf16.msra.mxu0 %v550_v0  ;;  %v555_v7 = vld [vmem:[%s759_s0 + $0x8] sm:$0xff]   ;;  %v557_v10 = vld [vmem:[%s758_s2 + $0x18] sm:$0xff]  }
   0x4   :  { %496 = vmatpush3.bf16.msra.mxu1 %v125_v2  ;;  %497 = vmatprep.mubr.msk.bf16.mxu1 %vm98_vm1, %v551_v3  ;;  %v554_v6 = vld [vmem:[%s759_s0] sm:$0xff]   ;;  %v559_v12 = vld [vmem:[%s759_s0 + $0x18] sm:$0xff]   ;;  %v561_v14 = vld [vmem:[%s758_s2 + $0x28] sm:$0xff]  }
   0x5   :  { %515 = vmatprep.subr.bf16.mxu0 %v552_v4  ;;  %517 = vmatprep.mubr.msk.bf16.mxu0 %vm276_vm2, %v554_v6  ;;  %v560_v11 = vld [vmem:[%s758_s2 + $0x20] sm:$0xff]   ;;  %v564_v15 = vld [vmem:[%s758_s2 + $0x30] sm:$0xff]   ;;  %v563_v16 = vld [vmem:[%s759_s0 + $0x28] sm:$0xff]  }
   0x6   :  { %v562_v13 = vld [vmem:[%s759_s0 + $0x20] sm:$0xff]   ;;  %v566_v17 = vld [vmem:[%s759_s0 + $0x30] sm:$0xff]   ;;  %v565_v18 = vld [vmem:[%s758_s2 + $0x38] sm:$0xff]  }
   0x7   :  { %498 = vmatmul.mubr.msk.bf16.vlgmr.msra.gmra.mrb[0].mxu1 %vm98_vm1, %v553_v5  ;;  %516 = vmatpush3.bf16.msra.mxu0 %v552_v4  ;;  %v567_v19 = vld [vmem:[%s759_s0 + $0x38] sm:$0xff]   ;;  %v674_v25 = vld [vmem:[%s760_s4] ss:$0 sm:$0xff] }
   0x8   :  { %501 = vmatprep.mubr.msk.bf16.mxu1 %vm98_vm1, %v556_v8 }
   0xa   :  { %518 = vmatmul.mubr.msk.bf16.vlgmr.msra.gmra.mrb[0].mxu0 %vm276_vm2, %v555_v7 }
   0xb   :  { %521 = vmatprep.mubr.msk.bf16.mxu0 %vm276_vm2, %v558_v9 }
   0xf   :  { %502 = vmatmul.mubr.msk.bf16.gmra.mrb[4].mxu1 %vm98_vm1, %v557_v10 }
  0x10   :  { %505 = vmatprep.mubr.msk.bf16.mxu1 %vm98_vm1, %v560_v11 }
  0x12   :  { %522 = vmatmul.mubr.msk.bf16.gmra.mrb[4].mxu0 %vm276_vm2, %v559_v12 }
  0x13   :  { %525 = vmatprep.mubr.msk.bf16.mxu0 %vm276_vm2, %v562_v13 }
  0x17   :  { %506 = vmatmul.mubr.msk.bf16.gmra.mrb[8].mxu1 %vm98_vm1, %v561_v14 }
  0x18   :  { %509 = vmatprep.mubr.msk.bf16.mxu1 %vm98_vm1, %v564_v15 }
  0x1a   :  { %526 = vmatmul.mubr.msk.bf16.gmra.mrb[8].mxu0 %vm276_vm2, %v563_v16 }
  0x1b   :  { %529 = vmatprep.mubr.msk.bf16.mxu0 %vm276_vm2, %v566_v17 }
  0x1f   :  { %510 = vmatmul.mubr.msk.bf16.gmra.mrb[12].mxu1 %vm98_vm1, %v565_v18 }
  0x22   :  { %530 = vmatmul.mubr.msk.bf16.gmra.mrb[12].mxu0 %vm276_vm2, %v567_v19 }
  0xda   :  { %v499_v20 = vpop.f32.mrb[0].mxu1 }
  0xdb   :  { %v161_v21 = vpop.f32.mrb[1].mxu1 }
  0xdc   :  { %v500_v22 = vpop.f32.mrb[2].mxu1 }
  0xdd   :  { %v164_v23 = vpop.f32.mrb[3].mxu1  ;;  %v519_v24 = vpop.f32.mrb[0].mxu0 }
  0xde   :  { %v344_v26 = vadd.f32 %v519_v24, %v499_v20  ;;  %v335_v27 = vpop.f32.mrb[1].mxu0 }
  0xdf   :  { %v336_v28 = vadd.f32 %v335_v27, %v161_v21  ;;  %v520_v29 = vpop.f32.mrb[2].mxu0 }
  0xe0   :  { %v407_v30 = vadd.f32 %v674_v25, %v344_v26  ;;  %v347_v31 = vadd.f32 %v520_v29, %v500_v22  ;;  %v338_v32 = vpop.f32.mrb[3].mxu0 }
  0xe1   :  { %v405_v33 = vadd.f32 %v674_v25, %v336_v28  ;;  %v339_v34 = vadd.f32 %v338_v32, %v164_v23 }
  0xe2   :  { %v503_v35 = vpop.f32.mrb[4].mxu1  ;;  %423 = vst.msk [vmem:[%s761_s5 + $0x10] sm:$0xff] %vm276_vm2, %v407_v30  ;;  %v408_v36 = vadd.f32 %v674_v25, %v347_v31 }
  0xe3   :  { %v177_v37 = vpop.f32.mrb[5].mxu1  ;;  %421 = vst.msk [vmem:[%s761_s5] sm:$0xff] %vm276_vm2, %v405_v33  ;;  %v406_v38 = vadd.f32 %v674_v25, %v339_v34 }
  0xe4   :  { %v504_v39 = vpop.f32.mrb[6].mxu1  ;;  %424 = vst.msk [vmem:[%s761_s5 + $0x18] sm:$0xff] %vm276_vm2, %v408_v36 }
  0xe5   :  { %v180_v40 = vpop.f32.mrb[7].mxu1  ;;  %422 = vst.msk [vmem:[%s761_s5 + $0x8] sm:$0xff] %vm276_vm2, %v406_v38  ;;  %v523_v41 = vpop.f32.mrb[4].mxu0 }
  0xe6   :  { %v360_v42 = vadd.f32 %v523_v41, %v503_v35  ;;  %v351_v43 = vpop.f32.mrb[5].mxu0 }
  0xe7   :  { %v352_v44 = vadd.f32 %v351_v43, %v177_v37  ;;  %v524_v45 = vpop.f32.mrb[6].mxu0 }
  0xe8   :  { %v411_v46 = vadd.f32 %v674_v25, %v360_v42  ;;  %v363_v47 = vadd.f32 %v524_v45, %v504_v39  ;;  %v354_v48 = vpop.f32.mrb[7].mxu0 }
  0xe9   :  { %v409_v49 = vadd.f32 %v674_v25, %v352_v44  ;;  %v355_v50 = vadd.f32 %v354_v48, %v180_v40 }
  0xea   :  { %v507_v51 = vpop.f32.mrb[8].mxu1  ;;  %427 = vst.msk [vmem:[%s761_s5 + $0x30] sm:$0xff] %vm276_vm2, %v411_v46  ;;  %v412_v52 = vadd.f32 %v674_v25, %v363_v47 }
  0xeb   :  { %v193_v53 = vpop.f32.mrb[9].mxu1  ;;  %425 = vst.msk [vmem:[%s761_s5 + $0x20] sm:$0xff] %vm276_vm2, %v409_v49  ;;  %v410_v54 = vadd.f32 %v674_v25, %v355_v50 }
  0xec   :  { %v508_v55 = vpop.f32.mrb[10].mxu1  ;;  %428 = vst.msk [vmem:[%s761_s5 + $0x38] sm:$0xff] %vm276_vm2, %v412_v52 }
  0xed   :  { %v196_v56 = vpop.f32.mrb[11].mxu1  ;;  %426 = vst.msk [vmem:[%s761_s5 + $0x28] sm:$0xff] %vm276_vm2, %v410_v54  ;;  %v527_v57 = vpop.f32.mrb[8].mxu0 }
  0xee   :  { %v376_v58 = vadd.f32 %v527_v57, %v507_v51  ;;  %v367_v59 = vpop.f32.mrb[9].mxu0 }
  0xef   :  { %v368_v60 = vadd.f32 %v367_v59, %v193_v53  ;;  %v528_v61 = vpop.f32.mrb[10].mxu0 }
  0xf0   :  { %v415_v62 = vadd.f32 %v674_v25, %v376_v58  ;;  %v379_v63 = vadd.f32 %v528_v61, %v508_v55  ;;  %v370_v0 = vpop.f32.mrb[11].mxu0 }
  0xf1   :  { %v413_v1 = vadd.f32 %v674_v25, %v368_v60  ;;  %v371_v2 = vadd.f32 %v370_v0, %v196_v56 }
  0xf2   :  { %v511_v3 = vpop.f32.mrb[12].mxu1  ;;  %431 = vst.msk [vmem:[%s761_s5 + $0x50] sm:$0xff] %vm276_vm2, %v415_v62  ;;  %v416_v4 = vadd.f32 %v674_v25, %v379_v63 }
  0xf3   :  { %v209_v5 = vpop.f32.mrb[13].mxu1  ;;  %429 = vst.msk [vmem:[%s761_s5 + $0x40] sm:$0xff] %vm276_vm2, %v413_v1  ;;  %v414_v6 = vadd.f32 %v674_v25, %v371_v2 }
  0xf4   :  { %v512_v7 = vpop.f32.mrb[14].mxu1  ;;  %432 = vst.msk [vmem:[%s761_s5 + $0x58] sm:$0xff] %vm276_vm2, %v416_v4 }
  0xf5   :  { %v212_v8 = vpop.f32.mrb[15].mxu1  ;;  %430 = vst.msk [vmem:[%s761_s5 + $0x48] sm:$0xff] %vm276_vm2, %v414_v6  ;;  %v531_v9 = vpop.f32.mrb[12].mxu0 }
  0xf6   :  { %v392_v10 = vadd.f32 %v531_v9, %v511_v3  ;;  %v383_v11 = vpop.f32.mrb[13].mxu0 }
  0xf7   :  { %v384_v12 = vadd.f32 %v383_v11, %v209_v5  ;;  %v532_v13 = vpop.f32.mrb[14].mxu0 }
  0xf8   :  { %v419_v14 = vadd.f32 %v674_v25, %v392_v10  ;;  %v395_v15 = vadd.f32 %v532_v13, %v512_v7  ;;  %v386_v16 = vpop.f32.mrb[15].mxu0 }
  0xf9   :  { %v417_v17 = vadd.f32 %v674_v25, %v384_v12  ;;  %v387_v18 = vadd.f32 %v386_v16, %v212_v8 }
  0xfa   :  { %435 = vst.msk [vmem:[%s761_s5 + $0x70] sm:$0xff] %vm276_vm2, %v419_v14  ;;  %v420_v19 = vadd.f32 %v674_v25, %v395_v15 }
  0xfb   :  { %433 = vst.msk [vmem:[%s761_s5 + $0x60] sm:$0xff] %vm276_vm2, %v417_v17  ;;  %v418_v20 = vadd.f32 %v674_v25, %v387_v18 }
  0xfc   :  { %436 = vst.msk [vmem:[%s761_s5 + $0x78] sm:$0xff] %vm276_vm2, %v420_v19 }
  0xfd   :  { %434 = vst.msk [vmem:[%s761_s5 + $0x68] sm:$0xff] %vm276_vm2, %v418_v20 }

// kernel: wave_block_forward.25
= control target key start
LH: loop header
LB: loop body
LE: loop exit
PB: predicated region body
PF: predicated region fallthrough
CT: control target
= control target key end

     0   :  { %vm22_vm0 = vcmask 523264   ;;  %v705_v1 = vmov 0.0   ;;  %vm127_vm1 = vcmask 261120   ;;  %vm555_vm2 = vcmask 519168   ;;  %s997_s1 = inlined_call_operand.vmem [shape: bf16[32,64], index: 1, kind: input, shape index: {}]   ;;  %s998_s0 = inlined_call_operand.vmem [shape: bf16[128,32], index: 0, kind: input, shape index: {}]   ;;  %s999_s2 = inlined_call_operand.vmem [shape: f32[1,64], index: 2, kind: input, shape index: {}]   ;;  %s1000_s3 = inlined_call_operand.vmem [shape: f32[1,64], index: 3, kind: input, shape index: {}]   ;;  %s1001_s4 = inlined_call_operand.vmem [shape: bf16[128,64], index: 4, kind: output, shape index: {}]  }
   0x1   :  { %v663_v0 = vld [vmem:[%s997_s1] sm:$0xff]   ;;  %25 = vst.msk [vmem:[#allocation2 + $0x10] sm:$0xff] %vm22_vm0, %v705_v1  ;;  %23 = vst.msk [vmem:[#allocation2] sm:$0xff] %vm22_vm0, %v705_v1  ;;  %v664_v2 = vld [vmem:[%s997_s1 + $0x8] sm:$0xff]  }
   0x2   :  { %24 = vst.msk [vmem:[#allocation2 + $0x8] sm:$0xff] %vm22_vm0, %v705_v1  ;;  %26 = vst.msk [vmem:[#allocation2 + $0x18] sm:$0xff] %vm22_vm0, %v705_v1  ;;  %638 = vmatprep.subr.bf16.mxu0 %v663_v0  ;;  %658 = vmatprep.subr.bf16.mxu1 %v663_v0  ;;  %v665_v3 = vld [vmem:[%s998_s0] sm:$0xff]   ;;  %v667_v5 = vld [vmem:[%s998_s0 + $0x8] sm:$0xff]  }
   0x3   :  { %27 = vst.msk [vmem:[#allocation2 + $0x20] sm:$0xff] %vm22_vm0, %v705_v1  ;;  %28 = vst.msk [vmem:[#allocation2 + $0x28] sm:$0xff] %vm22_vm0, %v705_v1  ;;  %639 = vmatpush3.bf16.msra.mxu0 %v663_v0  ;;  %660 = vmatpush3.bf16.msra.mxu1 %v663_v0  ;;  %v666_v4 = vld [vmem:[%s998_s0 + $0x20] sm:$0xff]   ;;  %v668_v6 = vld [vmem:[%s998_s0 + $0x28] sm:$0xff]  }
   0x4   :  { %29 = vst.msk [vmem:[#allocation2 + $0x30] sm:$0xff] %vm22_vm0, %v705_v1  ;;  %30 = vst.msk [vmem:[#allocation2 + $0x38] sm:$0xff] %vm22_vm0, %v705_v1  ;;  %640 = vmatprep.subr.bf16.mxu0 %v664_v2  ;;  %659 = vmatprep.subr.bf16.mxu1 %v664_v2  ;;  %v669_v7 = vld [vmem:[%s998_s0 + $0x10] sm:$0xff]   ;;  %v671_v9 = vld [vmem:[%s998_s0 + $0x18] sm:$0xff]  }
   0x5   :  { %31 = vst.msk [vmem:[#allocation2 + $0x40] sm:$0xff] %vm22_vm0, %v705_v1  ;;  %32 = vst.msk [vmem:[#allocation2 + $0x48] sm:$0xff] %vm22_vm0, %v705_v1  ;;  %642 = vmatprep.mubr.msk.bf16.mxu0 %vm127_vm1, %v665_v3  ;;  %650 = vmatprep.mubr.msk.bf16.mxu1 %vm127_vm1, %v666_v4  ;;  %v670_v8 = vld [vmem:[%s998_s0 + $0x30] sm:$0xff]   ;;  %v672_v10 = vld [vmem:[%s998_s0 + $0x38] sm:$0xff]  }
   0x6   :  { %33 = vst.msk [vmem:[#allocation2 + $0x50] sm:$0xff] %vm22_vm0, %v705_v1  ;;  %34 = vst.msk [vmem:[#allocation2 + $0x58] sm:$0xff] %vm22_vm0, %v705_v1  ;;  %v796_v39 = vld [vmem:[%s999_s2] ss:$0 sm:$0xff] }
   0x7   :  { %35 = vst.msk [vmem:[#allocation2 + $0x60] sm:$0xff] %vm22_vm0, %v705_v1  ;;  %36 = vst.msk [vmem:[#allocation2 + $0x68] sm:$0xff] %vm22_vm0, %v705_v1  ;;  %641 = vmatpush3.bf16.msra.mxu0 %v664_v2  ;;  %661 = vmatpush3.bf16.msra.mxu1 %v664_v2  ;;  %v801_v51 = vld [vmem:[%s1000_s3] ss:$0 sm:$0xff] }
   0x8   :  { %37 = vst.msk [vmem:[#allocation2 + $0x70] sm:$0xff] %vm22_vm0, %v705_v1  ;;  %38 = vst.msk [vmem:[#allocation2 + $0x78] sm:$0xff] %vm22_vm0, %v705_v1  ;;  %v57_v11 = vld [vmem:[#allocation2 + $0x10] sm:$0xff]  ;;  %v55_v13 = vld [vmem:[#allocation2] sm:$0xff] }
   0x9   :  { %v58_v17 = vld [vmem:[#allocation2 + $0x18] sm:$0xff]  ;;  %v56_v23 = vld [vmem:[#allocation2 + $0x8] sm:$0xff] }
   0xa   :  { %643 = vmatmul.mubr.msk.bf16.vlgmr.msra.gmra.mrb[0].mxu0 %vm127_vm1, %v667_v5  ;;  %651 = vmatmul.mubr.msk.bf16.vlgmr.msra.gmra.mrb[0].mxu1 %vm127_vm1, %v668_v6  ;;  %v59_v37 = vld [vmem:[#allocation2 + $0x20] sm:$0xff]  ;;  %v60_v48 = vld [vmem:[#allocation2 + $0x28] sm:$0xff] }
   0xb   :  { %646 = vmatprep.mubr.msk.bf16.mxu0 %vm127_vm1, %v669_v7  ;;  %654 = vmatprep.mubr.msk.bf16.mxu1 %vm127_vm1, %v670_v8  ;;  %v61_v35 = vld [vmem:[#allocation2 + $0x30] sm:$0xff]  ;;  %v62_v42 = vld [vmem:[#allocation2 + $0x38] sm:$0xff] }
   0xc   :  { %v63_v14 = vld [vmem:[#allocation2 + $0x40] sm:$0xff]  ;;  %v64_v24 = vld [vmem:[#allocation2 + $0x48] sm:$0xff] }
   0xd   :  { %v65_v12 = vld [vmem:[#allocation2 + $0x50] sm:$0xff]  ;;  %v66_v18 = vld [vmem:[#allocation2 + $0x58] sm:$0xff] }
   0xe   :  { %v67_v38 = vld [vmem:[#allocation2 + $0x60] sm:$0xff]  ;;  %v68_v49 = vld [vmem:[#allocation2 + $0x68] sm:$0xff] }
   0xf   :  { %v69_v36 = vld [vmem:[#allocation2 + $0x70] sm:$0xff]  ;;  %v70_v43 = vld [vmem:[#allocation2 + $0x78] sm:$0xff] }
  0x12   :  { %647 = vmatmul.mubr.msk.bf16.gmra.mrb[4].mxu0 %vm127_vm1, %v671_v9  ;;  %655 = vmatmul.mubr.msk.bf16.gmra.mrb[4].mxu1 %vm127_vm1, %v672_v10 }
  0xdd   :  { %v644_v15 = vpop.f32.mrb[0].mxu0  ;;  %v652_v16 = vpop.f32.mrb[0].mxu1 }
  0xde   :  { %v251_v19 = vadd.f32 %v644_v15, %v57_v11  ;;  %v259_v20 = vadd.f32 %v652_v16, %v65_v12  ;;  %v186_v21 = vpop.f32.mrb[1].mxu0  ;;  %v218_v22 = vpop.f32.mrb[1].mxu1 }
  0xdf   :  { %v249_v25 = vadd.f32 %v186_v21, %v55_v13  ;;  %v257_v26 = vadd.f32 %v218_v22, %v63_v14  ;;  %v645_v27 = vpop.f32.mrb[2].mxu0  ;;  %v653_v28 = vpop.f32.mrb[2].mxu1 }
  0xe0   :  { %268 = vst.msk [vmem:[#allocation2 + $0x10] sm:$0xff] %vm22_vm0, %v251_v19  ;;  %276 = vst.msk [vmem:[#allocation2 + $0x50] sm:$0xff] %vm22_vm0, %v259_v20  ;;  %v252_v29 = vadd.f32 %v645_v27, %v58_v17  ;;  %v260_v30 = vadd.f32 %v653_v28, %v66_v18  ;;  %v189_v31 = vpop.f32.mrb[3].mxu0  ;;  %v221_v32 = vpop.f32.mrb[3].mxu1 }
  0xe1   :  { %266 = vst.msk [vmem:[#allocation2] sm:$0xff] %vm22_vm0, %v249_v25  ;;  %274 = vst.msk [vmem:[#allocation2 + $0x40] sm:$0xff] %vm22_vm0, %v257_v26  ;;  %v250_v33 = vadd.f32 %v189_v31, %v56_v23  ;;  %v258_v34 = vadd.f32 %v221_v32, %v64_v24 }
  0xe2   :  { %269 = vst.msk [vmem:[#allocation2 + $0x18] sm:$0xff] %vm22_vm0, %v252_v29  ;;  %277 = vst.msk [vmem:[#allocation2 + $0x58] sm:$0xff] %vm22_vm0, %v260_v30 }
  0xe3   :  { %267 = vst.msk [vmem:[#allocation2 + $0x8] sm:$0xff] %vm22_vm0, %v250_v33  ;;  %275 = vst.msk [vmem:[#allocation2 + $0x48] sm:$0xff] %vm22_vm0, %v258_v34 }
  0xe5   :  { %v648_v40 = vpop.f32.mrb[4].mxu0  ;;  %v656_v41 = vpop.f32.mrb[4].mxu1 }
  0xe6   :  { %v255_v44 = vadd.f32 %v648_v40, %v61_v35  ;;  %v263_v45 = vadd.f32 %v656_v41, %v69_v36  ;;  %v202_v46 = vpop.f32.mrb[5].mxu0  ;;  %v234_v47 = vpop.f32.mrb[5].mxu1 }
  0xe7   :  { %v287_v50 = vld [vmem:[#allocation2 + $0x10] sm:$0xff]  ;;  %v253_v53 = vadd.f32 %v202_v46, %v59_v37  ;;  %v261_v54 = vadd.f32 %v234_v47, %v67_v38  ;;  %v649_v55 = vpop.f32.mrb[6].mxu0  ;;  %v657_v56 = vpop.f32.mrb[6].mxu1 }
  0xe8   :  { %v295_v52 = vld [vmem:[#allocation2 + $0x50] sm:$0xff]  ;;  %v310_v57 = vmul.f32 %v796_v39, %v287_v50  ;;  %v285_v59 = vld [vmem:[#allocation2] sm:$0xff]  ;;  %272 = vst.msk [vmem:[#allocation2 + $0x30] sm:$0xff] %vm22_vm0, %v255_v44  ;;  %280 = vst.msk [vmem:[#allocation2 + $0x70] sm:$0xff] %vm22_vm0, %v263_v45  ;;  %v256_v61 = vadd.f32 %v649_v55, %v62_v42  ;;  %v264_v62 = vadd.f32 %v657_v56, %v70_v43  ;;  %v205_v63 = vpop.f32.mrb[7].mxu0  ;;  %v237_v0 = vpop.f32.mrb[7].mxu1 }
  0xe9   :  { %v318_v58 = vmul.f32 %v796_v39, %v295_v52  ;;  %v293_v60 = vld [vmem:[#allocation2 + $0x40] sm:$0xff]  ;;  %v308_v1 = vmul.f32 %v796_v39, %v285_v59  ;;  %v288_v3 = vld [vmem:[#allocation2 + $0x18] sm:$0xff]  ;;  %270 = vst.msk [vmem:[#allocation2 + $0x20] sm:$0xff] %vm22_vm0, %v253_v53  ;;  %278 = vst.msk [vmem:[#allocation2 + $0x60] sm:$0xff] %vm22_vm0, %v261_v54  ;;  %v254_v5 = vadd.f32 %v205_v63, %v60_v48 }
  0xea   :  { %v316_v2 = vmul.f32 %v796_v39, %v293_v60  ;;  %v296_v4 = vld [vmem:[#allocation2 + $0x58] sm:$0xff]  ;;  %v262_v6 = vadd.f32 %v237_v0, %v68_v49  ;;  %v333_v7 = vadd.f32 %v801_v51, %v310_v57  ;;  %v311_v9 = vmul.f32 %v796_v39, %v288_v3  ;;  %v286_v11 = vld [vmem:[#allocation2 + $0x8] sm:$0xff]  ;;  %273 = vst.msk [vmem:[#allocation2 + $0x38] sm:$0xff] %vm22_vm0, %v256_v61 }
  0xeb   :  { %v341_v8 = vadd.f32 %v801_v51, %v318_v58  ;;  %v319_v10 = vmul.f32 %v796_v39, %v296_v4  ;;  %v294_v12 = vld [vmem:[#allocation2 + $0x48] sm:$0xff]  ;;  %281 = vst.msk [vmem:[#allocation2 + $0x78] sm:$0xff] %vm22_vm0, %v264_v62  ;;  %v331_v13 = vadd.f32 %v801_v51, %v308_v1  ;;  %v309_v15 = vmul.f32 %v796_v39, %v286_v11 }
  0xec   :  { %v819_v14 = vadd.f32 %v801_v51, %v316_v2  ;;  %271 = vst.msk [vmem:[#allocation2 + $0x28] sm:$0xff] %vm22_vm0, %v254_v5  ;;  %279 = vst.msk [vmem:[#allocation2 + $0x68] sm:$0xff] %vm22_vm0, %v262_v6  ;;  %v365_v16 = vmul.f32 0.044715, %v333_v7  ;;  %v317_v20 = vmul.f32 %v796_v39, %v294_v12  ;;  %v827_v23 = vadd.f32 %v801_v51, %v311_v9 }
  0xed   :  { %v373_v17 = vmul.f32 0.044715, %v341_v8  ;;  %v363_v18 = vmul.f32 0.044715, %v331_v13  ;;  %v830_v24 = vadd.f32 %v801_v51, %v319_v10  ;;  %v834_v27 = vadd.f32 %v801_v51, %v309_v15 }
  0xee   :  { %v371_v19 = vmul.f32 0.044715, %v819_v14  ;;  %v381_v21 = vmul.f32 %v365_v16, %v333_v7  ;;  %v366_v30 = vmul.f32 0.044715, %v827_v23  ;;  %v837_v31 = vmul.f32 0.5, %v333_v7 }
  0xef   :  { %v389_v22 = vmul.f32 %v373_v17, %v341_v8  ;;  %v379_v25 = vmul.f32 %v363_v18, %v331_v13  ;;  %v374_v34 = vmul.f32 0.044715, %v830_v24  ;;  %v843_v38 = vadd.f32 %v801_v51, %v317_v20  ;;  %v291_v44 = vld [vmem:[#allocation2 + $0x30] sm:$0xff] }
  0xf0   :  { %v387_v26 = vmul.f32 %v371_v19, %v819_v14  ;;  %v397_v28 = vmul.f32 %v381_v21, %v333_v7  ;;  %v382_v37 = vmul.f32 %v366_v30, %v827_v23  ;;  %v364_v43 = vmul.f32 0.044715, %v834_v27  ;;  %v299_v49 = vld [vmem:[#allocation2 + $0x70] sm:$0xff]  ;;  %v289_v3 = vld [vmem:[#allocation2 + $0x20] sm:$0xff] }
  0xf1   :  { %v405_v29 = vmul.f32 %v389_v22, %v341_v8  ;;  %v395_v32 = vmul.f32 %v379_v25, %v331_v13  ;;  %v390_v42 = vmul.f32 %v374_v34, %v830_v24  ;;  %v848_v46 = vmul.f32 0.5, %v341_v8  ;;  %v297_v4 = vld [vmem:[#allocation2 + $0x60] sm:$0xff] }
  0xf2   :  { %v403_v33 = vmul.f32 %v387_v26, %v819_v14  ;;  %v413_v35 = vadd.f32 %v397_v28, %v333_v7  ;;  %v398_v48 = vmul.f32 %v382_v37, %v827_v23  ;;  %v380_v54 = vmul.f32 %v364_v43, %v834_v27  ;;  %v300_v9 = vld [vmem:[#allocation2 + $0x78] sm:$0xff] }
  0xf3   :  { %v421_v36 = vadd.f32 %v405_v29, %v341_v8  ;;  %v411_v40 = vadd.f32 %v395_v32, %v331_v13  ;;  %v406_v53 = vmul.f32 %v390_v42, %v830_v24  ;;  %v372_v56 = vmul.f32 0.044715, %v843_v38  ;;  %v292_v8 = vld [vmem:[#allocation2 + $0x38] sm:$0xff]  ;;  %v290_v32 = vld [vmem:[#allocation2 + $0x28] sm:$0xff] }
  0xf4   :  { %v419_v41 = vadd.f32 %v403_v33, %v819_v14  ;;  %v429_v45 = vmul.f32 0.7978846, %v413_v35  ;;  %v414_v55 = vadd.f32 %v398_v48, %v827_v23  ;;  %v314_v57 = vmul.f32 %v796_v39, %v291_v44 }
  0xf5   :  { %v437_v47 = vmul.f32 0.7978846, %v421_v36  ;;  %v427_v50 = vmul.f32 0.7978846, %v411_v40  ;;  %v422_v58 = vadd.f32 %v406_v53, %v830_v24  ;;  %v396_v59 = vmul.f32 %v380_v54, %v834_v27 }
  0xf6   :  { %v435_v52 = vmul.f32 0.7978846, %v419_v41  ;;  %673 = vtanh.f32 %v429_v45  ;;  %v322_v60 = vmul.f32 %v796_v39, %v299_v49  ;;  %v430_v61 = vmul.f32 0.7978846, %v414_v55 }
  0xf7   :  { %675 = vtanh.f32 %v437_v47  ;;  %v388_v62 = vmul.f32 %v372_v56, %v843_v38  ;;  %v861_v63 = vadd.f32 %v801_v51, %v314_v57  ;;  %v438_v0 = vmul.f32 0.7978846, %v422_v58 }
  0xf8   :  { %677 = vtanh.f32 %v427_v50  ;;  %v412_v1 = vadd.f32 %v396_v59, %v834_v27  ;;  %v865_v2 = vadd.f32 %v801_v51, %v322_v60  ;;  %v347_v5 = vmul.f32 0.5, %v331_v13 }
  0xf9   :  { %679 = vtanh.f32 %v435_v52  ;;  %v404_v6 = vmul.f32 %v388_v62, %v843_v38  ;;  %v369_v7 = vmul.f32 0.044715, %v861_v63  ;;  %v355_v10 = vmul.f32 0.5, %v819_v14 }
  0xfa   :  { %681 = vtanh.f32 %v430_v61  ;;  %v428_v11 = vmul.f32 0.7978846, %v412_v1  ;;  %v377_v12 = vmul.f32 0.044715, %v865_v2  ;;  %v312_v13 = vmul.f32 %v796_v39, %v289_v3 }
  0xfb   :  { %683 = vtanh.f32 %v438_v0  ;;  %v420_v15 = vadd.f32 %v404_v6, %v843_v38  ;;  %v385_v16 = vmul.f32 %v369_v7, %v861_v63  ;;  %v320_v17 = vmul.f32 %v796_v39, %v297_v4 }
  0xfc   :  { %685 = vtanh.f32 %v428_v11  ;;  %v393_v18 = vmul.f32 %v377_v12, %v865_v2  ;;  %v315_v19 = vmul.f32 %v796_v39, %v292_v8  ;;  %v323_v14 = vmul.f32 %v796_v39, %v300_v9 }
  0xfd   :  { %v436_v20 = vmul.f32 0.7978846, %v420_v15  ;;  %v401_v21 = vmul.f32 %v385_v16, %v861_v63  ;;  %v880_v22 = vadd.f32 %v801_v51, %v312_v13  ;;  %v883_v25 = vadd.f32 %v801_v51, %v320_v17  ;;  %v298_v16 = vld [vmem:[#allocation2 + $0x68] sm:$0xff] }
  0xfe   :  { %v350_v26 = vmul.f32 0.5, %v827_v23  ;;  %v358_v28 = vmul.f32 0.5, %v830_v24  ;;  %v348_v29 = vmul.f32 0.5, %v834_v27  ;;  %v409_v30 = vmul.f32 %v393_v18, %v865_v2 }
  0xff   :  { %687 = vtanh.f32 %v436_v20  ;;  %v417_v34 = vadd.f32 %v401_v21, %v861_v63  ;;  %v367_v35 = vmul.f32 0.044715, %v880_v22  ;;  %v892_v36 = vadd.f32 %v801_v51, %v315_v19 }
 0x100   :  { %v674_v33 = vpop.eup %673  ;;  %v425_v23 = vadd.f32 %v409_v30, %v865_v2  ;;  %v375_v24 = vmul.f32 0.044715, %v883_v25  ;;  %v897_v27 = vadd.f32 %v801_v51, %v323_v14  ;;  %v313_v45 = vmul.f32 %v796_v39, %v290_v32 }
 0x101   :  { %v676_v37 = vpop.eup %675  ;;  %v461_v40 = vadd.f32 1.0, %v674_v33  ;;  %v433_v43 = vmul.f32 0.7978846, %v417_v34  ;;  %v383_v44 = vmul.f32 %v367_v35, %v880_v22  ;;  %v370_v6 = vmul.f32 0.044715, %v892_v36 }
 0x102   :  { %v678_v41 = vpop.eup %677  ;;  %v469_v42 = vadd.f32 1.0, %v676_v37  ;;  %v441_v50 = vmul.f32 0.7978846, %v425_v23  ;;  %v391_v52 = vmul.f32 %v375_v24, %v883_v25  ;;  %v356_v11 = vmul.f32 0.5, %v843_v38 }
 0x103   :  { %v680_v47 = vpop.eup %679  ;;  %v477_v48 = vmul.f32 %v461_v40, %v837_v31  ;;  %v459_v49 = vadd.f32 1.0, %v678_v41  ;;  %689 = vtanh.f32 %v433_v43  ;;  %v399_v56 = vmul.f32 %v383_v44, %v880_v22 }
 0x104   :  { %v682_v53 = vpop.eup %681  ;;  %v485_v54 = vmul.f32 %v469_v42, %v848_v46  ;;  %v467_v55 = vadd.f32 1.0, %v680_v47  ;;  %691 = vtanh.f32 %v441_v50  ;;  %v407_v4 = vmul.f32 %v391_v52, %v883_v25 }
 0x105   :  { %v684_v57 = vpop.eup %683  ;;  %v614_v58 = vpack.c.bf16 %v477_v48, %v477_v48  ;;  %v475_v59 = vmul.f32 %v459_v49, %v347_v5  ;;  %v462_v60 = vadd.f32 1.0, %v682_v53  ;;  %v415_v31 = vadd.f32 %v399_v56, %v880_v22 }
 0x106   :  { %v622_v61 = vpack.c.bf16 %v485_v54, %v485_v54  ;;  %v483_v62 = vmul.f32 %v467_v55, %v355_v10  ;;  %v470_v0 = vadd.f32 1.0, %v684_v57  ;;  %v686_v1 = vpop.eup %685  ;;  %v423_v12 = vadd.f32 %v407_v4, %v883_v25 }
 0x107   :  { %558 = vst.msk [vmem:[%s1001_s4 + $0x8] sm:$0xf] %vm555_vm2, %v614_v58  ;;  %v612_v46 = vpack.c.bf16 %v475_v59, %v475_v59  ;;  %v478_v3 = vmul.f32 %v462_v60, %v350_v26  ;;  %v460_v8 = vadd.f32 1.0, %v686_v1  ;;  %v431_v9 = vmul.f32 0.7978846, %v415_v31 }
 0x108   :  { %566 = vst.msk [vmem:[%s1001_s4 + $0x28] sm:$0xf] %vm555_vm2, %v622_v61  ;;  %v620_v5 = vpack.c.bf16 %v483_v62, %v483_v62  ;;  %v486_v7 = vmul.f32 %v470_v0, %v358_v28  ;;  %v386_v15 = vmul.f32 %v370_v6, %v892_v36  ;;  %v378_v19 = vmul.f32 0.044715, %v897_v27 }
 0x109   :  { %556 = vst.msk [vmem:[%s1001_s4] sm:$0xf] %vm555_vm2, %v612_v46  ;;  %v615_v10 = vpack.c.bf16 %v478_v3, %v478_v3  ;;  %v688_v13 = vpop.eup %687  ;;  %v476_v18 = vmul.f32 %v460_v8, %v348_v29  ;;  %693 = vtanh.f32 %v431_v9  ;;  %v439_v14 = vmul.f32 0.7978846, %v423_v12 }
 0x10a   :  { %564 = vst.msk [vmem:[%s1001_s4 + $0x20] sm:$0xf] %vm555_vm2, %v620_v5  ;;  %v623_v17 = vpack.c.bf16 %v486_v7, %v486_v7  ;;  %v468_v38 = vadd.f32 1.0, %v688_v13  ;;  %v402_v20 = vmul.f32 %v386_v15, %v892_v36  ;;  %v934_v21 = vadd.f32 %v801_v51, %v313_v45 }
 0x10b   :  { %559 = vst.msk [vmem:[%s1001_s4 + $0xc] sm:$0xf] %vm555_vm2, %v615_v10  ;;  %v613_v26 = vpack.c.bf16 %v476_v18, %v476_v18  ;;  %v394_v28 = vmul.f32 %v378_v19, %v897_v27  ;;  %v321_v29 = vmul.f32 %v796_v39, %v298_v16  ;;  %695 = vtanh.f32 %v439_v14 }
 0x10c   :  { %567 = vst.msk [vmem:[%s1001_s4 + $0x2c] sm:$0xf] %vm555_vm2, %v623_v17  ;;  %v484_v30 = vmul.f32 %v468_v38, %v356_v11  ;;  %v418_v32 = vadd.f32 %v402_v20, %v892_v36  ;;  %v368_v35 = vmul.f32 0.044715, %v934_v21  ;;  %v353_v39 = vmul.f32 0.5, %v861_v63 }
 0x10d   :  { %v690_v33 = vpop.eup %689  ;;  %557 = vst.msk [vmem:[%s1001_s4 + $0x4] sm:$0xf] %vm555_vm2, %v613_v26  ;;  %v410_v34 = vmul.f32 %v394_v28, %v897_v27  ;;  %v344_v37 = vadd.f32 %v801_v51, %v321_v29  ;;  %v361_v42 = vmul.f32 0.5, %v865_v2  ;;  %v351_v55 = vmul.f32 0.5, %v880_v22 }
 0x10e   :  { %v692_v40 = vpop.eup %691  ;;  %v621_v23 = vpack.c.bf16 %v484_v30, %v484_v30  ;;  %v465_v24 = vadd.f32 1.0, %v690_v33  ;;  %v434_v41 = vmul.f32 0.7978846, %v418_v32  ;;  %v384_v45 = vmul.f32 %v368_v35, %v934_v21 }
 0x10f   :  { %v473_v43 = vadd.f32 1.0, %v692_v40  ;;  %v426_v44 = vadd.f32 %v410_v34, %v897_v27  ;;  %v376_v51 = vmul.f32 0.044715, %v344_v37  ;;  %v359_v62 = vmul.f32 0.5, %v883_v25 }
 0x110   :  { %565 = vst.msk [vmem:[%s1001_s4 + $0x24] sm:$0xf] %vm555_vm2, %v621_v23  ;;  %v481_v47 = vmul.f32 %v465_v24, %v353_v39  ;;  %697 = vtanh.f32 %v434_v41  ;;  %v400_v63 = vmul.f32 %v384_v45, %v934_v21  ;;  %v354_v4 = vmul.f32 0.5, %v892_v36 }
 0x111   :  { %v489_v48 = vmul.f32 %v473_v43, %v361_v42  ;;  %v442_v49 = vmul.f32 0.7978846, %v426_v44  ;;  %v392_v52 = vmul.f32 %v376_v51, %v344_v37  ;;  %v362_v7 = vmul.f32 0.5, %v897_v27 }
 0x112   :  { %v618_v50 = vpack.c.bf16 %v481_v47, %v481_v47  ;;  %v416_v54 = vadd.f32 %v400_v63, %v934_v21  ;;  %v352_v12 = vmul.f32 0.5, %v934_v21  ;;  %v360_v13 = vmul.f32 0.5, %v344_v37 }
 0x113   :  { %v694_v2 = vpop.eup %693  ;;  %v626_v53 = vpack.c.bf16 %v489_v48, %v489_v48  ;;  %699 = vtanh.f32 %v442_v49  ;;  %v408_v57 = vmul.f32 %v392_v52, %v344_v37 }
 0x114   :  { %562 = vst.msk [vmem:[%s1001_s4 + $0x18] sm:$0xf] %vm555_vm2, %v618_v50  ;;  %v463_v56 = vadd.f32 1.0, %v694_v2  ;;  %v432_v58 = vmul.f32 0.7978846, %v416_v54 }
 0x115   :  { %570 = vst.msk [vmem:[%s1001_s4 + $0x38] sm:$0xf] %vm555_vm2, %v626_v53  ;;  %v696_v59 = vpop.eup %695  ;;  %v424_v61 = vadd.f32 %v408_v57, %v344_v37 }
 0x116   :  { %v479_v60 = vmul.f32 %v463_v56, %v351_v55  ;;  %v471_v0 = vadd.f32 1.0, %v696_v59  ;;  %701 = vtanh.f32 %v432_v58 }
 0x117   :  { %v440_v1 = vmul.f32 0.7978846, %v424_v61 }
 0x118   :  { %v616_v31 = vpack.c.bf16 %v479_v60, %v479_v60  ;;  %v487_v46 = vmul.f32 %v471_v0, %v359_v62 }
 0x119   :  { %703 = vtanh.f32 %v440_v1 }
 0x11a   :  { %v698_v3 = vpop.eup %697  ;;  %560 = vst.msk [vmem:[%s1001_s4 + $0x10] sm:$0xf] %vm555_vm2, %v616_v31  ;;  %v624_v22 = vpack.c.bf16 %v487_v46, %v487_v46 }
 0x11b   :  { %v466_v6 = vadd.f32 1.0, %v698_v3 }
 0x11c   :  { %568 = vst.msk [vmem:[%s1001_s4 + $0x30] sm:$0xf] %vm555_vm2, %v624_v22 }
 0x11d   :  { %v700_v5 = vpop.eup %699  ;;  %v482_v25 = vmul.f32 %v466_v6, %v354_v4 }
 0x11e   :  { %v474_v8 = vadd.f32 1.0, %v700_v5 }
 0x11f   :  { %v619_v9 = vpack.c.bf16 %v482_v25, %v482_v25 }
 0x120   :  { %v490_v10 = vmul.f32 %v474_v8, %v362_v7  ;;  %v702_v11 = vpop.eup %701 }
 0x121   :  { %563 = vst.msk [vmem:[%s1001_s4 + $0x1c] sm:$0xf] %vm555_vm2, %v619_v9  ;;  %v464_v15 = vadd.f32 1.0, %v702_v11 }
 0x122   :  { %v627_v36 = vpack.c.bf16 %v490_v10, %v490_v10 }
 0x123   :  { %v704_v16 = vpop.eup %703  ;;  %v480_v27 = vmul.f32 %v464_v15, %v352_v12 }
 0x124   :  { %571 = vst.msk [vmem:[%s1001_s4 + $0x3c] sm:$0xf] %vm555_vm2, %v627_v36  ;;  %v472_v17 = vadd.f32 1.0, %v704_v16 }
 0x125   :  { %v617_v18 = vpack.c.bf16 %v480_v27, %v480_v27 }
 0x126   :  { %v488_v19 = vmul.f32 %v472_v17, %v360_v13 }
 0x127   :  { %561 = vst.msk [vmem:[%s1001_s4 + $0x14] sm:$0xf] %vm555_vm2, %v617_v18 }
 0x128   :  { %v625_v38 = vpack.c.bf16 %v488_v19, %v488_v19 }
 0x12a   :  { %569 = vst.msk [vmem:[%s1001_s4 + $0x34] sm:$0xf] %vm555_vm2, %v625_v38 }

// kernel: wave_block_forward.26
= control target key start
LH: loop header
LB: loop body
LE: loop exit
PB: predicated region body
PF: predicated region fallthrough
CT: control target
= control target key end

     0   :  { %vm22_vm0 = vcmask 261120   ;;  %v462_v1 = vmov 0.0   ;;  %vm143_vm1 = vcmask 523264   ;;  %s670_s1 = inlined_call_operand.vmem [shape: bf16[64,32], index: 1, kind: input, shape index: {}]   ;;  %s671_s0 = inlined_call_operand.vmem [shape: bf16[128,64], index: 0, kind: input, shape index: {}]   ;;  %s672_s2 = inlined_call_operand.vmem [shape: f32[1,32], index: 2, kind: input, shape index: {}]   ;;  %s673_s3 = inlined_call_operand.vmem [shape: f32[1,32], index: 3, kind: input, shape index: {}]   ;;  %s674_s4 = inlined_call_operand.vmem [shape: f32[128,32], index: 4, kind: output, shape index: {}]  }
   0x1   :  { %v450_v0 = vld [vmem:[%s670_s1] sm:$0xff]   ;;  %25 = vst.msk [vmem:[#allocation2 + $0x10] sm:$0xff] %vm22_vm0, %v462_v1  ;;  %23 = vst.msk [vmem:[#allocation2] sm:$0xff] %vm22_vm0, %v462_v1  ;;  %v451_v2 = vld [vmem:[%s670_s1 + $0x8] sm:$0xff]  }
   0x2   :  { %24 = vst.msk [vmem:[#allocation2 + $0x8] sm:$0xff] %vm22_vm0, %v462_v1  ;;  %26 = vst.msk [vmem:[#allocation2 + $0x18] sm:$0xff] %vm22_vm0, %v462_v1  ;;  %417 = vmatprep.subr.bf16.mxu0 %v450_v0  ;;  %441 = vmatprep.subr.bf16.mxu1 %v450_v0  ;;  %v452_v3 = vld [vmem:[%s670_s1 + $0x10] sm:$0xff]   ;;  %v454_v4 = vld [vmem:[%s671_s0] sm:$0xff]  }
   0x3   :  { %27 = vst.msk [vmem:[#allocation2 + $0x20] sm:$0xff] %vm22_vm0, %v462_v1  ;;  %28 = vst.msk [vmem:[#allocation2 + $0x28] sm:$0xff] %vm22_vm0, %v462_v1  ;;  %418 = vmatpush3.bf16.msra.mxu0 %v450_v0  ;;  %445 = vmatpush3.bf16.msra.mxu1 %v450_v0  ;;  %v455_v5 = vld [vmem:[%s671_s0 + $0x20] sm:$0xff]   ;;  %v453_v6 = vld [vmem:[%s670_s1 + $0x18] sm:$0xff]  }
   0x4   :  { %29 = vst.msk [vmem:[#allocation2 + $0x30] sm:$0xff] %vm22_vm0, %v462_v1  ;;  %30 = vst.msk [vmem:[#allocation2 + $0x38] sm:$0xff] %vm22_vm0, %v462_v1  ;;  %419 = vmatprep.subr.bf16.mxu0 %v451_v2  ;;  %442 = vmatprep.subr.bf16.mxu1 %v451_v2  ;;  %v456_v7 = vld [vmem:[%s671_s0 + $0x8] sm:$0xff]   ;;  %v458_v9 = vld [vmem:[%s671_s0 + $0x10] sm:$0xff]  }
   0x5   :  { %31 = vst.msk [vmem:[#allocation2 + $0x40] sm:$0xff] %vm22_vm0, %v462_v1  ;;  %32 = vst.msk [vmem:[#allocation2 + $0x48] sm:$0xff] %vm22_vm0, %v462_v1  ;;  %425 = vmatprep.mubr.msk.bf16.mxu0 %vm143_vm1, %v454_v4  ;;  %433 = vmatprep.mubr.msk.bf16.mxu1 %vm143_vm1, %v455_v5  ;;  %v457_v8 = vld [vmem:[%s671_s0 + $0x28] sm:$0xff]   ;;  %v459_v10 = vld [vmem:[%s671_s0 + $0x30] sm:$0xff]  }
   0x6   :  { %33 = vst.msk [vmem:[#allocation2 + $0x50] sm:$0xff] %vm22_vm0, %v462_v1  ;;  %34 = vst.msk [vmem:[#allocation2 + $0x58] sm:$0xff] %vm22_vm0, %v462_v1  ;;  %v460_v11 = vld [vmem:[%s671_s0 + $0x18] sm:$0xff]   ;;  %v559_v41 = vld [vmem:[%s672_s2] ss:$0 sm:$0xff] }
   0x7   :  { %35 = vst.msk [vmem:[#allocation2 + $0x60] sm:$0xff] %vm22_vm0, %v462_v1  ;;  %36 = vst.msk [vmem:[#allocation2 + $0x68] sm:$0xff] %vm22_vm0, %v462_v1  ;;  %420 = vmatpush3.bf16.msra.mxu0 %v451_v2  ;;  %446 = vmatpush3.bf16.msra.mxu1 %v451_v2  ;;  %v461_v12 = vld [vmem:[%s671_s0 + $0x38] sm:$0xff]   ;;  %v564_v53 = vld [vmem:[%s673_s3] ss:$0 sm:$0xff] }
   0x8   :  { %37 = vst.msk [vmem:[#allocation2 + $0x70] sm:$0xff] %vm22_vm0, %v462_v1  ;;  %38 = vst.msk [vmem:[#allocation2 + $0x78] sm:$0xff] %vm22_vm0, %v462_v1  ;;  %421 = vmatprep.subr.bf16.mxu0 %v452_v3  ;;  %443 = vmatprep.subr.bf16.mxu1 %v452_v3  ;;  %v57_v13 = vld [vmem:[#allocation2 + $0x10] sm:$0xff]  ;;  %v55_v15 = vld [vmem:[#allocation2] sm:$0xff] }
   0x9   :  { %v58_v19 = vld [vmem:[#allocation2 + $0x18] sm:$0xff]  ;;  %v56_v25 = vld [vmem:[#allocation2 + $0x8] sm:$0xff] }
   0xa   :  { %v59_v39 = vld [vmem:[#allocation2 + $0x20] sm:$0xff]  ;;  %v60_v50 = vld [vmem:[#allocation2 + $0x28] sm:$0xff] }
   0xb   :  { %422 = vmatpush3.bf16.msra.mxu0 %v452_v3  ;;  %447 = vmatpush3.bf16.msra.mxu1 %v452_v3  ;;  %v61_v37 = vld [vmem:[#allocation2 + $0x30] sm:$0xff]  ;;  %v62_v44 = vld [vmem:[#allocation2 + $0x38] sm:$0xff] }
   0xc   :  { %423 = vmatprep.subr.bf16.mxu0 %v453_v6  ;;  %444 = vmatprep.subr.bf16.mxu1 %v453_v6  ;;  %v63_v16 = vld [vmem:[#allocation2 + $0x40] sm:$0xff]  ;;  %v64_v26 = vld [vmem:[#allocation2 + $0x48] sm:$0xff] }
   0xd   :  { %v65_v14 = vld [vmem:[#allocation2 + $0x50] sm:$0xff]  ;;  %v66_v20 = vld [vmem:[#allocation2 + $0x58] sm:$0xff] }
   0xe   :  { %v67_v40 = vld [vmem:[#allocation2 + $0x60] sm:$0xff]  ;;  %v68_v51 = vld [vmem:[#allocation2 + $0x68] sm:$0xff] }
   0xf   :  { %424 = vmatpush3.bf16.msra.mxu0 %v453_v6  ;;  %448 = vmatpush3.bf16.msra.mxu1 %v453_v6  ;;  %v69_v38 = vld [vmem:[#allocation2 + $0x70] sm:$0xff]  ;;  %v70_v45 = vld [vmem:[#allocation2 + $0x78] sm:$0xff] }
  0x12   :  { %426 = vmatmul.mubr.msk.bf16.vlgmr.msra.gmra.mrb[0].mxu0 %vm143_vm1, %v456_v7  ;;  %434 = vmatmul.mubr.msk.bf16.vlgmr.msra.gmra.mrb[0].mxu1 %vm143_vm1, %v457_v8 }
  0x13   :  { %429 = vmatprep.mubr.msk.bf16.mxu0 %vm143_vm1, %v458_v9  ;;  %437 = vmatprep.mubr.msk.bf16.mxu1 %vm143_vm1, %v459_v10 }
  0x1a   :  { %430 = vmatmul.mubr.msk.bf16.gmra.mrb[4].mxu0 %vm143_vm1, %v460_v11  ;;  %438 = vmatmul.mubr.msk.bf16.gmra.mrb[4].mxu1 %vm143_vm1, %v461_v12 }
  0xe5   :  { %v427_v17 = vpop.f32.mrb[0].mxu0  ;;  %v435_v18 = vpop.f32.mrb[0].mxu1 }
  0xe6   :  { %v267_v21 = vadd.f32 %v427_v17, %v57_v13  ;;  %v275_v22 = vadd.f32 %v435_v18, %v65_v14  ;;  %v202_v23 = vpop.f32.mrb[1].mxu0  ;;  %v234_v24 = vpop.f32.mrb[1].mxu1 }
  0xe7   :  { %v265_v27 = vadd.f32 %v202_v23, %v55_v15  ;;  %v273_v28 = vadd.f32 %v234_v24, %v63_v16  ;;  %v428_v29 = vpop.f32.mrb[2].mxu0  ;;  %v436_v30 = vpop.f32.mrb[2].mxu1 }
  0xe8   :  { %284 = vst.msk [vmem:[#allocation2 + $0x10] sm:$0xff] %vm22_vm0, %v267_v21  ;;  %292 = vst.msk [vmem:[#allocation2 + $0x50] sm:$0xff] %vm22_vm0, %v275_v22  ;;  %v268_v31 = vadd.f32 %v428_v29, %v58_v19  ;;  %v276_v32 = vadd.f32 %v436_v30, %v66_v20  ;;  %v205_v33 = vpop.f32.mrb[3].mxu0  ;;  %v237_v34 = vpop.f32.mrb[3].mxu1 }
  0xe9   :  { %282 = vst.msk [vmem:[#allocation2] sm:$0xff] %vm22_vm0, %v265_v27  ;;  %290 = vst.msk [vmem:[#allocation2 + $0x40] sm:$0xff] %vm22_vm0, %v273_v28  ;;  %v266_v35 = vadd.f32 %v205_v33, %v56_v25  ;;  %v274_v36 = vadd.f32 %v237_v34, %v64_v26 }
  0xea   :  { %285 = vst.msk [vmem:[#allocation2 + $0x18] sm:$0xff] %vm22_vm0, %v268_v31  ;;  %293 = vst.msk [vmem:[#allocation2 + $0x58] sm:$0xff] %vm22_vm0, %v276_v32 }
  0xeb   :  { %283 = vst.msk [vmem:[#allocation2 + $0x8] sm:$0xff] %vm22_vm0, %v266_v35  ;;  %291 = vst.msk [vmem:[#allocation2 + $0x48] sm:$0xff] %vm22_vm0, %v274_v36 }
  0xed   :  { %v431_v42 = vpop.f32.mrb[4].mxu0  ;;  %v439_v43 = vpop.f32.mrb[4].mxu1 }
  0xee   :  { %v271_v46 = vadd.f32 %v431_v42, %v61_v37  ;;  %v279_v47 = vadd.f32 %v439_v43, %v69_v38  ;;  %v218_v48 = vpop.f32.mrb[5].mxu0  ;;  %v250_v49 = vpop.f32.mrb[5].mxu1 }
  0xef   :  { %v303_v52 = vld [vmem:[#allocation2 + $0x10] sm:$0xff]  ;;  %v269_v55 = vadd.f32 %v218_v48, %v59_v39  ;;  %v277_v56 = vadd.f32 %v250_v49, %v67_v40  ;;  %v432_v57 = vpop.f32.mrb[6].mxu0  ;;  %v440_v58 = vpop.f32.mrb[6].mxu1 }
  0xf0   :  { %v311_v54 = vld [vmem:[#allocation2 + $0x50] sm:$0xff]  ;;  %v326_v59 = vmul.f32 %v559_v41, %v303_v52  ;;  %v301_v61 = vld [vmem:[#allocation2] sm:$0xff]  ;;  %288 = vst.msk [vmem:[#allocation2 + $0x30] sm:$0xff] %vm22_vm0, %v271_v46  ;;  %296 = vst.msk [vmem:[#allocation2 + $0x70] sm:$0xff] %vm22_vm0, %v279_v47  ;;  %v272_v63 = vadd.f32 %v432_v57, %v62_v44  ;;  %v280_v0 = vadd.f32 %v440_v58, %v70_v45  ;;  %v221_v1 = vpop.f32.mrb[7].mxu0  ;;  %v253_v2 = vpop.f32.mrb[7].mxu1 }
  0xf1   :  { %v334_v60 = vmul.f32 %v559_v41, %v311_v54  ;;  %v309_v62 = vld [vmem:[#allocation2 + $0x40] sm:$0xff]  ;;  %v324_v3 = vmul.f32 %v559_v41, %v301_v61  ;;  %v304_v5 = vld [vmem:[#allocation2 + $0x18] sm:$0xff]  ;;  %286 = vst.msk [vmem:[#allocation2 + $0x20] sm:$0xff] %vm22_vm0, %v269_v55  ;;  %294 = vst.msk [vmem:[#allocation2 + $0x60] sm:$0xff] %vm22_vm0, %v277_v56  ;;  %v270_v7 = vadd.f32 %v221_v1, %v60_v50 }
  0xf2   :  { %v332_v4 = vmul.f32 %v559_v41, %v309_v62  ;;  %v312_v6 = vld [vmem:[#allocation2 + $0x58] sm:$0xff]  ;;  %v278_v8 = vadd.f32 %v253_v2, %v68_v51  ;;  %v349_v9 = vadd.f32 %v564_v53, %v326_v59  ;;  %v327_v11 = vmul.f32 %v559_v41, %v304_v5  ;;  %v302_v13 = vld [vmem:[#allocation2 + $0x8] sm:$0xff]  ;;  %289 = vst.msk [vmem:[#allocation2 + $0x38] sm:$0xff] %vm22_vm0, %v272_v63 }
  0xf3   :  { %v357_v10 = vadd.f32 %v564_v53, %v334_v60  ;;  %v335_v12 = vmul.f32 %v559_v41, %v312_v6  ;;  %v310_v14 = vld [vmem:[#allocation2 + $0x48] sm:$0xff]  ;;  %297 = vst.msk [vmem:[#allocation2 + $0x78] sm:$0xff] %vm22_vm0, %v280_v0  ;;  %v347_v15 = vadd.f32 %v564_v53, %v324_v3  ;;  %v325_v17 = vmul.f32 %v559_v41, %v302_v13 }
  0xf4   :  { %v355_v16 = vadd.f32 %v564_v53, %v332_v4  ;;  %v333_v18 = vmul.f32 %v559_v41, %v310_v14  ;;  %287 = vst.msk [vmem:[#allocation2 + $0x28] sm:$0xff] %vm22_vm0, %v270_v7  ;;  %295 = vst.msk [vmem:[#allocation2 + $0x68] sm:$0xff] %vm22_vm0, %v278_v8  ;;  %v350_v19 = vadd.f32 %v564_v53, %v327_v11 }
  0xf5   :  { %365 = vst.msk [vmem:[%s674_s4 + $0x10] sm:$0xff] %vm22_vm0, %v349_v9  ;;  %373 = vst.msk [vmem:[%s674_s4 + $0x50] sm:$0xff] %vm22_vm0, %v357_v10  ;;  %v358_v20 = vadd.f32 %v564_v53, %v335_v12  ;;  %v348_v21 = vadd.f32 %v564_v53, %v325_v17 }
  0xf6   :  { %363 = vst.msk [vmem:[%s674_s4] sm:$0xff] %vm22_vm0, %v347_v15  ;;  %371 = vst.msk [vmem:[%s674_s4 + $0x40] sm:$0xff] %vm22_vm0, %v355_v16  ;;  %v356_v22 = vadd.f32 %v564_v53, %v333_v18 }
  0xf7   :  { %366 = vst.msk [vmem:[%s674_s4 + $0x18] sm:$0xff] %vm22_vm0, %v350_v19  ;;  %374 = vst.msk [vmem:[%s674_s4 + $0x58] sm:$0xff] %vm22_vm0, %v358_v20  ;;  %v307_v23 = vld [vmem:[#allocation2 + $0x30] sm:$0xff] }
  0xf8   :  { %364 = vst.msk [vmem:[%s674_s4 + $0x8] sm:$0xff] %vm22_vm0, %v348_v21  ;;  %372 = vst.msk [vmem:[%s674_s4 + $0x48] sm:$0xff] %vm22_vm0, %v356_v22  ;;  %v315_v24 = vld [vmem:[#allocation2 + $0x70] sm:$0xff]  ;;  %v330_v25 = vmul.f32 %v559_v41, %v307_v23  ;;  %v305_v27 = vld [vmem:[#allocation2 + $0x20] sm:$0xff] }
  0xf9   :  { %v338_v26 = vmul.f32 %v559_v41, %v315_v24  ;;  %v313_v28 = vld [vmem:[#allocation2 + $0x60] sm:$0xff]  ;;  %v328_v29 = vmul.f32 %v559_v41, %v305_v27  ;;  %v308_v31 = vld [vmem:[#allocation2 + $0x38] sm:$0xff] }
  0xfa   :  { %v336_v30 = vmul.f32 %v559_v41, %v313_v28  ;;  %v316_v32 = vld [vmem:[#allocation2 + $0x78] sm:$0xff]  ;;  %v353_v33 = vadd.f32 %v564_v53, %v330_v25  ;;  %v331_v35 = vmul.f32 %v559_v41, %v308_v31 }
  0xfb   :  { %v361_v34 = vadd.f32 %v564_v53, %v338_v26  ;;  %v339_v36 = vmul.f32 %v559_v41, %v316_v32  ;;  %v306_v37 = vld [vmem:[#allocation2 + $0x28] sm:$0xff]  ;;  %v351_v39 = vadd.f32 %v564_v53, %v328_v29 }
  0xfc   :  { %v314_v38 = vld [vmem:[#allocation2 + $0x68] sm:$0xff]  ;;  %v359_v40 = vadd.f32 %v564_v53, %v336_v30  ;;  %v329_v42 = vmul.f32 %v559_v41, %v306_v37  ;;  %369 = vst.msk [vmem:[%s674_s4 + $0x30] sm:$0xff] %vm22_vm0, %v353_v33  ;;  %v354_v44 = vadd.f32 %v564_v53, %v331_v35 }
  0xfd   :  { %v337_v43 = vmul.f32 %v559_v41, %v314_v38  ;;  %377 = vst.msk [vmem:[%s674_s4 + $0x70] sm:$0xff] %vm22_vm0, %v361_v34  ;;  %v362_v45 = vadd.f32 %v564_v53, %v339_v36  ;;  %367 = vst.msk [vmem:[%s674_s4 + $0x20] sm:$0xff] %vm22_vm0, %v351_v39 }
  0xfe   :  { %375 = vst.msk [vmem:[%s674_s4 + $0x60] sm:$0xff] %vm22_vm0, %v359_v40  ;;  %v352_v41 = vadd.f32 %v564_v53, %v329_v42  ;;  %370 = vst.msk [vmem:[%s674_s4 + $0x38] sm:$0xff] %vm22_vm0, %v354_v44 }
  0xff   :  { %v360_v46 = vadd.f32 %v564_v53, %v337_v43  ;;  %378 = vst.msk [vmem:[%s674_s4 + $0x78] sm:$0xff] %vm22_vm0, %v362_v45 }
 0x100   :  { %368 = vst.msk [vmem:[%s674_s4 + $0x28] sm:$0xff] %vm22_vm0, %v352_v41 }
 0x101   :  { %376 = vst.msk [vmem:[%s674_s4 + $0x68] sm:$0xff] %vm22_vm0, %v360_v46 }

// kernel: wave_block_forward.27
= control target key start
LH: loop header
LB: loop body
LE: loop exit
PB: predicated region body
PF: predicated region fallthrough
CT: control target
= control target key end

     0   :  { %vm22_vm0 = vcmask 130048   ;;  %v384_v1 = vmov 0.0   ;;  %vm95_vm1 = vcmask 261120   ;;  %s610_s1 = inlined_call_operand.vmem [shape: bf16[32,16], index: 1, kind: input, shape index: {}]   ;;  %s611_s0 = inlined_call_operand.vmem [shape: f32[128,32], index: 0, kind: input, shape index: {}]   ;;  %s612_s2 = inlined_call_operand.vmem [shape: f32[1,16], index: 2, kind: input, shape index: {}]   ;;  %s613_s3 = inlined_call_operand.vmem [shape: f32[1,16], index: 3, kind: input, shape index: {}]   ;;  %s614_s4 = inlined_call_operand.vmem [shape: f32[128,16], index: 4, kind: output, shape index: {}]  }
   0x1   :  { %v382_v0 = vld [vmem:[%s610_s1] sm:$0xff]   ;;  %25 = vst.msk [vmem:[#allocation2 + $0x10] sm:$0xff] %vm22_vm0, %v384_v1  ;;  %23 = vst.msk [vmem:[#allocation2] sm:$0xff] %vm22_vm0, %v384_v1  ;;  %v383_v2 = vld [vmem:[%s610_s1 + $0x8] sm:$0xff]  }
   0x2   :  { %24 = vst.msk [vmem:[#allocation2 + $0x8] sm:$0xff] %vm22_vm0, %v384_v1  ;;  %26 = vst.msk [vmem:[#allocation2 + $0x18] sm:$0xff] %vm22_vm0, %v384_v1  ;;  %357 = vmatprep.subr.bf16.mxu0 %v382_v0  ;;  %377 = vmatprep.subr.bf16.mxu1 %v382_v0  ;;  %v39_v3 = vld [vmem:[%s611_s0] sm:$0xff]  ;;  %v40_v4 = vld [vmem:[%s611_s0 + $0x8] sm:$0xff] }
   0x3   :  { %27 = vst.msk [vmem:[#allocation2 + $0x20] sm:$0xff] %vm22_vm0, %v384_v1  ;;  %28 = vst.msk [vmem:[#allocation2 + $0x28] sm:$0xff] %vm22_vm0, %v384_v1  ;;  %v47_v5 = vld [vmem:[%s611_s0 + $0x40] sm:$0xff]  ;;  %358 = vmatpush3.bf16.msra.mxu0 %v382_v0  ;;  %379 = vmatpush3.bf16.msra.mxu1 %v382_v0  ;;  %v55_v6 = vpack.c.bf16 %v40_v4, %v39_v3  ;;  %v48_v7 = vld [vmem:[%s611_s0 + $0x48] sm:$0xff] }
   0x4   :  { %29 = vst.msk [vmem:[#allocation2 + $0x30] sm:$0xff] %vm22_vm0, %v384_v1  ;;  %30 = vst.msk [vmem:[#allocation2 + $0x38] sm:$0xff] %vm22_vm0, %v384_v1  ;;  %v41_v8 = vld [vmem:[%s611_s0 + $0x10] sm:$0xff]  ;;  %v42_v9 = vld [vmem:[%s611_s0 + $0x18] sm:$0xff]  ;;  %359 = vmatprep.subr.bf16.mxu0 %v383_v2  ;;  %378 = vmatprep.subr.bf16.mxu1 %v383_v2  ;;  %v59_v10 = vpack.c.bf16 %v48_v7, %v47_v5 }
   0x5   :  { %31 = vst.msk [vmem:[#allocation2 + $0x40] sm:$0xff] %vm22_vm0, %v384_v1  ;;  %32 = vst.msk [vmem:[#allocation2 + $0x48] sm:$0xff] %vm22_vm0, %v384_v1  ;;  %v49_v11 = vld [vmem:[%s611_s0 + $0x50] sm:$0xff]  ;;  %v50_v12 = vld [vmem:[%s611_s0 + $0x58] sm:$0xff]  ;;  %361 = vmatprep.mubr.msk.bf16.mxu0 %vm95_vm1, %v55_v6  ;;  %v56_v17 = vpack.c.bf16 %v42_v9, %v41_v8 }
   0x6   :  { %33 = vst.msk [vmem:[#allocation2 + $0x50] sm:$0xff] %vm22_vm0, %v384_v1  ;;  %34 = vst.msk [vmem:[#allocation2 + $0x58] sm:$0xff] %vm22_vm0, %v384_v1  ;;  %v43_v13 = vld [vmem:[%s611_s0 + $0x20] sm:$0xff]  ;;  %v44_v14 = vld [vmem:[%s611_s0 + $0x28] sm:$0xff]  ;;  %369 = vmatprep.mubr.msk.bf16.mxu1 %vm95_vm1, %v59_v10  ;;  %v60_v18 = vpack.c.bf16 %v50_v12, %v49_v11 }
   0x7   :  { %35 = vst.msk [vmem:[#allocation2 + $0x60] sm:$0xff] %vm22_vm0, %v384_v1  ;;  %36 = vst.msk [vmem:[#allocation2 + $0x68] sm:$0xff] %vm22_vm0, %v384_v1  ;;  %v51_v15 = vld [vmem:[%s611_s0 + $0x60] sm:$0xff]  ;;  %v52_v16 = vld [vmem:[%s611_s0 + $0x68] sm:$0xff]  ;;  %360 = vmatpush3.bf16.msra.mxu0 %v383_v2  ;;  %380 = vmatpush3.bf16.msra.mxu1 %v383_v2  ;;  %v57_v19 = vpack.c.bf16 %v44_v14, %v43_v13 }
   0x8   :  { %37 = vst.msk [vmem:[#allocation2 + $0x70] sm:$0xff] %vm22_vm0, %v384_v1  ;;  %38 = vst.msk [vmem:[#allocation2 + $0x78] sm:$0xff] %vm22_vm0, %v384_v1  ;;  %v61_v20 = vpack.c.bf16 %v52_v16, %v51_v15  ;;  %v45_v21 = vld [vmem:[%s611_s0 + $0x30] sm:$0xff]  ;;  %v46_v22 = vld [vmem:[%s611_s0 + $0x38] sm:$0xff] }
   0x9   :  { %v53_v23 = vld [vmem:[%s611_s0 + $0x70] sm:$0xff]  ;;  %v54_v24 = vld [vmem:[%s611_s0 + $0x78] sm:$0xff]  ;;  %v58_v25 = vpack.c.bf16 %v46_v22, %v45_v21  ;;  %v63_v29 = vld [vmem:[#allocation2] sm:$0xff] }
   0xa   :  { %362 = vmatmul.mubr.msk.bf16.vlgmr.msra.gmra.mrb[0].mxu0 %vm95_vm1, %v56_v17  ;;  %370 = vmatmul.mubr.msk.bf16.vlgmr.msra.gmra.mrb[0].mxu1 %vm95_vm1, %v60_v18  ;;  %v62_v26 = vpack.c.bf16 %v54_v24, %v53_v23  ;;  %v65_v27 = vld [vmem:[#allocation2 + $0x10] sm:$0xff]  ;;  %v66_v33 = vld [vmem:[#allocation2 + $0x18] sm:$0xff]  ;;  %v64_v39 = vld [vmem:[#allocation2 + $0x8] sm:$0xff] }
   0xb   :  { %365 = vmatprep.mubr.msk.bf16.mxu0 %vm95_vm1, %v57_v19  ;;  %373 = vmatprep.mubr.msk.bf16.mxu1 %vm95_vm1, %v61_v20  ;;  %v69_v51 = vld [vmem:[#allocation2 + $0x30] sm:$0xff]  ;;  %v67_v53 = vld [vmem:[#allocation2 + $0x20] sm:$0xff]  ;;  %v70_v58 = vld [vmem:[#allocation2 + $0x38] sm:$0xff] }
   0xc   :  { %v71_v30 = vld [vmem:[#allocation2 + $0x40] sm:$0xff]  ;;  %v72_v40 = vld [vmem:[#allocation2 + $0x48] sm:$0xff] }
   0xd   :  { %v73_v28 = vld [vmem:[#allocation2 + $0x50] sm:$0xff]  ;;  %v74_v34 = vld [vmem:[#allocation2 + $0x58] sm:$0xff]  ;;  %v499_v55 = vld [vmem:[%s612_s2] ss:$0 sm:$0xff] }
   0xe   :  { %v75_v54 = vld [vmem:[#allocation2 + $0x60] sm:$0xff]  ;;  %v68_v0 = vld [vmem:[#allocation2 + $0x28] sm:$0xff] }
   0xf   :  { %v77_v52 = vld [vmem:[#allocation2 + $0x70] sm:$0xff]  ;;  %v78_v59 = vld [vmem:[#allocation2 + $0x78] sm:$0xff]  ;;  %v76_v1 = vld [vmem:[#allocation2 + $0x68] sm:$0xff] }
  0x10   :  { %v504_v3 = vld [vmem:[%s613_s3] ss:$0 sm:$0xff] }
  0x12   :  { %366 = vmatmul.mubr.msk.bf16.gmra.mrb[4].mxu0 %vm95_vm1, %v58_v25  ;;  %374 = vmatmul.mubr.msk.bf16.gmra.mrb[4].mxu1 %vm95_vm1, %v62_v26 }
  0xdd   :  { %v363_v31 = vpop.f32.mrb[0].mxu0  ;;  %v371_v32 = vpop.f32.mrb[0].mxu1 }
  0xde   :  { %v219_v35 = vadd.f32 %v363_v31, %v65_v27  ;;  %v227_v36 = vadd.f32 %v371_v32, %v73_v28  ;;  %v154_v37 = vpop.f32.mrb[1].mxu0  ;;  %v186_v38 = vpop.f32.mrb[1].mxu1 }
  0xdf   :  { %v217_v41 = vadd.f32 %v154_v37, %v63_v29  ;;  %v225_v42 = vadd.f32 %v186_v38, %v71_v30  ;;  %v364_v43 = vpop.f32.mrb[2].mxu0  ;;  %v372_v44 = vpop.f32.mrb[2].mxu1 }
  0xe0   :  { %236 = vst.msk [vmem:[#allocation2 + $0x10] sm:$0xff] %vm22_vm0, %v219_v35  ;;  %244 = vst.msk [vmem:[#allocation2 + $0x50] sm:$0xff] %vm22_vm0, %v227_v36  ;;  %v220_v45 = vadd.f32 %v364_v43, %v66_v33  ;;  %v228_v46 = vadd.f32 %v372_v44, %v74_v34  ;;  %v157_v47 = vpop.f32.mrb[3].mxu0  ;;  %v189_v48 = vpop.f32.mrb[3].mxu1 }
  0xe1   :  { %234 = vst.msk [vmem:[#allocation2] sm:$0xff] %vm22_vm0, %v217_v41  ;;  %242 = vst.msk [vmem:[#allocation2 + $0x40] sm:$0xff] %vm22_vm0, %v225_v42  ;;  %v218_v49 = vadd.f32 %v157_v47, %v64_v39  ;;  %v226_v50 = vadd.f32 %v189_v48, %v72_v40 }
  0xe2   :  { %237 = vst.msk [vmem:[#allocation2 + $0x18] sm:$0xff] %vm22_vm0, %v220_v45  ;;  %245 = vst.msk [vmem:[#allocation2 + $0x58] sm:$0xff] %vm22_vm0, %v228_v46 }
  0xe3   :  { %235 = vst.msk [vmem:[#allocation2 + $0x8] sm:$0xff] %vm22_vm0, %v218_v49  ;;  %243 = vst.msk [vmem:[#allocation2 + $0x48] sm:$0xff] %vm22_vm0, %v226_v50 }
  0xe5   :  { %v367_v56 = vpop.f32.mrb[4].mxu0  ;;  %v375_v57 = vpop.f32.mrb[4].mxu1 }
  0xe6   :  { %v223_v60 = vadd.f32 %v367_v56, %v69_v51  ;;  %v231_v61 = vadd.f32 %v375_v57, %v77_v52  ;;  %v170_v62 = vpop.f32.mrb[5].mxu0  ;;  %v202_v63 = vpop.f32.mrb[5].mxu1 }
  0xe7   :  { %v255_v2 = vld [vmem:[#allocation2 + $0x10] sm:$0xff]  ;;  %v221_v5 = vadd.f32 %v170_v62, %v67_v53  ;;  %v229_v6 = vadd.f32 %v202_v63, %v75_v54  ;;  %v368_v7 = vpop.f32.mrb[6].mxu0  ;;  %v376_v8 = vpop.f32.mrb[6].mxu1 }
  0xe8   :  { %v263_v4 = vld [vmem:[#allocation2 + $0x50] sm:$0xff]  ;;  %v278_v9 = vmul.f32 %v499_v55, %v255_v2  ;;  %v253_v11 = vld [vmem:[#allocation2] sm:$0xff]  ;;  %240 = vst.msk [vmem:[#allocation2 + $0x30] sm:$0xff] %vm22_vm0, %v223_v60  ;;  %248 = vst.msk [vmem:[#allocation2 + $0x70] sm:$0xff] %vm22_vm0, %v231_v61  ;;  %v224_v13 = vadd.f32 %v368_v7, %v70_v58  ;;  %v232_v14 = vadd.f32 %v376_v8, %v78_v59  ;;  %v173_v15 = vpop.f32.mrb[7].mxu0  ;;  %v205_v16 = vpop.f32.mrb[7].mxu1 }
  0xe9   :  { %v286_v10 = vmul.f32 %v499_v55, %v263_v4  ;;  %v261_v12 = vld [vmem:[#allocation2 + $0x40] sm:$0xff]  ;;  %v276_v17 = vmul.f32 %v499_v55, %v253_v11  ;;  %v256_v19 = vld [vmem:[#allocation2 + $0x18] sm:$0xff]  ;;  %238 = vst.msk [vmem:[#allocation2 + $0x20] sm:$0xff] %vm22_vm0, %v221_v5  ;;  %246 = vst.msk [vmem:[#allocation2 + $0x60] sm:$0xff] %vm22_vm0, %v229_v6  ;;  %v222_v21 = vadd.f32 %v173_v15, %v68_v0 }
  0xea   :  { %v284_v18 = vmul.f32 %v499_v55, %v261_v12  ;;  %v264_v20 = vld [vmem:[#allocation2 + $0x58] sm:$0xff]  ;;  %v230_v22 = vadd.f32 %v205_v16, %v76_v1  ;;  %v301_v23 = vadd.f32 %v504_v3, %v278_v9  ;;  %v279_v25 = vmul.f32 %v499_v55, %v256_v19  ;;  %v254_v27 = vld [vmem:[#allocation2 + $0x8] sm:$0xff]  ;;  %241 = vst.msk [vmem:[#allocation2 + $0x38] sm:$0xff] %vm22_vm0, %v224_v13 }
  0xeb   :  { %v309_v24 = vadd.f32 %v504_v3, %v286_v10  ;;  %v287_v26 = vmul.f32 %v499_v55, %v264_v20  ;;  %v262_v28 = vld [vmem:[#allocation2 + $0x48] sm:$0xff]  ;;  %249 = vst.msk [vmem:[#allocation2 + $0x78] sm:$0xff] %vm22_vm0, %v232_v14  ;;  %v299_v29 = vadd.f32 %v504_v3, %v276_v17  ;;  %v277_v31 = vmul.f32 %v499_v55, %v254_v27 }
  0xec   :  { %v307_v30 = vadd.f32 %v504_v3, %v284_v18  ;;  %v285_v32 = vmul.f32 %v499_v55, %v262_v28  ;;  %239 = vst.msk [vmem:[#allocation2 + $0x28] sm:$0xff] %vm22_vm0, %v222_v21  ;;  %247 = vst.msk [vmem:[#allocation2 + $0x68] sm:$0xff] %vm22_vm0, %v230_v22  ;;  %v302_v33 = vadd.f32 %v504_v3, %v279_v25 }
  0xed   :  { %317 = vst.msk [vmem:[%s614_s4 + $0x10] sm:$0xff] %vm22_vm0, %v301_v23  ;;  %325 = vst.msk [vmem:[%s614_s4 + $0x50] sm:$0xff] %vm22_vm0, %v309_v24  ;;  %v310_v34 = vadd.f32 %v504_v3, %v287_v26  ;;  %v300_v35 = vadd.f32 %v504_v3, %v277_v31 }
  0xee   :  { %315 = vst.msk [vmem:[%s614_s4] sm:$0xff] %vm22_vm0, %v299_v29  ;;  %323 = vst.msk [vmem:[%s614_s4 + $0x40] sm:$0xff] %vm22_vm0, %v307_v30  ;;  %v308_v36 = vadd.f32 %v504_v3, %v285_v32 }
  0xef   :  { %318 = vst.msk [vmem:[%s614_s4 + $0x18] sm:$0xff] %vm22_vm0, %v302_v33  ;;  %326 = vst.msk [vmem:[%s614_s4 + $0x58] sm:$0xff] %vm22_vm0, %v310_v34  ;;  %v259_v37 = vld [vmem:[#allocation2 + $0x30] sm:$0xff] }
  0xf0   :  { %316 = vst.msk [vmem:[%s614_s4 + $0x8] sm:$0xff] %vm22_vm0, %v300_v35  ;;  %324 = vst.msk [vmem:[%s614_s4 + $0x48] sm:$0xff] %vm22_vm0, %v308_v36  ;;  %v267_v38 = vld [vmem:[#allocation2 + $0x70] sm:$0xff]  ;;  %v282_v39 = vmul.f32 %v499_v55, %v259_v37  ;;  %v257_v41 = vld [vmem:[#allocation2 + $0x20] sm:$0xff] }
  0xf1   :  { %v290_v40 = vmul.f32 %v499_v55, %v267_v38  ;;  %v265_v42 = vld [vmem:[#allocation2 + $0x60] sm:$0xff]  ;;  %v280_v43 = vmul.f32 %v499_v55, %v257_v41  ;;  %v260_v45 = vld [vmem:[#allocation2 + $0x38] sm:$0xff] }
  0xf2   :  { %v288_v44 = vmul.f32 %v499_v55, %v265_v42  ;;  %v268_v46 = vld [vmem:[#allocation2 + $0x78] sm:$0xff]  ;;  %v305_v47 = vadd.f32 %v504_v3, %v282_v39  ;;  %v283_v49 = vmul.f32 %v499_v55, %v260_v45 }
  0xf3   :  { %v313_v48 = vadd.f32 %v504_v3, %v290_v40  ;;  %v291_v50 = vmul.f32 %v499_v55, %v268_v46  ;;  %v258_v51 = vld [vmem:[#allocation2 + $0x28] sm:$0xff]  ;;  %v303_v53 = vadd.f32 %v504_v3, %v280_v43 }
  0xf4   :  { %v266_v52 = vld [vmem:[#allocation2 + $0x68] sm:$0xff]  ;;  %v311_v54 = vadd.f32 %v504_v3, %v288_v44  ;;  %v281_v56 = vmul.f32 %v499_v55, %v258_v51  ;;  %321 = vst.msk [vmem:[%s614_s4 + $0x30] sm:$0xff] %vm22_vm0, %v305_v47  ;;  %v306_v58 = vadd.f32 %v504_v3, %v283_v49 }
  0xf5   :  { %v289_v57 = vmul.f32 %v499_v55, %v266_v52  ;;  %329 = vst.msk [vmem:[%s614_s4 + $0x70] sm:$0xff] %vm22_vm0, %v313_v48  ;;  %v314_v59 = vadd.f32 %v504_v3, %v291_v50  ;;  %319 = vst.msk [vmem:[%s614_s4 + $0x20] sm:$0xff] %vm22_vm0, %v303_v53 }
  0xf6   :  { %327 = vst.msk [vmem:[%s614_s4 + $0x60] sm:$0xff] %vm22_vm0, %v311_v54  ;;  %v304_v55 = vadd.f32 %v504_v3, %v281_v56  ;;  %322 = vst.msk [vmem:[%s614_s4 + $0x38] sm:$0xff] %vm22_vm0, %v306_v58 }
  0xf7   :  { %v312_v60 = vadd.f32 %v504_v3, %v289_v57  ;;  %330 = vst.msk [vmem:[%s614_s4 + $0x78] sm:$0xff] %vm22_vm0, %v314_v59 }
  0xf8   :  { %320 = vst.msk [vmem:[%s614_s4 + $0x28] sm:$0xff] %vm22_vm0, %v304_v55 }
  0xf9   :  { %328 = vst.msk [vmem:[%s614_s4 + $0x68] sm:$0xff] %vm22_vm0, %v312_v60 }

</bundles_post_ra>
